<compile_context>
chip_gen: v7x
topology: tpu7x:2x2x1
jax: 0.10.0
libtpu: 0.0.40
codegen_flags: <defaults>
</compile_context>

<pallas_src>
import functools
import jax
import jax.numpy as jnp
from jax import lax
from jax.experimental import pallas as pl
from jax.experimental.pallas import tpu as pltpu

BN_EPS = 1e-5
LANE = 128
VMEM_SPEC = pl.BlockSpec(memory_space=pltpu.MemorySpace.VMEM)
MOSAIC_PARAMS = pltpu.CompilerParams(
    dimension_semantics=("parallel", "parallel", "arbitrary"),
    vmem_limit_bytes=32 * 1024 * 1024,   # explicit budget; well under 64 MiB (v7x per-TC)
)


# ---------------------------------------------------------------------------
# Pallas kernels
# ---------------------------------------------------------------------------
def _matmul_bias_kernel(x_ref, w_ref, b_ref, o_ref, acc_ref, *, relu):
    """Tiled matmul: bf16 MXU inputs, f32 accumulation, epilogue = +bias (+ReLU)."""
    @pl.when(pl.program_id(2) == 0)
    def _init():
        acc_ref[...] = jnp.zeros_like(acc_ref)

    acc_ref[...] += jnp.dot(x_ref[...], w_ref[...], preferred_element_type=jnp.float32)

    @pl.when(pl.program_id(2) == pl.num_programs(2) - 1)
    def _finalize():
        y = acc_ref[...] + b_ref[...]
        if relu:
            y = jnp.maximum(y, 0.0)
        o_ref[...] = y.astype(o_ref.dtype)


def _matmul_bias_res_kernel(x_ref, w_ref, b_ref, r_ref, o_ref, acc_ref, *, relu):
    """Same as above, epilogue additionally fuses the residual add (ResNet shortcut)."""
    @pl.when(pl.program_id(2) == 0)
    def _init():
        acc_ref[...] = jnp.zeros_like(acc_ref)

    acc_ref[...] += jnp.dot(x_ref[...], w_ref[...], preferred_element_type=jnp.float32)

    @pl.when(pl.program_id(2) == pl.num_programs(2) - 1)
    def _finalize():
        y = acc_ref[...] + b_ref[...] + r_ref[...].astype(jnp.float32)
        if relu:
            y = jnp.maximum(y, 0.0)
        o_ref[...] = y.astype(o_ref.dtype)


def _avgpool_proj_kernel(x_ref, w_ref, b_ref, o_ref, *, inv_hw):
    """Fused head: adaptive-avg-pool(1x1) + Linear(512, d_model) + ReLU."""
    pooled = jnp.sum(x_ref[...].astype(jnp.float32), axis=1) * inv_hw        # (B, C)
    y = jnp.dot(pooled.astype(jnp.bfloat16), w_ref[...],
                preferred_element_type=jnp.float32)
    y = jnp.maximum(y + b_ref[...], 0.0)
    o_ref[...] = y.astype(o_ref.dtype)


# ---------------------------------------------------------------------------
# Wrappers around pallas_call
# ---------------------------------------------------------------------------
def _pick_tile(dim, candidates):
    for c in candidates:
        if dim >= c and dim % c == 0:
            return c
    return dim  # fall back to a single full-extent block (always legal)


def fused_matmul(x, w, bias, residual=None, relu=True, out_dtype=jnp.bfloat16):
    """relu?( x @ w + bias [+ residual] ) with an (M, N, K)-tiled grid."""
    M, K = x.shape
    Kw, N = w.shape
    assert K == Kw, (K, Kw)
    tm = _pick_tile(M, (256, 128, 64, 32, 16, 8))
    tn = _pick_tile(N, (256, 128))
    tk = _pick_tile(K, (512, 384, 256, 128))
    grid = (M // tm, N // tn, K // tk)

    x = x.astype(jnp.bfloat16)
    b2 = bias.reshape(1, N).astype(jnp.float32)

    in_specs = [
        pl.BlockSpec((tm, tk), lambda i, j, k: (i, k)),
        pl.BlockSpec((tk, tn), lambda i, j, k: (k, j)),
        pl.BlockSpec((1, tn), lambda i, j, k: (0, j)),
    ]
    args = [x, w, b2]
    if residual is None:
        kern = functools.partial(_matmul_bias_kernel, relu=relu)
    else:
        kern = functools.partial(_matmul_bias_res_kernel, relu=relu)
        in_specs.append(pl.BlockSpec((tm, tn), lambda i, j, k: (i, j)))
        args.append(residual.astype(jnp.bfloat16))

    return pl.pallas_call(
        kern,
        out_shape=jax.ShapeDtypeStruct((M, N), out_dtype),
        grid_spec=pltpu.PrefetchScalarGridSpec(
            num_scalar_prefetch=0,
            grid=grid,
            in_specs=in_specs,
            out_specs=pl.BlockSpec((tm, tn), lambda i, j, k: (i, j)),
            scratch_shapes=[pltpu.VMEM((tm, tn), jnp.float32)],
        ),
        compiler_params=MOSAIC_PARAMS,
    )(*args)


def extract_patches(x, k, stride, pad):
    """NHWC -> (B*OH*OW, C*k*k) patches via XLA's fused gather (no python stacking).
    Feature order is (C, ky, kx) flattened; the synthetic weights are stored to match."""
    B, H, W, C = x.shape
    if k == 1:
        xs = x[:, ::stride, ::stride, :] if stride > 1 else x
        OH, OW = xs.shape[1], xs.shape[2]
        return xs.reshape(B * OH * OW, C), OH, OW
    p = lax.conv_general_dilated_patches(
        x, (k, k), (stride, stride), ((pad, pad), (pad, pad)),
        dimension_numbers=("NHWC", "HWIO", "NHWC"))
    OH, OW = p.shape[1], p.shape[2]
    return p.reshape(B * OH * OW, C * k * k), OH, OW


def conv_bn(x, params, stride, pad, relu=True, residual=None):
    """Conv2d(no bias) + folded BN (+ residual) (+ ReLU). x: (B,H,W,Cin) NHWC bf16."""
    B = x.shape[0]
    patches, OH, OW = extract_patches(x, params["k"], stride, pad)
    res = None if residual is None else residual.reshape(B * OH * OW, -1)
    y = fused_matmul(patches, params["w"], params["b"], residual=res, relu=relu)
    return y.reshape(B, OH, OW, -1)


def maxpool2d(x, k=3, stride=2, pad=1):
    # TODO(synk): strided-window max-pool has no clean non-materializing Pallas form
    # (needs strided in-kernel loads); use one fused XLA shifted-max instead.
    B, H, W, C = x.shape
    neg = jnp.finfo(x.dtype).min
    xp = jnp.pad(x, ((0, 0), (pad, pad), (pad, pad), (0, 0)), constant_values=neg)
    OH = (H + 2 * pad - k) // stride + 1
    OW = (W + 2 * pad - k) // stride + 1
    out = None
    for i in range(k):
        for j in range(k):
            v = xp[:, i:i + stride * OH:stride, j:j + stride * OW:stride, :]
            out = v if out is None else jnp.maximum(out, v)
    return out


def avgpool_project(x, w, b, out_dtype=jnp.float32):
    """Fused adaptive-avg-pool(1x1) + Linear + ReLU. x: (B, H*W, C) bf16."""
    Bt, HW, C = x.shape
    D = w.shape[1]
    kern = functools.partial(_avgpool_proj_kernel, inv_hw=1.0 / HW)
    return pl.pallas_call(
        kern,
        out_shape=jax.ShapeDtypeStruct((Bt, D), out_dtype),
        in_specs=[VMEM_SPEC, VMEM_SPEC, VMEM_SPEC],
        out_specs=VMEM_SPEC,
    )(x, w, b)


# ---------------------------------------------------------------------------
# Deterministic synthetic parameters (ResNet18 shapes + projection)
# ---------------------------------------------------------------------------
def make_conv_bn(key, cin, cout, k, cout_pad=None):
    cout_pad = cout if cout_pad is None else cout_pad
    kw_, kg, kb, km, kv = jax.random.split(key, 5)
    fan_in = cin * k * k
    # Weight stored pre-flattened as (cin*k*k, cout), matching the (C, ky, kx) patch order.
    w = jax.random.normal(kw_, (fan_in, cout), jnp.float32) * jnp.sqrt(2.0 / fan_in)
    gamma = 1.0 + 0.1 * jax.random.normal(kg, (cout,), jnp.float32)
    beta = 0.05 * jax.random.normal(kb, (cout,), jnp.float32)
    mean = 0.01 * jax.random.normal(km, (cout,), jnp.float32)
    var = 1.0 + 0.1 * jnp.abs(jax.random.normal(kv, (cout,), jnp.float32))
    scale = gamma / jnp.sqrt(var + BN_EPS)
    bias = beta - mean * scale
    w = w * scale[None, :]                         # fold BN scale into the weights
    if cout_pad > cout:                            # lane-pad out channels; padded lanes stay 0
        w = jnp.pad(w, ((0, 0), (0, cout_pad - cout)))
        bias = jnp.pad(bias, (0, cout_pad - cout))
    return {"w": w.astype(jnp.bfloat16), "b": bias.astype(jnp.float32), "k": k}


def init_visual_encoder_params(key, d_model=256):
    cpad = lambda c: max(c, LANE)
    keys = iter(jax.random.split(key, 64))
    params = {"conv1": make_conv_bn(next(keys), 3, 64, 7, cout_pad=cpad(64))}
    layers = []
    cin = cpad(64)
    for cout, stride in [(64, 1), (128, 2), (256, 2), (512, 2)]:
        blocks = []
        for b in range(2):
            s = stride if b == 0 else 1
            blk = {
                "conv1": make_conv_bn(next(keys), cin, cout, 3, cout_pad=cpad(cout)),
                "conv2": make_conv_bn(next(keys), cpad(cout), cout, 3, cout_pad=cpad(cout)),
                "stride": s,
            }
            if s != 1 or cin != cpad(cout):
                blk["down"] = make_conv_bn(next(keys), cin, cout, 1, cout_pad=cpad(cout))
            blocks.append(blk)
            cin = cpad(cout)
        layers.append(blocks)
    params["layers"] = layers
    kw_, kb = jax.random.split(next(keys))
    params["proj_w"] = (jax.random.normal(kw_, (512, d_model), jnp.float32)
                        * jnp.sqrt(1.0 / 512)).astype(jnp.bfloat16)
    params["proj_b"] = 0.01 * jax.random.normal(kb, (1, d_model), jnp.float32)
    return params


# ---------------------------------------------------------------------------
# Forward pass (mirrors VisualEncoder.forward, inference mode)
# ---------------------------------------------------------------------------
def visual_encoder_forward(params, images_nchw):
    """images: (B, 3, H, W) -> (features (B, d_model) f32, sequence (B, 1, d_model))."""
    x = jnp.transpose(images_nchw, (0, 2, 3, 1)).astype(jnp.bfloat16)  # NHWC, bf16

    # ResNet18 stem
    x = conv_bn(x, params["conv1"], stride=2, pad=3, relu=True)
    x = maxpool2d(x, k=3, stride=2, pad=1)
    # TODO(synk): per-block fusion (conv1+conv2+shortcut in one pallas_call) not done; each
    # conv is still its own (tiled, fused-epilogue) kernel launch.

    # ResNet18 basic-block stages: relu(bn2(conv2(relu(bn1(conv1 x)))) + identity)
    for blocks in params["layers"]:
        for blk in blocks:
            identity = x
            out = conv_bn(x, blk["conv1"], stride=blk["stride"], pad=1, relu=True)
            if "down" in blk:
                identity = conv_bn(x, blk["down"], stride=blk["stride"], pad=0, relu=False)
            x = conv_bn(out, blk["conv2"], stride=1, pad=1, relu=True, residual=identity)

    # adaptive-avg-pool(1,1) + squeeze + Linear(512,d_model) + ReLU
    # (Dropout(0.1) is identity at inference.)
    B, H, W, C = x.shape
    feats = avgpool_project(x.reshape(B, H * W, C), params["proj_w"], params["proj_b"])
    sequence = feats[:, None, :]   # (B, 1, d_model)
    return feats, sequence


if __name__ == "__main__":
    key = jax.random.PRNGKey(0)
    k_params, k_img = jax.random.split(key)

    D_MODEL = 256
    params = init_visual_encoder_params(k_params, d_model=D_MODEL)

    # Small input consistent with the module: NCHW, 3 channels (32x32 is the min ResNet18 size).
    images = jax.random.normal(k_img, (2, 3, 32, 32), jnp.float32)

    fwd = jax.jit(functools.partial(visual_encoder_forward, params))
    features, sequence = fwd(images)
    features = jax.block_until_ready(features)
    sequence = jax.block_until_ready(sequence)

    assert features.shape == (2, D_MODEL), features.shape
    assert sequence.shape == (2, 1, D_MODEL), sequence.shape
    assert jnp.all(jnp.isfinite(features)) and jnp.all(features >= 0.0)  # post-ReLU

    print("KERNEL_OK")
</pallas_src>

<mosaic_0001>
module attributes {stable_mosaic.version = 11 : i64} {
  func.func @_matmul_bias_kernel(%arg0: i32, %arg1: i32, %arg2: i32, %arg3: memref<256x147xbf16, #tpu.memory_space<vmem>>, %arg4: memref<147x128xbf16, #tpu.memory_space<vmem>>, %arg5: memref<1x128xf32, #tpu.memory_space<vmem>>, %arg6: memref<256x128xbf16, #tpu.memory_space<vmem>>, %arg7: memref<256x128xf32, #tpu.memory_space<vmem>>) attributes {dimension_semantics = [#tpu.dimension_semantics<parallel>, #tpu.dimension_semantics<parallel>, #tpu.dimension_semantics<arbitrary>], iteration_bounds = array<i64: 2, 1, 1>, scalar_prefetch = 0 : i64, scratch_operands = 1 : i64, tpu.core_type = #tpu.core_type<tc>, window_params = [{transform_indices = @transform_0, window_bounds = array<i64: 256, 147>}, {transform_indices = @transform_1, window_bounds = array<i64: 147, 128>}, {transform_indices = @transform_2, window_bounds = array<i64: 1, 128>}, {transform_indices = @transform_3, window_bounds = array<i64: 256, 128>}]} {
    %c0_i32 = arith.constant 0 : i32
    %0 = arith.cmpi eq, %arg2, %c0_i32 : i32
    %1 = arith.extui %0 : i1 to i32
    %c0_i32_0 = arith.constant 0 : i32
    %2 = arith.cmpi ne, %1, %c0_i32_0 : i32
    scf.if %2 {
      %cst_10 = arith.constant 0.000000e+00 : f32
      %12 = vector.broadcast %cst_10 : f32 to vector<256x128xf32>
      %c0_11 = arith.constant 0 : index
      %c0_12 = arith.constant 0 : index
      %13 = vector.load %arg7[%c0_11, %c0_12] : memref<256x128xf32, #tpu.memory_space<vmem>>, vector<256x128xf32>
      tpu.vector_store %arg7[%c0_11, %c0_12], %12 {strides = array<i32>} : memref<256x128xf32, #tpu.memory_space<vmem>>, vector<256x128xf32>,
    } else {
    }
    %c0 = arith.constant 0 : index
    %c0_1 = arith.constant 0 : index
    %3 = vector.load %arg7[%c0, %c0_1] : memref<256x128xf32, #tpu.memory_space<vmem>>, vector<256x128xf32>
    %c0_2 = arith.constant 0 : index
    %c0_3 = arith.constant 0 : index
    %4 = vector.load %arg3[%c0_2, %c0_3] : memref<256x147xbf16, #tpu.memory_space<vmem>>, vector<256x147xbf16>
    %c0_4 = arith.constant 0 : index
    %c0_5 = arith.constant 0 : index
    %5 = vector.load %arg4[%c0_4, %c0_5] : memref<147x128xbf16, #tpu.memory_space<vmem>>, vector<147x128xbf16>
    %cst = arith.constant dense<0.000000e+00> : vector<256x128xf32>
    %6 = tpu.matmul %4, %5, %cst {dimension_numbers = #tpu.dot_dimension_numbers<[1], [0], [0], [1], [0, 0, 1, 1], [], []>} : vector<256x147xbf16>, vector<147x128xbf16>, vector<256x128xf32> -> vector<256x128xf32>
    %7 = arith.addf %3, %6 : vector<256x128xf32>
    %c0_6 = arith.constant 0 : index
    %c0_7 = arith.constant 0 : index
    %8 = vector.load %arg7[%c0_6, %c0_7] : memref<256x128xf32, #tpu.memory_space<vmem>>, vector<256x128xf32>
    tpu.vector_store %arg7[%c0_6, %c0_7], %7 {strides = array<i32>} : memref<256x128xf32, #tpu.memory_space<vmem>>, vector<256x128xf32>,
    %c0_i32_8 = arith.constant 0 : i32
    %9 = arith.cmpi eq, %arg2, %c0_i32_8 : i32
    %10 = arith.extui %9 : i1 to i32
    %c0_i32_9 = arith.constant 0 : i32
    %11 = arith.cmpi ne, %10, %c0_i32_9 : i32
    scf.if %11 {
      %c0_10 = arith.constant 0 : index
      %c0_11 = arith.constant 0 : index
      %12 = vector.load %arg7[%c0_10, %c0_11] : memref<256x128xf32, #tpu.memory_space<vmem>>, vector<256x128xf32>
      %c0_12 = arith.constant 0 : index
      %c0_13 = arith.constant 0 : index
      %13 = vector.load %arg5[%c0_12, %c0_13] : memref<1x128xf32, #tpu.memory_space<vmem>>, vector<1x128xf32>
      %14 = vector.broadcast %13 : vector<1x128xf32> to vector<256x128xf32>
      %15 = arith.addf %12, %14 : vector<256x128xf32>
      %cst_14 = arith.constant 0.000000e+00 : f32
      %16 = vector.broadcast %cst_14 : f32 to vector<256x128xf32>
      %17 = arith.maximumf %15, %16 : vector<256x128xf32>
      %18 = arith.truncf %17 : vector<256x128xf32> to vector<256x128xbf16>
      %c0_15 = arith.constant 0 : index
      %c0_16 = arith.constant 0 : index
      %19 = vector.load %arg6[%c0_15, %c0_16] : memref<256x128xbf16, #tpu.memory_space<vmem>>, vector<256x128xbf16>
      tpu.vector_store %arg6[%c0_15, %c0_16], %18 {strides = array<i32>} : memref<256x128xbf16, #tpu.memory_space<vmem>>, vector<256x128xbf16>,
    } else {
    }
    return
  }
  func.func @transform_0(%arg0: i32, %arg1: i32, %arg2: i32) -> (i32, i32) {
    %c0_i32 = arith.constant 0 : i32
    return %arg0, %arg2 : i32, i32
  }
  func.func @transform_1(%arg0: i32, %arg1: i32, %arg2: i32) -> (i32, i32) {
    %c0_i32 = arith.constant 0 : i32
    return %arg2, %arg1 : i32, i32
  }
  func.func @transform_2(%arg0: i32, %arg1: i32, %arg2: i32) -> (i32, i32) {
    %c0_i32 = arith.constant 0 : i32
    %c0_i32_0 = arith.constant 0 : i32
    return %c0_i32, %arg1 : i32, i32
  }
  func.func @transform_3(%arg0: i32, %arg1: i32, %arg2: i32) -> (i32, i32) {
    %c0_i32 = arith.constant 0 : i32
    return %arg0, %arg1 : i32, i32
  }
}

module attributes {stable_mosaic.version = 11 : i64} {
  func.func @_matmul_bias_kernel(%arg0: i32, %arg1: i32, %arg2: i32, %arg3: memref<128x384xbf16, #tpu.memory_space<vmem>>, %arg4: memref<384x128xbf16, #tpu.memory_space<vmem>>, %arg5: memref<1x128xf32, #tpu.memory_space<vmem>>, %arg6: memref<128x128xbf16, #tpu.memory_space<vmem>>, %arg7: memref<128x128xf32, #tpu.memory_space<vmem>>) attributes {dimension_semantics = [#tpu.dimension_semantics<parallel>, #tpu.dimension_semantics<parallel>, #tpu.dimension_semantics<arbitrary>], iteration_bounds = array<i64: 1, 1, 3>, scalar_prefetch = 0 : i64, scratch_operands = 1 : i64, tpu.core_type = #tpu.core_type<tc>, window_params = [{transform_indices = @transform_0, window_bounds = array<i64: 128, 384>}, {transform_indices = @transform_1, window_bounds = array<i64: 384, 128>}, {transform_indices = @transform_2, window_bounds = array<i64: 1, 128>}, {transform_indices = @transform_3, window_bounds = array<i64: 128, 128>}]} {
    %c0_i32 = arith.constant 0 : i32
    %0 = arith.cmpi eq, %arg2, %c0_i32 : i32
    %1 = arith.extui %0 : i1 to i32
    %c0_i32_0 = arith.constant 0 : i32
    %2 = arith.cmpi ne, %1, %c0_i32_0 : i32
    scf.if %2 {
      %cst_9 = arith.constant 0.000000e+00 : f32
      %12 = vector.broadcast %cst_9 : f32 to vector<128x128xf32>
      %c0_10 = arith.constant 0 : index
      %c0_11 = arith.constant 0 : index
      %13 = vector.load %arg7[%c0_10, %c0_11] : memref<128x128xf32, #tpu.memory_space<vmem>>, vector<128x128xf32>
      tpu.vector_store %arg7[%c0_10, %c0_11], %12 {strides = array<i32>} : memref<128x128xf32, #tpu.memory_space<vmem>>, vector<128x128xf32>,
    } else {
    }
    %c0 = arith.constant 0 : index
    %c0_1 = arith.constant 0 : index
    %3 = vector.load %arg7[%c0, %c0_1] : memref<128x128xf32, #tpu.memory_space<vmem>>, vector<128x128xf32>
    %c0_2 = arith.constant 0 : index
    %c0_3 = arith.constant 0 : index
    %4 = vector.load %arg3[%c0_2, %c0_3] : memref<128x384xbf16, #tpu.memory_space<vmem>>, vector<128x384xbf16>
    %c0_4 = arith.constant 0 : index
    %c0_5 = arith.constant 0 : index
    %5 = vector.load %arg4[%c0_4, %c0_5] : memref<384x128xbf16, #tpu.memory_space<vmem>>, vector<384x128xbf16>
    %cst = arith.constant dense<0.000000e+00> : vector<128x128xf32>
    %6 = tpu.matmul %4, %5, %cst {dimension_numbers = #tpu.dot_dimension_numbers<[1], [0], [0], [1], [0, 0, 1, 1], [], []>} : vector<128x384xbf16>, vector<384x128xbf16>, vector<128x128xf32> -> vector<128x128xf32>
    %7 = arith.addf %3, %6 : vector<128x128xf32>
    %c0_6 = arith.constant 0 : index
    %c0_7 = arith.constant 0 : index
    %8 = vector.load %arg7[%c0_6, %c0_7] : memref<128x128xf32, #tpu.memory_space<vmem>>, vector<128x128xf32>
    tpu.vector_store %arg7[%c0_6, %c0_7], %7 {strides = array<i32>} : memref<128x128xf32, #tpu.memory_space<vmem>>, vector<128x128xf32>,
    %c2_i32 = arith.constant 2 : i32
    %9 = arith.cmpi eq, %arg2, %c2_i32 : i32
    %10 = arith.extui %9 : i1 to i32
    %c0_i32_8 = arith.constant 0 : i32
    %11 = arith.cmpi ne, %10, %c0_i32_8 : i32
    scf.if %11 {
      %c0_9 = arith.constant 0 : index
      %c0_10 = arith.constant 0 : index
      %12 = vector.load %arg7[%c0_9, %c0_10] : memref<128x128xf32, #tpu.memory_space<vmem>>, vector<128x128xf32>
      %c0_11 = arith.constant 0 : index
      %c0_12 = arith.constant 0 : index
      %13 = vector.load %arg5[%c0_11, %c0_12] : memref<1x128xf32, #tpu.memory_space<vmem>>, vector<1x128xf32>
      %14 = vector.broadcast %13 : vector<1x128xf32> to vector<128x128xf32>
      %15 = arith.addf %12, %14 : vector<128x128xf32>
      %cst_13 = arith.constant 0.000000e+00 : f32
      %16 = vector.broadcast %cst_13 : f32 to vector<128x128xf32>
      %17 = arith.maximumf %15, %16 : vector<128x128xf32>
      %18 = arith.truncf %17 : vector<128x128xf32> to vector<128x128xbf16>
      %c0_14 = arith.constant 0 : index
      %c0_15 = arith.constant 0 : index
      %19 = vector.load %arg6[%c0_14, %c0_15] : memref<128x128xbf16, #tpu.memory_space<vmem>>, vector<128x128xbf16>
      tpu.vector_store %arg6[%c0_14, %c0_15], %18 {strides = array<i32>} : memref<128x128xbf16, #tpu.memory_space<vmem>>, vector<128x128xbf16>,
    } else {
    }
    return
  }
  func.func @transform_0(%arg0: i32, %arg1: i32, %arg2: i32) -> (i32, i32) {
    %c0_i32 = arith.constant 0 : i32
    return %arg0, %arg2 : i32, i32
  }
  func.func @transform_1(%arg0: i32, %arg1: i32, %arg2: i32) -> (i32, i32) {
    %c0_i32 = arith.constant 0 : i32
    return %arg2, %arg1 : i32, i32
  }
  func.func @transform_2(%arg0: i32, %arg1: i32, %arg2: i32) -> (i32, i32) {
    %c0_i32 = arith.constant 0 : i32
    %c0_i32_0 = arith.constant 0 : i32
    return %c0_i32, %arg1 : i32, i32
  }
  func.func @transform_3(%arg0: i32, %arg1: i32, %arg2: i32) -> (i32, i32) {
    %c0_i32 = arith.constant 0 : i32
    return %arg0, %arg1 : i32, i32
  }
}

module attributes {stable_mosaic.version = 11 : i64} {
  func.func @_matmul_bias_res_kernel(%arg0: i32, %arg1: i32, %arg2: i32, %arg3: memref<128x384xbf16, #tpu.memory_space<vmem>>, %arg4: memref<384x128xbf16, #tpu.memory_space<vmem>>, %arg5: memref<1x128xf32, #tpu.memory_space<vmem>>, %arg6: memref<128x128xbf16, #tpu.memory_space<vmem>>, %arg7: memref<128x128xbf16, #tpu.memory_space<vmem>>, %arg8: memref<128x128xf32, #tpu.memory_space<vmem>>) attributes {dimension_semantics = [#tpu.dimension_semantics<parallel>, #tpu.dimension_semantics<parallel>, #tpu.dimension_semantics<arbitrary>], iteration_bounds = array<i64: 1, 1, 3>, scalar_prefetch = 0 : i64, scratch_operands = 1 : i64, tpu.core_type = #tpu.core_type<tc>, window_params = [{transform_indices = @transform_0, window_bounds = array<i64: 128, 384>}, {transform_indices = @transform_1, window_bounds = array<i64: 384, 128>}, {transform_indices = @transform_2, window_bounds = array<i64: 1, 128>}, {transform_indices = @transform_3, window_bounds = array<i64: 128, 128>}, {transform_indices = @transform_4, window_bounds = array<i64: 128, 128>}]} {
    %c0_i32 = arith.constant 0 : i32
    %0 = arith.cmpi eq, %arg2, %c0_i32 : i32
    %1 = arith.extui %0 : i1 to i32
    %c0_i32_0 = arith.constant 0 : i32
    %2 = arith.cmpi ne, %1, %c0_i32_0 : i32
    scf.if %2 {
      %cst_9 = arith.constant 0.000000e+00 : f32
      %12 = vector.broadcast %cst_9 : f32 to vector<128x128xf32>
      %c0_10 = arith.constant 0 : index
      %c0_11 = arith.constant 0 : index
      %13 = vector.load %arg8[%c0_10, %c0_11] : memref<128x128xf32, #tpu.memory_space<vmem>>, vector<128x128xf32>
      tpu.vector_store %arg8[%c0_10, %c0_11], %12 {strides = array<i32>} : memref<128x128xf32, #tpu.memory_space<vmem>>, vector<128x128xf32>,
    } else {
    }
    %c0 = arith.constant 0 : index
    %c0_1 = arith.constant 0 : index
    %3 = vector.load %arg8[%c0, %c0_1] : memref<128x128xf32, #tpu.memory_space<vmem>>, vector<128x128xf32>
    %c0_2 = arith.constant 0 : index
    %c0_3 = arith.constant 0 : index
    %4 = vector.load %arg3[%c0_2, %c0_3] : memref<128x384xbf16, #tpu.memory_space<vmem>>, vector<128x384xbf16>
    %c0_4 = arith.constant 0 : index
    %c0_5 = arith.constant 0 : index
    %5 = vector.load %arg4[%c0_4, %c0_5] : memref<384x128xbf16, #tpu.memory_space<vmem>>, vector<384x128xbf16>
    %cst = arith.constant dense<0.000000e+00> : vector<128x128xf32>
    %6 = tpu.matmul %4, %5, %cst {dimension_numbers = #tpu.dot_dimension_numbers<[1], [0], [0], [1], [0, 0, 1, 1], [], []>} : vector<128x384xbf16>, vector<384x128xbf16>, vector<128x128xf32> -> vector<128x128xf32>
    %7 = arith.addf %3, %6 : vector<128x128xf32>
    %c0_6 = arith.constant 0 : index
    %c0_7 = arith.constant 0 : index
    %8 = vector.load %arg8[%c0_6, %c0_7] : memref<128x128xf32, #tpu.memory_space<vmem>>, vector<128x128xf32>
    tpu.vector_store %arg8[%c0_6, %c0_7], %7 {strides = array<i32>} : memref<128x128xf32, #tpu.memory_space<vmem>>, vector<128x128xf32>,
    %c2_i32 = arith.constant 2 : i32
    %9 = arith.cmpi eq, %arg2, %c2_i32 : i32
    %10 = arith.extui %9 : i1 to i32
    %c0_i32_8 = arith.constant 0 : i32
    %11 = arith.cmpi ne, %10, %c0_i32_8 : i32
    scf.if %11 {
      %c0_9 = arith.constant 0 : index
      %c0_10 = arith.constant 0 : index
      %12 = vector.load %arg8[%c0_9, %c0_10] : memref<128x128xf32, #tpu.memory_space<vmem>>, vector<128x128xf32>
      %c0_11 = arith.constant 0 : index
      %c0_12 = arith.constant 0 : index
      %13 = vector.load %arg5[%c0_11, %c0_12] : memref<1x128xf32, #tpu.memory_space<vmem>>, vector<1x128xf32>
      %14 = vector.broadcast %13 : vector<1x128xf32> to vector<128x128xf32>
      %15 = arith.addf %12, %14 : vector<128x128xf32>
      %c0_13 = arith.constant 0 : index
      %c0_14 = arith.constant 0 : index
      %16 = vector.load %arg6[%c0_13, %c0_14] : memref<128x128xbf16, #tpu.memory_space<vmem>>, vector<128x128xbf16>
      %17 = arith.extf %16 : vector<128x128xbf16> to vector<128x128xf32>
      %18 = arith.addf %15, %17 : vector<128x128xf32>
      %cst_15 = arith.constant 0.000000e+00 : f32
      %19 = vector.broadcast %cst_15 : f32 to vector<128x128xf32>
      %20 = arith.maximumf %18, %19 : vector<128x128xf32>
      %21 = arith.truncf %20 : vector<128x128xf32> to vector<128x128xbf16>
      %c0_16 = arith.constant 0 : index
      %c0_17 = arith.constant 0 : index
      %22 = vector.load %arg7[%c0_16, %c0_17] : memref<128x128xbf16, #tpu.memory_space<vmem>>, vector<128x128xbf16>
      tpu.vector_store %arg7[%c0_16, %c0_17], %21 {strides = array<i32>} : memref<128x128xbf16, #tpu.memory_space<vmem>>, vector<128x128xbf16>,
    } else {
    }
    return
  }
  func.func @transform_0(%arg0: i32, %arg1: i32, %arg2: i32) -> (i32, i32) {
    %c0_i32 = arith.constant 0 : i32
    return %arg0, %arg2 : i32, i32
  }
  func.func @transform_1(%arg0: i32, %arg1: i32, %arg2: i32) -> (i32, i32) {
    %c0_i32 = arith.constant 0 : i32
    return %arg2, %arg1 : i32, i32
  }
  func.func @transform_2(%arg0: i32, %arg1: i32, %arg2: i32) -> (i32, i32) {
    %c0_i32 = arith.constant 0 : i32
    %c0_i32_0 = arith.constant 0 : i32
    return %c0_i32, %arg1 : i32, i32
  }
  func.func @transform_3(%arg0: i32, %arg1: i32, %arg2: i32) -> (i32, i32) {
    %c0_i32 = arith.constant 0 : i32
    return %arg0, %arg1 : i32, i32
  }
  func.func @transform_4(%arg0: i32, %arg1: i32, %arg2: i32) -> (i32, i32) {
    %c0_i32 = arith.constant 0 : i32
    return %arg0, %arg1 : i32, i32
  }
}

module attributes {stable_mosaic.version = 11 : i64} {
  func.func @_matmul_bias_kernel(%arg0: i32, %arg1: i32, %arg2: i32, %arg3: memref<32x384xbf16, #tpu.memory_space<vmem>>, %arg4: memref<384x128xbf16, #tpu.memory_space<vmem>>, %arg5: memref<1x128xf32, #tpu.memory_space<vmem>>, %arg6: memref<32x128xbf16, #tpu.memory_space<vmem>>, %arg7: memref<32x128xf32, #tpu.memory_space<vmem>>) attributes {dimension_semantics = [#tpu.dimension_semantics<parallel>, #tpu.dimension_semantics<parallel>, #tpu.dimension_semantics<arbitrary>], iteration_bounds = array<i64: 1, 1, 3>, scalar_prefetch = 0 : i64, scratch_operands = 1 : i64, tpu.core_type = #tpu.core_type<tc>, window_params = [{transform_indices = @transform_0, window_bounds = array<i64: 32, 384>}, {transform_indices = @transform_1, window_bounds = array<i64: 384, 128>}, {transform_indices = @transform_2, window_bounds = array<i64: 1, 128>}, {transform_indices = @transform_3, window_bounds = array<i64: 32, 128>}]} {
    %c0_i32 = arith.constant 0 : i32
    %0 = arith.cmpi eq, %arg2, %c0_i32 : i32
    %1 = arith.extui %0 : i1 to i32
    %c0_i32_0 = arith.constant 0 : i32
    %2 = arith.cmpi ne, %1, %c0_i32_0 : i32
    scf.if %2 {
      %cst_9 = arith.constant 0.000000e+00 : f32
      %12 = vector.broadcast %cst_9 : f32 to vector<32x128xf32>
      %c0_10 = arith.constant 0 : index
      %c0_11 = arith.constant 0 : index
      %13 = vector.load %arg7[%c0_10, %c0_11] : memref<32x128xf32, #tpu.memory_space<vmem>>, vector<32x128xf32>
      tpu.vector_store %arg7[%c0_10, %c0_11], %12 {strides = array<i32>} : memref<32x128xf32, #tpu.memory_space<vmem>>, vector<32x128xf32>,
    } else {
    }
    %c0 = arith.constant 0 : index
    %c0_1 = arith.constant 0 : index
    %3 = vector.load %arg7[%c0, %c0_1] : memref<32x128xf32, #tpu.memory_space<vmem>>, vector<32x128xf32>
    %c0_2 = arith.constant 0 : index
    %c0_3 = arith.constant 0 : index
    %4 = vector.load %arg3[%c0_2, %c0_3] : memref<32x384xbf16, #tpu.memory_space<vmem>>, vector<32x384xbf16>
    %c0_4 = arith.constant 0 : index
    %c0_5 = arith.constant 0 : index
    %5 = vector.load %arg4[%c0_4, %c0_5] : memref<384x128xbf16, #tpu.memory_space<vmem>>, vector<384x128xbf16>
    %cst = arith.constant dense<0.000000e+00> : vector<32x128xf32>
    %6 = tpu.matmul %4, %5, %cst {dimension_numbers = #tpu.dot_dimension_numbers<[1], [0], [0], [1], [0, 0, 1, 1], [], []>} : vector<32x384xbf16>, vector<384x128xbf16>, vector<32x128xf32> -> vector<32x128xf32>
    %7 = arith.addf %3, %6 : vector<32x128xf32>
    %c0_6 = arith.constant 0 : index
    %c0_7 = arith.constant 0 : index
    %8 = vector.load %arg7[%c0_6, %c0_7] : memref<32x128xf32, #tpu.memory_space<vmem>>, vector<32x128xf32>
    tpu.vector_store %arg7[%c0_6, %c0_7], %7 {strides = array<i32>} : memref<32x128xf32, #tpu.memory_space<vmem>>, vector<32x128xf32>,
    %c2_i32 = arith.constant 2 : i32
    %9 = arith.cmpi eq, %arg2, %c2_i32 : i32
    %10 = arith.extui %9 : i1 to i32
    %c0_i32_8 = arith.constant 0 : i32
    %11 = arith.cmpi ne, %10, %c0_i32_8 : i32
    scf.if %11 {
      %c0_9 = arith.constant 0 : index
      %c0_10 = arith.constant 0 : index
      %12 = vector.load %arg7[%c0_9, %c0_10] : memref<32x128xf32, #tpu.memory_space<vmem>>, vector<32x128xf32>
      %c0_11 = arith.constant 0 : index
      %c0_12 = arith.constant 0 : index
      %13 = vector.load %arg5[%c0_11, %c0_12] : memref<1x128xf32, #tpu.memory_space<vmem>>, vector<1x128xf32>
      %14 = vector.broadcast %13 : vector<1x128xf32> to vector<32x128xf32>
      %15 = arith.addf %12, %14 : vector<32x128xf32>
      %cst_13 = arith.constant 0.000000e+00 : f32
      %16 = vector.broadcast %cst_13 : f32 to vector<32x128xf32>
      %17 = arith.maximumf %15, %16 : vector<32x128xf32>
      %18 = arith.truncf %17 : vector<32x128xf32> to vector<32x128xbf16>
      %c0_14 = arith.constant 0 : index
      %c0_15 = arith.constant 0 : index
      %19 = vector.load %arg6[%c0_14, %c0_15] : memref<32x128xbf16, #tpu.memory_space<vmem>>, vector<32x128xbf16>
      tpu.vector_store %arg6[%c0_14, %c0_15], %18 {strides = array<i32>} : memref<32x128xbf16, #tpu.memory_space<vmem>>, vector<32x128xbf16>,
    } else {
    }
    return
  }
  func.func @transform_0(%arg0: i32, %arg1: i32, %arg2: i32) -> (i32, i32) {
    %c0_i32 = arith.constant 0 : i32
    return %arg0, %arg2 : i32, i32
  }
  func.func @transform_1(%arg0: i32, %arg1: i32, %arg2: i32) -> (i32, i32) {
    %c0_i32 = arith.constant 0 : i32
    return %arg2, %arg1 : i32, i32
  }
  func.func @transform_2(%arg0: i32, %arg1: i32, %arg2: i32) -> (i32, i32) {
    %c0_i32 = arith.constant 0 : i32
    %c0_i32_0 = arith.constant 0 : i32
    return %c0_i32, %arg1 : i32, i32
  }
  func.func @transform_3(%arg0: i32, %arg1: i32, %arg2: i32) -> (i32, i32) {
    %c0_i32 = arith.constant 0 : i32
    return %arg0, %arg1 : i32, i32
  }
}

module attributes {stable_mosaic.version = 11 : i64} {
  func.func @_matmul_bias_kernel(%arg0: i32, %arg1: i32, %arg2: i32, %arg3: memref<32x128xbf16, #tpu.memory_space<vmem>>, %arg4: memref<128x128xbf16, #tpu.memory_space<vmem>>, %arg5: memref<1x128xf32, #tpu.memory_space<vmem>>, %arg6: memref<32x128xbf16, #tpu.memory_space<vmem>>, %arg7: memref<32x128xf32, #tpu.memory_space<vmem>>) attributes {dimension_semantics = [#tpu.dimension_semantics<parallel>, #tpu.dimension_semantics<parallel>, #tpu.dimension_semantics<arbitrary>], iteration_bounds = array<i64: 1, 1, 1>, scalar_prefetch = 0 : i64, scratch_operands = 1 : i64, tpu.core_type = #tpu.core_type<tc>, window_params = [{transform_indices = @transform_0, window_bounds = array<i64: 32, 128>}, {transform_indices = @transform_1, window_bounds = array<i64: 128, 128>}, {transform_indices = @transform_2, window_bounds = array<i64: 1, 128>}, {transform_indices = @transform_3, window_bounds = array<i64: 32, 128>}]} {
    %c0_i32 = arith.constant 0 : i32
    %0 = arith.cmpi eq, %arg2, %c0_i32 : i32
    %1 = arith.extui %0 : i1 to i32
    %c0_i32_0 = arith.constant 0 : i32
    %2 = arith.cmpi ne, %1, %c0_i32_0 : i32
    scf.if %2 {
      %cst_10 = arith.constant 0.000000e+00 : f32
      %12 = vector.broadcast %cst_10 : f32 to vector<32x128xf32>
      %c0_11 = arith.constant 0 : index
      %c0_12 = arith.constant 0 : index
      %13 = vector.load %arg7[%c0_11, %c0_12] : memref<32x128xf32, #tpu.memory_space<vmem>>, vector<32x128xf32>
      tpu.vector_store %arg7[%c0_11, %c0_12], %12 {strides = array<i32>} : memref<32x128xf32, #tpu.memory_space<vmem>>, vector<32x128xf32>,
    } else {
    }
    %c0 = arith.constant 0 : index
    %c0_1 = arith.constant 0 : index
    %3 = vector.load %arg7[%c0, %c0_1] : memref<32x128xf32, #tpu.memory_space<vmem>>, vector<32x128xf32>
    %c0_2 = arith.constant 0 : index
    %c0_3 = arith.constant 0 : index
    %4 = vector.load %arg3[%c0_2, %c0_3] : memref<32x128xbf16, #tpu.memory_space<vmem>>, vector<32x128xbf16>
    %c0_4 = arith.constant 0 : index
    %c0_5 = arith.constant 0 : index
    %5 = vector.load %arg4[%c0_4, %c0_5] : memref<128x128xbf16, #tpu.memory_space<vmem>>, vector<128x128xbf16>
    %cst = arith.constant dense<0.000000e+00> : vector<32x128xf32>
    %6 = tpu.matmul %4, %5, %cst {dimension_numbers = #tpu.dot_dimension_numbers<[1], [0], [0], [1], [0, 0, 1, 1], [], []>} : vector<32x128xbf16>, vector<128x128xbf16>, vector<32x128xf32> -> vector<32x128xf32>
    %7 = arith.addf %3, %6 : vector<32x128xf32>
    %c0_6 = arith.constant 0 : index
    %c0_7 = arith.constant 0 : index
    %8 = vector.load %arg7[%c0_6, %c0_7] : memref<32x128xf32, #tpu.memory_space<vmem>>, vector<32x128xf32>
    tpu.vector_store %arg7[%c0_6, %c0_7], %7 {strides = array<i32>} : memref<32x128xf32, #tpu.memory_space<vmem>>, vector<32x128xf32>,
    %c0_i32_8 = arith.constant 0 : i32
    %9 = arith.cmpi eq, %arg2, %c0_i32_8 : i32
    %10 = arith.extui %9 : i1 to i32
    %c0_i32_9 = arith.constant 0 : i32
    %11 = arith.cmpi ne, %10, %c0_i32_9 : i32
    scf.if %11 {
      %c0_10 = arith.constant 0 : index
      %c0_11 = arith.constant 0 : index
      %12 = vector.load %arg7[%c0_10, %c0_11] : memref<32x128xf32, #tpu.memory_space<vmem>>, vector<32x128xf32>
      %c0_12 = arith.constant 0 : index
      %c0_13 = arith.constant 0 : index
      %13 = vector.load %arg5[%c0_12, %c0_13] : memref<1x128xf32, #tpu.memory_space<vmem>>, vector<1x128xf32>
      %14 = vector.broadcast %13 : vector<1x128xf32> to vector<32x128xf32>
      %15 = arith.addf %12, %14 : vector<32x128xf32>
      %16 = arith.truncf %15 : vector<32x128xf32> to vector<32x128xbf16>
      %c0_14 = arith.constant 0 : index
      %c0_15 = arith.constant 0 : index
      %17 = vector.load %arg6[%c0_14, %c0_15] : memref<32x128xbf16, #tpu.memory_space<vmem>>, vector<32x128xbf16>
      tpu.vector_store %arg6[%c0_14, %c0_15], %16 {strides = array<i32>} : memref<32x128xbf16, #tpu.memory_space<vmem>>, vector<32x128xbf16>,
    } else {
    }
    return
  }
  func.func @transform_0(%arg0: i32, %arg1: i32, %arg2: i32) -> (i32, i32) {
    %c0_i32 = arith.constant 0 : i32
    return %arg0, %arg2 : i32, i32
  }
  func.func @transform_1(%arg0: i32, %arg1: i32, %arg2: i32) -> (i32, i32) {
    %c0_i32 = arith.constant 0 : i32
    return %arg2, %arg1 : i32, i32
  }
  func.func @transform_2(%arg0: i32, %arg1: i32, %arg2: i32) -> (i32, i32) {
    %c0_i32 = arith.constant 0 : i32
    %c0_i32_0 = arith.constant 0 : i32
    return %c0_i32, %arg1 : i32, i32
  }
  func.func @transform_3(%arg0: i32, %arg1: i32, %arg2: i32) -> (i32, i32) {
    %c0_i32 = arith.constant 0 : i32
    return %arg0, %arg1 : i32, i32
  }
}

module attributes {stable_mosaic.version = 11 : i64} {
  func.func @_matmul_bias_res_kernel(%arg0: i32, %arg1: i32, %arg2: i32, %arg3: memref<32x384xbf16, #tpu.memory_space<vmem>>, %arg4: memref<384x128xbf16, #tpu.memory_space<vmem>>, %arg5: memref<1x128xf32, #tpu.memory_space<vmem>>, %arg6: memref<32x128xbf16, #tpu.memory_space<vmem>>, %arg7: memref<32x128xbf16, #tpu.memory_space<vmem>>, %arg8: memref<32x128xf32, #tpu.memory_space<vmem>>) attributes {dimension_semantics = [#tpu.dimension_semantics<parallel>, #tpu.dimension_semantics<parallel>, #tpu.dimension_semantics<arbitrary>], iteration_bounds = array<i64: 1, 1, 3>, scalar_prefetch = 0 : i64, scratch_operands = 1 : i64, tpu.core_type = #tpu.core_type<tc>, window_params = [{transform_indices = @transform_0, window_bounds = array<i64: 32, 384>}, {transform_indices = @transform_1, window_bounds = array<i64: 384, 128>}, {transform_indices = @transform_2, window_bounds = array<i64: 1, 128>}, {transform_indices = @transform_3, window_bounds = array<i64: 32, 128>}, {transform_indices = @transform_4, window_bounds = array<i64: 32, 128>}]} {
    %c0_i32 = arith.constant 0 : i32
    %0 = arith.cmpi eq, %arg2, %c0_i32 : i32
    %1 = arith.extui %0 : i1 to i32
    %c0_i32_0 = arith.constant 0 : i32
    %2 = arith.cmpi ne, %1, %c0_i32_0 : i32
    scf.if %2 {
      %cst_9 = arith.constant 0.000000e+00 : f32
      %12 = vector.broadcast %cst_9 : f32 to vector<32x128xf32>
      %c0_10 = arith.constant 0 : index
      %c0_11 = arith.constant 0 : index
      %13 = vector.load %arg8[%c0_10, %c0_11] : memref<32x128xf32, #tpu.memory_space<vmem>>, vector<32x128xf32>
      tpu.vector_store %arg8[%c0_10, %c0_11], %12 {strides = array<i32>} : memref<32x128xf32, #tpu.memory_space<vmem>>, vector<32x128xf32>,
    } else {
    }
    %c0 = arith.constant 0 : index
    %c0_1 = arith.constant 0 : index
    %3 = vector.load %arg8[%c0, %c0_1] : memref<32x128xf32, #tpu.memory_space<vmem>>, vector<32x128xf32>
    %c0_2 = arith.constant 0 : index
    %c0_3 = arith.constant 0 : index
    %4 = vector.load %arg3[%c0_2, %c0_3] : memref<32x384xbf16, #tpu.memory_space<vmem>>, vector<32x384xbf16>
    %c0_4 = arith.constant 0 : index
    %c0_5 = arith.constant 0 : index
    %5 = vector.load %arg4[%c0_4, %c0_5] : memref<384x128xbf16, #tpu.memory_space<vmem>>, vector<384x128xbf16>
    %cst = arith.constant dense<0.000000e+00> : vector<32x128xf32>
    %6 = tpu.matmul %4, %5, %cst {dimension_numbers = #tpu.dot_dimension_numbers<[1], [0], [0], [1], [0, 0, 1, 1], [], []>} : vector<32x384xbf16>, vector<384x128xbf16>, vector<32x128xf32> -> vector<32x128xf32>
    %7 = arith.addf %3, %6 : vector<32x128xf32>
    %c0_6 = arith.constant 0 : index
    %c0_7 = arith.constant 0 : index
    %8 = vector.load %arg8[%c0_6, %c0_7] : memref<32x128xf32, #tpu.memory_space<vmem>>, vector<32x128xf32>
    tpu.vector_store %arg8[%c0_6, %c0_7], %7 {strides = array<i32>} : memref<32x128xf32, #tpu.memory_space<vmem>>, vector<32x128xf32>,
    %c2_i32 = arith.constant 2 : i32
    %9 = arith.cmpi eq, %arg2, %c2_i32 : i32
    %10 = arith.extui %9 : i1 to i32
    %c0_i32_8 = arith.constant 0 : i32
    %11 = arith.cmpi ne, %10, %c0_i32_8 : i32
    scf.if %11 {
      %c0_9 = arith.constant 0 : index
      %c0_10 = arith.constant 0 : index
      %12 = vector.load %arg8[%c0_9, %c0_10] : memref<32x128xf32, #tpu.memory_space<vmem>>, vector<32x128xf32>
      %c0_11 = arith.constant 0 : index
      %c0_12 = arith.constant 0 : index
      %13 = vector.load %arg5[%c0_11, %c0_12] : memref<1x128xf32, #tpu.memory_space<vmem>>, vector<1x128xf32>
      %14 = vector.broadcast %13 : vector<1x128xf32> to vector<32x128xf32>
      %15 = arith.addf %12, %14 : vector<32x128xf32>
      %c0_13 = arith.constant 0 : index
      %c0_14 = arith.constant 0 : index
      %16 = vector.load %arg6[%c0_13, %c0_14] : memref<32x128xbf16, #tpu.memory_space<vmem>>, vector<32x128xbf16>
      %17 = arith.extf %16 : vector<32x128xbf16> to vector<32x128xf32>
      %18 = arith.addf %15, %17 : vector<32x128xf32>
      %cst_15 = arith.constant 0.000000e+00 : f32
      %19 = vector.broadcast %cst_15 : f32 to vector<32x128xf32>
      %20 = arith.maximumf %18, %19 : vector<32x128xf32>
      %21 = arith.truncf %20 : vector<32x128xf32> to vector<32x128xbf16>
      %c0_16 = arith.constant 0 : index
      %c0_17 = arith.constant 0 : index
      %22 = vector.load %arg7[%c0_16, %c0_17] : memref<32x128xbf16, #tpu.memory_space<vmem>>, vector<32x128xbf16>
      tpu.vector_store %arg7[%c0_16, %c0_17], %21 {strides = array<i32>} : memref<32x128xbf16, #tpu.memory_space<vmem>>, vector<32x128xbf16>,
    } else {
    }
    return
  }
  func.func @transform_0(%arg0: i32, %arg1: i32, %arg2: i32) -> (i32, i32) {
    %c0_i32 = arith.constant 0 : i32
    return %arg0, %arg2 : i32, i32
  }
  func.func @transform_1(%arg0: i32, %arg1: i32, %arg2: i32) -> (i32, i32) {
    %c0_i32 = arith.constant 0 : i32
    return %arg2, %arg1 : i32, i32
  }
  func.func @transform_2(%arg0: i32, %arg1: i32, %arg2: i32) -> (i32, i32) {
    %c0_i32 = arith.constant 0 : i32
    %c0_i32_0 = arith.constant 0 : i32
    return %c0_i32, %arg1 : i32, i32
  }
  func.func @transform_3(%arg0: i32, %arg1: i32, %arg2: i32) -> (i32, i32) {
    %c0_i32 = arith.constant 0 : i32
    return %arg0, %arg1 : i32, i32
  }
  func.func @transform_4(%arg0: i32, %arg1: i32, %arg2: i32) -> (i32, i32) {
    %c0_i32 = arith.constant 0 : i32
    return %arg0, %arg1 : i32, i32
  }
}

module attributes {stable_mosaic.version = 11 : i64} {
  func.func @_matmul_bias_kernel(%arg0: i32, %arg1: i32, %arg2: i32, %arg3: memref<8x384xbf16, #tpu.memory_space<vmem>>, %arg4: memref<384x256xbf16, #tpu.memory_space<vmem>>, %arg5: memref<1x256xf32, #tpu.memory_space<vmem>>, %arg6: memref<8x256xbf16, #tpu.memory_space<vmem>>, %arg7: memref<8x256xf32, #tpu.memory_space<vmem>>) attributes {dimension_semantics = [#tpu.dimension_semantics<parallel>, #tpu.dimension_semantics<parallel>, #tpu.dimension_semantics<arbitrary>], iteration_bounds = array<i64: 1, 1, 3>, scalar_prefetch = 0 : i64, scratch_operands = 1 : i64, tpu.core_type = #tpu.core_type<tc>, window_params = [{transform_indices = @transform_0, window_bounds = array<i64: 8, 384>}, {transform_indices = @transform_1, window_bounds = array<i64: 384, 256>}, {transform_indices = @transform_2, window_bounds = array<i64: 1, 256>}, {transform_indices = @transform_3, window_bounds = array<i64: 8, 256>}]} {
    %c0_i32 = arith.constant 0 : i32
    %0 = arith.cmpi eq, %arg2, %c0_i32 : i32
    %1 = arith.extui %0 : i1 to i32
    %c0_i32_0 = arith.constant 0 : i32
    %2 = arith.cmpi ne, %1, %c0_i32_0 : i32
    scf.if %2 {
      %cst_9 = arith.constant 0.000000e+00 : f32
      %12 = vector.broadcast %cst_9 : f32 to vector<8x256xf32>
      %c0_10 = arith.constant 0 : index
      %c0_11 = arith.constant 0 : index
      %13 = vector.load %arg7[%c0_10, %c0_11] : memref<8x256xf32, #tpu.memory_space<vmem>>, vector<8x256xf32>
      tpu.vector_store %arg7[%c0_10, %c0_11], %12 {strides = array<i32>} : memref<8x256xf32, #tpu.memory_space<vmem>>, vector<8x256xf32>,
    } else {
    }
    %c0 = arith.constant 0 : index
    %c0_1 = arith.constant 0 : index
    %3 = vector.load %arg7[%c0, %c0_1] : memref<8x256xf32, #tpu.memory_space<vmem>>, vector<8x256xf32>
    %c0_2 = arith.constant 0 : index
    %c0_3 = arith.constant 0 : index
    %4 = vector.load %arg3[%c0_2, %c0_3] : memref<8x384xbf16, #tpu.memory_space<vmem>>, vector<8x384xbf16>
    %c0_4 = arith.constant 0 : index
    %c0_5 = arith.constant 0 : index
    %5 = vector.load %arg4[%c0_4, %c0_5] : memref<384x256xbf16, #tpu.memory_space<vmem>>, vector<384x256xbf16>
    %cst = arith.constant dense<0.000000e+00> : vector<8x256xf32>
    %6 = tpu.matmul %4, %5, %cst {dimension_numbers = #tpu.dot_dimension_numbers<[1], [0], [0], [1], [0, 0, 1, 1], [], []>} : vector<8x384xbf16>, vector<384x256xbf16>, vector<8x256xf32> -> vector<8x256xf32>
    %7 = arith.addf %3, %6 : vector<8x256xf32>
    %c0_6 = arith.constant 0 : index
    %c0_7 = arith.constant 0 : index
    %8 = vector.load %arg7[%c0_6, %c0_7] : memref<8x256xf32, #tpu.memory_space<vmem>>, vector<8x256xf32>
    tpu.vector_store %arg7[%c0_6, %c0_7], %7 {strides = array<i32>} : memref<8x256xf32, #tpu.memory_space<vmem>>, vector<8x256xf32>,
    %c2_i32 = arith.constant 2 : i32
    %9 = arith.cmpi eq, %arg2, %c2_i32 : i32
    %10 = arith.extui %9 : i1 to i32
    %c0_i32_8 = arith.constant 0 : i32
    %11 = arith.cmpi ne, %10, %c0_i32_8 : i32
    scf.if %11 {
      %c0_9 = arith.constant 0 : index
      %c0_10 = arith.constant 0 : index
      %12 = vector.load %arg7[%c0_9, %c0_10] : memref<8x256xf32, #tpu.memory_space<vmem>>, vector<8x256xf32>
      %c0_11 = arith.constant 0 : index
      %c0_12 = arith.constant 0 : index
      %13 = vector.load %arg5[%c0_11, %c0_12] : memref<1x256xf32, #tpu.memory_space<vmem>>, vector<1x256xf32>
      %14 = vector.broadcast %13 : vector<1x256xf32> to vector<8x256xf32>
      %15 = arith.addf %12, %14 : vector<8x256xf32>
      %cst_13 = arith.constant 0.000000e+00 : f32
      %16 = vector.broadcast %cst_13 : f32 to vector<8x256xf32>
      %17 = arith.maximumf %15, %16 : vector<8x256xf32>
      %18 = arith.truncf %17 : vector<8x256xf32> to vector<8x256xbf16>
      %c0_14 = arith.constant 0 : index
      %c0_15 = arith.constant 0 : index
      %19 = vector.load %arg6[%c0_14, %c0_15] : memref<8x256xbf16, #tpu.memory_space<vmem>>, vector<8x256xbf16>
      tpu.vector_store %arg6[%c0_14, %c0_15], %18 {strides = array<i32>} : memref<8x256xbf16, #tpu.memory_space<vmem>>, vector<8x256xbf16>,
    } else {
    }
    return
  }
  func.func @transform_0(%arg0: i32, %arg1: i32, %arg2: i32) -> (i32, i32) {
    %c0_i32 = arith.constant 0 : i32
    return %arg0, %arg2 : i32, i32
  }
  func.func @transform_1(%arg0: i32, %arg1: i32, %arg2: i32) -> (i32, i32) {
    %c0_i32 = arith.constant 0 : i32
    return %arg2, %arg1 : i32, i32
  }
  func.func @transform_2(%arg0: i32, %arg1: i32, %arg2: i32) -> (i32, i32) {
    %c0_i32 = arith.constant 0 : i32
    %c0_i32_0 = arith.constant 0 : i32
    return %c0_i32, %arg1 : i32, i32
  }
  func.func @transform_3(%arg0: i32, %arg1: i32, %arg2: i32) -> (i32, i32) {
    %c0_i32 = arith.constant 0 : i32
    return %arg0, %arg1 : i32, i32
  }
}

module attributes {stable_mosaic.version = 11 : i64} {
  func.func @_matmul_bias_kernel(%arg0: i32, %arg1: i32, %arg2: i32, %arg3: memref<8x128xbf16, #tpu.memory_space<vmem>>, %arg4: memref<128x256xbf16, #tpu.memory_space<vmem>>, %arg5: memref<1x256xf32, #tpu.memory_space<vmem>>, %arg6: memref<8x256xbf16, #tpu.memory_space<vmem>>, %arg7: memref<8x256xf32, #tpu.memory_space<vmem>>) attributes {dimension_semantics = [#tpu.dimension_semantics<parallel>, #tpu.dimension_semantics<parallel>, #tpu.dimension_semantics<arbitrary>], iteration_bounds = array<i64: 1, 1, 1>, scalar_prefetch = 0 : i64, scratch_operands = 1 : i64, tpu.core_type = #tpu.core_type<tc>, window_params = [{transform_indices = @transform_0, window_bounds = array<i64: 8, 128>}, {transform_indices = @transform_1, window_bounds = array<i64: 128, 256>}, {transform_indices = @transform_2, window_bounds = array<i64: 1, 256>}, {transform_indices = @transform_3, window_bounds = array<i64: 8, 256>}]} {
    %c0_i32 = arith.constant 0 : i32
    %0 = arith.cmpi eq, %arg2, %c0_i32 : i32
    %1 = arith.extui %0 : i1 to i32
    %c0_i32_0 = arith.constant 0 : i32
    %2 = arith.cmpi ne, %1, %c0_i32_0 : i32
    scf.if %2 {
      %cst_10 = arith.constant 0.000000e+00 : f32
      %12 = vector.broadcast %cst_10 : f32 to vector<8x256xf32>
      %c0_11 = arith.constant 0 : index
      %c0_12 = arith.constant 0 : index
      %13 = vector.load %arg7[%c0_11, %c0_12] : memref<8x256xf32, #tpu.memory_space<vmem>>, vector<8x256xf32>
      tpu.vector_store %arg7[%c0_11, %c0_12], %12 {strides = array<i32>} : memref<8x256xf32, #tpu.memory_space<vmem>>, vector<8x256xf32>,
    } else {
    }
    %c0 = arith.constant 0 : index
    %c0_1 = arith.constant 0 : index
    %3 = vector.load %arg7[%c0, %c0_1] : memref<8x256xf32, #tpu.memory_space<vmem>>, vector<8x256xf32>
    %c0_2 = arith.constant 0 : index
    %c0_3 = arith.constant 0 : index
    %4 = vector.load %arg3[%c0_2, %c0_3] : memref<8x128xbf16, #tpu.memory_space<vmem>>, vector<8x128xbf16>
    %c0_4 = arith.constant 0 : index
    %c0_5 = arith.constant 0 : index
    %5 = vector.load %arg4[%c0_4, %c0_5] : memref<128x256xbf16, #tpu.memory_space<vmem>>, vector<128x256xbf16>
    %cst = arith.constant dense<0.000000e+00> : vector<8x256xf32>
    %6 = tpu.matmul %4, %5, %cst {dimension_numbers = #tpu.dot_dimension_numbers<[1], [0], [0], [1], [0, 0, 1, 1], [], []>} : vector<8x128xbf16>, vector<128x256xbf16>, vector<8x256xf32> -> vector<8x256xf32>
    %7 = arith.addf %3, %6 : vector<8x256xf32>
    %c0_6 = arith.constant 0 : index
    %c0_7 = arith.constant 0 : index
    %8 = vector.load %arg7[%c0_6, %c0_7] : memref<8x256xf32, #tpu.memory_space<vmem>>, vector<8x256xf32>
    tpu.vector_store %arg7[%c0_6, %c0_7], %7 {strides = array<i32>} : memref<8x256xf32, #tpu.memory_space<vmem>>, vector<8x256xf32>,
    %c0_i32_8 = arith.constant 0 : i32
    %9 = arith.cmpi eq, %arg2, %c0_i32_8 : i32
    %10 = arith.extui %9 : i1 to i32
    %c0_i32_9 = arith.constant 0 : i32
    %11 = arith.cmpi ne, %10, %c0_i32_9 : i32
    scf.if %11 {
      %c0_10 = arith.constant 0 : index
      %c0_11 = arith.constant 0 : index
      %12 = vector.load %arg7[%c0_10, %c0_11] : memref<8x256xf32, #tpu.memory_space<vmem>>, vector<8x256xf32>
      %c0_12 = arith.constant 0 : index
      %c0_13 = arith.constant 0 : index
      %13 = vector.load %arg5[%c0_12, %c0_13] : memref<1x256xf32, #tpu.memory_space<vmem>>, vector<1x256xf32>
      %14 = vector.broadcast %13 : vector<1x256xf32> to vector<8x256xf32>
      %15 = arith.addf %12, %14 : vector<8x256xf32>
      %16 = arith.truncf %15 : vector<8x256xf32> to vector<8x256xbf16>
      %c0_14 = arith.constant 0 : index
      %c0_15 = arith.constant 0 : index
      %17 = vector.load %arg6[%c0_14, %c0_15] : memref<8x256xbf16, #tpu.memory_space<vmem>>, vector<8x256xbf16>
      tpu.vector_store %arg6[%c0_14, %c0_15], %16 {strides = array<i32>} : memref<8x256xbf16, #tpu.memory_space<vmem>>, vector<8x256xbf16>,
    } else {
    }
    return
  }
  func.func @transform_0(%arg0: i32, %arg1: i32, %arg2: i32) -> (i32, i32) {
    %c0_i32 = arith.constant 0 : i32
    return %arg0, %arg2 : i32, i32
  }
  func.func @transform_1(%arg0: i32, %arg1: i32, %arg2: i32) -> (i32, i32) {
    %c0_i32 = arith.constant 0 : i32
    return %arg2, %arg1 : i32, i32
  }
  func.func @transform_2(%arg0: i32, %arg1: i32, %arg2: i32) -> (i32, i32) {
    %c0_i32 = arith.constant 0 : i32
    %c0_i32_0 = arith.constant 0 : i32
    return %c0_i32, %arg1 : i32, i32
  }
  func.func @transform_3(%arg0: i32, %arg1: i32, %arg2: i32) -> (i32, i32) {
    %c0_i32 = arith.constant 0 : i32
    return %arg0, %arg1 : i32, i32
  }
}

module attributes {stable_mosaic.version = 11 : i64} {
  func.func @_matmul_bias_res_kernel(%arg0: i32, %arg1: i32, %arg2: i32, %arg3: memref<8x384xbf16, #tpu.memory_space<vmem>>, %arg4: memref<384x256xbf16, #tpu.memory_space<vmem>>, %arg5: memref<1x256xf32, #tpu.memory_space<vmem>>, %arg6: memref<8x256xbf16, #tpu.memory_space<vmem>>, %arg7: memref<8x256xbf16, #tpu.memory_space<vmem>>, %arg8: memref<8x256xf32, #tpu.memory_space<vmem>>) attributes {dimension_semantics = [#tpu.dimension_semantics<parallel>, #tpu.dimension_semantics<parallel>, #tpu.dimension_semantics<arbitrary>], iteration_bounds = array<i64: 1, 1, 6>, scalar_prefetch = 0 : i64, scratch_operands = 1 : i64, tpu.core_type = #tpu.core_type<tc>, window_params = [{transform_indices = @transform_0, window_bounds = array<i64: 8, 384>}, {transform_indices = @transform_1, window_bounds = array<i64: 384, 256>}, {transform_indices = @transform_2, window_bounds = array<i64: 1, 256>}, {transform_indices = @transform_3, window_bounds = array<i64: 8, 256>}, {transform_indices = @transform_4, window_bounds = array<i64: 8, 256>}]} {
    %c0_i32 = arith.constant 0 : i32
    %0 = arith.cmpi eq, %arg2, %c0_i32 : i32
    %1 = arith.extui %0 : i1 to i32
    %c0_i32_0 = arith.constant 0 : i32
    %2 = arith.cmpi ne, %1, %c0_i32_0 : i32
    scf.if %2 {
      %cst_9 = arith.constant 0.000000e+00 : f32
      %12 = vector.broadcast %cst_9 : f32 to vector<8x256xf32>
      %c0_10 = arith.constant 0 : index
      %c0_11 = arith.constant 0 : index
      %13 = vector.load %arg8[%c0_10, %c0_11] : memref<8x256xf32, #tpu.memory_space<vmem>>, vector<8x256xf32>
      tpu.vector_store %arg8[%c0_10, %c0_11], %12 {strides = array<i32>} : memref<8x256xf32, #tpu.memory_space<vmem>>, vector<8x256xf32>,
    } else {
    }
    %c0 = arith.constant 0 : index
    %c0_1 = arith.constant 0 : index
    %3 = vector.load %arg8[%c0, %c0_1] : memref<8x256xf32, #tpu.memory_space<vmem>>, vector<8x256xf32>
    %c0_2 = arith.constant 0 : index
    %c0_3 = arith.constant 0 : index
    %4 = vector.load %arg3[%c0_2, %c0_3] : memref<8x384xbf16, #tpu.memory_space<vmem>>, vector<8x384xbf16>
    %c0_4 = arith.constant 0 : index
    %c0_5 = arith.constant 0 : index
    %5 = vector.load %arg4[%c0_4, %c0_5] : memref<384x256xbf16, #tpu.memory_space<vmem>>, vector<384x256xbf16>
    %cst = arith.constant dense<0.000000e+00> : vector<8x256xf32>
    %6 = tpu.matmul %4, %5, %cst {dimension_numbers = #tpu.dot_dimension_numbers<[1], [0], [0], [1], [0, 0, 1, 1], [], []>} : vector<8x384xbf16>, vector<384x256xbf16>, vector<8x256xf32> -> vector<8x256xf32>
    %7 = arith.addf %3, %6 : vector<8x256xf32>
    %c0_6 = arith.constant 0 : index
    %c0_7 = arith.constant 0 : index
    %8 = vector.load %arg8[%c0_6, %c0_7] : memref<8x256xf32, #tpu.memory_space<vmem>>, vector<8x256xf32>
    tpu.vector_store %arg8[%c0_6, %c0_7], %7 {strides = array<i32>} : memref<8x256xf32, #tpu.memory_space<vmem>>, vector<8x256xf32>,
    %c5_i32 = arith.constant 5 : i32
    %9 = arith.cmpi eq, %arg2, %c5_i32 : i32
    %10 = arith.extui %9 : i1 to i32
    %c0_i32_8 = arith.constant 0 : i32
    %11 = arith.cmpi ne, %10, %c0_i32_8 : i32
    scf.if %11 {
      %c0_9 = arith.constant 0 : index
      %c0_10 = arith.constant 0 : index
      %12 = vector.load %arg8[%c0_9, %c0_10] : memref<8x256xf32, #tpu.memory_space<vmem>>, vector<8x256xf32>
      %c0_11 = arith.constant 0 : index
      %c0_12 = arith.constant 0 : index
      %13 = vector.load %arg5[%c0_11, %c0_12] : memref<1x256xf32, #tpu.memory_space<vmem>>, vector<1x256xf32>
      %14 = vector.broadcast %13 : vector<1x256xf32> to vector<8x256xf32>
      %15 = arith.addf %12, %14 : vector<8x256xf32>
      %c0_13 = arith.constant 0 : index
      %c0_14 = arith.constant 0 : index
      %16 = vector.load %arg6[%c0_13, %c0_14] : memref<8x256xbf16, #tpu.memory_space<vmem>>, vector<8x256xbf16>
      %17 = arith.extf %16 : vector<8x256xbf16> to vector<8x256xf32>
      %18 = arith.addf %15, %17 : vector<8x256xf32>
      %cst_15 = arith.constant 0.000000e+00 : f32
      %19 = vector.broadcast %cst_15 : f32 to vector<8x256xf32>
      %20 = arith.maximumf %18, %19 : vector<8x256xf32>
      %21 = arith.truncf %20 : vector<8x256xf32> to vector<8x256xbf16>
      %c0_16 = arith.constant 0 : index
      %c0_17 = arith.constant 0 : index
      %22 = vector.load %arg7[%c0_16, %c0_17] : memref<8x256xbf16, #tpu.memory_space<vmem>>, vector<8x256xbf16>
      tpu.vector_store %arg7[%c0_16, %c0_17], %21 {strides = array<i32>} : memref<8x256xbf16, #tpu.memory_space<vmem>>, vector<8x256xbf16>,
    } else {
    }
    return
  }
  func.func @transform_0(%arg0: i32, %arg1: i32, %arg2: i32) -> (i32, i32) {
    %c0_i32 = arith.constant 0 : i32
    return %arg0, %arg2 : i32, i32
  }
  func.func @transform_1(%arg0: i32, %arg1: i32, %arg2: i32) -> (i32, i32) {
    %c0_i32 = arith.constant 0 : i32
    return %arg2, %arg1 : i32, i32
  }
  func.func @transform_2(%arg0: i32, %arg1: i32, %arg2: i32) -> (i32, i32) {
    %c0_i32 = arith.constant 0 : i32
    %c0_i32_0 = arith.constant 0 : i32
    return %c0_i32, %arg1 : i32, i32
  }
  func.func @transform_3(%arg0: i32, %arg1: i32, %arg2: i32) -> (i32, i32) {
    %c0_i32 = arith.constant 0 : i32
    return %arg0, %arg1 : i32, i32
  }
  func.func @transform_4(%arg0: i32, %arg1: i32, %arg2: i32) -> (i32, i32) {
    %c0_i32 = arith.constant 0 : i32
    return %arg0, %arg1 : i32, i32
  }
}

module attributes {stable_mosaic.version = 11 : i64} {
  func.func @_matmul_bias_kernel(%arg0: i32, %arg1: i32, %arg2: i32, %arg3: memref<8x384xbf16, #tpu.memory_space<vmem>>, %arg4: memref<384x256xbf16, #tpu.memory_space<vmem>>, %arg5: memref<1x256xf32, #tpu.memory_space<vmem>>, %arg6: memref<8x256xbf16, #tpu.memory_space<vmem>>, %arg7: memref<8x256xf32, #tpu.memory_space<vmem>>) attributes {dimension_semantics = [#tpu.dimension_semantics<parallel>, #tpu.dimension_semantics<parallel>, #tpu.dimension_semantics<arbitrary>], iteration_bounds = array<i64: 1, 1, 6>, scalar_prefetch = 0 : i64, scratch_operands = 1 : i64, tpu.core_type = #tpu.core_type<tc>, window_params = [{transform_indices = @transform_0, window_bounds = array<i64: 8, 384>}, {transform_indices = @transform_1, window_bounds = array<i64: 384, 256>}, {transform_indices = @transform_2, window_bounds = array<i64: 1, 256>}, {transform_indices = @transform_3, window_bounds = array<i64: 8, 256>}]} {
    %c0_i32 = arith.constant 0 : i32
    %0 = arith.cmpi eq, %arg2, %c0_i32 : i32
    %1 = arith.extui %0 : i1 to i32
    %c0_i32_0 = arith.constant 0 : i32
    %2 = arith.cmpi ne, %1, %c0_i32_0 : i32
    scf.if %2 {
      %cst_9 = arith.constant 0.000000e+00 : f32
      %12 = vector.broadcast %cst_9 : f32 to vector<8x256xf32>
      %c0_10 = arith.constant 0 : index
      %c0_11 = arith.constant 0 : index
      %13 = vector.load %arg7[%c0_10, %c0_11] : memref<8x256xf32, #tpu.memory_space<vmem>>, vector<8x256xf32>
      tpu.vector_store %arg7[%c0_10, %c0_11], %12 {strides = array<i32>} : memref<8x256xf32, #tpu.memory_space<vmem>>, vector<8x256xf32>,
    } else {
    }
    %c0 = arith.constant 0 : index
    %c0_1 = arith.constant 0 : index
    %3 = vector.load %arg7[%c0, %c0_1] : memref<8x256xf32, #tpu.memory_space<vmem>>, vector<8x256xf32>
    %c0_2 = arith.constant 0 : index
    %c0_3 = arith.constant 0 : index
    %4 = vector.load %arg3[%c0_2, %c0_3] : memref<8x384xbf16, #tpu.memory_space<vmem>>, vector<8x384xbf16>
    %c0_4 = arith.constant 0 : index
    %c0_5 = arith.constant 0 : index
    %5 = vector.load %arg4[%c0_4, %c0_5] : memref<384x256xbf16, #tpu.memory_space<vmem>>, vector<384x256xbf16>
    %cst = arith.constant dense<0.000000e+00> : vector<8x256xf32>
    %6 = tpu.matmul %4, %5, %cst {dimension_numbers = #tpu.dot_dimension_numbers<[1], [0], [0], [1], [0, 0, 1, 1], [], []>} : vector<8x384xbf16>, vector<384x256xbf16>, vector<8x256xf32> -> vector<8x256xf32>
    %7 = arith.addf %3, %6 : vector<8x256xf32>
    %c0_6 = arith.constant 0 : index
    %c0_7 = arith.constant 0 : index
    %8 = vector.load %arg7[%c0_6, %c0_7] : memref<8x256xf32, #tpu.memory_space<vmem>>, vector<8x256xf32>
    tpu.vector_store %arg7[%c0_6, %c0_7], %7 {strides = array<i32>} : memref<8x256xf32, #tpu.memory_space<vmem>>, vector<8x256xf32>,
    %c5_i32 = arith.constant 5 : i32
    %9 = arith.cmpi eq, %arg2, %c5_i32 : i32
    %10 = arith.extui %9 : i1 to i32
    %c0_i32_8 = arith.constant 0 : i32
    %11 = arith.cmpi ne, %10, %c0_i32_8 : i32
    scf.if %11 {
      %c0_9 = arith.constant 0 : index
      %c0_10 = arith.constant 0 : index
      %12 = vector.load %arg7[%c0_9, %c0_10] : memref<8x256xf32, #tpu.memory_space<vmem>>, vector<8x256xf32>
      %c0_11 = arith.constant 0 : index
      %c0_12 = arith.constant 0 : index
      %13 = vector.load %arg5[%c0_11, %c0_12] : memref<1x256xf32, #tpu.memory_space<vmem>>, vector<1x256xf32>
      %14 = vector.broadcast %13 : vector<1x256xf32> to vector<8x256xf32>
      %15 = arith.addf %12, %14 : vector<8x256xf32>
      %cst_13 = arith.constant 0.000000e+00 : f32
      %16 = vector.broadcast %cst_13 : f32 to vector<8x256xf32>
      %17 = arith.maximumf %15, %16 : vector<8x256xf32>
      %18 = arith.truncf %17 : vector<8x256xf32> to vector<8x256xbf16>
      %c0_14 = arith.constant 0 : index
      %c0_15 = arith.constant 0 : index
      %19 = vector.load %arg6[%c0_14, %c0_15] : memref<8x256xbf16, #tpu.memory_space<vmem>>, vector<8x256xbf16>
      tpu.vector_store %arg6[%c0_14, %c0_15], %18 {strides = array<i32>} : memref<8x256xbf16, #tpu.memory_space<vmem>>, vector<8x256xbf16>,
    } else {
    }
    return
  }
  func.func @transform_0(%arg0: i32, %arg1: i32, %arg2: i32) -> (i32, i32) {
    %c0_i32 = arith.constant 0 : i32
    return %arg0, %arg2 : i32, i32
  }
  func.func @transform_1(%arg0: i32, %arg1: i32, %arg2: i32) -> (i32, i32) {
    %c0_i32 = arith.constant 0 : i32
    return %arg2, %arg1 : i32, i32
  }
  func.func @transform_2(%arg0: i32, %arg1: i32, %arg2: i32) -> (i32, i32) {
    %c0_i32 = arith.constant 0 : i32
    %c0_i32_0 = arith.constant 0 : i32
    return %c0_i32, %arg1 : i32, i32
  }
  func.func @transform_3(%arg0: i32, %arg1: i32, %arg2: i32) -> (i32, i32) {
    %c0_i32 = arith.constant 0 : i32
    return %arg0, %arg1 : i32, i32
  }
}

module attributes {stable_mosaic.version = 11 : i64} {
  func.func @_matmul_bias_kernel(%arg0: i32, %arg1: i32, %arg2: i32, %arg3: memref<2x384xbf16, #tpu.memory_space<vmem>>, %arg4: memref<384x256xbf16, #tpu.memory_space<vmem>>, %arg5: memref<1x256xf32, #tpu.memory_space<vmem>>, %arg6: memref<2x256xbf16, #tpu.memory_space<vmem>>, %arg7: memref<2x256xf32, #tpu.memory_space<vmem>>) attributes {dimension_semantics = [#tpu.dimension_semantics<parallel>, #tpu.dimension_semantics<parallel>, #tpu.dimension_semantics<arbitrary>], iteration_bounds = array<i64: 1, 2, 6>, scalar_prefetch = 0 : i64, scratch_operands = 1 : i64, tpu.core_type = #tpu.core_type<tc>, window_params = [{transform_indices = @transform_0, window_bounds = array<i64: 2, 384>}, {transform_indices = @transform_1, window_bounds = array<i64: 384, 256>}, {transform_indices = @transform_2, window_bounds = array<i64: 1, 256>}, {transform_indices = @transform_3, window_bounds = array<i64: 2, 256>}]} {
    %c0_i32 = arith.constant 0 : i32
    %0 = arith.cmpi eq, %arg2, %c0_i32 : i32
    %1 = arith.extui %0 : i1 to i32
    %c0_i32_0 = arith.constant 0 : i32
    %2 = arith.cmpi ne, %1, %c0_i32_0 : i32
    scf.if %2 {
      %cst_9 = arith.constant 0.000000e+00 : f32
      %12 = vector.broadcast %cst_9 : f32 to vector<2x256xf32>
      %c0_10 = arith.constant 0 : index
      %c0_11 = arith.constant 0 : index
      %13 = vector.load %arg7[%c0_10, %c0_11] : memref<2x256xf32, #tpu.memory_space<vmem>>, vector<2x256xf32>
      tpu.vector_store %arg7[%c0_10, %c0_11], %12 {strides = array<i32>} : memref<2x256xf32, #tpu.memory_space<vmem>>, vector<2x256xf32>,
    } else {
    }
    %c0 = arith.constant 0 : index
    %c0_1 = arith.constant 0 : index
    %3 = vector.load %arg7[%c0, %c0_1] : memref<2x256xf32, #tpu.memory_space<vmem>>, vector<2x256xf32>
    %c0_2 = arith.constant 0 : index
    %c0_3 = arith.constant 0 : index
    %4 = vector.load %arg3[%c0_2, %c0_3] : memref<2x384xbf16, #tpu.memory_space<vmem>>, vector<2x384xbf16>
    %c0_4 = arith.constant 0 : index
    %c0_5 = arith.constant 0 : index
    %5 = vector.load %arg4[%c0_4, %c0_5] : memref<384x256xbf16, #tpu.memory_space<vmem>>, vector<384x256xbf16>
    %cst = arith.constant dense<0.000000e+00> : vector<2x256xf32>
    %6 = tpu.matmul %4, %5, %cst {dimension_numbers = #tpu.dot_dimension_numbers<[1], [0], [0], [1], [0, 0, 1, 1], [], []>} : vector<2x384xbf16>, vector<384x256xbf16>, vector<2x256xf32> -> vector<2x256xf32>
    %7 = arith.addf %3, %6 : vector<2x256xf32>
    %c0_6 = arith.constant 0 : index
    %c0_7 = arith.constant 0 : index
    %8 = vector.load %arg7[%c0_6, %c0_7] : memref<2x256xf32, #tpu.memory_space<vmem>>, vector<2x256xf32>
    tpu.vector_store %arg7[%c0_6, %c0_7], %7 {strides = array<i32>} : memref<2x256xf32, #tpu.memory_space<vmem>>, vector<2x256xf32>,
    %c5_i32 = arith.constant 5 : i32
    %9 = arith.cmpi eq, %arg2, %c5_i32 : i32
    %10 = arith.extui %9 : i1 to i32
    %c0_i32_8 = arith.constant 0 : i32
    %11 = arith.cmpi ne, %10, %c0_i32_8 : i32
    scf.if %11 {
      %c0_9 = arith.constant 0 : index
      %c0_10 = arith.constant 0 : index
      %12 = vector.load %arg7[%c0_9, %c0_10] : memref<2x256xf32, #tpu.memory_space<vmem>>, vector<2x256xf32>
      %c0_11 = arith.constant 0 : index
      %c0_12 = arith.constant 0 : index
      %13 = vector.load %arg5[%c0_11, %c0_12] : memref<1x256xf32, #tpu.memory_space<vmem>>, vector<1x256xf32>
      %14 = vector.broadcast %13 : vector<1x256xf32> to vector<2x256xf32>
      %15 = arith.addf %12, %14 : vector<2x256xf32>
      %cst_13 = arith.constant 0.000000e+00 : f32
      %16 = vector.broadcast %cst_13 : f32 to vector<2x256xf32>
      %17 = arith.maximumf %15, %16 : vector<2x256xf32>
      %18 = arith.truncf %17 : vector<2x256xf32> to vector<2x256xbf16>
      %c0_14 = arith.constant 0 : index
      %c0_15 = arith.constant 0 : index
      %19 = vector.load %arg6[%c0_14, %c0_15] : memref<2x256xbf16, #tpu.memory_space<vmem>>, vector<2x256xbf16>
      tpu.vector_store %arg6[%c0_14, %c0_15], %18 {strides = array<i32>} : memref<2x256xbf16, #tpu.memory_space<vmem>>, vector<2x256xbf16>,
    } else {
    }
    return
  }
  func.func @transform_0(%arg0: i32, %arg1: i32, %arg2: i32) -> (i32, i32) {
    %c0_i32 = arith.constant 0 : i32
    return %arg0, %arg2 : i32, i32
  }
  func.func @transform_1(%arg0: i32, %arg1: i32, %arg2: i32) -> (i32, i32) {
    %c0_i32 = arith.constant 0 : i32
    return %arg2, %arg1 : i32, i32
  }
  func.func @transform_2(%arg0: i32, %arg1: i32, %arg2: i32) -> (i32, i32) {
    %c0_i32 = arith.constant 0 : i32
    %c0_i32_0 = arith.constant 0 : i32
    return %c0_i32, %arg1 : i32, i32
  }
  func.func @transform_3(%arg0: i32, %arg1: i32, %arg2: i32) -> (i32, i32) {
    %c0_i32 = arith.constant 0 : i32
    return %arg0, %arg1 : i32, i32
  }
}

module attributes {stable_mosaic.version = 11 : i64} {
  func.func @_matmul_bias_kernel(%arg0: i32, %arg1: i32, %arg2: i32, %arg3: memref<2x256xbf16, #tpu.memory_space<vmem>>, %arg4: memref<256x256xbf16, #tpu.memory_space<vmem>>, %arg5: memref<1x256xf32, #tpu.memory_space<vmem>>, %arg6: memref<2x256xbf16, #tpu.memory_space<vmem>>, %arg7: memref<2x256xf32, #tpu.memory_space<vmem>>) attributes {dimension_semantics = [#tpu.dimension_semantics<parallel>, #tpu.dimension_semantics<parallel>, #tpu.dimension_semantics<arbitrary>], iteration_bounds = array<i64: 1, 2, 1>, scalar_prefetch = 0 : i64, scratch_operands = 1 : i64, tpu.core_type = #tpu.core_type<tc>, window_params = [{transform_indices = @transform_0, window_bounds = array<i64: 2, 256>}, {transform_indices = @transform_1, window_bounds = array<i64: 256, 256>}, {transform_indices = @transform_2, window_bounds = array<i64: 1, 256>}, {transform_indices = @transform_3, window_bounds = array<i64: 2, 256>}]} {
    %c0_i32 = arith.constant 0 : i32
    %0 = arith.cmpi eq, %arg2, %c0_i32 : i32
    %1 = arith.extui %0 : i1 to i32
    %c0_i32_0 = arith.constant 0 : i32
    %2 = arith.cmpi ne, %1, %c0_i32_0 : i32
    scf.if %2 {
      %cst_10 = arith.constant 0.000000e+00 : f32
      %12 = vector.broadcast %cst_10 : f32 to vector<2x256xf32>
      %c0_11 = arith.constant 0 : index
      %c0_12 = arith.constant 0 : index
      %13 = vector.load %arg7[%c0_11, %c0_12] : memref<2x256xf32, #tpu.memory_space<vmem>>, vector<2x256xf32>
      tpu.vector_store %arg7[%c0_11, %c0_12], %12 {strides = array<i32>} : memref<2x256xf32, #tpu.memory_space<vmem>>, vector<2x256xf32>,
    } else {
    }
    %c0 = arith.constant 0 : index
    %c0_1 = arith.constant 0 : index
    %3 = vector.load %arg7[%c0, %c0_1] : memref<2x256xf32, #tpu.memory_space<vmem>>, vector<2x256xf32>
    %c0_2 = arith.constant 0 : index
    %c0_3 = arith.constant 0 : index
    %4 = vector.load %arg3[%c0_2, %c0_3] : memref<2x256xbf16, #tpu.memory_space<vmem>>, vector<2x256xbf16>
    %c0_4 = arith.constant 0 : index
    %c0_5 = arith.constant 0 : index
    %5 = vector.load %arg4[%c0_4, %c0_5] : memref<256x256xbf16, #tpu.memory_space<vmem>>, vector<256x256xbf16>
    %cst = arith.constant dense<0.000000e+00> : vector<2x256xf32>
    %6 = tpu.matmul %4, %5, %cst {dimension_numbers = #tpu.dot_dimension_numbers<[1], [0], [0], [1], [0, 0, 1, 1], [], []>} : vector<2x256xbf16>, vector<256x256xbf16>, vector<2x256xf32> -> vector<2x256xf32>
    %7 = arith.addf %3, %6 : vector<2x256xf32>
    %c0_6 = arith.constant 0 : index
    %c0_7 = arith.constant 0 : index
    %8 = vector.load %arg7[%c0_6, %c0_7] : memref<2x256xf32, #tpu.memory_space<vmem>>, vector<2x256xf32>
    tpu.vector_store %arg7[%c0_6, %c0_7], %7 {strides = array<i32>} : memref<2x256xf32, #tpu.memory_space<vmem>>, vector<2x256xf32>,
    %c0_i32_8 = arith.constant 0 : i32
    %9 = arith.cmpi eq, %arg2, %c0_i32_8 : i32
    %10 = arith.extui %9 : i1 to i32
    %c0_i32_9 = arith.constant 0 : i32
    %11 = arith.cmpi ne, %10, %c0_i32_9 : i32
    scf.if %11 {
      %c0_10 = arith.constant 0 : index
      %c0_11 = arith.constant 0 : index
      %12 = vector.load %arg7[%c0_10, %c0_11] : memref<2x256xf32, #tpu.memory_space<vmem>>, vector<2x256xf32>
      %c0_12 = arith.constant 0 : index
      %c0_13 = arith.constant 0 : index
      %13 = vector.load %arg5[%c0_12, %c0_13] : memref<1x256xf32, #tpu.memory_space<vmem>>, vector<1x256xf32>
      %14 = vector.broadcast %13 : vector<1x256xf32> to vector<2x256xf32>
      %15 = arith.addf %12, %14 : vector<2x256xf32>
      %16 = arith.truncf %15 : vector<2x256xf32> to vector<2x256xbf16>
      %c0_14 = arith.constant 0 : index
      %c0_15 = arith.constant 0 : index
      %17 = vector.load %arg6[%c0_14, %c0_15] : memref<2x256xbf16, #tpu.memory_space<vmem>>, vector<2x256xbf16>
      tpu.vector_store %arg6[%c0_14, %c0_15], %16 {strides = array<i32>} : memref<2x256xbf16, #tpu.memory_space<vmem>>, vector<2x256xbf16>,
    } else {
    }
    return
  }
  func.func @transform_0(%arg0: i32, %arg1: i32, %arg2: i32) -> (i32, i32) {
    %c0_i32 = arith.constant 0 : i32
    return %arg0, %arg2 : i32, i32
  }
  func.func @transform_1(%arg0: i32, %arg1: i32, %arg2: i32) -> (i32, i32) {
    %c0_i32 = arith.constant 0 : i32
    return %arg2, %arg1 : i32, i32
  }
  func.func @transform_2(%arg0: i32, %arg1: i32, %arg2: i32) -> (i32, i32) {
    %c0_i32 = arith.constant 0 : i32
    %c0_i32_0 = arith.constant 0 : i32
    return %c0_i32, %arg1 : i32, i32
  }
  func.func @transform_3(%arg0: i32, %arg1: i32, %arg2: i32) -> (i32, i32) {
    %c0_i32 = arith.constant 0 : i32
    return %arg0, %arg1 : i32, i32
  }
}

module attributes {stable_mosaic.version = 11 : i64} {
  func.func @_matmul_bias_res_kernel(%arg0: i32, %arg1: i32, %arg2: i32, %arg3: memref<2x512xbf16, #tpu.memory_space<vmem>>, %arg4: memref<512x256xbf16, #tpu.memory_space<vmem>>, %arg5: memref<1x256xf32, #tpu.memory_space<vmem>>, %arg6: memref<2x256xbf16, #tpu.memory_space<vmem>>, %arg7: memref<2x256xbf16, #tpu.memory_space<vmem>>, %arg8: memref<2x256xf32, #tpu.memory_space<vmem>>) attributes {dimension_semantics = [#tpu.dimension_semantics<parallel>, #tpu.dimension_semantics<parallel>, #tpu.dimension_semantics<arbitrary>], iteration_bounds = array<i64: 1, 2, 9>, scalar_prefetch = 0 : i64, scratch_operands = 1 : i64, tpu.core_type = #tpu.core_type<tc>, window_params = [{transform_indices = @transform_0, window_bounds = array<i64: 2, 512>}, {transform_indices = @transform_1, window_bounds = array<i64: 512, 256>}, {transform_indices = @transform_2, window_bounds = array<i64: 1, 256>}, {transform_indices = @transform_3, window_bounds = array<i64: 2, 256>}, {transform_indices = @transform_4, window_bounds = array<i64: 2, 256>}]} {
    %c0_i32 = arith.constant 0 : i32
    %0 = arith.cmpi eq, %arg2, %c0_i32 : i32
    %1 = arith.extui %0 : i1 to i32
    %c0_i32_0 = arith.constant 0 : i32
    %2 = arith.cmpi ne, %1, %c0_i32_0 : i32
    scf.if %2 {
      %cst_9 = arith.constant 0.000000e+00 : f32
      %12 = vector.broadcast %cst_9 : f32 to vector<2x256xf32>
      %c0_10 = arith.constant 0 : index
      %c0_11 = arith.constant 0 : index
      %13 = vector.load %arg8[%c0_10, %c0_11] : memref<2x256xf32, #tpu.memory_space<vmem>>, vector<2x256xf32>
      tpu.vector_store %arg8[%c0_10, %c0_11], %12 {strides = array<i32>} : memref<2x256xf32, #tpu.memory_space<vmem>>, vector<2x256xf32>,
    } else {
    }
    %c0 = arith.constant 0 : index
    %c0_1 = arith.constant 0 : index
    %3 = vector.load %arg8[%c0, %c0_1] : memref<2x256xf32, #tpu.memory_space<vmem>>, vector<2x256xf32>
    %c0_2 = arith.constant 0 : index
    %c0_3 = arith.constant 0 : index
    %4 = vector.load %arg3[%c0_2, %c0_3] : memref<2x512xbf16, #tpu.memory_space<vmem>>, vector<2x512xbf16>
    %c0_4 = arith.constant 0 : index
    %c0_5 = arith.constant 0 : index
    %5 = vector.load %arg4[%c0_4, %c0_5] : memref<512x256xbf16, #tpu.memory_space<vmem>>, vector<512x256xbf16>
    %cst = arith.constant dense<0.000000e+00> : vector<2x256xf32>
    %6 = tpu.matmul %4, %5, %cst {dimension_numbers = #tpu.dot_dimension_numbers<[1], [0], [0], [1], [0, 0, 1, 1], [], []>} : vector<2x512xbf16>, vector<512x256xbf16>, vector<2x256xf32> -> vector<2x256xf32>
    %7 = arith.addf %3, %6 : vector<2x256xf32>
    %c0_6 = arith.constant 0 : index
    %c0_7 = arith.constant 0 : index
    %8 = vector.load %arg8[%c0_6, %c0_7] : memref<2x256xf32, #tpu.memory_space<vmem>>, vector<2x256xf32>
    tpu.vector_store %arg8[%c0_6, %c0_7], %7 {strides = array<i32>} : memref<2x256xf32, #tpu.memory_space<vmem>>, vector<2x256xf32>,
    %c8_i32 = arith.constant 8 : i32
    %9 = arith.cmpi eq, %arg2, %c8_i32 : i32
    %10 = arith.extui %9 : i1 to i32
    %c0_i32_8 = arith.constant 0 : i32
    %11 = arith.cmpi ne, %10, %c0_i32_8 : i32
    scf.if %11 {
      %c0_9 = arith.constant 0 : index
      %c0_10 = arith.constant 0 : index
      %12 = vector.load %arg8[%c0_9, %c0_10] : memref<2x256xf32, #tpu.memory_space<vmem>>, vector<2x256xf32>
      %c0_11 = arith.constant 0 : index
      %c0_12 = arith.constant 0 : index
      %13 = vector.load %arg5[%c0_11, %c0_12] : memref<1x256xf32, #tpu.memory_space<vmem>>, vector<1x256xf32>
      %14 = vector.broadcast %13 : vector<1x256xf32> to vector<2x256xf32>
      %15 = arith.addf %12, %14 : vector<2x256xf32>
      %c0_13 = arith.constant 0 : index
      %c0_14 = arith.constant 0 : index
      %16 = vector.load %arg6[%c0_13, %c0_14] : memref<2x256xbf16, #tpu.memory_space<vmem>>, vector<2x256xbf16>
      %17 = arith.extf %16 : vector<2x256xbf16> to vector<2x256xf32>
      %18 = arith.addf %15, %17 : vector<2x256xf32>
      %cst_15 = arith.constant 0.000000e+00 : f32
      %19 = vector.broadcast %cst_15 : f32 to vector<2x256xf32>
      %20 = arith.maximumf %18, %19 : vector<2x256xf32>
      %21 = arith.truncf %20 : vector<2x256xf32> to vector<2x256xbf16>
      %c0_16 = arith.constant 0 : index
      %c0_17 = arith.constant 0 : index
      %22 = vector.load %arg7[%c0_16, %c0_17] : memref<2x256xbf16, #tpu.memory_space<vmem>>, vector<2x256xbf16>
      tpu.vector_store %arg7[%c0_16, %c0_17], %21 {strides = array<i32>} : memref<2x256xbf16, #tpu.memory_space<vmem>>, vector<2x256xbf16>,
    } else {
    }
    return
  }
  func.func @transform_0(%arg0: i32, %arg1: i32, %arg2: i32) -> (i32, i32) {
    %c0_i32 = arith.constant 0 : i32
    return %arg0, %arg2 : i32, i32
  }
  func.func @transform_1(%arg0: i32, %arg1: i32, %arg2: i32) -> (i32, i32) {
    %c0_i32 = arith.constant 0 : i32
    return %arg2, %arg1 : i32, i32
  }
  func.func @transform_2(%arg0: i32, %arg1: i32, %arg2: i32) -> (i32, i32) {
    %c0_i32 = arith.constant 0 : i32
    %c0_i32_0 = arith.constant 0 : i32
    return %c0_i32, %arg1 : i32, i32
  }
  func.func @transform_3(%arg0: i32, %arg1: i32, %arg2: i32) -> (i32, i32) {
    %c0_i32 = arith.constant 0 : i32
    return %arg0, %arg1 : i32, i32
  }
  func.func @transform_4(%arg0: i32, %arg1: i32, %arg2: i32) -> (i32, i32) {
    %c0_i32 = arith.constant 0 : i32
    return %arg0, %arg1 : i32, i32
  }
}

module attributes {stable_mosaic.version = 11 : i64} {
  func.func @_matmul_bias_kernel(%arg0: i32, %arg1: i32, %arg2: i32, %arg3: memref<2x512xbf16, #tpu.memory_space<vmem>>, %arg4: memref<512x256xbf16, #tpu.memory_space<vmem>>, %arg5: memref<1x256xf32, #tpu.memory_space<vmem>>, %arg6: memref<2x256xbf16, #tpu.memory_space<vmem>>, %arg7: memref<2x256xf32, #tpu.memory_space<vmem>>) attributes {dimension_semantics = [#tpu.dimension_semantics<parallel>, #tpu.dimension_semantics<parallel>, #tpu.dimension_semantics<arbitrary>], iteration_bounds = array<i64: 1, 2, 9>, scalar_prefetch = 0 : i64, scratch_operands = 1 : i64, tpu.core_type = #tpu.core_type<tc>, window_params = [{transform_indices = @transform_0, window_bounds = array<i64: 2, 512>}, {transform_indices = @transform_1, window_bounds = array<i64: 512, 256>}, {transform_indices = @transform_2, window_bounds = array<i64: 1, 256>}, {transform_indices = @transform_3, window_bounds = array<i64: 2, 256>}]} {
    %c0_i32 = arith.constant 0 : i32
    %0 = arith.cmpi eq, %arg2, %c0_i32 : i32
    %1 = arith.extui %0 : i1 to i32
    %c0_i32_0 = arith.constant 0 : i32
    %2 = arith.cmpi ne, %1, %c0_i32_0 : i32
    scf.if %2 {
      %cst_9 = arith.constant 0.000000e+00 : f32
      %12 = vector.broadcast %cst_9 : f32 to vector<2x256xf32>
      %c0_10 = arith.constant 0 : index
      %c0_11 = arith.constant 0 : index
      %13 = vector.load %arg7[%c0_10, %c0_11] : memref<2x256xf32, #tpu.memory_space<vmem>>, vector<2x256xf32>
      tpu.vector_store %arg7[%c0_10, %c0_11], %12 {strides = array<i32>} : memref<2x256xf32, #tpu.memory_space<vmem>>, vector<2x256xf32>,
    } else {
    }
    %c0 = arith.constant 0 : index
    %c0_1 = arith.constant 0 : index
    %3 = vector.load %arg7[%c0, %c0_1] : memref<2x256xf32, #tpu.memory_space<vmem>>, vector<2x256xf32>
    %c0_2 = arith.constant 0 : index
    %c0_3 = arith.constant 0 : index
    %4 = vector.load %arg3[%c0_2, %c0_3] : memref<2x512xbf16, #tpu.memory_space<vmem>>, vector<2x512xbf16>
    %c0_4 = arith.constant 0 : index
    %c0_5 = arith.constant 0 : index
    %5 = vector.load %arg4[%c0_4, %c0_5] : memref<512x256xbf16, #tpu.memory_space<vmem>>, vector<512x256xbf16>
    %cst = arith.constant dense<0.000000e+00> : vector<2x256xf32>
    %6 = tpu.matmul %4, %5, %cst {dimension_numbers = #tpu.dot_dimension_numbers<[1], [0], [0], [1], [0, 0, 1, 1], [], []>} : vector<2x512xbf16>, vector<512x256xbf16>, vector<2x256xf32> -> vector<2x256xf32>
    %7 = arith.addf %3, %6 : vector<2x256xf32>
    %c0_6 = arith.constant 0 : index
    %c0_7 = arith.constant 0 : index
    %8 = vector.load %arg7[%c0_6, %c0_7] : memref<2x256xf32, #tpu.memory_space<vmem>>, vector<2x256xf32>
    tpu.vector_store %arg7[%c0_6, %c0_7], %7 {strides = array<i32>} : memref<2x256xf32, #tpu.memory_space<vmem>>, vector<2x256xf32>,
    %c8_i32 = arith.constant 8 : i32
    %9 = arith.cmpi eq, %arg2, %c8_i32 : i32
    %10 = arith.extui %9 : i1 to i32
    %c0_i32_8 = arith.constant 0 : i32
    %11 = arith.cmpi ne, %10, %c0_i32_8 : i32
    scf.if %11 {
      %c0_9 = arith.constant 0 : index
      %c0_10 = arith.constant 0 : index
      %12 = vector.load %arg7[%c0_9, %c0_10] : memref<2x256xf32, #tpu.memory_space<vmem>>, vector<2x256xf32>
      %c0_11 = arith.constant 0 : index
      %c0_12 = arith.constant 0 : index
      %13 = vector.load %arg5[%c0_11, %c0_12] : memref<1x256xf32, #tpu.memory_space<vmem>>, vector<1x256xf32>
      %14 = vector.broadcast %13 : vector<1x256xf32> to vector<2x256xf32>
      %15 = arith.addf %12, %14 : vector<2x256xf32>
      %cst_13 = arith.constant 0.000000e+00 : f32
      %16 = vector.broadcast %cst_13 : f32 to vector<2x256xf32>
      %17 = arith.maximumf %15, %16 : vector<2x256xf32>
      %18 = arith.truncf %17 : vector<2x256xf32> to vector<2x256xbf16>
      %c0_14 = arith.constant 0 : index
      %c0_15 = arith.constant 0 : index
      %19 = vector.load %arg6[%c0_14, %c0_15] : memref<2x256xbf16, #tpu.memory_space<vmem>>, vector<2x256xbf16>
      tpu.vector_store %arg6[%c0_14, %c0_15], %18 {strides = array<i32>} : memref<2x256xbf16, #tpu.memory_space<vmem>>, vector<2x256xbf16>,
    } else {
    }
    return
  }
  func.func @transform_0(%arg0: i32, %arg1: i32, %arg2: i32) -> (i32, i32) {
    %c0_i32 = arith.constant 0 : i32
    return %arg0, %arg2 : i32, i32
  }
  func.func @transform_1(%arg0: i32, %arg1: i32, %arg2: i32) -> (i32, i32) {
    %c0_i32 = arith.constant 0 : i32
    return %arg2, %arg1 : i32, i32
  }
  func.func @transform_2(%arg0: i32, %arg1: i32, %arg2: i32) -> (i32, i32) {
    %c0_i32 = arith.constant 0 : i32
    %c0_i32_0 = arith.constant 0 : i32
    return %c0_i32, %arg1 : i32, i32
  }
  func.func @transform_3(%arg0: i32, %arg1: i32, %arg2: i32) -> (i32, i32) {
    %c0_i32 = arith.constant 0 : i32
    return %arg0, %arg1 : i32, i32
  }
}

module attributes {stable_mosaic.version = 11 : i64} {
  func.func @_avgpool_proj_kernel(%arg0: memref<2x1x512xbf16, #tpu.memory_space<vmem>>, %arg1: memref<512x256xbf16, #tpu.memory_space<vmem>>, %arg2: memref<1x256xf32, #tpu.memory_space<vmem>>, %arg3: memref<2x256xf32, #tpu.memory_space<vmem>>) attributes {dimension_semantics = [], scalar_prefetch = 0 : i64, scratch_operands = 0 : i64, tpu.core_type = #tpu.core_type<tc>} {
    %c0 = arith.constant 0 : index
    %c0_0 = arith.constant 0 : index
    %c0_1 = arith.constant 0 : index
    %0 = vector.load %arg0[%c0, %c0_0, %c0_1] : memref<2x1x512xbf16, #tpu.memory_space<vmem>>, vector<2x1x512xbf16>
    %1 = arith.extf %0 : vector<2x1x512xbf16> to vector<2x1x512xf32>
    %cst = arith.constant dense<0.000000e+00> : vector<2x512xf32>
    %2 = vector.multi_reduction <add>, %1, %cst [1] : vector<2x1x512xf32> to vector<2x512xf32>
    %cst_2 = arith.constant 1.000000e+00 : f32
    %3 = vector.broadcast %cst_2 : f32 to vector<2x512xf32>
    %4 = arith.mulf %2, %3 : vector<2x512xf32>
    %5 = arith.truncf %4 : vector<2x512xf32> to vector<2x512xbf16>
    %c0_3 = arith.constant 0 : index
    %c0_4 = arith.constant 0 : index
    %6 = vector.load %arg1[%c0_3, %c0_4] : memref<512x256xbf16, #tpu.memory_space<vmem>>, vector<512x256xbf16>
    %cst_5 = arith.constant dense<0.000000e+00> : vector<2x256xf32>
    %7 = tpu.matmul %5, %6, %cst_5 {dimension_numbers = #tpu.dot_dimension_numbers<[1], [0], [0], [1], [0, 0, 1, 1], [], []>} : vector<2x512xbf16>, vector<512x256xbf16>, vector<2x256xf32> -> vector<2x256xf32>
    %c0_6 = arith.constant 0 : index
    %c0_7 = arith.constant 0 : index
    %8 = vector.load %arg2[%c0_6, %c0_7] : memref<1x256xf32, #tpu.memory_space<vmem>>, vector<1x256xf32>
    %9 = vector.broadcast %8 : vector<1x256xf32> to vector<2x256xf32>
    %10 = arith.addf %7, %9 : vector<2x256xf32>
    %cst_8 = arith.constant 0.000000e+00 : f32
    %11 = vector.broadcast %cst_8 : f32 to vector<2x256xf32>
    %12 = arith.maximumf %10, %11 : vector<2x256xf32>
    %c0_9 = arith.constant 0 : index
    %c0_10 = arith.constant 0 : index
    %13 = vector.load %arg3[%c0_9, %c0_10] : memref<2x256xf32, #tpu.memory_space<vmem>>, vector<2x256xf32>
    tpu.vector_store %arg3[%c0_9, %c0_10], %12 {strides = array<i32>} : memref<2x256xf32, #tpu.memory_space<vmem>>, vector<2x256xf32>,
    return
  }
}

</mosaic_0001>

<bundles_post_ra>
// kernel: visual_encoder_forward.21
= control target key start
LH: loop header
LB: loop body
LE: loop exit
PB: predicated region body
PF: predicated region fallthrough
CT: control target
= control target key end

     0   :  { %s1632_s12 = smov 0   ;;  %s1634_s13 = smov 0   ;;  %s1804_s0 = inlined_call_operand.vmem [shape: bf16[512,147], index: 0, kind: input, shape index: {}]   ;;  %s1805_s1 = inlined_call_operand.vmem [shape: bf16[147,128], index: 1, kind: input, shape index: {}]   ;;  %s1806_s2 = inlined_call_operand.vmem [shape: f32[1,128], index: 2, kind: input, shape index: {}]   ;;  %s1807_s3 = inlined_call_operand.vmem [shape: bf16[512,128], index: 3, kind: output, shape index: {}]  }
   0x1   :  { %s1636_s14 = smov 0  }
   0x2 LB: > { %s32_s15 = sadd.s32 1, %s1604_s13  ;;  %p1255_p0 = scmp.ge.s32.totalorder %s1608_s14, 1  ;;  %s1608_s14 = sphi %s1636_s14, %s13_s14   ;;  %s1604_s13 = sphi %s1634_s13, %s1809_s13   ;;  %s1600_s12 = sphi %s1632_s12, %s1808_s12  }
   0x3   : > { %p34_p1 = scmp.ge.s32.totalorder %s32_s15, 2  ;;  %p191_p2 = scmp.lt.s32.totalorder %s1608_s14, 3 }
   0x5   : > { %s1811_s15 = smov (%p34_p1, %s32_s15), 0  ;;  %p192_p3 = pnand %p1255_p0, %p191_p2 }
   0x6   : > { %v1528_v0 = vld [vmem:[%s1805_s1] sm:$0xff] (!%p192_p3)   ;;  %v1610_v1 = vmov (!%p192_p3), 0   ;;  %v1529_v2 = vld [vmem:[%s1805_s1 + $0x8] sm:$0xff] (!%p192_p3)   ;;  %v1530_v3 = vld [vmem:[%s1805_s1 + $0x10] sm:$0xff] (!%p192_p3)   ;;  %s1256_s22 = sshll.u32 (!%p192_p3), %s1600_s12, 5  ;;  %vm588_vm0 = vcmask (!%p192_p3), 154624  }
   0x7   : > { %195 = sbr.rel (%p192_p3) target bundleno = 324 (0x144), region = 32  ;;  %644 = vmatprep.subr.bf16.mxu0 (!%p192_p3), %v1610_v1  ;;  %1482 = vmatprep.subr.bf16.mxu1 (!%p192_p3), %v1610_v1  ;;  %p236_p4 = scmp.lt.s32.totalorder (!%p192_p3), %s1256_s22, 63  ;;  %v1531_v4 = vld [vmem:[%s1805_s1 + $0x18] sm:$0xff] (!%p192_p3)   ;;  %v1532_v5 = vld [vmem:[%s1805_s1 + $0x20] sm:$0xff] (!%p192_p3)   ;;  %v1533_v8 = vld [vmem:[%s1805_s1 + $0x28] sm:$0xff] (!%p192_p3)   ;;  %vm637_vm1 = vcmask (!%p192_p3), 1040384  }
   0x8   : > { %645 = vmatpush1.bf16.msra.mxu0 (!%p192_p3), %v1528_v0  ;;  %1492 = vmatpush1.bf16.msra.mxu1 (!%p192_p3), %v1528_v0  ;;  %v1534_v9 = vld [vmem:[%s1805_s1 + $0x30] sm:$0xff] (!%p192_p3)   ;;  %v1535_v10 = vld [vmem:[%s1805_s1 + $0x38] sm:$0xff] (!%p192_p3)   ;;  %vm638_vm2 = vcmask (!%p192_p3), 1041408   ;;  %v1611_v11 = vmov (!%p192_p3), 65535   ;;  %v1536_v13 = vld [vmem:[%s1805_s1 + $0x40] sm:$0xff] (!%p192_p3)  }
   0x9   : > { %646 = vmatprep.subr.bf16.mxu0 (!%p192_p3), %v1610_v1  ;;  %1483 = vmatprep.subr.bf16.mxu1 (!%p192_p3), %v1610_v1  ;;  %v639_v12 = vsel (!%p192_p3), %vm637_vm1, 4294967295, %v1611_v11  ;;  %v1537_v14 = vld [vmem:[%s1805_s1 + $0x48] ss:$0 sps:$4 sm:$0x33] (!%p192_p3)   ;;  %v1739_v47 = vld [vmem:[%s1806_s2] ss:$0 sm:$0xff] (!%p192_p3) }
   0xa   : > { %v640_v15 = vsel (!%p192_p3), %vm638_vm2, %v639_v12, 0 }
   0xb   : > { %v642_v16 = vand.u32 (!%p192_p3), %v1537_v14, %v640_v15 }
   0xc   : > { %647 = vmatpush1.bf16.msra.mxu0 (!%p192_p3), %v1529_v2  ;;  %1493 = vmatpush1.bf16.msra.mxu1 (!%p192_p3), %v1529_v2 }
   0xd   : > { %648 = vmatprep.subr.bf16.mxu0 (!%p192_p3), %v1610_v1  ;;  %1484 = vmatprep.subr.bf16.mxu1 (!%p192_p3), %v1610_v1 }
   0xe   : > { %s1813_s22 = smov (!%p236_p4, %s1256_s22), 63 }
   0xf   : > { %s1354_s25 = sshll.u32 %s1813_s22, 3  ;;  %s1260_s19 = sshll.u32 %s1813_s22, 2 }
  0x10   : > { %649 = vmatpush1.bf16.msra.mxu0 %v1530_v3  ;;  %1494 = vmatpush1.bf16.msra.mxu1 %v1530_v3  ;;  %s1668_s28 = scalar_lea.vmem %s1804_s0, %s1354_s25  ;;  %s1749_s23 = scalar_lea.vmem %s1807_s3, %s1260_s19 }
  0x11   : > { %650 = vmatprep.subr.bf16.mxu0 %v1610_v1  ;;  %1485 = vmatprep.subr.bf16.mxu1 %v1610_v1  ;;  %v1540_v6 = vld [vmem:[%s1668_s28 + $0x4] ss:$8 sps:$4 sm:$0xff]   ;;  %v1538_v17 = vld [vmem:[%s1668_s28] ss:$8 sps:$4 sm:$0xff]   ;;  %v1544_v19 = vld [vmem:[%s1668_s28 + $0x14] ss:$8 sps:$4 sm:$0xff]  }
  0x12   : > { %v1543_v7 = vld [vmem:[%s1668_s28 + $0x84] ss:$8 sps:$4 sm:$0xff]   ;;  %1303 = vmatprep.mubr.msk.bf16.mxu0 %vm588_vm0, %v1540_v6  ;;  %v1541_v18 = vld [vmem:[%s1668_s28 + $0x80] ss:$8 sps:$4 sm:$0xff]   ;;  %v1546_v20 = vld [vmem:[%s1668_s28 + $0x94] ss:$8 sps:$4 sm:$0xff]  }
  0x13   : > { %1311 = vmatprep.mubr.msk.bf16.mxu1 %vm588_vm0, %v1543_v7  ;;  %v1548_v21 = vld [vmem:[%s1668_s28 + $0x10] ss:$8 sps:$4 sm:$0xff]   ;;  %v1550_v23 = vld [vmem:[%s1668_s28 + $0x24] ss:$8 sps:$4 sm:$0xff]   ;;  %v1554_v25 = vld [vmem:[%s1668_s28 + $0x20] ss:$8 sps:$4 sm:$0xff]  }
  0x14   : > { %651 = vmatpush1.bf16.msra.mxu0 %v1531_v4  ;;  %1495 = vmatpush1.bf16.msra.mxu1 %v1531_v4  ;;  %v1549_v22 = vld [vmem:[%s1668_s28 + $0x90] ss:$8 sps:$4 sm:$0xff]   ;;  %v1552_v24 = vld [vmem:[%s1668_s28 + $0xa4] ss:$8 sps:$4 sm:$0xff]   ;;  %v1555_v26 = vld [vmem:[%s1668_s28 + $0xa0] ss:$8 sps:$4 sm:$0xff]  }
  0x15   : > { %652 = vmatprep.subr.bf16.mxu0 %v1610_v1  ;;  %1486 = vmatprep.subr.bf16.mxu1 %v1610_v1  ;;  %v1556_v27 = vld [vmem:[%s1668_s28 + $0x34] ss:$8 sps:$4 sm:$0xff]   ;;  %v1560_v29 = vld [vmem:[%s1668_s28 + $0x30] ss:$8 sps:$4 sm:$0xff]   ;;  %v1562_v31 = vld [vmem:[%s1668_s28 + $0x44] ss:$8 sps:$4 sm:$0xff]  }
  0x16   : > { %v1558_v28 = vld [vmem:[%s1668_s28 + $0xb4] ss:$8 sps:$4 sm:$0xff]   ;;  %v1561_v30 = vld [vmem:[%s1668_s28 + $0xb0] ss:$8 sps:$4 sm:$0xff]   ;;  %v1564_v32 = vld [vmem:[%s1668_s28 + $0xc4] ss:$8 sps:$4 sm:$0xff]  }
  0x17   : > { %v1566_v33 = vld [vmem:[%s1668_s28 + $0x40] ss:$8 sps:$4 sm:$0xff]   ;;  %v1568_v35 = vld [vmem:[%s1668_s28 + $0x54] ss:$8 sps:$4 sm:$0xff]   ;;  %v1572_v37 = vld [vmem:[%s1668_s28 + $0x50] ss:$8 sps:$4 sm:$0xff]  }
  0x18   : > { %653 = vmatpush1.bf16.msra.mxu0 %v1532_v5  ;;  %1496 = vmatpush1.bf16.msra.mxu1 %v1532_v5  ;;  %v1567_v34 = vld [vmem:[%s1668_s28 + $0xc0] ss:$8 sps:$4 sm:$0xff]   ;;  %v1570_v36 = vld [vmem:[%s1668_s28 + $0xd4] ss:$8 sps:$4 sm:$0xff]   ;;  %v1573_v38 = vld [vmem:[%s1668_s28 + $0xd0] ss:$8 sps:$4 sm:$0xff]  }
  0x19   : > { %654 = vmatprep.subr.bf16.mxu0 %v1610_v1  ;;  %1487 = vmatprep.subr.bf16.mxu1 %v1610_v1  ;;  %v1574_v39 = vld [vmem:[%s1668_s28 + $0x64] ss:$8 sps:$4 sm:$0xff]   ;;  %v1578_v41 = vld [vmem:[%s1668_s28 + $0x60] ss:$8 sps:$4 sm:$0xff]   ;;  %v1580_v43 = vld [vmem:[%s1668_s28 + $0x74] ss:$8 sps:$4 sm:$0xff]  }
  0x1a   : > { %v1576_v40 = vld [vmem:[%s1668_s28 + $0xe4] ss:$8 sps:$4 sm:$0xff]   ;;  %v1579_v42 = vld [vmem:[%s1668_s28 + $0xe0] ss:$8 sps:$4 sm:$0xff]   ;;  %v1582_v44 = vld [vmem:[%s1668_s28 + $0xf4] ss:$8 sps:$4 sm:$0xff]  }
  0x1b   : > { %v1584_v45 = vld [vmem:[%s1668_s28 + $0x70] ss:$8 sps:$4 sm:$0xff]  }
  0x1c   : > { %655 = vmatpush1.bf16.msra.mxu0 %v1533_v8  ;;  %1497 = vmatpush1.bf16.msra.mxu1 %v1533_v8  ;;  %v1585_v46 = vld [vmem:[%s1668_s28 + $0xf0] ss:$8 sps:$4 sm:$0xff]  }
  0x1d   : > { %656 = vmatprep.subr.bf16.mxu0 %v1610_v1  ;;  %1488 = vmatprep.subr.bf16.mxu1 %v1610_v1 }
  0x20   : > { %657 = vmatpush1.bf16.msra.mxu0 %v1534_v9  ;;  %1498 = vmatpush1.bf16.msra.mxu1 %v1534_v9 }
  0x21   : > { %658 = vmatprep.subr.bf16.mxu0 %v1610_v1  ;;  %1489 = vmatprep.subr.bf16.mxu1 %v1610_v1 }
  0x24   : > { %659 = vmatpush1.bf16.msra.mxu0 %v1535_v10  ;;  %1499 = vmatpush1.bf16.msra.mxu1 %v1535_v10 }
  0x25   : > { %660 = vmatprep.subr.bf16.mxu0 %v1610_v1  ;;  %1490 = vmatprep.subr.bf16.mxu1 %v1610_v1 }
  0x28   : > { %661 = vmatpush1.bf16.msra.mxu0 %v1536_v13  ;;  %1500 = vmatpush1.bf16.msra.mxu1 %v1536_v13 }
  0x29   : > { %662 = vmatprep.subr.bf16.mxu0 %v1610_v1  ;;  %1491 = vmatprep.subr.bf16.mxu1 %v1610_v1 }
  0x2c   : > { %663 = vmatpush1.bf16.msra.mxu0 %v642_v16  ;;  %1501 = vmatpush1.bf16.msra.mxu1 %v642_v16 }
  0x2f   : > { %677 = vmatmul.mubr.bf16.vlgmr.msra.gmra.mrb[0].mxu0 %v1538_v17  ;;  %741 = vmatmul.mubr.bf16.vlgmr.msra.gmra.mrb[0].mxu1 %v1541_v18 }
  0x30   : > { %1304 = vmatprep.mubr.msk.bf16.mxu0 %vm588_vm0, %v1544_v19  ;;  %1312 = vmatprep.mubr.msk.bf16.mxu1 %vm588_vm0, %v1546_v20 }
  0x37   : > { %685 = vmatmul.mubr.bf16.gmra.mrb[4].mxu0 %v1548_v21  ;;  %749 = vmatmul.mubr.bf16.gmra.mrb[4].mxu1 %v1549_v22 }
  0x38   : > { %1305 = vmatprep.mubr.msk.bf16.mxu0 %vm588_vm0, %v1550_v23  ;;  %1313 = vmatprep.mubr.msk.bf16.mxu1 %vm588_vm0, %v1552_v24 }
  0x3f   : > { %693 = vmatmul.mubr.bf16.gmra.mrb[8].mxu0 %v1554_v25  ;;  %757 = vmatmul.mubr.bf16.gmra.mrb[8].mxu1 %v1555_v26 }
  0x40   : > { %1306 = vmatprep.mubr.msk.bf16.mxu0 %vm588_vm0, %v1556_v27  ;;  %1314 = vmatprep.mubr.msk.bf16.mxu1 %vm588_vm0, %v1558_v28 }
  0x47   : > { %701 = vmatmul.mubr.bf16.gmra.mrb[12].mxu0 %v1560_v29  ;;  %765 = vmatmul.mubr.bf16.gmra.mrb[12].mxu1 %v1561_v30 }
  0x48   : > { %1307 = vmatprep.mubr.msk.bf16.mxu0 %vm588_vm0, %v1562_v31  ;;  %1315 = vmatprep.mubr.msk.bf16.mxu1 %vm588_vm0, %v1564_v32 }
  0x4f   : > { %709 = vmatmul.mubr.bf16.gmra.mrb[16].mxu0 %v1566_v33  ;;  %773 = vmatmul.mubr.bf16.gmra.mrb[16].mxu1 %v1567_v34 }
  0x50   : > { %1308 = vmatprep.mubr.msk.bf16.mxu0 %vm588_vm0, %v1568_v35  ;;  %1316 = vmatprep.mubr.msk.bf16.mxu1 %vm588_vm0, %v1570_v36 }
  0x57   : > { %717 = vmatmul.mubr.bf16.gmra.mrb[20].mxu0 %v1572_v37  ;;  %781 = vmatmul.mubr.bf16.gmra.mrb[20].mxu1 %v1573_v38 }
  0x58   : > { %1309 = vmatprep.mubr.msk.bf16.mxu0 %vm588_vm0, %v1574_v39  ;;  %1317 = vmatprep.mubr.msk.bf16.mxu1 %vm588_vm0, %v1576_v40 }
  0x5f   : > { %725 = vmatmul.mubr.bf16.gmra.mrb[24].mxu0 %v1578_v41  ;;  %789 = vmatmul.mubr.bf16.gmra.mrb[24].mxu1 %v1579_v42 }
  0x60   : > { %1310 = vmatprep.mubr.msk.bf16.mxu0 %vm588_vm0, %v1580_v43  ;;  %1318 = vmatprep.mubr.msk.bf16.mxu1 %vm588_vm0, %v1582_v44 }
  0x67   : > { %733 = vmatmul.mubr.bf16.gmra.mrb[28].mxu0 %v1584_v45  ;;  %797 = vmatmul.mubr.bf16.gmra.mrb[28].mxu1 %v1585_v46 }
 0x102   : > { %v678_v48 = vpop.f32.mrb[0].mxu0  ;;  %v742_v49 = vpop.f32.mrb[0].mxu1 }
 0x103   : > { %v911_v50 = vadd.f32 %v1739_v47, %v678_v48  ;;  %v927_v51 = vadd.f32 %v1739_v47, %v742_v49  ;;  %v680_v52 = vpop.f32.mrb[1].mxu0  ;;  %v744_v53 = vpop.f32.mrb[1].mxu1 }
 0x104   : > { %v681_v54 = vpop.f32.mrb[2].mxu0  ;;  %v745_v55 = vpop.f32.mrb[2].mxu1 }
 0x105   : > { %v912_v56 = vadd.f32 %v1739_v47, %v681_v54  ;;  %v928_v57 = vadd.f32 %v1739_v47, %v745_v55  ;;  %v683_v58 = vpop.f32.mrb[3].mxu0  ;;  %v747_v59 = vpop.f32.mrb[3].mxu1  ;;  %v943_v60 = vmax.f32 %v911_v50, 0.0  ;;  %v959_v61 = vmax.f32 %v927_v51, 0.0 }
 0x107   : > { %v944_v62 = vmax.f32 %v912_v56, 0.0  ;;  %v960_v63 = vmax.f32 %v928_v57, 0.0 }
 0x109   : > { %v1390_v0 = vpack.c.bf16 %v944_v62, %v943_v60  ;;  %v1430_v1 = vpack.c.bf16 %v960_v63, %v959_v61 }
 0x10a   : > { %v686_v2 = vpop.f32.mrb[4].mxu0  ;;  %v750_v3 = vpop.f32.mrb[4].mxu1 }
 0x10b   : > { %1391 = vst [vmem:[%s1749_s23] sm:$0xff] %v1390_v0   ;;  %1474 = vst [vmem:[%s1749_s23 + $0x40] sm:$0xff] %v1430_v1   ;;  %v913_v4 = vadd.f32 %v1739_v47, %v686_v2  ;;  %v929_v5 = vadd.f32 %v1739_v47, %v750_v3  ;;  %v688_v6 = vpop.f32.mrb[5].mxu0  ;;  %v752_v7 = vpop.f32.mrb[5].mxu1 }
 0x10c   : > { %v689_v8 = vpop.f32.mrb[6].mxu0  ;;  %v753_v9 = vpop.f32.mrb[6].mxu1 }
 0x10d   : > { %v914_v10 = vadd.f32 %v1739_v47, %v689_v8  ;;  %v930_v11 = vadd.f32 %v1739_v47, %v753_v9  ;;  %v691_v12 = vpop.f32.mrb[7].mxu0  ;;  %v755_v13 = vpop.f32.mrb[7].mxu1  ;;  %v945_v14 = vmax.f32 %v913_v4, 0.0  ;;  %v961_v15 = vmax.f32 %v929_v5, 0.0 }
 0x10f   : > { %v946_v16 = vmax.f32 %v914_v10, 0.0  ;;  %v962_v17 = vmax.f32 %v930_v11, 0.0 }
 0x111   : > { %v1395_v18 = vpack.c.bf16 %v946_v16, %v945_v14  ;;  %v1435_v19 = vpack.c.bf16 %v962_v17, %v961_v15 }
 0x112   : > { %v694_v20 = vpop.f32.mrb[8].mxu0  ;;  %v758_v21 = vpop.f32.mrb[8].mxu1 }
 0x113   : > { %1467 = vst [vmem:[%s1749_s23 + $0x8] sm:$0xff] %v1395_v18   ;;  %1475 = vst [vmem:[%s1749_s23 + $0x48] sm:$0xff] %v1435_v19   ;;  %v915_v22 = vadd.f32 %v1739_v47, %v694_v20  ;;  %v931_v23 = vadd.f32 %v1739_v47, %v758_v21  ;;  %v696_v24 = vpop.f32.mrb[9].mxu0  ;;  %v760_v25 = vpop.f32.mrb[9].mxu1 }
 0x114   : > { %v697_v26 = vpop.f32.mrb[10].mxu0  ;;  %v761_v27 = vpop.f32.mrb[10].mxu1 }
 0x115   : > { %v916_v28 = vadd.f32 %v1739_v47, %v697_v26  ;;  %v932_v29 = vadd.f32 %v1739_v47, %v761_v27  ;;  %v699_v30 = vpop.f32.mrb[11].mxu0  ;;  %v763_v31 = vpop.f32.mrb[11].mxu1  ;;  %v947_v32 = vmax.f32 %v915_v22, 0.0  ;;  %v963_v33 = vmax.f32 %v931_v23, 0.0 }
 0x117   : > { %v948_v34 = vmax.f32 %v916_v28, 0.0  ;;  %v964_v35 = vmax.f32 %v932_v29, 0.0 }
 0x119   : > { %v1400_v36 = vpack.c.bf16 %v948_v34, %v947_v32  ;;  %v1440_v37 = vpack.c.bf16 %v964_v35, %v963_v33 }
 0x11a   : > { %v702_v38 = vpop.f32.mrb[12].mxu0  ;;  %v766_v39 = vpop.f32.mrb[12].mxu1 }
 0x11b   : > { %1468 = vst [vmem:[%s1749_s23 + $0x10] sm:$0xff] %v1400_v36   ;;  %1476 = vst [vmem:[%s1749_s23 + $0x50] sm:$0xff] %v1440_v37   ;;  %v917_v40 = vadd.f32 %v1739_v47, %v702_v38  ;;  %v933_v41 = vadd.f32 %v1739_v47, %v766_v39  ;;  %v704_v42 = vpop.f32.mrb[13].mxu0  ;;  %v768_v43 = vpop.f32.mrb[13].mxu1 }
 0x11c   : > { %v705_v44 = vpop.f32.mrb[14].mxu0  ;;  %v769_v45 = vpop.f32.mrb[14].mxu1 }
 0x11d   : > { %v918_v46 = vadd.f32 %v1739_v47, %v705_v44  ;;  %v934_v48 = vadd.f32 %v1739_v47, %v769_v45  ;;  %v707_v49 = vpop.f32.mrb[15].mxu0  ;;  %v771_v50 = vpop.f32.mrb[15].mxu1  ;;  %v949_v51 = vmax.f32 %v917_v40, 0.0  ;;  %v965_v52 = vmax.f32 %v933_v41, 0.0 }
 0x11f   : > { %v950_v53 = vmax.f32 %v918_v46, 0.0  ;;  %v966_v54 = vmax.f32 %v934_v48, 0.0 }
 0x121   : > { %v1405_v55 = vpack.c.bf16 %v950_v53, %v949_v51  ;;  %v1445_v56 = vpack.c.bf16 %v966_v54, %v965_v52 }
 0x122   : > { %v710_v57 = vpop.f32.mrb[16].mxu0  ;;  %v774_v58 = vpop.f32.mrb[16].mxu1 }
 0x123   : > { %1469 = vst [vmem:[%s1749_s23 + $0x18] sm:$0xff] %v1405_v55   ;;  %1477 = vst [vmem:[%s1749_s23 + $0x58] sm:$0xff] %v1445_v56   ;;  %v919_v59 = vadd.f32 %v1739_v47, %v710_v57  ;;  %v935_v60 = vadd.f32 %v1739_v47, %v774_v58  ;;  %v712_v61 = vpop.f32.mrb[17].mxu0  ;;  %v776_v62 = vpop.f32.mrb[17].mxu1 }
 0x124   : > { %v713_v63 = vpop.f32.mrb[18].mxu0  ;;  %v777_v0 = vpop.f32.mrb[18].mxu1 }
 0x125   : > { %v920_v1 = vadd.f32 %v1739_v47, %v713_v63  ;;  %v936_v2 = vadd.f32 %v1739_v47, %v777_v0  ;;  %v715_v3 = vpop.f32.mrb[19].mxu0  ;;  %v779_v4 = vpop.f32.mrb[19].mxu1  ;;  %v951_v5 = vmax.f32 %v919_v59, 0.0  ;;  %v967_v6 = vmax.f32 %v935_v60, 0.0 }
 0x127   : > { %v952_v7 = vmax.f32 %v920_v1, 0.0  ;;  %v968_v8 = vmax.f32 %v936_v2, 0.0 }
 0x129   : > { %v1410_v9 = vpack.c.bf16 %v952_v7, %v951_v5  ;;  %v1450_v10 = vpack.c.bf16 %v968_v8, %v967_v6 }
 0x12a   : > { %v718_v11 = vpop.f32.mrb[20].mxu0  ;;  %v782_v12 = vpop.f32.mrb[20].mxu1 }
 0x12b   : > { %1470 = vst [vmem:[%s1749_s23 + $0x20] sm:$0xff] %v1410_v9   ;;  %1478 = vst [vmem:[%s1749_s23 + $0x60] sm:$0xff] %v1450_v10   ;;  %v921_v13 = vadd.f32 %v1739_v47, %v718_v11  ;;  %v937_v14 = vadd.f32 %v1739_v47, %v782_v12  ;;  %v720_v15 = vpop.f32.mrb[21].mxu0  ;;  %v784_v16 = vpop.f32.mrb[21].mxu1 }
 0x12c   : > { %v721_v17 = vpop.f32.mrb[22].mxu0  ;;  %v785_v18 = vpop.f32.mrb[22].mxu1 }
 0x12d   : > { %v922_v19 = vadd.f32 %v1739_v47, %v721_v17  ;;  %v938_v20 = vadd.f32 %v1739_v47, %v785_v18  ;;  %v723_v21 = vpop.f32.mrb[23].mxu0  ;;  %v787_v22 = vpop.f32.mrb[23].mxu1  ;;  %v953_v23 = vmax.f32 %v921_v13, 0.0  ;;  %v969_v24 = vmax.f32 %v937_v14, 0.0 }
 0x12f   : > { %v954_v25 = vmax.f32 %v922_v19, 0.0  ;;  %v970_v26 = vmax.f32 %v938_v20, 0.0 }
 0x131   : > { %v1415_v27 = vpack.c.bf16 %v954_v25, %v953_v23  ;;  %v1455_v28 = vpack.c.bf16 %v970_v26, %v969_v24 }
 0x132   : > { %v726_v29 = vpop.f32.mrb[24].mxu0  ;;  %v790_v30 = vpop.f32.mrb[24].mxu1 }
 0x133   : > { %1471 = vst [vmem:[%s1749_s23 + $0x28] sm:$0xff] %v1415_v27   ;;  %1479 = vst [vmem:[%s1749_s23 + $0x68] sm:$0xff] %v1455_v28   ;;  %v923_v31 = vadd.f32 %v1739_v47, %v726_v29  ;;  %v939_v32 = vadd.f32 %v1739_v47, %v790_v30  ;;  %v728_v33 = vpop.f32.mrb[25].mxu0  ;;  %v792_v34 = vpop.f32.mrb[25].mxu1 }
 0x134   : > { %v729_v35 = vpop.f32.mrb[26].mxu0  ;;  %v793_v36 = vpop.f32.mrb[26].mxu1 }
 0x135   : > { %v924_v37 = vadd.f32 %v1739_v47, %v729_v35  ;;  %v940_v38 = vadd.f32 %v1739_v47, %v793_v36  ;;  %v731_v39 = vpop.f32.mrb[27].mxu0  ;;  %v795_v40 = vpop.f32.mrb[27].mxu1  ;;  %v955_v41 = vmax.f32 %v923_v31, 0.0  ;;  %v971_v42 = vmax.f32 %v939_v32, 0.0 }
 0x137   : > { %v956_v43 = vmax.f32 %v924_v37, 0.0  ;;  %v972_v44 = vmax.f32 %v940_v38, 0.0 }
 0x139   : > { %v1420_v45 = vpack.c.bf16 %v956_v43, %v955_v41  ;;  %v1460_v46 = vpack.c.bf16 %v972_v44, %v971_v42 }
 0x13a   : > { %v734_v48 = vpop.f32.mrb[28].mxu0  ;;  %v798_v49 = vpop.f32.mrb[28].mxu1 }
 0x13b   : > { %1472 = vst [vmem:[%s1749_s23 + $0x30] sm:$0xff] %v1420_v45   ;;  %1480 = vst [vmem:[%s1749_s23 + $0x70] sm:$0xff] %v1460_v46   ;;  %v925_v50 = vadd.f32 %v1739_v47, %v734_v48  ;;  %v941_v51 = vadd.f32 %v1739_v47, %v798_v49  ;;  %v736_v52 = vpop.f32.mrb[29].mxu0  ;;  %v800_v53 = vpop.f32.mrb[29].mxu1 }
 0x13c   : > { %v737_v54 = vpop.f32.mrb[30].mxu0  ;;  %v801_v55 = vpop.f32.mrb[30].mxu1 }
 0x13d   : > { %v926_v56 = vadd.f32 %v1739_v47, %v737_v54  ;;  %v942_v57 = vadd.f32 %v1739_v47, %v801_v55  ;;  %v739_v58 = vpop.f32.mrb[31].mxu0  ;;  %v803_v59 = vpop.f32.mrb[31].mxu1  ;;  %v957_v60 = vmax.f32 %v925_v50, 0.0  ;;  %v973_v61 = vmax.f32 %v941_v51, 0.0 }
 0x13f   : > { %v958_v62 = vmax.f32 %v926_v56, 0.0  ;;  %v974_v63 = vmax.f32 %v942_v57, 0.0 }
 0x141   : > { %v1425_v0 = vpack.c.bf16 %v958_v62, %v957_v60  ;;  %v1465_v1 = vpack.c.bf16 %v974_v63, %v973_v61 }
 0x143   : > { %1473 = vst [vmem:[%s1749_s23 + $0x38] sm:$0xff] %v1425_v0   ;;  %1481 = vst [vmem:[%s1749_s23 + $0x78] sm:$0xff] %v1465_v1  }
 0x144 PF: > { %s13_s14 = sadd.s32 1, %s1608_s14   ;;  %s1808_s12 = smov %s1604_s13 }
 0x145   : > { %p10_p5 = scmp.ge.s32.totalorder %s13_s14, 4   ;;  %s1809_s13 = smov %s1811_s15 }
 0x147   :  { %12 = sbr.rel (!%p10_p5) target bundleno = 2 (0x2), region = 76 }

// kernel: visual_encoder_forward.22
= control target key start
LH: loop header
LB: loop body
LE: loop exit
PB: predicated region body
PF: predicated region fallthrough
CT: control target
= control target key end

     0   :  { %s1659_s12 = smov 0   ;;  %s1661_s13 = smov 0   ;;  %s1873_s0 = inlined_call_operand.vmem [shape: bf16[128,1152], index: 0, kind: input, shape index: {}]   ;;  %s1874_s1 = inlined_call_operand.vmem [shape: bf16[1152,128], index: 1, kind: input, shape index: {}]   ;;  %s1875_s2 = inlined_call_operand.vmem [shape: f32[1,128], index: 2, kind: input, shape index: {}]   ;;  %s1876_s3 = inlined_call_operand.vmem [shape: bf16[128,128], index: 3, kind: output, shape index: {}]  }
   0x1   :  { %s1663_s14 = smov 0   ;;  %s1665_s15 = smov 0  }
   0x2   :  { %s1667_s16 = smov 0  }
   0x3 LB: > { %s25_s17 = sadd.s32 1, %s1632_s15  ;;  %p48_p1 = scmp.ne.s32.totalorder %s1624_s13, %s1620_s12  ;;  %s1636_s16 = sphi %s1667_s16, %s13_s16   ;;  %s1632_s15 = sphi %s1665_s15, %s1880_s15   ;;  %s1628_s14 = sphi %s1663_s14, %s1879_s14   ;;  %s1624_s13 = sphi %s1661_s13, %s1878_s13   ;;  %s1620_s12 = sphi %s1659_s12, %s1877_s12  }
   0x4   : > { %p26_p0 = scmp.ge.s32.totalorder %s25_s17, 3  ;;  %p49_p2 = scmp.eq.s32.totalorder %s1636_s16, 0 }
   0x5   : > { %s41_s19 = sadd.s32 1, %s1624_s13  ;;  %p1216_p5 = scmp.ge.s32.totalorder %s1636_s16, 3 }
   0x6   : > { %s1882_s17 = smov (%p26_p0, %s25_s17), 0  ;;  %p50_p3 = por %p49_p2, %p48_p1 }
   0x7   : > { %s37_s18 = ssub.s32 %s1632_s15, %s1882_s17  ;;  %162 = sbr.rel (%p1216_p5) target bundleno = 37 (0x25), region = 20 }
   0x8   : > { %p39_p4 = scmp.eq.s32.totalorder %s37_s18, 0 }
   0xa   : > { %s1694_s20 = scalar_select %p39_p4, %s1624_s13, %s41_s19  }
   0xe   : > { %165 = sbr.rel (!%p50_p3) target bundleno = 37 (0x25), region = 24  ;;  %s167_s21 = sand.u32 (%p50_p3), 1, %s1624_s13  }
   0xf   : > { %s1323_s22 = smul.u32 (%p50_p3), 12, %s1632_s15 }
  0x10   : > { %s1499_s23 = smul.u32 (%p50_p3), 192, %s167_s21 }
  0x11   : > { %s1702_s26 = scalar_lea.vmem (%p50_p3), %s1873_s0, %s1323_s22 }
  0x12   : > { %v190_v0 = vld [vmem:[%s1702_s26] sm:$0xff] (%p50_p3)  ;;  %v194_v2 = vld [vmem:[%s1702_s26 + $0x48] sm:$0xff] (%p50_p3)  ;;  %s1707_s27 = scalar_lea.vmem (%p50_p3), [#allocation3], %s1499_s23  ;;  %v198_v4 = vld [vmem:[%s1702_s26 + $0x90] sm:$0xff] (%p50_p3) }
  0x13   : > { %v192_v1 = vld [vmem:[%s1702_s26 + $0x24] sm:$0xff] (%p50_p3)  ;;  %191 = vst [vmem:[%s1707_s27] sm:$0xff] (%p50_p3), %v190_v0  ;;  %195 = vst [vmem:[%s1707_s27 + $0x18] sm:$0xff] (%p50_p3), %v194_v2  ;;  %v196_v3 = vld [vmem:[%s1702_s26 + $0x6c] sm:$0xff] (%p50_p3) }
  0x14   : > { %193 = vst [vmem:[%s1707_s27 + $0xc] sm:$0xff] (%p50_p3), %v192_v1  ;;  %v200_v5 = vld [vmem:[%s1702_s26 + $0xb4] sm:$0xff] (%p50_p3)  ;;  %197 = vst [vmem:[%s1707_s27 + $0x24] sm:$0xff] (%p50_p3), %v196_v3  ;;  %v204_v7 = vld [vmem:[%s1702_s26 + $0xfc] sm:$0xff] (%p50_p3) }
  0x15   : > { %199 = vst [vmem:[%s1707_s27 + $0x30] sm:$0xff] %v198_v4  ;;  %201 = vst [vmem:[%s1707_s27 + $0x3c] sm:$0xff] %v200_v5  ;;  %v202_v6 = vld [vmem:[%s1702_s26 + $0xd8] sm:$0xff]  ;;  %v206_v8 = vld [vmem:[%s1702_s26 + $0x120] sm:$0xff] }
  0x16   : > { %203 = vst [vmem:[%s1707_s27 + $0x48] sm:$0xff] %v202_v6  ;;  %205 = vst [vmem:[%s1707_s27 + $0x54] sm:$0xff] %v204_v7  ;;  %v208_v9 = vld [vmem:[%s1702_s26 + $0x144] sm:$0xff]  ;;  %v212_v11 = vld [vmem:[%s1702_s26 + $0x18c] sm:$0xff] }
  0x17   : > { %207 = vst [vmem:[%s1707_s27 + $0x60] sm:$0xff] %v206_v8  ;;  %v210_v10 = vld [vmem:[%s1702_s26 + $0x168] sm:$0xff]  ;;  %209 = vst [vmem:[%s1707_s27 + $0x6c] sm:$0xff] %v208_v9  ;;  %v214_v12 = vld [vmem:[%s1702_s26 + $0x1b0] sm:$0xff] }
  0x18   : > { %211 = vst [vmem:[%s1707_s27 + $0x78] sm:$0xff] %v210_v10  ;;  %213 = vst [vmem:[%s1707_s27 + $0x84] sm:$0xff] %v212_v11  ;;  %v216_v13 = vld [vmem:[%s1702_s26 + $0x1d4] sm:$0xff]  ;;  %v220_v15 = vld [vmem:[%s1702_s26 + $0x21c] sm:$0xff] }
  0x19   : > { %v218_v14 = vld [vmem:[%s1702_s26 + $0x1f8] sm:$0xff]  ;;  %215 = vst [vmem:[%s1707_s27 + $0x90] sm:$0xff] %v214_v12  ;;  %217 = vst [vmem:[%s1707_s27 + $0x9c] sm:$0xff] %v216_v13  ;;  %v1218_v16 = vld [vmem:[%s1702_s26 + $0x8] sm:$0xf] }
  0x1a   : > { %219 = vst [vmem:[%s1707_s27 + $0xa8] sm:$0xff] %v218_v14  ;;  %v1220_v17 = vld [vmem:[%s1702_s26 + $0x2c] sm:$0xf]  ;;  %221 = vst [vmem:[%s1707_s27 + $0xb4] sm:$0xff] %v220_v15  ;;  %v1222_v18 = vld [vmem:[%s1702_s26 + $0x50] sm:$0xf] }
  0x1b   : > { %1219 = vst [vmem:[%s1707_s27 + $0x8] sm:$0xf] %v1218_v16  ;;  %1221 = vst [vmem:[%s1707_s27 + $0x14] sm:$0xf] %v1220_v17  ;;  %v1224_v19 = vld [vmem:[%s1702_s26 + $0x74] sm:$0xf] }
  0x1c   : > { %v1226_v20 = vld [vmem:[%s1702_s26 + $0x98] sm:$0xf]  ;;  %1223 = vst [vmem:[%s1707_s27 + $0x20] sm:$0xf] %v1222_v18  ;;  %1225 = vst [vmem:[%s1707_s27 + $0x2c] sm:$0xf] %v1224_v19 }
  0x1d   : > { %1227 = vst [vmem:[%s1707_s27 + $0x38] sm:$0xf] %v1226_v20  ;;  %v1228_v21 = vld [vmem:[%s1702_s26 + $0xbc] sm:$0xf]  ;;  %v1230_v22 = vld [vmem:[%s1702_s26 + $0xe0] sm:$0xf] }
  0x1e   : > { %v1232_v23 = vld [vmem:[%s1702_s26 + $0x104] sm:$0xf]  ;;  %1229 = vst [vmem:[%s1707_s27 + $0x44] sm:$0xf] %v1228_v21  ;;  %1231 = vst [vmem:[%s1707_s27 + $0x50] sm:$0xf] %v1230_v22 }
  0x1f   : > { %1233 = vst [vmem:[%s1707_s27 + $0x5c] sm:$0xf] %v1232_v23  ;;  %v1234_v24 = vld [vmem:[%s1702_s26 + $0x128] sm:$0xf]  ;;  %v1236_v25 = vld [vmem:[%s1702_s26 + $0x14c] sm:$0xf] }
  0x20   : > { %v1238_v26 = vld [vmem:[%s1702_s26 + $0x170] sm:$0xf]  ;;  %1235 = vst [vmem:[%s1707_s27 + $0x68] sm:$0xf] %v1234_v24  ;;  %1237 = vst [vmem:[%s1707_s27 + $0x74] sm:$0xf] %v1236_v25 }
  0x21   : > { %1239 = vst [vmem:[%s1707_s27 + $0x80] sm:$0xf] %v1238_v26  ;;  %v1240_v27 = vld [vmem:[%s1702_s26 + $0x194] sm:$0xf]  ;;  %v1242_v28 = vld [vmem:[%s1702_s26 + $0x1b8] sm:$0xf] }
  0x22   : > { %v1244_v29 = vld [vmem:[%s1702_s26 + $0x1dc] sm:$0xf]  ;;  %1241 = vst [vmem:[%s1707_s27 + $0x8c] sm:$0xf] %v1240_v27  ;;  %1243 = vst [vmem:[%s1707_s27 + $0x98] sm:$0xf] %v1242_v28 }
  0x23   : > { %1245 = vst [vmem:[%s1707_s27 + $0xa4] sm:$0xf] %v1244_v29  ;;  %v1246_v30 = vld [vmem:[%s1702_s26 + $0x200] sm:$0xf]  ;;  %v1248_v31 = vld [vmem:[%s1702_s26 + $0x224] sm:$0xf] }
  0x24   : > { %1247 = vst [vmem:[%s1707_s27 + $0xb0] sm:$0xf] %v1246_v30  ;;  %1249 = vst [vmem:[%s1707_s27 + $0xbc] sm:$0xf] %v1248_v31 }
  0x25 PF: > { %p1250_p6 = scmp.ge.s32.totalorder %s1636_s16, 1  ;;  %p277_p7 = scmp.lt.s32.totalorder %s1636_s16, 4 }
  0x27   : > { %p278_p8 = pnand %p1250_p6, %p277_p7 }
  0x28   : > { %s284_s28 = sand.u32 (!%p278_p8), 1, %s1620_s12   ;;  %s323_s29 = smul.u32 (!%p278_p8), 48, %s1628_s14 }
  0x29   : > { %281 = sbr.rel (%p278_p8) target bundleno = 383 (0x17f), region = 54  ;;  %p1252_p10 = scmp.ne.s32.totalorder (!%p278_p8), %s1628_s14, 0 }
  0x2a   : > { %s1500_s30 = smul.u32 (!%p278_p8), 192, %s284_s28  ;;  %p324_p9 = scmp.lt.s32.totalorder (!%p278_p8), %s323_s29, 143 }
  0x2c   : > { %s1779_s8 = scalar_lea.vmem (!%p278_p8), [#allocation3], %s1500_s30 }
  0x30   : > { %s1884_s29 = smov (!%p324_p9, %s323_s29), 143  ;;  %348 = sbr.rel (%p1252_p10) target bundleno = 58 (0x3a), region = 62 }
  0x31   : > { %s1251_s4 = sshll.u32 %s1884_s29, 2  ;;  %v1638_v32 = vmov (!%p1252_p10), 0.0  }
  0x32   : > { %s1777_s7 = scalar_lea.vmem %s1874_s1, %s1251_s4  ;;  %349 = vst [vmem:[#allocation2] sm:$0xff] (!%p1252_p10), %v1638_v32  ;;  %350 = vst [vmem:[#allocation2 + $0x8] sm:$0xff] (!%p1252_p10), %v1638_v32 }
  0x33   : > { %351 = vst [vmem:[#allocation2 + $0x10] sm:$0xff] (!%p1252_p10), %v1638_v32  ;;  %352 = vst [vmem:[#allocation2 + $0x18] sm:$0xff] (!%p1252_p10), %v1638_v32 }
  0x34   : > { %353 = vst [vmem:[#allocation2 + $0x20] sm:$0xff] (!%p1252_p10), %v1638_v32  ;;  %354 = vst [vmem:[#allocation2 + $0x28] sm:$0xff] (!%p1252_p10), %v1638_v32 }
  0x35   : > { %355 = vst [vmem:[#allocation2 + $0x30] sm:$0xff] (!%p1252_p10), %v1638_v32  ;;  %356 = vst [vmem:[#allocation2 + $0x38] sm:$0xff] (!%p1252_p10), %v1638_v32 }
  0x36   : > { %357 = vst [vmem:[#allocation2 + $0x40] sm:$0xff] (!%p1252_p10), %v1638_v32  ;;  %358 = vst [vmem:[#allocation2 + $0x48] sm:$0xff] (!%p1252_p10), %v1638_v32 }
  0x37   : > { %359 = vst [vmem:[#allocation2 + $0x50] sm:$0xff] %v1638_v32  ;;  %360 = vst [vmem:[#allocation2 + $0x58] sm:$0xff] %v1638_v32 }
  0x38   : > { %361 = vst [vmem:[#allocation2 + $0x60] sm:$0xff] %v1638_v32  ;;  %362 = vst [vmem:[#allocation2 + $0x68] sm:$0xff] %v1638_v32 }
  0x39   : > { %363 = vst [vmem:[#allocation2 + $0x70] sm:$0xff] %v1638_v32  ;;  %364 = vst [vmem:[#allocation2 + $0x78] sm:$0xff] %v1638_v32 }
  0x3a PF: > { %v1542_v33 = vld [vmem:[%s1777_s7 + $0x40] sm:$0xff]   ;;  %v1545_v36 = vld [vmem:[%s1777_s7 + $0x48] sm:$0xff]   ;;  %v1548_v39 = vld [vmem:[%s1777_s7 + $0x50] sm:$0xff]   ;;  %p1301_p11 = scmp.ne.s32.totalorder %s1628_s14, 2 }
  0x3b   : > { %v1543_v34 = vld [vmem:[%s1777_s7] sm:$0xff]   ;;  %1387 = vmatprep.subr.bf16.mxu0 %v1542_v33  ;;  %v1546_v37 = vld [vmem:[%s1777_s7 + $0x8] sm:$0xff]   ;;  %v1549_v40 = vld [vmem:[%s1777_s7 + $0x10] sm:$0xff]  }
  0x3c   : > { %v1544_v35 = vld [vmem:[%s1777_s7 + $0x80] sm:$0xff]   ;;  %1388 = vmatpush3.bf16.msra.mxu0 %v1543_v34  ;;  %v1547_v38 = vld [vmem:[%s1777_s7 + $0x88] sm:$0xff]   ;;  %v1550_v41 = vld [vmem:[%s1777_s7 + $0x90] sm:$0xff]  }
  0x3d   : > { %1467 = vmatprep.subr.bf16.mxu1 %v1544_v35  ;;  %1389 = vmatprep.subr.bf16.mxu0 %v1545_v36  ;;  %v1551_v42 = vld [vmem:[%s1777_s7 + $0x58] sm:$0xff]   ;;  %v1554_v45 = vld [vmem:[%s1777_s7 + $0x60] sm:$0xff]   ;;  %v1557_v48 = vld [vmem:[%s1777_s7 + $0x68] sm:$0xff]  }
  0x3e   : > { %1468 = vmatpush3.bf16.msra.mxu1 %v1544_v35  ;;  %v1552_v43 = vld [vmem:[%s1777_s7 + $0x18] sm:$0xff]   ;;  %v1556_v46 = vld [vmem:[%s1777_s7 + $0xa0] sm:$0xff]   ;;  %v1559_v49 = vld [vmem:[%s1777_s7 + $0xa8] sm:$0xff]  }
  0x3f   : > { %1469 = vmatprep.subr.bf16.mxu1 %v1547_v38  ;;  %v1553_v44 = vld [vmem:[%s1777_s7 + $0x98] sm:$0xff]   ;;  %v1555_v47 = vld [vmem:[%s1777_s7 + $0x20] sm:$0xff]   ;;  %v1558_v50 = vld [vmem:[%s1777_s7 + $0x28] sm:$0xff]  }
  0x40   : > { %1390 = vmatpush3.bf16.msra.mxu0 %v1546_v37  ;;  %v1560_v51 = vld [vmem:[%s1777_s7 + $0x70] sm:$0xff]   ;;  %v1563_v54 = vld [vmem:[%s1777_s7 + $0x78] sm:$0xff]   ;;  %v1566_v59 = vld [vmem:[%s1779_s8] ss:$12 sps:$4 sm:$0xff]  }
  0x41   : > { %1391 = vmatprep.subr.bf16.mxu0 %v1548_v39  ;;  %v1561_v52 = vld [vmem:[%s1777_s7 + $0x30] sm:$0xff]   ;;  %v1565_v55 = vld [vmem:[%s1777_s7 + $0xb8] sm:$0xff]   ;;  %v1570_v61 = vld [vmem:[%s1779_s8 + $0x20] ss:$12 sps:$4 sm:$0xff]  }
  0x42   : > { %1470 = vmatpush3.bf16.msra.mxu1 %v1547_v38  ;;  %v1562_v53 = vld [vmem:[%s1777_s7 + $0xb0] sm:$0xff]   ;;  %v1564_v58 = vld [vmem:[%s1777_s7 + $0x38] sm:$0xff]   ;;  %v1586_v5 = vld [vmem:[%s1779_s8 + $0x80] ss:$12 sps:$4 sm:$0xff]  }
  0x43   : > { %1471 = vmatprep.subr.bf16.mxu1 %v1550_v41  ;;  %v1568_v56 = vld [vmem:[%s1779_s8 + $0x4] ss:$12 sps:$4 sm:$0xff]   ;;  %v1569_v57 = vld [vmem:[%s1779_s8 + $0x8] ss:$12 sps:$4 sm:$0xff]   ;;  %v1579_v4 = vld [vmem:[%s1779_s8 + $0x4c] ss:$12 sps:$4 sm:$0xff]  }
  0x44   : > { %1392 = vmatpush3.bf16.msra.mxu0 %v1549_v40  ;;  %765 = vmatprep.mubr.bf16.mxu0 %v1568_v56  ;;  %v1571_v60 = vld [vmem:[%s1779_s8 + $0x1c] ss:$12 sps:$4 sm:$0xff]   ;;  %v1577_v62 = vld [vmem:[%s1779_s8 + $0x38] ss:$12 sps:$4 sm:$0xff]   ;;  %v1574_v0 = vld [vmem:[%s1779_s8 + $0x34] ss:$12 sps:$4 sm:$0xff]  }
  0x45   : > { %1393 = vmatprep.subr.bf16.mxu0 %v1551_v42  ;;  %1483 = vmatprep.mubr.bf16.mxu1 %v1569_v57  ;;  %v1573_v63 = vld [vmem:[%s1779_s8 + $0x18] ss:$12 sps:$4 sm:$0xff]   ;;  %v1578_v1 = vld [vmem:[%s1779_s8 + $0x50] ss:$12 sps:$4 sm:$0xff]   ;;  %v1585_v2 = vld [vmem:[%s1779_s8 + $0x68] ss:$12 sps:$4 sm:$0xff]  }
  0x46   : > { %1472 = vmatpush3.bf16.msra.mxu1 %v1550_v41  ;;  %v1576_v3 = vld [vmem:[%s1779_s8 + $0x30] ss:$12 sps:$4 sm:$0xff]   ;;  %v1593_v6 = vld [vmem:[%s1779_s8 + $0x98] ss:$12 sps:$4 sm:$0xff]   ;;  %v1581_v7 = vld [vmem:[%s1779_s8 + $0x48] ss:$12 sps:$4 sm:$0xff]  }
  0x47   : > { %1473 = vmatprep.subr.bf16.mxu1 %v1553_v44  ;;  %v1582_v8 = vld [vmem:[%s1779_s8 + $0x64] ss:$12 sps:$4 sm:$0xff]   ;;  %v1584_v10 = vld [vmem:[%s1779_s8 + $0x60] ss:$12 sps:$4 sm:$0xff]   ;;  %v1587_v11 = vld [vmem:[%s1779_s8 + $0x7c] ss:$12 sps:$4 sm:$0xff]  }
  0x48   : > { %1394 = vmatpush3.bf16.msra.mxu0 %v1552_v43  ;;  %v1594_v9 = vld [vmem:[%s1779_s8 + $0xb0] ss:$12 sps:$4 sm:$0xff]   ;;  %v1589_v12 = vld [vmem:[%s1779_s8 + $0x78] ss:$12 sps:$4 sm:$0xff]   ;;  %v1590_v13 = vld [vmem:[%s1779_s8 + $0x94] ss:$12 sps:$4 sm:$0xff]  }
  0x49   : > { %1395 = vmatprep.subr.bf16.mxu0 %v1554_v45  ;;  %v1592_v14 = vld [vmem:[%s1779_s8 + $0x90] ss:$12 sps:$4 sm:$0xff]   ;;  %v1595_v15 = vld [vmem:[%s1779_s8 + $0xac] ss:$12 sps:$4 sm:$0xff]   ;;  %v1597_v16 = vld [vmem:[%s1779_s8 + $0xa8] ss:$12 sps:$4 sm:$0xff]  }
  0x4a   : > { %1474 = vmatpush3.bf16.msra.mxu1 %v1553_v44  ;;  %v365_v23 = vld [vmem:[#allocation2] sm:$0xff]  ;;  %v366_v28 = vld [vmem:[#allocation2 + $0x8] sm:$0xff]  ;;  %v367_v38 = vld [vmem:[#allocation2 + $0x10] sm:$0xff] }
  0x4b   : > { %1475 = vmatprep.subr.bf16.mxu1 %v1556_v46  ;;  %v368_v44 = vld [vmem:[#allocation2 + $0x18] sm:$0xff] }
  0x4c   : > { %1396 = vmatpush3.bf16.msra.mxu0 %v1555_v47 }
  0x4d   : > { %1397 = vmatprep.subr.bf16.mxu0 %v1557_v48 }
  0x4e   : > { %1476 = vmatpush3.bf16.msra.mxu1 %v1556_v46 }
  0x4f   : > { %1477 = vmatprep.subr.bf16.mxu1 %v1559_v49 }
  0x50   : > { %1398 = vmatpush3.bf16.msra.mxu0 %v1558_v50 }
  0x51   : > { %1399 = vmatprep.subr.bf16.mxu0 %v1560_v51 }
  0x52   : > { %1478 = vmatpush3.bf16.msra.mxu1 %v1559_v49 }
  0x53   : > { %1479 = vmatprep.subr.bf16.mxu1 %v1562_v53 }
  0x54   : > { %1400 = vmatpush3.bf16.msra.mxu0 %v1561_v52 }
  0x55   : > { %1401 = vmatprep.subr.bf16.mxu0 %v1563_v54 }
  0x56   : > { %1480 = vmatpush3.bf16.msra.mxu1 %v1562_v53 }
  0x57   : > { %1481 = vmatprep.subr.bf16.mxu1 %v1565_v55 }
  0x58   : > { %1402 = vmatpush3.bf16.msra.mxu0 %v1564_v58 }
  0x5a   : > { %1482 = vmatpush3.bf16.msra.mxu1 %v1565_v55  ;;  %v369_v55 = vld [vmem:[#allocation2 + $0x20] sm:$0xff] }
  0x5b   : > { %766 = vmatmul.mubr.bf16.vlgmr.msra.gmra.mrb[0].mxu0 %v1566_v59 }
  0x5c   : > { %773 = vmatprep.mubr.bf16.mxu0 %v1571_v60  ;;  %v370_v60 = vld [vmem:[#allocation2 + $0x28] sm:$0xff] }
  0x5d   : > { %1484 = vmatmul.mubr.bf16.vlgmr.msra.gmra.mrb[0].mxu1 %v1570_v61 }
  0x5e   : > { %1487 = vmatprep.mubr.bf16.mxu1 %v1577_v62 }
  0x63   : > { %774 = vmatmul.mubr.bf16.gmra.mrb[4].mxu0 %v1573_v63 }
  0x64   : > { %781 = vmatprep.mubr.bf16.mxu0 %v1574_v0 }
  0x65   : > { %1488 = vmatmul.mubr.bf16.gmra.mrb[4].mxu1 %v1578_v1 }
  0x66   : > { %1491 = vmatprep.mubr.bf16.mxu1 %v1585_v2 }
  0x6b   : > { %782 = vmatmul.mubr.bf16.gmra.mrb[8].mxu0 %v1576_v3 }
  0x6c   : > { %789 = vmatprep.mubr.bf16.mxu0 %v1579_v4 }
  0x6d   : > { %1492 = vmatmul.mubr.bf16.gmra.mrb[8].mxu1 %v1586_v5 }
  0x6e   : > { %1495 = vmatprep.mubr.bf16.mxu1 %v1593_v6  ;;  %v371_v6 = vld [vmem:[#allocation2 + $0x30] sm:$0xff] }
  0x73   : > { %790 = vmatmul.mubr.bf16.gmra.mrb[12].mxu0 %v1581_v7 }
  0x74   : > { %797 = vmatprep.mubr.bf16.mxu0 %v1582_v8 }
  0x75   : > { %1496 = vmatmul.mubr.bf16.gmra.mrb[12].mxu1 %v1594_v9 }
  0x7b   : > { %798 = vmatmul.mubr.bf16.gmra.mrb[16].mxu0 %v1584_v10 }
  0x7c   : > { %805 = vmatprep.mubr.bf16.mxu0 %v1587_v11 }
  0x83   : > { %806 = vmatmul.mubr.bf16.gmra.mrb[20].mxu0 %v1589_v12  ;;  %v372_v12 = vld [vmem:[#allocation2 + $0x38] sm:$0xff] }
  0x84   : > { %813 = vmatprep.mubr.bf16.mxu0 %v1590_v13 }
  0x8b   : > { %814 = vmatmul.mubr.bf16.gmra.mrb[24].mxu0 %v1592_v14 }
  0x8c   : > { %821 = vmatprep.mubr.bf16.mxu0 %v1595_v15 }
  0x93   : > { %822 = vmatmul.mubr.bf16.gmra.mrb[28].mxu0 %v1597_v16 }
 0x12e   : > { %v1403_v17 = vpop.f32.mrb[0].mxu0 }
 0x12f   : > { %v1404_v18 = vpop.f32.mrb[1].mxu0 }
 0x130   : > { %v1405_v19 = vadd.f32 %v1404_v18, %v1403_v17  ;;  %v1406_v20 = vpop.f32.mrb[2].mxu0  ;;  %v1485_v21 = vpop.f32.mrb[0].mxu1 }
 0x131   : > { %v1407_v22 = vpop.f32.mrb[3].mxu0  ;;  %v864_v24 = vpop.f32.mrb[1].mxu1 }
 0x132   : > { %v1408_v25 = vadd.f32 %v1407_v22, %v1406_v20  ;;  %v865_v26 = vadd.f32 %v1405_v19, %v864_v24  ;;  %v1486_v27 = vpop.f32.mrb[2].mxu1  ;;  %v373_v22 = vld [vmem:[#allocation2 + $0x40] sm:$0xff] }
 0x133   : > { %v867_v29 = vpop.f32.mrb[3].mxu1 }
 0x134   : > { %v927_v30 = vadd.f32 %v865_v26, %v365_v23  ;;  %v868_v31 = vadd.f32 %v1408_v25, %v867_v29  ;;  %v374_v25 = vld [vmem:[#allocation2 + $0x48] sm:$0xff] }
 0x136   : > { %943 = vst [vmem:[#allocation2] sm:$0xff] %v927_v30  ;;  %v928_v32 = vadd.f32 %v868_v31, %v366_v28  ;;  %v1409_v33 = vpop.f32.mrb[4].mxu0 }
 0x137   : > { %v1410_v34 = vpop.f32.mrb[5].mxu0 }
 0x138   : > { %944 = vst [vmem:[#allocation2 + $0x8] sm:$0xff] %v928_v32  ;;  %v1411_v35 = vadd.f32 %v1410_v34, %v1409_v33  ;;  %v1412_v36 = vpop.f32.mrb[6].mxu0  ;;  %v1489_v37 = vpop.f32.mrb[4].mxu1  ;;  %v375_v33 = vld [vmem:[#allocation2 + $0x50] sm:$0xff] }
 0x139   : > { %v1413_v39 = vpop.f32.mrb[7].mxu0  ;;  %v880_v40 = vpop.f32.mrb[5].mxu1 }
 0x13a   : > { %v873_v41 = vadd.f32 %v1485_v21, %v1411_v35  ;;  %v1414_v42 = vadd.f32 %v1413_v39, %v1412_v36  ;;  %v1490_v43 = vpop.f32.mrb[6].mxu1 }
 0x13b   : > { %v883_v45 = vpop.f32.mrb[7].mxu1 }
 0x13c   : > { %v929_v46 = vadd.f32 %v873_v41, %v367_v38  ;;  %v876_v47 = vadd.f32 %v1486_v27, %v1414_v42 }
 0x13e   : > { %945 = vst [vmem:[#allocation2 + $0x10] sm:$0xff] %v929_v46  ;;  %v930_v48 = vadd.f32 %v876_v47, %v368_v44  ;;  %v1415_v49 = vpop.f32.mrb[8].mxu0  ;;  %v377_v46 = vld [vmem:[#allocation2 + $0x60] sm:$0xff] }
 0x13f   : > { %v1416_v50 = vpop.f32.mrb[9].mxu0 }
 0x140   : > { %946 = vst [vmem:[#allocation2 + $0x18] sm:$0xff] %v930_v48  ;;  %v1417_v51 = vadd.f32 %v1416_v50, %v1415_v49  ;;  %v1418_v52 = vpop.f32.mrb[10].mxu0  ;;  %v1493_v53 = vpop.f32.mrb[8].mxu1  ;;  %v378_v49 = vld [vmem:[#allocation2 + $0x68] sm:$0xff] }
 0x141   : > { %v1419_v54 = vpop.f32.mrb[11].mxu0  ;;  %v896_v56 = vpop.f32.mrb[9].mxu1 }
 0x142   : > { %v1420_v57 = vadd.f32 %v1419_v54, %v1418_v52  ;;  %v881_v58 = vadd.f32 %v1417_v51, %v880_v40  ;;  %v1494_v59 = vpop.f32.mrb[10].mxu1 }
 0x143   : > { %v899_v61 = vpop.f32.mrb[11].mxu1 }
 0x144   : > { %v931_v62 = vadd.f32 %v881_v58, %v369_v55  ;;  %v884_v63 = vadd.f32 %v1420_v57, %v883_v45  ;;  %v379_v57 = vld [vmem:[#allocation2 + $0x70] sm:$0xff] }
 0x146   : > { %947 = vst [vmem:[#allocation2 + $0x20] sm:$0xff] %v931_v62  ;;  %v932_v0 = vadd.f32 %v884_v63, %v370_v60  ;;  %v1421_v1 = vpop.f32.mrb[12].mxu0 }
 0x147   : > { %v1422_v2 = vpop.f32.mrb[13].mxu0 }
 0x148   : > { %948 = vst [vmem:[#allocation2 + $0x28] sm:$0xff] %v932_v0  ;;  %v1423_v3 = vadd.f32 %v1422_v2, %v1421_v1  ;;  %v1424_v4 = vpop.f32.mrb[14].mxu0  ;;  %v1497_v5 = vpop.f32.mrb[12].mxu1  ;;  %v963_v1 = vld [vmem:[#allocation2] sm:$0xff] (!%p1301_p11)  ;;  %v964_v2 = vld [vmem:[#allocation2 + $0x8] sm:$0xff] (!%p1301_p11) }
 0x149   : > { %v1425_v7 = vpop.f32.mrb[15].mxu0  ;;  %v912_v8 = vpop.f32.mrb[13].mxu1 }
 0x14a   : > { %v889_v9 = vadd.f32 %v1489_v37, %v1423_v3  ;;  %v1426_v10 = vadd.f32 %v1425_v7, %v1424_v4  ;;  %v1498_v11 = vpop.f32.mrb[14].mxu1  ;;  %v376_v37 = vld [vmem:[#allocation2 + $0x58] sm:$0xff]  ;;  %v1302_v3 = vld [vmem:[%s1875_s2] ss:$0 sm:$0xff] (!%p1301_p11)  ;;  %v965_v7 = vld [vmem:[#allocation2 + $0x10] sm:$0xff] (!%p1301_p11) }
 0x14b   : > { %v915_v13 = vpop.f32.mrb[15].mxu1  ;;  %v986_v4 = vadd.f32 (!%p1301_p11), %v1302_v3, %v963_v1 }
 0x14c   : > { %v933_v14 = vadd.f32 %v889_v9, %v371_v6  ;;  %v892_v15 = vadd.f32 %v1490_v43, %v1426_v10  ;;  %v987_v6 = vadd.f32 (!%p1301_p11), %v1302_v3, %v964_v2  ;;  %v988_v9 = vadd.f32 (!%p1301_p11), %v1302_v3, %v965_v7 }
 0x14e   : > { %949 = vst [vmem:[#allocation2 + $0x30] sm:$0xff] %v933_v14  ;;  %v934_v16 = vadd.f32 %v892_v15, %v372_v12  ;;  %v1427_v17 = vpop.f32.mrb[16].mxu0  ;;  %v1002_v15 = vmax.f32 (!%p1301_p11), %v986_v4, 0.0 }
 0x14f   : > { %v1428_v18 = vpop.f32.mrb[17].mxu0 }
 0x150   : > { %950 = vst [vmem:[#allocation2 + $0x38] sm:$0xff] %v934_v16  ;;  %v1429_v19 = vadd.f32 %v1428_v18, %v1427_v17  ;;  %v1430_v20 = vpop.f32.mrb[18].mxu0  ;;  %v1003_v16 = vmax.f32 (!%p1301_p11), %v987_v6, 0.0 }
 0x151   : > { %v1431_v21 = vpop.f32.mrb[19].mxu0 }
 0x152   : > { %v1432_v23 = vadd.f32 %v1431_v21, %v1430_v20  ;;  %v897_v24 = vadd.f32 %v1429_v19, %v896_v56 }
 0x154   : > { %v935_v26 = vadd.f32 %v897_v24, %v373_v22  ;;  %v900_v27 = vadd.f32 %v1432_v23, %v899_v61  ;;  %v380_v61 = vld [vmem:[#allocation2 + $0x78] sm:$0xff]  ;;  %v1004_v22 = vmax.f32 (!%p1301_p11), %v988_v9, 0.0 }
 0x156   : > { %951 = vst [vmem:[#allocation2 + $0x40] sm:$0xff] %v935_v26  ;;  %v936_v28 = vadd.f32 %v900_v27, %v374_v25  ;;  %v1433_v29 = vpop.f32.mrb[20].mxu0 }
 0x157   : > { %v1434_v30 = vpop.f32.mrb[21].mxu0  ;;  %v970_v14 = vld [vmem:[#allocation2 + $0x38] sm:$0xff] (!%p1301_p11) }
 0x158   : > { %952 = vst [vmem:[#allocation2 + $0x48] sm:$0xff] %v936_v28  ;;  %v1435_v31 = vadd.f32 %v1434_v30, %v1433_v29  ;;  %v1436_v32 = vpop.f32.mrb[22].mxu0  ;;  %v993_v25 = vadd.f32 (!%p1301_p11), %v1302_v3, %v970_v14  ;;  %v1343_v28 = vpack.c.bf16 (!%p1301_p11), %v1003_v16, %v1002_v15 }
 0x159   : > { %v1437_v34 = vpop.f32.mrb[23].mxu0 }
 0x15a   : > { %v905_v35 = vadd.f32 %v1493_v53, %v1435_v31  ;;  %v1438_v36 = vadd.f32 %v1437_v34, %v1436_v32  ;;  %v1009_v34 = vmax.f32 (!%p1301_p11), %v993_v25, 0.0  ;;  %1344 = vst [vmem:[%s1876_s3] sm:$0xff] (!%p1301_p11), %v1343_v28  }
 0x15c   : > { %v937_v38 = vadd.f32 %v905_v35, %v375_v33  ;;  %v908_v39 = vadd.f32 %v1494_v59, %v1438_v36 }
 0x15d   : > { %v971_v19 = vld [vmem:[#allocation2 + $0x40] sm:$0xff] (!%p1301_p11) }
 0x15e   : > { %953 = vst [vmem:[#allocation2 + $0x50] sm:$0xff] %v937_v38  ;;  %v938_v40 = vadd.f32 %v908_v39, %v376_v37  ;;  %v1439_v41 = vpop.f32.mrb[24].mxu0  ;;  %v994_v31 = vadd.f32 (!%p1301_p11), %v1302_v3, %v971_v19 }
 0x15f   : > { %v1440_v42 = vpop.f32.mrb[25].mxu0  ;;  %v972_v20 = vld [vmem:[#allocation2 + $0x48] sm:$0xff] (!%p1301_p11) }
 0x160   : > { %954 = vst [vmem:[#allocation2 + $0x58] sm:$0xff] %v938_v40  ;;  %v1441_v43 = vadd.f32 %v1440_v42, %v1439_v41  ;;  %v1442_v44 = vpop.f32.mrb[26].mxu0  ;;  %v995_v35 = vadd.f32 (!%p1301_p11), %v1302_v3, %v972_v20  ;;  %v1010_v40 = vmax.f32 (!%p1301_p11), %v994_v31, 0.0 }
 0x161   : > { %v1443_v45 = vpop.f32.mrb[27].mxu0 }
 0x162   : > { %v1444_v47 = vadd.f32 %v1443_v45, %v1442_v44  ;;  %v913_v48 = vadd.f32 %v1441_v43, %v912_v8  ;;  %v967_v8 = vld [vmem:[#allocation2 + $0x20] sm:$0xff] (!%p1301_p11)  ;;  %v1011_v44 = vmax.f32 (!%p1301_p11), %v995_v35, 0.0 }
 0x163   : > { %v990_v12 = vadd.f32 (!%p1301_p11), %v1302_v3, %v967_v8 }
 0x164   : > { %v939_v50 = vadd.f32 %v913_v48, %v377_v46  ;;  %v916_v51 = vadd.f32 %v1444_v47, %v915_v13  ;;  %v969_v13 = vld [vmem:[#allocation2 + $0x30] sm:$0xff] (!%p1301_p11) }
 0x165   : > { %v992_v18 = vadd.f32 (!%p1301_p11), %v1302_v3, %v969_v13  ;;  %v973_v21 = vld [vmem:[#allocation2 + $0x50] sm:$0xff] (!%p1301_p11)  ;;  %v1006_v24 = vmax.f32 (!%p1301_p11), %v990_v12, 0.0 }
 0x166   : > { %955 = vst [vmem:[#allocation2 + $0x60] sm:$0xff] %v939_v50  ;;  %v940_v52 = vadd.f32 %v916_v51, %v378_v49  ;;  %v1445_v53 = vpop.f32.mrb[28].mxu0  ;;  %v996_v36 = vadd.f32 (!%p1301_p11), %v1302_v3, %v973_v21  ;;  %v1363_v51 = vpack.c.bf16 (!%p1301_p11), %v1011_v44, %v1010_v40 }
 0x167   : > { %v1446_v54 = vpop.f32.mrb[29].mxu0  ;;  %v974_v26 = vld [vmem:[#allocation2 + $0x58] sm:$0xff] (!%p1301_p11)  ;;  %v1008_v30 = vmax.f32 (!%p1301_p11), %v992_v18, 0.0 }
 0x168   : > { %956 = vst [vmem:[#allocation2 + $0x68] sm:$0xff] %v940_v52  ;;  %v1447_v55 = vadd.f32 %v1446_v54, %v1445_v53  ;;  %v1448_v56 = vpop.f32.mrb[30].mxu0  ;;  %v997_v41 = vadd.f32 (!%p1301_p11), %v1302_v3, %v974_v26  ;;  %v1012_v45 = vmax.f32 (!%p1301_p11), %v996_v36, 0.0  ;;  %1383 = vst [vmem:[%s1876_s3 + $0x20] sm:$0xff] (!%p1301_p11), %v1363_v51  }
 0x169   : > { %v1449_v58 = vpop.f32.mrb[31].mxu0  ;;  %v1358_v43 = vpack.c.bf16 (!%p1301_p11), %v1009_v34, %v1008_v30 }
 0x16a   : > { %v921_v59 = vadd.f32 %v1497_v5, %v1447_v55  ;;  %v1450_v60 = vadd.f32 %v1449_v58, %v1448_v56  ;;  %962 = sbr.rel (%p1301_p11) target bundleno = 383 (0x17f), region = 66  ;;  %v966_v5 = vld [vmem:[#allocation2 + $0x18] sm:$0xff] (!%p1301_p11)  ;;  %v1013_v47 = vmax.f32 (!%p1301_p11), %v997_v41, 0.0 }
 0x16b   : > { %v989_v10 = vadd.f32 (!%p1301_p11), %v1302_v3, %v966_v5  ;;  %1382 = vst [vmem:[%s1876_s3 + $0x18] sm:$0xff] (!%p1301_p11), %v1358_v43  }
 0x16c   : > { %v941_v62 = vadd.f32 %v921_v59, %v379_v57  ;;  %v924_v63 = vadd.f32 %v1498_v11, %v1450_v60  ;;  %v968_v11 = vld [vmem:[#allocation2 + $0x28] sm:$0xff] (!%p1301_p11)  ;;  %v1368_v53 = vpack.c.bf16 (!%p1301_p11), %v1013_v47, %v1012_v45 }
 0x16d   : > { %v991_v17 = vadd.f32 (!%p1301_p11), %v1302_v3, %v968_v11  ;;  %v1005_v23 = vmax.f32 (!%p1301_p11), %v989_v10, 0.0  ;;  %v975_v27 = vld [vmem:[#allocation2 + $0x60] sm:$0xff] (!%p1301_p11) }
 0x16e   : > { %957 = vst [vmem:[#allocation2 + $0x70] sm:$0xff] %v941_v62  ;;  %v942_v0 = vadd.f32 %v924_v63, %v380_v61  ;;  %v998_v42 = vadd.f32 (!%p1301_p11), %v1302_v3, %v975_v27  ;;  %1384 = vst [vmem:[%s1876_s3 + $0x28] sm:$0xff] (!%p1301_p11), %v1368_v53  }
 0x16f   : > { %v1007_v29 = vmax.f32 (!%p1301_p11), %v991_v17, 0.0  ;;  %v976_v32 = vld [vmem:[#allocation2 + $0x68] sm:$0xff] (!%p1301_p11)  ;;  %v1348_v33 = vpack.c.bf16 (!%p1301_p11), %v1005_v23, %v1004_v22 }
 0x170   : > { %958 = vst [vmem:[#allocation2 + $0x78] sm:$0xff] %v942_v0  ;;  %v999_v46 = vadd.f32 (!%p1301_p11), %v1302_v3, %v976_v32  ;;  %v1014_v48 = vmax.f32 (!%p1301_p11), %v998_v42, 0.0 }
 0x171   : > { %v1353_v39 = vpack.c.bf16 %v1007_v29, %v1006_v24  ;;  %1380 = vst [vmem:[%s1876_s3 + $0x8] sm:$0xff] %v1348_v33  }
 0x172   : > { %v1015_v52 = vmax.f32 %v999_v46, 0.0 }
 0x173   : > { %1381 = vst [vmem:[%s1876_s3 + $0x10] sm:$0xff] %v1353_v39  }
 0x174   : > { %v1373_v56 = vpack.c.bf16 %v1015_v52, %v1014_v48 }
 0x175   : > { %v977_v37 = vld [vmem:[#allocation2 + $0x70] sm:$0xff] }
 0x176   : > { %v1000_v49 = vadd.f32 %v1302_v3, %v977_v37  ;;  %1385 = vst [vmem:[%s1876_s3 + $0x30] sm:$0xff] %v1373_v56  }
 0x177   : > { %v978_v38 = vld [vmem:[#allocation2 + $0x78] sm:$0xff] }
 0x178   : > { %v1001_v50 = vadd.f32 %v1302_v3, %v978_v38  ;;  %v1016_v54 = vmax.f32 %v1000_v49, 0.0 }
 0x17a   : > { %v1017_v55 = vmax.f32 %v1001_v50, 0.0 }
 0x17c   : > { %v1378_v57 = vpack.c.bf16 %v1017_v55, %v1016_v54 }
 0x17e   : > { %1386 = vst [vmem:[%s1876_s3 + $0x38] sm:$0xff] %v1378_v57  }
 0x17f PF: > { %s13_s16 = sadd.s32 1, %s1636_s16   ;;  %s1877_s12 = smov %s1624_s13 }
 0x180   : > { %p10_p12 = scmp.ge.s32.totalorder %s13_s16, 5   ;;  %s1878_s13 = smov %s1694_s20 }
 0x181   : > { %s1879_s14 = smov %s1632_s15  ;;  %s1880_s15 = smov %s1882_s17 }
 0x182   :  { %12 = sbr.rel (!%p10_p12) target bundleno = 3 (0x3), region = 113 }

// kernel: visual_encoder_forward.23
= control target key start
LH: loop header
LB: loop body
LE: loop exit
PB: predicated region body
PF: predicated region fallthrough
CT: control target
= control target key end

     0   :  { %s1830_s15 = smov 0   ;;  %s1832_s16 = smov 0   ;;  %s2086_s0 = inlined_call_operand.vmem [shape: bf16[128,1152], index: 0, kind: input, shape index: {}]   ;;  %s2087_s1 = inlined_call_operand.vmem [shape: bf16[1152,128], index: 1, kind: input, shape index: {}]   ;;  %s2088_s2 = inlined_call_operand.vmem [shape: f32[1,128], index: 2, kind: input, shape index: {}]   ;;  %s2089_s3 = inlined_call_operand.vmem [shape: bf16[128,128], index: 3, kind: input, shape index: {}]   ;;  %s2090_s4 = inlined_call_operand.vmem [shape: bf16[128,128], index: 4, kind: output, shape index: {}]  }
   0x1   :  { %s1834_s17 = smov 0   ;;  %s1836_s18 = smov 0  }
   0x2   :  { %s1838_s19 = smov 0  }
   0x3 LB: > { %s26_s20 = sadd.s32 1, %s1798_s18  ;;  %p49_p1 = scmp.ne.s32.totalorder %s1790_s16, %s1786_s15  ;;  %s1802_s19 = sphi %s1838_s19, %s14_s19   ;;  %s1798_s18 = sphi %s1836_s18, %s2094_s18   ;;  %s1794_s17 = sphi %s1834_s17, %s2093_s17   ;;  %s1790_s16 = sphi %s1832_s16, %s2092_s16   ;;  %s1786_s15 = sphi %s1830_s15, %s2091_s15  }
   0x4   : > { %p27_p0 = scmp.ge.s32.totalorder %s26_s20, 3  ;;  %p50_p2 = scmp.eq.s32.totalorder %s1802_s19, 0 }
   0x5   : > { %s42_s22 = sadd.s32 1, %s1790_s16  ;;  %p1343_p5 = scmp.ge.s32.totalorder %s1802_s19, 3 }
   0x6   : > { %s2096_s20 = smov (%p27_p0, %s26_s20), 0  ;;  %p51_p3 = por %p50_p2, %p49_p1 }
   0x7   : > { %s38_s21 = ssub.s32 %s1798_s18, %s2096_s20  ;;  %203 = sbr.rel (%p1343_p5) target bundleno = 37 (0x25), region = 24 }
   0x8   : > { %p40_p4 = scmp.eq.s32.totalorder %s38_s21, 0 }
   0xa   : > { %s1865_s23 = scalar_select %p40_p4, %s1790_s16, %s42_s22  }
   0xe   : > { %206 = sbr.rel (!%p51_p3) target bundleno = 37 (0x25), region = 28  ;;  %s208_s24 = sand.u32 (%p51_p3), 1, %s1790_s16  }
   0xf   : > { %s1450_s25 = smul.u32 (%p51_p3), 12, %s1798_s18 }
  0x10   : > { %s1665_s26 = smul.u32 (%p51_p3), 192, %s208_s24 }
  0x11   : > { %s1873_s29 = scalar_lea.vmem (%p51_p3), %s2086_s0, %s1450_s25 }
  0x12   : > { %v231_v0 = vld [vmem:[%s1873_s29] sm:$0xff] (%p51_p3)  ;;  %v235_v2 = vld [vmem:[%s1873_s29 + $0x48] sm:$0xff] (%p51_p3)  ;;  %s1878_s30 = scalar_lea.vmem (%p51_p3), [#allocation3], %s1665_s26  ;;  %v239_v4 = vld [vmem:[%s1873_s29 + $0x90] sm:$0xff] (%p51_p3) }
  0x13   : > { %v233_v1 = vld [vmem:[%s1873_s29 + $0x24] sm:$0xff] (%p51_p3)  ;;  %232 = vst [vmem:[%s1878_s30] sm:$0xff] (%p51_p3), %v231_v0  ;;  %236 = vst [vmem:[%s1878_s30 + $0x18] sm:$0xff] (%p51_p3), %v235_v2  ;;  %v237_v3 = vld [vmem:[%s1873_s29 + $0x6c] sm:$0xff] (%p51_p3) }
  0x14   : > { %234 = vst [vmem:[%s1878_s30 + $0xc] sm:$0xff] (%p51_p3), %v233_v1  ;;  %v241_v5 = vld [vmem:[%s1873_s29 + $0xb4] sm:$0xff] (%p51_p3)  ;;  %238 = vst [vmem:[%s1878_s30 + $0x24] sm:$0xff] (%p51_p3), %v237_v3  ;;  %v245_v7 = vld [vmem:[%s1873_s29 + $0xfc] sm:$0xff] (%p51_p3) }
  0x15   : > { %240 = vst [vmem:[%s1878_s30 + $0x30] sm:$0xff] %v239_v4  ;;  %242 = vst [vmem:[%s1878_s30 + $0x3c] sm:$0xff] %v241_v5  ;;  %v243_v6 = vld [vmem:[%s1873_s29 + $0xd8] sm:$0xff]  ;;  %v247_v8 = vld [vmem:[%s1873_s29 + $0x120] sm:$0xff] }
  0x16   : > { %244 = vst [vmem:[%s1878_s30 + $0x48] sm:$0xff] %v243_v6  ;;  %246 = vst [vmem:[%s1878_s30 + $0x54] sm:$0xff] %v245_v7  ;;  %v249_v9 = vld [vmem:[%s1873_s29 + $0x144] sm:$0xff]  ;;  %v253_v11 = vld [vmem:[%s1873_s29 + $0x18c] sm:$0xff] }
  0x17   : > { %248 = vst [vmem:[%s1878_s30 + $0x60] sm:$0xff] %v247_v8  ;;  %v251_v10 = vld [vmem:[%s1873_s29 + $0x168] sm:$0xff]  ;;  %250 = vst [vmem:[%s1878_s30 + $0x6c] sm:$0xff] %v249_v9  ;;  %v255_v12 = vld [vmem:[%s1873_s29 + $0x1b0] sm:$0xff] }
  0x18   : > { %252 = vst [vmem:[%s1878_s30 + $0x78] sm:$0xff] %v251_v10  ;;  %254 = vst [vmem:[%s1878_s30 + $0x84] sm:$0xff] %v253_v11  ;;  %v257_v13 = vld [vmem:[%s1873_s29 + $0x1d4] sm:$0xff]  ;;  %v261_v15 = vld [vmem:[%s1873_s29 + $0x21c] sm:$0xff] }
  0x19   : > { %v259_v14 = vld [vmem:[%s1873_s29 + $0x1f8] sm:$0xff]  ;;  %256 = vst [vmem:[%s1878_s30 + $0x90] sm:$0xff] %v255_v12  ;;  %258 = vst [vmem:[%s1878_s30 + $0x9c] sm:$0xff] %v257_v13  ;;  %v1345_v16 = vld [vmem:[%s1873_s29 + $0x8] sm:$0xf] }
  0x1a   : > { %260 = vst [vmem:[%s1878_s30 + $0xa8] sm:$0xff] %v259_v14  ;;  %v1347_v17 = vld [vmem:[%s1873_s29 + $0x2c] sm:$0xf]  ;;  %262 = vst [vmem:[%s1878_s30 + $0xb4] sm:$0xff] %v261_v15  ;;  %v1349_v18 = vld [vmem:[%s1873_s29 + $0x50] sm:$0xf] }
  0x1b   : > { %1346 = vst [vmem:[%s1878_s30 + $0x8] sm:$0xf] %v1345_v16  ;;  %1348 = vst [vmem:[%s1878_s30 + $0x14] sm:$0xf] %v1347_v17  ;;  %v1351_v19 = vld [vmem:[%s1873_s29 + $0x74] sm:$0xf] }
  0x1c   : > { %v1353_v20 = vld [vmem:[%s1873_s29 + $0x98] sm:$0xf]  ;;  %1350 = vst [vmem:[%s1878_s30 + $0x20] sm:$0xf] %v1349_v18  ;;  %1352 = vst [vmem:[%s1878_s30 + $0x2c] sm:$0xf] %v1351_v19 }
  0x1d   : > { %1354 = vst [vmem:[%s1878_s30 + $0x38] sm:$0xf] %v1353_v20  ;;  %v1355_v21 = vld [vmem:[%s1873_s29 + $0xbc] sm:$0xf]  ;;  %v1357_v22 = vld [vmem:[%s1873_s29 + $0xe0] sm:$0xf] }
  0x1e   : > { %v1359_v23 = vld [vmem:[%s1873_s29 + $0x104] sm:$0xf]  ;;  %1356 = vst [vmem:[%s1878_s30 + $0x44] sm:$0xf] %v1355_v21  ;;  %1358 = vst [vmem:[%s1878_s30 + $0x50] sm:$0xf] %v1357_v22 }
  0x1f   : > { %1360 = vst [vmem:[%s1878_s30 + $0x5c] sm:$0xf] %v1359_v23  ;;  %v1361_v24 = vld [vmem:[%s1873_s29 + $0x128] sm:$0xf]  ;;  %v1363_v25 = vld [vmem:[%s1873_s29 + $0x14c] sm:$0xf] }
  0x20   : > { %v1365_v26 = vld [vmem:[%s1873_s29 + $0x170] sm:$0xf]  ;;  %1362 = vst [vmem:[%s1878_s30 + $0x68] sm:$0xf] %v1361_v24  ;;  %1364 = vst [vmem:[%s1878_s30 + $0x74] sm:$0xf] %v1363_v25 }
  0x21   : > { %1366 = vst [vmem:[%s1878_s30 + $0x80] sm:$0xf] %v1365_v26  ;;  %v1367_v27 = vld [vmem:[%s1873_s29 + $0x194] sm:$0xf]  ;;  %v1369_v28 = vld [vmem:[%s1873_s29 + $0x1b8] sm:$0xf] }
  0x22   : > { %v1371_v29 = vld [vmem:[%s1873_s29 + $0x1dc] sm:$0xf]  ;;  %1368 = vst [vmem:[%s1878_s30 + $0x8c] sm:$0xf] %v1367_v27  ;;  %1370 = vst [vmem:[%s1878_s30 + $0x98] sm:$0xf] %v1369_v28 }
  0x23   : > { %1372 = vst [vmem:[%s1878_s30 + $0xa4] sm:$0xf] %v1371_v29  ;;  %v1373_v30 = vld [vmem:[%s1873_s29 + $0x200] sm:$0xf]  ;;  %v1375_v31 = vld [vmem:[%s1873_s29 + $0x224] sm:$0xf] }
  0x24   : > { %1374 = vst [vmem:[%s1878_s30 + $0xb0] sm:$0xf] %v1373_v30  ;;  %1376 = vst [vmem:[%s1878_s30 + $0xbc] sm:$0xf] %v1375_v31 }
  0x25 PF: > { %p1377_p6 = scmp.ge.s32.totalorder %s1802_s19, 1  ;;  %p318_p7 = scmp.lt.s32.totalorder %s1802_s19, 4 }
  0x27   : > { %p319_p8 = pnand %p1377_p6, %p318_p7 }
  0x28   : > { %s325_s5 = sand.u32 (!%p319_p8), 1, %s1786_s15   ;;  %s374_s6 = smul.u32 (!%p319_p8), 48, %s1794_s17 }
  0x29   : > { %322 = sbr.rel (%p319_p8) target bundleno = 385 (0x181), region = 58  ;;  %p1379_p10 = scmp.ne.s32.totalorder (!%p319_p8), %s1794_s17, 0 }
  0x2a   : > { %s1666_s7 = smul.u32 (!%p319_p8), 192, %s325_s5  ;;  %p375_p9 = scmp.lt.s32.totalorder (!%p319_p8), %s374_s6, 143 }
  0x2c   : > { %s1950_s12 = scalar_lea.vmem (!%p319_p8), [#allocation3], %s1666_s7 }
  0x30   : > { %s2098_s6 = smov (!%p375_p9, %s374_s6), 143  ;;  %408 = sbr.rel (%p1379_p10) target bundleno = 58 (0x3a), region = 66 }
  0x31   : > { %s1378_s8 = sshll.u32 %s2098_s6, 2  ;;  %v1804_v32 = vmov (!%p1379_p10), 0.0  }
  0x32   : > { %s1948_s11 = scalar_lea.vmem %s2087_s1, %s1378_s8  ;;  %409 = vst [vmem:[#allocation2] sm:$0xff] (!%p1379_p10), %v1804_v32  ;;  %410 = vst [vmem:[#allocation2 + $0x8] sm:$0xff] (!%p1379_p10), %v1804_v32 }
  0x33   : > { %411 = vst [vmem:[#allocation2 + $0x10] sm:$0xff] (!%p1379_p10), %v1804_v32  ;;  %412 = vst [vmem:[#allocation2 + $0x18] sm:$0xff] (!%p1379_p10), %v1804_v32 }
  0x34   : > { %413 = vst [vmem:[#allocation2 + $0x20] sm:$0xff] (!%p1379_p10), %v1804_v32  ;;  %414 = vst [vmem:[#allocation2 + $0x28] sm:$0xff] (!%p1379_p10), %v1804_v32 }
  0x35   : > { %415 = vst [vmem:[#allocation2 + $0x30] sm:$0xff] (!%p1379_p10), %v1804_v32  ;;  %416 = vst [vmem:[#allocation2 + $0x38] sm:$0xff] (!%p1379_p10), %v1804_v32 }
  0x36   : > { %417 = vst [vmem:[#allocation2 + $0x40] sm:$0xff] (!%p1379_p10), %v1804_v32  ;;  %418 = vst [vmem:[#allocation2 + $0x48] sm:$0xff] (!%p1379_p10), %v1804_v32 }
  0x37   : > { %419 = vst [vmem:[#allocation2 + $0x50] sm:$0xff] %v1804_v32  ;;  %420 = vst [vmem:[#allocation2 + $0x58] sm:$0xff] %v1804_v32 }
  0x38   : > { %421 = vst [vmem:[#allocation2 + $0x60] sm:$0xff] %v1804_v32  ;;  %422 = vst [vmem:[#allocation2 + $0x68] sm:$0xff] %v1804_v32 }
  0x39   : > { %423 = vst [vmem:[#allocation2 + $0x70] sm:$0xff] %v1804_v32  ;;  %424 = vst [vmem:[#allocation2 + $0x78] sm:$0xff] %v1804_v32 }
  0x3a PF: > { %v1708_v33 = vld [vmem:[%s1948_s11 + $0x40] sm:$0xff]   ;;  %v1711_v36 = vld [vmem:[%s1948_s11 + $0x48] sm:$0xff]   ;;  %v1714_v39 = vld [vmem:[%s1948_s11 + $0x50] sm:$0xff]   ;;  %p1428_p11 = scmp.ne.s32.totalorder %s1794_s17, 2 }
  0x3b   : > { %v1709_v34 = vld [vmem:[%s1948_s11] sm:$0xff]   ;;  %1553 = vmatprep.subr.bf16.mxu0 %v1708_v33  ;;  %v1712_v37 = vld [vmem:[%s1948_s11 + $0x8] sm:$0xff]   ;;  %v1715_v40 = vld [vmem:[%s1948_s11 + $0x10] sm:$0xff]  }
  0x3c   : > { %v1710_v35 = vld [vmem:[%s1948_s11 + $0x80] sm:$0xff]   ;;  %1554 = vmatpush3.bf16.msra.mxu0 %v1709_v34  ;;  %v1713_v38 = vld [vmem:[%s1948_s11 + $0x88] sm:$0xff]   ;;  %v1716_v41 = vld [vmem:[%s1948_s11 + $0x90] sm:$0xff]  }
  0x3d   : > { %1633 = vmatprep.subr.bf16.mxu1 %v1710_v35  ;;  %1555 = vmatprep.subr.bf16.mxu0 %v1711_v36  ;;  %v1717_v42 = vld [vmem:[%s1948_s11 + $0x58] sm:$0xff]   ;;  %v1720_v45 = vld [vmem:[%s1948_s11 + $0x60] sm:$0xff]   ;;  %v1723_v48 = vld [vmem:[%s1948_s11 + $0x68] sm:$0xff]  }
  0x3e   : > { %1634 = vmatpush3.bf16.msra.mxu1 %v1710_v35  ;;  %v1718_v43 = vld [vmem:[%s1948_s11 + $0x18] sm:$0xff]   ;;  %v1722_v46 = vld [vmem:[%s1948_s11 + $0xa0] sm:$0xff]   ;;  %v1725_v49 = vld [vmem:[%s1948_s11 + $0xa8] sm:$0xff]  }
  0x3f   : > { %1635 = vmatprep.subr.bf16.mxu1 %v1713_v38  ;;  %v1719_v44 = vld [vmem:[%s1948_s11 + $0x98] sm:$0xff]   ;;  %v1721_v47 = vld [vmem:[%s1948_s11 + $0x20] sm:$0xff]   ;;  %v1724_v50 = vld [vmem:[%s1948_s11 + $0x28] sm:$0xff]  }
  0x40   : > { %1556 = vmatpush3.bf16.msra.mxu0 %v1712_v37  ;;  %v1726_v51 = vld [vmem:[%s1948_s11 + $0x70] sm:$0xff]   ;;  %v1729_v54 = vld [vmem:[%s1948_s11 + $0x78] sm:$0xff]   ;;  %v1732_v59 = vld [vmem:[%s1950_s12] ss:$12 sps:$4 sm:$0xff]  }
  0x41   : > { %1557 = vmatprep.subr.bf16.mxu0 %v1714_v39  ;;  %v1727_v52 = vld [vmem:[%s1948_s11 + $0x30] sm:$0xff]   ;;  %v1731_v55 = vld [vmem:[%s1948_s11 + $0xb8] sm:$0xff]   ;;  %v1736_v61 = vld [vmem:[%s1950_s12 + $0x20] ss:$12 sps:$4 sm:$0xff]  }
  0x42   : > { %1636 = vmatpush3.bf16.msra.mxu1 %v1713_v38  ;;  %v1728_v53 = vld [vmem:[%s1948_s11 + $0xb0] sm:$0xff]   ;;  %v1730_v58 = vld [vmem:[%s1948_s11 + $0x38] sm:$0xff]   ;;  %v1752_v5 = vld [vmem:[%s1950_s12 + $0x80] ss:$12 sps:$4 sm:$0xff]  }
  0x43   : > { %1637 = vmatprep.subr.bf16.mxu1 %v1716_v41  ;;  %v1734_v56 = vld [vmem:[%s1950_s12 + $0x4] ss:$12 sps:$4 sm:$0xff]   ;;  %v1735_v57 = vld [vmem:[%s1950_s12 + $0x8] ss:$12 sps:$4 sm:$0xff]   ;;  %v1745_v4 = vld [vmem:[%s1950_s12 + $0x4c] ss:$12 sps:$4 sm:$0xff]  }
  0x44   : > { %1558 = vmatpush3.bf16.msra.mxu0 %v1715_v40  ;;  %825 = vmatprep.mubr.bf16.mxu0 %v1734_v56  ;;  %v1737_v60 = vld [vmem:[%s1950_s12 + $0x1c] ss:$12 sps:$4 sm:$0xff]   ;;  %v1743_v62 = vld [vmem:[%s1950_s12 + $0x38] ss:$12 sps:$4 sm:$0xff]   ;;  %v1740_v0 = vld [vmem:[%s1950_s12 + $0x34] ss:$12 sps:$4 sm:$0xff]  }
  0x45   : > { %1559 = vmatprep.subr.bf16.mxu0 %v1717_v42  ;;  %1649 = vmatprep.mubr.bf16.mxu1 %v1735_v57  ;;  %v1739_v63 = vld [vmem:[%s1950_s12 + $0x18] ss:$12 sps:$4 sm:$0xff]   ;;  %v1744_v1 = vld [vmem:[%s1950_s12 + $0x50] ss:$12 sps:$4 sm:$0xff]   ;;  %v1751_v2 = vld [vmem:[%s1950_s12 + $0x68] ss:$12 sps:$4 sm:$0xff]  }
  0x46   : > { %1638 = vmatpush3.bf16.msra.mxu1 %v1716_v41  ;;  %v1742_v3 = vld [vmem:[%s1950_s12 + $0x30] ss:$12 sps:$4 sm:$0xff]   ;;  %v1759_v6 = vld [vmem:[%s1950_s12 + $0x98] ss:$12 sps:$4 sm:$0xff]   ;;  %v1747_v7 = vld [vmem:[%s1950_s12 + $0x48] ss:$12 sps:$4 sm:$0xff]  }
  0x47   : > { %1639 = vmatprep.subr.bf16.mxu1 %v1719_v44  ;;  %v1748_v8 = vld [vmem:[%s1950_s12 + $0x64] ss:$12 sps:$4 sm:$0xff]   ;;  %v1750_v10 = vld [vmem:[%s1950_s12 + $0x60] ss:$12 sps:$4 sm:$0xff]   ;;  %v1753_v11 = vld [vmem:[%s1950_s12 + $0x7c] ss:$12 sps:$4 sm:$0xff]  }
  0x48   : > { %1560 = vmatpush3.bf16.msra.mxu0 %v1718_v43  ;;  %v1760_v9 = vld [vmem:[%s1950_s12 + $0xb0] ss:$12 sps:$4 sm:$0xff]   ;;  %v1755_v12 = vld [vmem:[%s1950_s12 + $0x78] ss:$12 sps:$4 sm:$0xff]   ;;  %v1756_v13 = vld [vmem:[%s1950_s12 + $0x94] ss:$12 sps:$4 sm:$0xff]  }
  0x49   : > { %1561 = vmatprep.subr.bf16.mxu0 %v1720_v45  ;;  %v1758_v14 = vld [vmem:[%s1950_s12 + $0x90] ss:$12 sps:$4 sm:$0xff]   ;;  %v1761_v15 = vld [vmem:[%s1950_s12 + $0xac] ss:$12 sps:$4 sm:$0xff]   ;;  %v1763_v16 = vld [vmem:[%s1950_s12 + $0xa8] ss:$12 sps:$4 sm:$0xff]  }
  0x4a   : > { %1640 = vmatpush3.bf16.msra.mxu1 %v1719_v44  ;;  %v425_v23 = vld [vmem:[#allocation2] sm:$0xff]  ;;  %v426_v28 = vld [vmem:[#allocation2 + $0x8] sm:$0xff]  ;;  %v427_v38 = vld [vmem:[#allocation2 + $0x10] sm:$0xff] }
  0x4b   : > { %1641 = vmatprep.subr.bf16.mxu1 %v1722_v46  ;;  %v428_v44 = vld [vmem:[#allocation2 + $0x18] sm:$0xff] }
  0x4c   : > { %1562 = vmatpush3.bf16.msra.mxu0 %v1721_v47 }
  0x4d   : > { %1563 = vmatprep.subr.bf16.mxu0 %v1723_v48 }
  0x4e   : > { %1642 = vmatpush3.bf16.msra.mxu1 %v1722_v46 }
  0x4f   : > { %1643 = vmatprep.subr.bf16.mxu1 %v1725_v49 }
  0x50   : > { %1564 = vmatpush3.bf16.msra.mxu0 %v1724_v50 }
  0x51   : > { %1565 = vmatprep.subr.bf16.mxu0 %v1726_v51 }
  0x52   : > { %1644 = vmatpush3.bf16.msra.mxu1 %v1725_v49 }
  0x53   : > { %1645 = vmatprep.subr.bf16.mxu1 %v1728_v53 }
  0x54   : > { %1566 = vmatpush3.bf16.msra.mxu0 %v1727_v52 }
  0x55   : > { %1567 = vmatprep.subr.bf16.mxu0 %v1729_v54 }
  0x56   : > { %1646 = vmatpush3.bf16.msra.mxu1 %v1728_v53 }
  0x57   : > { %1647 = vmatprep.subr.bf16.mxu1 %v1731_v55 }
  0x58   : > { %1568 = vmatpush3.bf16.msra.mxu0 %v1730_v58 }
  0x5a   : > { %1648 = vmatpush3.bf16.msra.mxu1 %v1731_v55  ;;  %v429_v55 = vld [vmem:[#allocation2 + $0x20] sm:$0xff] }
  0x5b   : > { %826 = vmatmul.mubr.bf16.vlgmr.msra.gmra.mrb[0].mxu0 %v1732_v59 }
  0x5c   : > { %833 = vmatprep.mubr.bf16.mxu0 %v1737_v60  ;;  %v430_v60 = vld [vmem:[#allocation2 + $0x28] sm:$0xff] }
  0x5d   : > { %1650 = vmatmul.mubr.bf16.vlgmr.msra.gmra.mrb[0].mxu1 %v1736_v61 }
  0x5e   : > { %1653 = vmatprep.mubr.bf16.mxu1 %v1743_v62 }
  0x63   : > { %834 = vmatmul.mubr.bf16.gmra.mrb[4].mxu0 %v1739_v63 }
  0x64   : > { %841 = vmatprep.mubr.bf16.mxu0 %v1740_v0 }
  0x65   : > { %1654 = vmatmul.mubr.bf16.gmra.mrb[4].mxu1 %v1744_v1 }
  0x66   : > { %1657 = vmatprep.mubr.bf16.mxu1 %v1751_v2 }
  0x6b   : > { %842 = vmatmul.mubr.bf16.gmra.mrb[8].mxu0 %v1742_v3 }
  0x6c   : > { %849 = vmatprep.mubr.bf16.mxu0 %v1745_v4 }
  0x6d   : > { %1658 = vmatmul.mubr.bf16.gmra.mrb[8].mxu1 %v1752_v5 }
  0x6e   : > { %1661 = vmatprep.mubr.bf16.mxu1 %v1759_v6  ;;  %v431_v6 = vld [vmem:[#allocation2 + $0x30] sm:$0xff] }
  0x73   : > { %850 = vmatmul.mubr.bf16.gmra.mrb[12].mxu0 %v1747_v7 }
  0x74   : > { %857 = vmatprep.mubr.bf16.mxu0 %v1748_v8 }
  0x75   : > { %1662 = vmatmul.mubr.bf16.gmra.mrb[12].mxu1 %v1760_v9 }
  0x7b   : > { %858 = vmatmul.mubr.bf16.gmra.mrb[16].mxu0 %v1750_v10 }
  0x7c   : > { %865 = vmatprep.mubr.bf16.mxu0 %v1753_v11 }
  0x83   : > { %866 = vmatmul.mubr.bf16.gmra.mrb[20].mxu0 %v1755_v12  ;;  %v432_v12 = vld [vmem:[#allocation2 + $0x38] sm:$0xff] }
  0x84   : > { %873 = vmatprep.mubr.bf16.mxu0 %v1756_v13 }
  0x8b   : > { %874 = vmatmul.mubr.bf16.gmra.mrb[24].mxu0 %v1758_v14 }
  0x8c   : > { %881 = vmatprep.mubr.bf16.mxu0 %v1761_v15 }
  0x93   : > { %882 = vmatmul.mubr.bf16.gmra.mrb[28].mxu0 %v1763_v16 }
 0x12e   : > { %v1569_v17 = vpop.f32.mrb[0].mxu0 }
 0x12f   : > { %v1570_v18 = vpop.f32.mrb[1].mxu0 }
 0x130   : > { %v1571_v19 = vadd.f32 %v1570_v18, %v1569_v17  ;;  %v1572_v20 = vpop.f32.mrb[2].mxu0  ;;  %v1651_v21 = vpop.f32.mrb[0].mxu1 }
 0x131   : > { %v1573_v22 = vpop.f32.mrb[3].mxu0  ;;  %v924_v24 = vpop.f32.mrb[1].mxu1 }
 0x132   : > { %v1574_v25 = vadd.f32 %v1573_v22, %v1572_v20  ;;  %v925_v26 = vadd.f32 %v1571_v19, %v924_v24  ;;  %v1652_v27 = vpop.f32.mrb[2].mxu1  ;;  %v433_v22 = vld [vmem:[#allocation2 + $0x40] sm:$0xff] }
 0x133   : > { %v927_v29 = vpop.f32.mrb[3].mxu1 }
 0x134   : > { %v987_v30 = vadd.f32 %v925_v26, %v425_v23  ;;  %v928_v31 = vadd.f32 %v1574_v25, %v927_v29  ;;  %v434_v25 = vld [vmem:[#allocation2 + $0x48] sm:$0xff] }
 0x136   : > { %1003 = vst [vmem:[#allocation2] sm:$0xff] %v987_v30  ;;  %v988_v32 = vadd.f32 %v928_v31, %v426_v28  ;;  %v1575_v33 = vpop.f32.mrb[4].mxu0 }
 0x137   : > { %v1576_v34 = vpop.f32.mrb[5].mxu0 }
 0x138   : > { %1004 = vst [vmem:[#allocation2 + $0x8] sm:$0xff] %v988_v32  ;;  %v1577_v35 = vadd.f32 %v1576_v34, %v1575_v33  ;;  %v1578_v36 = vpop.f32.mrb[6].mxu0  ;;  %v1655_v37 = vpop.f32.mrb[4].mxu1  ;;  %v435_v33 = vld [vmem:[#allocation2 + $0x50] sm:$0xff] }
 0x139   : > { %v1579_v39 = vpop.f32.mrb[7].mxu0  ;;  %v940_v40 = vpop.f32.mrb[5].mxu1 }
 0x13a   : > { %v933_v41 = vadd.f32 %v1651_v21, %v1577_v35  ;;  %v1580_v42 = vadd.f32 %v1579_v39, %v1578_v36  ;;  %v1656_v43 = vpop.f32.mrb[6].mxu1 }
 0x13b   : > { %v943_v45 = vpop.f32.mrb[7].mxu1 }
 0x13c   : > { %v989_v46 = vadd.f32 %v933_v41, %v427_v38  ;;  %v936_v47 = vadd.f32 %v1652_v27, %v1580_v42 }
 0x13e   : > { %1005 = vst [vmem:[#allocation2 + $0x10] sm:$0xff] %v989_v46  ;;  %v990_v48 = vadd.f32 %v936_v47, %v428_v44  ;;  %v1581_v49 = vpop.f32.mrb[8].mxu0  ;;  %v437_v46 = vld [vmem:[#allocation2 + $0x60] sm:$0xff] }
 0x13f   : > { %v1582_v50 = vpop.f32.mrb[9].mxu0 }
 0x140   : > { %1006 = vst [vmem:[#allocation2 + $0x18] sm:$0xff] %v990_v48  ;;  %v1583_v51 = vadd.f32 %v1582_v50, %v1581_v49  ;;  %v1584_v52 = vpop.f32.mrb[10].mxu0  ;;  %v1659_v53 = vpop.f32.mrb[8].mxu1  ;;  %v438_v49 = vld [vmem:[#allocation2 + $0x68] sm:$0xff] }
 0x141   : > { %v1585_v54 = vpop.f32.mrb[11].mxu0  ;;  %v956_v56 = vpop.f32.mrb[9].mxu1 }
 0x142   : > { %v1586_v57 = vadd.f32 %v1585_v54, %v1584_v52  ;;  %v941_v58 = vadd.f32 %v1583_v51, %v940_v40  ;;  %v1660_v59 = vpop.f32.mrb[10].mxu1 }
 0x143   : > { %v959_v61 = vpop.f32.mrb[11].mxu1 }
 0x144   : > { %v991_v62 = vadd.f32 %v941_v58, %v429_v55  ;;  %v944_v63 = vadd.f32 %v1586_v57, %v943_v45  ;;  %v439_v57 = vld [vmem:[#allocation2 + $0x70] sm:$0xff] }
 0x146   : > { %1007 = vst [vmem:[#allocation2 + $0x20] sm:$0xff] %v991_v62  ;;  %v992_v0 = vadd.f32 %v944_v63, %v430_v60  ;;  %v1587_v1 = vpop.f32.mrb[12].mxu0 }
 0x147   : > { %v1588_v2 = vpop.f32.mrb[13].mxu0 }
 0x148   : > { %1008 = vst [vmem:[#allocation2 + $0x28] sm:$0xff] %v992_v0  ;;  %v1589_v3 = vadd.f32 %v1588_v2, %v1587_v1  ;;  %v1590_v4 = vpop.f32.mrb[14].mxu0  ;;  %v1663_v5 = vpop.f32.mrb[12].mxu1  ;;  %v1023_v1 = vld [vmem:[#allocation2] sm:$0xff] (!%p1428_p11)  ;;  %v1024_v2 = vld [vmem:[#allocation2 + $0x8] sm:$0xff] (!%p1428_p11) }
 0x149   : > { %v1591_v7 = vpop.f32.mrb[15].mxu0  ;;  %v972_v8 = vpop.f32.mrb[13].mxu1 }
 0x14a   : > { %v949_v9 = vadd.f32 %v1655_v37, %v1589_v3  ;;  %v1592_v10 = vadd.f32 %v1591_v7, %v1590_v4  ;;  %v1664_v11 = vpop.f32.mrb[14].mxu1  ;;  %v436_v37 = vld [vmem:[#allocation2 + $0x58] sm:$0xff]  ;;  %v2005_v3 = vld [vmem:[%s2088_s2] ss:$0 sm:$0xff] (!%p1428_p11)  ;;  %v1025_v7 = vld [vmem:[#allocation2 + $0x10] sm:$0xff] (!%p1428_p11) }
 0x14b   : > { %v975_v13 = vpop.f32.mrb[15].mxu1  ;;  %v1046_v4 = vadd.f32 (!%p1428_p11), %v2005_v3, %v1023_v1 }
 0x14c   : > { %v993_v14 = vadd.f32 %v949_v9, %v431_v6  ;;  %v952_v15 = vadd.f32 %v1656_v43, %v1592_v10  ;;  %v1468_v6 = vld [vmem:[%s2089_s3] sm:$0xff] (!%p1428_p11)  }
 0x14d   : > { %v1469_v9 = vunpack.c.l.bf16 (!%p1428_p11), %v1468_v6  ;;  %v1470_v10 = vunpack.c.h.bf16 (!%p1428_p11), %v1468_v6 }
 0x14e   : > { %1009 = vst [vmem:[#allocation2 + $0x30] sm:$0xff] %v993_v14  ;;  %v994_v16 = vadd.f32 %v952_v15, %v432_v12  ;;  %v1593_v17 = vpop.f32.mrb[16].mxu0  ;;  %v1027_v14 = vld [vmem:[#allocation2 + $0x20] sm:$0xff] (!%p1428_p11) }
 0x14f   : > { %v1594_v18 = vpop.f32.mrb[17].mxu0  ;;  %v1028_v15 = vld [vmem:[#allocation2 + $0x28] sm:$0xff] (!%p1428_p11) }
 0x150   : > { %1010 = vst [vmem:[#allocation2 + $0x38] sm:$0xff] %v994_v16  ;;  %v1595_v19 = vadd.f32 %v1594_v18, %v1593_v17  ;;  %v1596_v20 = vpop.f32.mrb[18].mxu0  ;;  %v1050_v18 = vadd.f32 (!%p1428_p11), %v2005_v3, %v1027_v14 }
 0x151   : > { %v1597_v21 = vpop.f32.mrb[19].mxu0 }
 0x152   : > { %v1598_v23 = vadd.f32 %v1597_v21, %v1596_v20  ;;  %v957_v24 = vadd.f32 %v1595_v19, %v956_v56  ;;  %v1051_v19 = vadd.f32 (!%p1428_p11), %v2005_v3, %v1028_v15  ;;  %v1540_v20 = vld [vmem:[%s2089_s3 + $0x10] sm:$0xff] (!%p1428_p11)  }
 0x154   : > { %v995_v26 = vadd.f32 %v957_v24, %v433_v22  ;;  %v960_v27 = vadd.f32 %v1598_v23, %v959_v61  ;;  %v440_v61 = vld [vmem:[#allocation2 + $0x78] sm:$0xff]  ;;  %v1094_v23 = vadd.f32 (!%p1428_p11), %v1469_v9, %v1046_v4 }
 0x155   : > { %v1029_v21 = vld [vmem:[#allocation2 + $0x30] sm:$0xff] (!%p1428_p11) }
 0x156   : > { %1011 = vst [vmem:[#allocation2 + $0x40] sm:$0xff] %v995_v26  ;;  %v996_v28 = vadd.f32 %v960_v27, %v434_v25  ;;  %v1599_v29 = vpop.f32.mrb[20].mxu0  ;;  %v1477_v25 = vunpack.c.l.bf16 (!%p1428_p11), %v1540_v20  ;;  %v1478_v26 = vunpack.c.h.bf16 (!%p1428_p11), %v1540_v20  ;;  %v1541_v27 = vld [vmem:[%s2089_s3 + $0x18] sm:$0xff] (!%p1428_p11)  }
 0x157   : > { %v1600_v30 = vpop.f32.mrb[21].mxu0  ;;  %v1030_v22 = vld [vmem:[#allocation2 + $0x38] sm:$0xff] (!%p1428_p11) }
 0x158   : > { %1012 = vst [vmem:[#allocation2 + $0x48] sm:$0xff] %v996_v28  ;;  %v1601_v31 = vadd.f32 %v1600_v30, %v1599_v29  ;;  %v1602_v32 = vpop.f32.mrb[22].mxu0  ;;  %v1052_v30 = vadd.f32 (!%p1428_p11), %v2005_v3, %v1029_v21 }
 0x159   : > { %v1603_v34 = vpop.f32.mrb[23].mxu0 }
 0x15a   : > { %v965_v35 = vadd.f32 %v1659_v53, %v1601_v31  ;;  %v1604_v36 = vadd.f32 %v1603_v34, %v1602_v32  ;;  %v1053_v31 = vadd.f32 (!%p1428_p11), %v2005_v3, %v1030_v22 }
 0x15c   : > { %v997_v38 = vadd.f32 %v965_v35, %v435_v33  ;;  %v968_v39 = vadd.f32 %v1660_v59, %v1604_v36  ;;  %v1110_v33 = vmax.f32 (!%p1428_p11), %v1094_v23, 0.0  ;;  %v1098_v35 = vadd.f32 (!%p1428_p11), %v1477_v25, %v1050_v18 }
 0x15d   : > { %v1031_v32 = vld [vmem:[#allocation2 + $0x40] sm:$0xff] (!%p1428_p11)  ;;  %v1099_v36 = vadd.f32 (!%p1428_p11), %v1478_v26, %v1051_v19 }
 0x15e   : > { %1013 = vst [vmem:[#allocation2 + $0x50] sm:$0xff] %v997_v38  ;;  %v998_v40 = vadd.f32 %v968_v39, %v436_v37  ;;  %v1605_v41 = vpop.f32.mrb[24].mxu0 }
 0x15f   : > { %v1606_v42 = vpop.f32.mrb[25].mxu0  ;;  %v1032_v37 = vld [vmem:[#allocation2 + $0x48] sm:$0xff] (!%p1428_p11) }
 0x160   : > { %1014 = vst [vmem:[#allocation2 + $0x58] sm:$0xff] %v998_v40  ;;  %v1607_v43 = vadd.f32 %v1606_v42, %v1605_v41  ;;  %v1608_v44 = vpop.f32.mrb[26].mxu0  ;;  %v1481_v40 = vunpack.c.l.bf16 (!%p1428_p11), %v1541_v27  ;;  %v1482_v41 = vunpack.c.h.bf16 (!%p1428_p11), %v1541_v27  ;;  %v1542_v42 = vld [vmem:[%s2089_s3 + $0x20] sm:$0xff] (!%p1428_p11)  }
 0x161   : > { %v1609_v45 = vpop.f32.mrb[27].mxu0 }
 0x162   : > { %v1610_v47 = vadd.f32 %v1609_v45, %v1608_v44  ;;  %v973_v48 = vadd.f32 %v1607_v43, %v972_v8  ;;  %v1026_v8 = vld [vmem:[#allocation2 + $0x18] sm:$0xff] (!%p1428_p11)  ;;  %v1114_v45 = vmax.f32 (!%p1428_p11), %v1098_v35, 0.0 }
 0x163   : > { %v1049_v12 = vadd.f32 (!%p1428_p11), %v2005_v3, %v1026_v8 }
 0x164   : > { %v999_v50 = vadd.f32 %v973_v48, %v437_v46  ;;  %v976_v51 = vadd.f32 %v1610_v47, %v975_v13  ;;  %v1539_v13 = vld [vmem:[%s2089_s3 + $0x8] sm:$0xff] (!%p1428_p11)   ;;  %v1115_v46 = vmax.f32 (!%p1428_p11), %v1099_v36, 0.0  ;;  %v1054_v47 = vadd.f32 (!%p1428_p11), %v2005_v3, %v1031_v32 }
 0x165   : > { %v1473_v16 = vunpack.c.l.bf16 (!%p1428_p11), %v1539_v13  ;;  %v1474_v17 = vunpack.c.h.bf16 (!%p1428_p11), %v1539_v13  ;;  %v1033_v43 = vld [vmem:[#allocation2 + $0x50] sm:$0xff] (!%p1428_p11) }
 0x166   : > { %1015 = vst [vmem:[#allocation2 + $0x60] sm:$0xff] %v999_v50  ;;  %v1000_v52 = vadd.f32 %v976_v51, %v438_v49  ;;  %v1611_v53 = vpop.f32.mrb[28].mxu0  ;;  %v1543_v49 = vld [vmem:[%s2089_s3 + $0x28] sm:$0xff] (!%p1428_p11)   ;;  %v1100_v51 = vadd.f32 (!%p1428_p11), %v1481_v40, %v1052_v30 }
 0x167   : > { %v1612_v54 = vpop.f32.mrb[29].mxu0  ;;  %v1097_v29 = vadd.f32 (!%p1428_p11), %v1474_v17, %v1049_v12  ;;  %v1034_v48 = vld [vmem:[#allocation2 + $0x58] sm:$0xff] (!%p1428_p11)  ;;  %v1490_v4 = vunpack.c.h.bf16 (!%p1428_p11), %v1543_v49 }
 0x168   : > { %1016 = vst [vmem:[#allocation2 + $0x68] sm:$0xff] %v1000_v52  ;;  %v1613_v55 = vadd.f32 %v1612_v54, %v1611_v53  ;;  %v1614_v56 = vpop.f32.mrb[30].mxu0  ;;  %v1101_v52 = vadd.f32 (!%p1428_p11), %v1482_v41, %v1053_v31  ;;  %v1055_v53 = vadd.f32 (!%p1428_p11), %v2005_v3, %v1032_v37  ;;  %v1545_v12 = vld [vmem:[%s2089_s3 + $0x38] sm:$0xff] (!%p1428_p11)  }
 0x169   : > { %v1615_v58 = vpop.f32.mrb[31].mxu0  ;;  %v1113_v39 = vmax.f32 (!%p1428_p11), %v1097_v29, 0.0  ;;  %v1498_v26 = vunpack.c.h.bf16 (!%p1428_p11), %v1545_v12 }
 0x16a   : > { %v981_v59 = vadd.f32 %v1663_v5, %v1613_v55  ;;  %v1616_v60 = vadd.f32 %v1615_v58, %v1614_v56  ;;  %1022 = sbr.rel (%p1428_p11) target bundleno = 385 (0x181), region = 70  ;;  %v1047_v5 = vadd.f32 (!%p1428_p11), %v2005_v3, %v1024_v2  ;;  %v1512_v55 = vpack.c.bf16 (!%p1428_p11), %v1115_v46, %v1114_v45 }
 0x16b   : > { %v1485_v56 = vunpack.c.l.bf16 (!%p1428_p11), %v1542_v42  ;;  %v1056_v58 = vadd.f32 (!%p1428_p11), %v2005_v3, %v1033_v43 }
 0x16c   : > { %v1001_v62 = vadd.f32 %v981_v59, %v439_v57  ;;  %v984_v63 = vadd.f32 %v1664_v11, %v1616_v60  ;;  %v1048_v11 = vadd.f32 (!%p1428_p11), %v2005_v3, %v1025_v7  ;;  %v1095_v24 = vadd.f32 (!%p1428_p11), %v1470_v10, %v1047_v5  ;;  %v1544_v60 = vld [vmem:[%s2089_s3 + $0x30] sm:$0xff] (!%p1428_p11)   ;;  %1547 = vst [vmem:[%s2090_s4 + $0x10] sm:$0xff] (!%p1428_p11), %v1512_v55  }
 0x16d   : > { %v1035_v54 = vld [vmem:[#allocation2 + $0x60] sm:$0xff] (!%p1428_p11)  ;;  %v1486_v57 = vunpack.c.h.bf16 (!%p1428_p11), %v1542_v42  ;;  %v1102_v1 = vadd.f32 (!%p1428_p11), %v1485_v56, %v1054_v47 }
 0x16e   : > { %1017 = vst [vmem:[#allocation2 + $0x70] sm:$0xff] %v1001_v62  ;;  %v1002_v0 = vadd.f32 %v984_v63, %v440_v61  ;;  %v1096_v28 = vadd.f32 (!%p1428_p11), %v1473_v16, %v1048_v11  ;;  %v1111_v34 = vmax.f32 (!%p1428_p11), %v1095_v24, 0.0  ;;  %v1116_v61 = vmax.f32 (!%p1428_p11), %v1100_v51, 0.0 }
 0x16f   : > { %v1036_v59 = vld [vmem:[#allocation2 + $0x68] sm:$0xff] (!%p1428_p11)  ;;  %v1117_v62 = vmax.f32 (!%p1428_p11), %v1101_v52, 0.0  ;;  %v1057_v63 = vadd.f32 (!%p1428_p11), %v2005_v3, %v1034_v48  ;;  %v1103_v2 = vadd.f32 (!%p1428_p11), %v1486_v57, %v1055_v53  ;;  %v1058_v5 = vadd.f32 (!%p1428_p11), %v2005_v3, %v1035_v54 }
 0x170   : > { %1018 = vst [vmem:[#allocation2 + $0x78] sm:$0xff] %v1002_v0  ;;  %v1112_v38 = vmax.f32 (!%p1428_p11), %v1096_v28, 0.0  ;;  %v1502_v44 = vpack.c.bf16 (!%p1428_p11), %v1111_v34, %v1110_v33  ;;  %v1489_v0 = vunpack.c.l.bf16 (!%p1428_p11), %v1543_v49  ;;  %v1059_v10 = vadd.f32 (!%p1428_p11), %v2005_v3, %v1036_v59 }
 0x171   : > { %v1517_v8 = vpack.c.bf16 %v1117_v62, %v1116_v61  ;;  %v1493_v11 = vunpack.c.l.bf16 %v1544_v60  ;;  %v1118_v13 = vmax.f32 %v1102_v1, 0.0  ;;  %v1119_v14 = vmax.f32 %v1103_v2, 0.0 }
 0x172   : > { %v1507_v50 = vpack.c.bf16 %v1113_v39, %v1112_v38  ;;  %1503 = vst [vmem:[%s2090_s4] sm:$0xff] %v1502_v44   ;;  %v1104_v9 = vadd.f32 %v1489_v0, %v1056_v58  ;;  %v1105_v15 = vadd.f32 %v1490_v4, %v1057_v63  ;;  %v1494_v16 = vunpack.c.h.bf16 %v1544_v60 }
 0x173   : > { %1548 = vst [vmem:[%s2090_s4 + $0x18] sm:$0xff] %v1517_v8   ;;  %v1106_v18 = vadd.f32 %v1493_v11, %v1058_v5  ;;  %v1522_v21 = vpack.c.bf16 %v1119_v14, %v1118_v13  ;;  %v1497_v24 = vunpack.c.l.bf16 %v1545_v12 }
 0x174   : > { %1546 = vst [vmem:[%s2090_s4 + $0x8] sm:$0xff] %v1507_v50   ;;  %v1120_v17 = vmax.f32 %v1104_v9, 0.0  ;;  %v1121_v22 = vmax.f32 %v1105_v15, 0.0  ;;  %v1107_v23 = vadd.f32 %v1494_v16, %v1059_v10 }
 0x175   : > { %v1037_v6 = vld [vmem:[#allocation2 + $0x70] sm:$0xff]  ;;  %v1122_v25 = vmax.f32 %v1106_v18, 0.0  ;;  %1549 = vst [vmem:[%s2090_s4 + $0x20] sm:$0xff] %v1522_v21  }
 0x176   : > { %v1060_v19 = vadd.f32 %v2005_v3, %v1037_v6  ;;  %v1527_v27 = vpack.c.bf16 %v1121_v22, %v1120_v17  ;;  %v1123_v28 = vmax.f32 %v1107_v23, 0.0 }
 0x177   : > { %v1038_v7 = vld [vmem:[#allocation2 + $0x78] sm:$0xff] }
 0x178   : > { %v1061_v20 = vadd.f32 %v2005_v3, %v1038_v7  ;;  %v1108_v29 = vadd.f32 %v1497_v24, %v1060_v19  ;;  %1550 = vst [vmem:[%s2090_s4 + $0x28] sm:$0xff] %v1527_v27   ;;  %v1532_v31 = vpack.c.bf16 %v1123_v28, %v1122_v25 }
 0x17a   : > { %v1109_v30 = vadd.f32 %v1498_v26, %v1061_v20  ;;  %v1124_v3 = vmax.f32 %v1108_v29, 0.0  ;;  %1551 = vst [vmem:[%s2090_s4 + $0x30] sm:$0xff] %v1532_v31  }
 0x17c   : > { %v1125_v32 = vmax.f32 %v1109_v30, 0.0 }
 0x17e   : > { %v1537_v33 = vpack.c.bf16 %v1125_v32, %v1124_v3 }
 0x180   : > { %1552 = vst [vmem:[%s2090_s4 + $0x38] sm:$0xff] %v1537_v33  }
 0x181 PF: > { %s14_s19 = sadd.s32 1, %s1802_s19   ;;  %s2091_s15 = smov %s1790_s16 }
 0x182   : > { %p11_p12 = scmp.ge.s32.totalorder %s14_s19, 5   ;;  %s2092_s16 = smov %s1865_s23 }
 0x183   : > { %s2093_s17 = smov %s1798_s18  ;;  %s2094_s18 = smov %s2096_s20 }
 0x184   :  { %13 = sbr.rel (!%p11_p12) target bundleno = 3 (0x3), region = 120 }

// kernel: visual_encoder_forward.26
= control target key start
LH: loop header
LB: loop body
LE: loop exit
PB: predicated region body
PF: predicated region fallthrough
CT: control target
= control target key end

     0   :  { %s1071_s12 = smov 0   ;;  %s1073_s13 = smov 0   ;;  %s1181_s0 = inlined_call_operand.vmem [shape: bf16[32,1152], index: 0, kind: input, shape index: {}]   ;;  %s1182_s1 = inlined_call_operand.vmem [shape: bf16[1152,128], index: 1, kind: input, shape index: {}]   ;;  %s1183_s2 = inlined_call_operand.vmem [shape: f32[1,128], index: 2, kind: input, shape index: {}]   ;;  %s1184_s3 = inlined_call_operand.vmem [shape: bf16[32,128], index: 3, kind: output, shape index: {}]  }
   0x1   :  { %s1075_s14 = smov 0   ;;  %s1077_s15 = smov 0  }
   0x2   :  { %s1079_s16 = smov 0  }
   0x3 LB: > { %s25_s17 = sadd.s32 1, %s1044_s15  ;;  %p48_p1 = scmp.ne.s32.totalorder %s1036_s13, %s1032_s12  ;;  %s1048_s16 = sphi %s1079_s16, %s13_s16   ;;  %s1044_s15 = sphi %s1077_s15, %s1188_s15   ;;  %s1040_s14 = sphi %s1075_s14, %s1187_s14   ;;  %s1036_s13 = sphi %s1073_s13, %s1186_s13   ;;  %s1032_s12 = sphi %s1071_s12, %s1185_s12  }
   0x4   : > { %p26_p0 = scmp.ge.s32.totalorder %s25_s17, 3  ;;  %p49_p2 = scmp.eq.s32.totalorder %s1048_s16, 0 }
   0x5   : > { %s41_s19 = sadd.s32 1, %s1036_s13  ;;  %p808_p5 = scmp.ge.s32.totalorder %s1048_s16, 3 }
   0x6   : > { %s1190_s17 = smov (%p26_p0, %s25_s17), 0  ;;  %p50_p3 = por %p49_p2, %p48_p1 }
   0x7   : > { %s37_s18 = ssub.s32 %s1044_s15, %s1190_s17  ;;  %162 = sbr.rel (%p808_p5) target bundleno = 23 (0x17), region = 20 }
   0x8   : > { %p39_p4 = scmp.eq.s32.totalorder %s37_s18, 0 }
   0xa   : > { %s1106_s20 = scalar_select %p39_p4, %s1036_s13, %s41_s19  }
   0xe   : > { %165 = sbr.rel (!%p50_p3) target bundleno = 23 (0x17), region = 24  ;;  %s167_s21 = sand.u32 (%p50_p3), 1, %s1036_s13  }
   0xf   : > { %s861_s22 = smul.u32 (%p50_p3), 12, %s1044_s15 }
  0x10   : > { %s935_s23 = smul.u32 (%p50_p3), 48, %s167_s21 }
  0x11   : > { %s175_s26 = scalar_lea.vmem (%p50_p3), %s1181_s0, %s861_s22 }
  0x12   : > { %v190_v0 = vld [vmem:[%s175_s26] sm:$0xff] (%p50_p3)  ;;  %v194_v2 = vld [vmem:[%s175_s26 + $0x48] sm:$0xff] (%p50_p3)  ;;  %s169_s27 = scalar_lea.vmem (%p50_p3), [#allocation3], %s935_s23  ;;  %v814_v6 = vld [vmem:[%s175_s26 + $0x50] sm:$0xf] (%p50_p3) }
  0x13   : > { %v192_v1 = vld [vmem:[%s175_s26 + $0x24] sm:$0xff] (%p50_p3)  ;;  %191 = vst [vmem:[%s169_s27] sm:$0xff] (%p50_p3), %v190_v0  ;;  %195 = vst [vmem:[%s169_s27 + $0x18] sm:$0xff] (%p50_p3), %v194_v2  ;;  %v196_v3 = vld [vmem:[%s175_s26 + $0x6c] sm:$0xff] (%p50_p3) }
  0x14   : > { %193 = vst [vmem:[%s169_s27 + $0xc] sm:$0xff] (%p50_p3), %v192_v1  ;;  %v810_v4 = vld [vmem:[%s175_s26 + $0x8] sm:$0xf] (%p50_p3)  ;;  %v812_v5 = vld [vmem:[%s175_s26 + $0x2c] sm:$0xf] (%p50_p3)  ;;  %197 = vst [vmem:[%s169_s27 + $0x24] sm:$0xff] (%p50_p3), %v196_v3 }
  0x15   : > { %811 = vst [vmem:[%s169_s27 + $0x8] sm:$0xf] %v810_v4  ;;  %813 = vst [vmem:[%s169_s27 + $0x14] sm:$0xf] %v812_v5  ;;  %v816_v7 = vld [vmem:[%s175_s26 + $0x74] sm:$0xf] }
  0x16   : > { %815 = vst [vmem:[%s169_s27 + $0x20] sm:$0xf] %v814_v6  ;;  %817 = vst [vmem:[%s169_s27 + $0x2c] sm:$0xf] %v816_v7 }
  0x17 PF: > { %p818_p6 = scmp.ge.s32.totalorder %s1048_s16, 1  ;;  %p229_p7 = scmp.lt.s32.totalorder %s1048_s16, 4 }
  0x19   : > { %p230_p8 = pnand %p818_p6, %p229_p7 }
  0x1a   : > { %s236_s28 = sand.u32 (!%p230_p8), 1, %s1032_s12   ;;  %s275_s29 = smul.u32 (!%p230_p8), 48, %s1040_s14 }
  0x1b   : > { %233 = sbr.rel (%p230_p8) target bundleno = 318 (0x13e), region = 54  ;;  %p820_p10 = scmp.ne.s32.totalorder (!%p230_p8), %s1040_s14, 0 }
  0x1c   : > { %s936_s30 = smul.u32 (!%p230_p8), 48, %s236_s28  ;;  %p276_p9 = scmp.lt.s32.totalorder (!%p230_p8), %s275_s29, 143 }
  0x1e   : > { %s1123_s8 = scalar_lea.vmem (!%p230_p8), [#allocation3], %s936_s30 }
  0x22   : > { %s1192_s29 = smov (!%p276_p9, %s275_s29), 143  ;;  %300 = sbr.rel (%p820_p10) target bundleno = 41 (0x29), region = 62 }
  0x23   : > { %s819_s4 = sshll.u32 %s1192_s29, 2  ;;  %v1050_v8 = vmov (!%p820_p10), 0.0  }
  0x24   : > { %s1121_s7 = scalar_lea.vmem %s1182_s1, %s819_s4  ;;  %301 = vst [vmem:[#allocation2] sm:$0xff] (!%p820_p10), %v1050_v8  ;;  %302 = vst [vmem:[#allocation2 + $0x8] sm:$0xff] (!%p820_p10), %v1050_v8 }
  0x25   : > { %303 = vst [vmem:[#allocation2 + $0x10] sm:$0xff] (!%p820_p10), %v1050_v8  ;;  %304 = vst [vmem:[#allocation2 + $0x18] sm:$0xff] (!%p820_p10), %v1050_v8 }
  0x29 PF: > { %v978_v9 = vld [vmem:[%s1121_s7 + $0x40] sm:$0xff]   ;;  %v981_v12 = vld [vmem:[%s1121_s7 + $0x48] sm:$0xff]   ;;  %v984_v15 = vld [vmem:[%s1121_s7 + $0x50] sm:$0xff]   ;;  %p851_p11 = scmp.ne.s32.totalorder %s1040_s14, 2 }
  0x2a   : > { %v979_v10 = vld [vmem:[%s1121_s7] sm:$0xff]   ;;  %877 = vmatprep.subr.bf16.mxu0 %v978_v9  ;;  %v982_v13 = vld [vmem:[%s1121_s7 + $0x8] sm:$0xff]   ;;  %v985_v16 = vld [vmem:[%s1121_s7 + $0x10] sm:$0xff]  }
  0x2b   : > { %v980_v11 = vld [vmem:[%s1121_s7 + $0x80] sm:$0xff]   ;;  %878 = vmatpush3.bf16.msra.mxu0 %v979_v10  ;;  %v983_v14 = vld [vmem:[%s1121_s7 + $0x88] sm:$0xff]   ;;  %v986_v17 = vld [vmem:[%s1121_s7 + $0x90] sm:$0xff]  }
  0x2c   : > { %915 = vmatprep.subr.bf16.mxu1 %v980_v11  ;;  %879 = vmatprep.subr.bf16.mxu0 %v981_v12  ;;  %v987_v18 = vld [vmem:[%s1121_s7 + $0x58] sm:$0xff]   ;;  %v990_v21 = vld [vmem:[%s1121_s7 + $0x60] sm:$0xff]   ;;  %v993_v24 = vld [vmem:[%s1121_s7 + $0x68] sm:$0xff]  }
  0x2d   : > { %916 = vmatpush3.bf16.msra.mxu1 %v980_v11  ;;  %v988_v19 = vld [vmem:[%s1121_s7 + $0x18] sm:$0xff]   ;;  %v992_v22 = vld [vmem:[%s1121_s7 + $0xa0] sm:$0xff]   ;;  %v995_v25 = vld [vmem:[%s1121_s7 + $0xa8] sm:$0xff]  }
  0x2e   : > { %917 = vmatprep.subr.bf16.mxu1 %v983_v14  ;;  %v989_v20 = vld [vmem:[%s1121_s7 + $0x98] sm:$0xff]   ;;  %v991_v23 = vld [vmem:[%s1121_s7 + $0x20] sm:$0xff]   ;;  %v994_v26 = vld [vmem:[%s1121_s7 + $0x28] sm:$0xff]  }
  0x2f   : > { %880 = vmatpush3.bf16.msra.mxu0 %v982_v13  ;;  %v996_v27 = vld [vmem:[%s1121_s7 + $0x70] sm:$0xff]   ;;  %v999_v30 = vld [vmem:[%s1121_s7 + $0x78] sm:$0xff]   ;;  %v305_v45 = vld [vmem:[#allocation2] sm:$0xff] }
  0x30   : > { %881 = vmatprep.subr.bf16.mxu0 %v984_v15  ;;  %v997_v28 = vld [vmem:[%s1121_s7 + $0x30] sm:$0xff]   ;;  %v1001_v31 = vld [vmem:[%s1121_s7 + $0xb8] sm:$0xff]   ;;  %v306_v50 = vld [vmem:[#allocation2 + $0x8] sm:$0xff] }
  0x31   : > { %918 = vmatpush3.bf16.msra.mxu1 %v983_v14  ;;  %v998_v29 = vld [vmem:[%s1121_s7 + $0xb0] sm:$0xff]   ;;  %v1000_v34 = vld [vmem:[%s1121_s7 + $0x38] sm:$0xff]   ;;  %v852_v5 = vld [vmem:[%s1183_s2] ss:$0 sm:$0xff] (!%p851_p11) }
  0x32   : > { %919 = vmatprep.subr.bf16.mxu1 %v986_v17  ;;  %v1004_v32 = vld [vmem:[%s1123_s8 + $0x4] ss:$12 sps:$4 sm:$0xff]   ;;  %v1005_v33 = vld [vmem:[%s1123_s8 + $0x8] ss:$12 sps:$4 sm:$0xff]   ;;  %v1002_v35 = vld [vmem:[%s1123_s8] ss:$12 sps:$4 sm:$0xff]  }
  0x33   : > { %882 = vmatpush3.bf16.msra.mxu0 %v985_v16  ;;  %573 = vmatprep.mubr.bf16.mxu0 %v1004_v32  ;;  %v1007_v36 = vld [vmem:[%s1123_s8 + $0x1c] ss:$12 sps:$4 sm:$0xff]   ;;  %v1006_v37 = vld [vmem:[%s1123_s8 + $0x20] ss:$12 sps:$4 sm:$0xff]   ;;  %v1009_v38 = vld [vmem:[%s1123_s8 + $0x18] ss:$12 sps:$4 sm:$0xff]  }
  0x34   : > { %883 = vmatprep.subr.bf16.mxu0 %v987_v18  ;;  %931 = vmatprep.mubr.bf16.mxu1 %v1005_v33  ;;  %v307_v59 = vld [vmem:[#allocation2 + $0x10] sm:$0xff]  ;;  %v308_v63 = vld [vmem:[#allocation2 + $0x18] sm:$0xff] }
  0x35   : > { %920 = vmatpush3.bf16.msra.mxu1 %v986_v17 }
  0x36   : > { %921 = vmatprep.subr.bf16.mxu1 %v989_v20 }
  0x37   : > { %884 = vmatpush3.bf16.msra.mxu0 %v988_v19 }
  0x38   : > { %885 = vmatprep.subr.bf16.mxu0 %v990_v21 }
  0x39   : > { %922 = vmatpush3.bf16.msra.mxu1 %v989_v20 }
  0x3a   : > { %923 = vmatprep.subr.bf16.mxu1 %v992_v22 }
  0x3b   : > { %886 = vmatpush3.bf16.msra.mxu0 %v991_v23 }
  0x3c   : > { %887 = vmatprep.subr.bf16.mxu0 %v993_v24 }
  0x3d   : > { %924 = vmatpush3.bf16.msra.mxu1 %v992_v22 }
  0x3e   : > { %925 = vmatprep.subr.bf16.mxu1 %v995_v25 }
  0x3f   : > { %888 = vmatpush3.bf16.msra.mxu0 %v994_v26 }
  0x40   : > { %889 = vmatprep.subr.bf16.mxu0 %v996_v27 }
  0x41   : > { %926 = vmatpush3.bf16.msra.mxu1 %v995_v25 }
  0x42   : > { %927 = vmatprep.subr.bf16.mxu1 %v998_v29 }
  0x43   : > { %890 = vmatpush3.bf16.msra.mxu0 %v997_v28 }
  0x44   : > { %891 = vmatprep.subr.bf16.mxu0 %v999_v30 }
  0x45   : > { %928 = vmatpush3.bf16.msra.mxu1 %v998_v29 }
  0x46   : > { %929 = vmatprep.subr.bf16.mxu1 %v1001_v31 }
  0x47   : > { %892 = vmatpush3.bf16.msra.mxu0 %v1000_v34 }
  0x49   : > { %930 = vmatpush3.bf16.msra.mxu1 %v1001_v31 }
  0x4a   : > { %574 = vmatmul.mubr.bf16.vlgmr.msra.gmra.mrb[0].mxu0 %v1002_v35 }
  0x4b   : > { %581 = vmatprep.mubr.bf16.mxu0 %v1007_v36 }
  0x4c   : > { %932 = vmatmul.mubr.bf16.vlgmr.msra.gmra.mrb[0].mxu1 %v1006_v37 }
  0x52   : > { %582 = vmatmul.mubr.bf16.gmra.mrb[4].mxu0 %v1009_v38 }
 0x11d   : > { %v893_v39 = vpop.f32.mrb[0].mxu0 }
 0x11e   : > { %v894_v40 = vpop.f32.mrb[1].mxu0 }
 0x11f   : > { %v895_v41 = vadd.f32 %v894_v40, %v893_v39  ;;  %v896_v42 = vpop.f32.mrb[2].mxu0  ;;  %v933_v43 = vpop.f32.mrb[0].mxu1 }
 0x120   : > { %v897_v44 = vpop.f32.mrb[3].mxu0  ;;  %v624_v46 = vpop.f32.mrb[1].mxu1 }
 0x121   : > { %v898_v47 = vadd.f32 %v897_v44, %v896_v42  ;;  %v625_v48 = vadd.f32 %v895_v41, %v624_v46  ;;  %v934_v49 = vpop.f32.mrb[2].mxu1 }
 0x122   : > { %v627_v51 = vpop.f32.mrb[3].mxu1 }
 0x123   : > { %v639_v52 = vadd.f32 %v625_v48, %v305_v45  ;;  %v628_v53 = vadd.f32 %v898_v47, %v627_v51 }
 0x125   : > { %643 = vst [vmem:[#allocation2] sm:$0xff] %v639_v52  ;;  %v640_v54 = vadd.f32 %v628_v53, %v306_v50  ;;  %v899_v55 = vpop.f32.mrb[4].mxu0 }
 0x126   : > { %v900_v56 = vpop.f32.mrb[5].mxu0 }
 0x127   : > { %644 = vst [vmem:[#allocation2 + $0x8] sm:$0xff] %v640_v54  ;;  %v901_v57 = vadd.f32 %v900_v56, %v899_v55  ;;  %v902_v58 = vpop.f32.mrb[6].mxu0 }
 0x128   : > { %v903_v60 = vpop.f32.mrb[7].mxu0 }
 0x129   : > { %v633_v61 = vadd.f32 %v933_v43, %v901_v57  ;;  %v904_v62 = vadd.f32 %v903_v60, %v902_v58  ;;  %650 = sbr.rel (%p851_p11) target bundleno = 318 (0x13e), region = 66 }
 0x12b   : > { %v641_v0 = vadd.f32 %v633_v61, %v307_v59  ;;  %v636_v1 = vadd.f32 %v934_v49, %v904_v62 }
 0x12c   : > { %v651_v3 = vld [vmem:[#allocation2] sm:$0xff] (!%p851_p11) }
 0x12d   : > { %645 = vst [vmem:[#allocation2 + $0x10] sm:$0xff] %v641_v0  ;;  %v642_v2 = vadd.f32 %v636_v1, %v308_v63  ;;  %v662_v6 = vadd.f32 (!%p851_p11), %v852_v5, %v651_v3 }
 0x12e   : > { %v652_v4 = vld [vmem:[#allocation2 + $0x8] sm:$0xff] (!%p851_p11) }
 0x12f   : > { %646 = vst [vmem:[#allocation2 + $0x18] sm:$0xff] %v642_v2  ;;  %v663_v7 = vadd.f32 (!%p851_p11), %v852_v5, %v652_v4  ;;  %v666_v12 = vmax.f32 (!%p851_p11), %v662_v6, 0.0 }
 0x131   : > { %v667_v13 = vmax.f32 %v663_v7, 0.0 }
 0x133   : > { %v869_v16 = vpack.c.bf16 %v667_v13, %v666_v12 }
 0x134   : > { %v653_v8 = vld [vmem:[#allocation2 + $0x10] sm:$0xff] }
 0x135   : > { %v664_v10 = vadd.f32 %v852_v5, %v653_v8  ;;  %870 = vst [vmem:[%s1184_s3] sm:$0xff] %v869_v16  }
 0x136   : > { %v654_v9 = vld [vmem:[#allocation2 + $0x18] sm:$0xff] }
 0x137   : > { %v665_v11 = vadd.f32 %v852_v5, %v654_v9  ;;  %v668_v14 = vmax.f32 %v664_v10, 0.0 }
 0x139   : > { %v669_v15 = vmax.f32 %v665_v11, 0.0 }
 0x13b   : > { %v874_v17 = vpack.c.bf16 %v669_v15, %v668_v14 }
 0x13d   : > { %876 = vst [vmem:[%s1184_s3 + $0x8] sm:$0xff] %v874_v17  }
 0x13e PF: > { %s13_s16 = sadd.s32 1, %s1048_s16   ;;  %s1185_s12 = smov %s1036_s13 }
 0x13f   : > { %p10_p12 = scmp.ge.s32.totalorder %s13_s16, 5   ;;  %s1186_s13 = smov %s1106_s20 }
 0x140   : > { %s1187_s14 = smov %s1044_s15  ;;  %s1188_s15 = smov %s1190_s17 }
 0x141   :  { %12 = sbr.rel (!%p10_p12) target bundleno = 3 (0x3), region = 113 }

// kernel: visual_encoder_forward.27
= control target key start
LH: loop header
LB: loop body
LE: loop exit
PB: predicated region body
PF: predicated region fallthrough
CT: control target
= control target key end

     0   :  { %s335_s1 = inlined_call_operand.vmem [shape: bf16[128,128], index: 1, kind: input, shape index: {}]   ;;  %s336_s0 = inlined_call_operand.vmem [shape: bf16[32,128], index: 0, kind: input, shape index: {}]   ;;  %s337_s2 = inlined_call_operand.vmem [shape: f32[1,128], index: 2, kind: input, shape index: {}]   ;;  %s338_s3 = inlined_call_operand.vmem [shape: bf16[32,128], index: 3, kind: output, shape index: {}]  }
   0x1   :  { %v266_v0 = vld [vmem:[%s335_s1] sm:$0xff]   ;;  %v267_v1 = vld [vmem:[%s335_s1 + $0x8] sm:$0xff]   ;;  %v268_v2 = vld [vmem:[%s335_s1 + $0x10] sm:$0xff]  }
   0x2   :  { %246 = vmatprep.subr.bf16.mxu0 %v266_v0  ;;  %v269_v3 = vld [vmem:[%s335_s1 + $0x18] sm:$0xff]   ;;  %v274_v4 = vld [vmem:[%s336_s0] sm:$0xff]   ;;  %v271_v6 = vld [vmem:[%s335_s1 + $0x28] sm:$0xff]  }
   0x3   :  { %247 = vmatpush3.bf16.msra.mxu0 %v266_v0  ;;  %262 = vmatprep.mubr.bf16.mxu0 %v274_v4  ;;  %v270_v5 = vld [vmem:[%s335_s1 + $0x20] sm:$0xff]   ;;  %v272_v7 = vld [vmem:[%s335_s1 + $0x30] sm:$0xff]   ;;  %v273_v8 = vld [vmem:[%s335_s1 + $0x38] sm:$0xff]  }
   0x4   :  { %248 = vmatprep.subr.bf16.mxu0 %v267_v1  ;;  %v275_v9 = vld [vmem:[%s336_s0 + $0x8] sm:$0xff]   ;;  %v216_v11 = vld [vmem:[%s337_s2] ss:$0 sm:$0xff] }
   0x7   :  { %249 = vmatpush3.bf16.msra.mxu0 %v267_v1 }
   0x8   :  { %250 = vmatprep.subr.bf16.mxu0 %v268_v2 }
   0xb   :  { %251 = vmatpush3.bf16.msra.mxu0 %v268_v2 }
   0xc   :  { %252 = vmatprep.subr.bf16.mxu0 %v269_v3 }
   0xf   :  { %253 = vmatpush3.bf16.msra.mxu0 %v269_v3 }
  0x10   :  { %254 = vmatprep.subr.bf16.mxu0 %v270_v5 }
  0x13   :  { %255 = vmatpush3.bf16.msra.mxu0 %v270_v5 }
  0x14   :  { %256 = vmatprep.subr.bf16.mxu0 %v271_v6 }
  0x17   :  { %257 = vmatpush3.bf16.msra.mxu0 %v271_v6 }
  0x18   :  { %258 = vmatprep.subr.bf16.mxu0 %v272_v7 }
  0x1b   :  { %259 = vmatpush3.bf16.msra.mxu0 %v272_v7 }
  0x1c   :  { %260 = vmatprep.subr.bf16.mxu0 %v273_v8 }
  0x1f   :  { %261 = vmatpush3.bf16.msra.mxu0 %v273_v8 }
  0x22   :  { %263 = vmatmul.mubr.bf16.vlgmr.msra.gmra.mrb[0].mxu0 %v275_v9 }
  0xf5   :  { %v264_v10 = vpop.f32.mrb[0].mxu0 }
  0xf6   :  { %v141_v12 = vpop.f32.mrb[1].mxu0  ;;  %v180_v14 = vadd.f32 %v264_v10, %v216_v11 }
  0xf7   :  { %v265_v13 = vpop.f32.mrb[2].mxu0  ;;  %v178_v17 = vadd.f32 %v216_v11, %v141_v12 }
  0xf8   :  { %v181_v15 = vadd.f32 %v265_v13, %v216_v11  ;;  %v144_v16 = vpop.f32.mrb[3].mxu0 }
  0xf9   :  { %v179_v18 = vadd.f32 %v216_v11, %v144_v16 }
  0xfa   :  { %v233_v19 = vpack.c.bf16 %v181_v15, %v180_v14 }
  0xfb   :  { %v228_v20 = vpack.c.bf16 %v179_v18, %v178_v17 }
  0xfc   :  { %235 = vst [vmem:[%s338_s3 + $0x8] sm:$0xff] %v233_v19  }
  0xfd   :  { %229 = vst [vmem:[%s338_s3] sm:$0xff] %v228_v20  }

// kernel: visual_encoder_forward.28
= control target key start
LH: loop header
LB: loop body
LE: loop exit
PB: predicated region body
PF: predicated region fallthrough
CT: control target
= control target key end

     0   :  { %s1176_s15 = smov 0   ;;  %s1178_s16 = smov 0   ;;  %s1292_s0 = inlined_call_operand.vmem [shape: bf16[32,1152], index: 0, kind: input, shape index: {}]   ;;  %s1293_s1 = inlined_call_operand.vmem [shape: bf16[1152,128], index: 1, kind: input, shape index: {}]   ;;  %s1294_s2 = inlined_call_operand.vmem [shape: f32[1,128], index: 2, kind: input, shape index: {}]   ;;  %s1295_s3 = inlined_call_operand.vmem [shape: bf16[32,128], index: 3, kind: input, shape index: {}]   ;;  %s1296_s4 = inlined_call_operand.vmem [shape: bf16[32,128], index: 4, kind: output, shape index: {}]  }
   0x1   :  { %s1180_s17 = smov 0   ;;  %s1182_s18 = smov 0  }
   0x2   :  { %s1184_s19 = smov 0  }
   0x3 LB: > { %s26_s20 = sadd.s32 1, %s1144_s18  ;;  %p49_p1 = scmp.ne.s32.totalorder %s1136_s16, %s1132_s15  ;;  %s1148_s19 = sphi %s1184_s19, %s14_s19   ;;  %s1144_s18 = sphi %s1182_s18, %s1300_s18   ;;  %s1140_s17 = sphi %s1180_s17, %s1299_s17   ;;  %s1136_s16 = sphi %s1178_s16, %s1298_s16   ;;  %s1132_s15 = sphi %s1176_s15, %s1297_s15  }
   0x4   : > { %p27_p0 = scmp.ge.s32.totalorder %s26_s20, 3  ;;  %p50_p2 = scmp.eq.s32.totalorder %s1148_s19, 0 }
   0x5   : > { %s42_s22 = sadd.s32 1, %s1136_s16  ;;  %p899_p5 = scmp.ge.s32.totalorder %s1148_s19, 3 }
   0x6   : > { %s1302_s20 = smov (%p27_p0, %s26_s20), 0  ;;  %p51_p3 = por %p50_p2, %p49_p1 }
   0x7   : > { %s38_s21 = ssub.s32 %s1144_s18, %s1302_s20  ;;  %203 = sbr.rel (%p899_p5) target bundleno = 23 (0x17), region = 24 }
   0x8   : > { %p40_p4 = scmp.eq.s32.totalorder %s38_s21, 0 }
   0xa   : > { %s1211_s23 = scalar_select %p40_p4, %s1136_s16, %s42_s22  }
   0xe   : > { %206 = sbr.rel (!%p51_p3) target bundleno = 23 (0x17), region = 28  ;;  %s208_s24 = sand.u32 (%p51_p3), 1, %s1136_s16  }
   0xf   : > { %s952_s25 = smul.u32 (%p51_p3), 12, %s1144_s18 }
  0x10   : > { %s1035_s26 = smul.u32 (%p51_p3), 48, %s208_s24 }
  0x11   : > { %s216_s29 = scalar_lea.vmem (%p51_p3), %s1292_s0, %s952_s25 }
  0x12   : > { %v231_v0 = vld [vmem:[%s216_s29] sm:$0xff] (%p51_p3)  ;;  %v235_v2 = vld [vmem:[%s216_s29 + $0x48] sm:$0xff] (%p51_p3)  ;;  %s210_s30 = scalar_lea.vmem (%p51_p3), [#allocation3], %s1035_s26  ;;  %v905_v6 = vld [vmem:[%s216_s29 + $0x50] sm:$0xf] (%p51_p3) }
  0x13   : > { %v233_v1 = vld [vmem:[%s216_s29 + $0x24] sm:$0xff] (%p51_p3)  ;;  %232 = vst [vmem:[%s210_s30] sm:$0xff] (%p51_p3), %v231_v0  ;;  %236 = vst [vmem:[%s210_s30 + $0x18] sm:$0xff] (%p51_p3), %v235_v2  ;;  %v237_v3 = vld [vmem:[%s216_s29 + $0x6c] sm:$0xff] (%p51_p3) }
  0x14   : > { %234 = vst [vmem:[%s210_s30 + $0xc] sm:$0xff] (%p51_p3), %v233_v1  ;;  %v901_v4 = vld [vmem:[%s216_s29 + $0x8] sm:$0xf] (%p51_p3)  ;;  %v903_v5 = vld [vmem:[%s216_s29 + $0x2c] sm:$0xf] (%p51_p3)  ;;  %238 = vst [vmem:[%s210_s30 + $0x24] sm:$0xff] (%p51_p3), %v237_v3 }
  0x15   : > { %902 = vst [vmem:[%s210_s30 + $0x8] sm:$0xf] %v901_v4  ;;  %904 = vst [vmem:[%s210_s30 + $0x14] sm:$0xf] %v903_v5  ;;  %v907_v7 = vld [vmem:[%s216_s29 + $0x74] sm:$0xf] }
  0x16   : > { %906 = vst [vmem:[%s210_s30 + $0x20] sm:$0xf] %v905_v6  ;;  %908 = vst [vmem:[%s210_s30 + $0x2c] sm:$0xf] %v907_v7 }
  0x17 PF: > { %p909_p6 = scmp.ge.s32.totalorder %s1148_s19, 1  ;;  %p270_p7 = scmp.lt.s32.totalorder %s1148_s19, 4 }
  0x19   : > { %p271_p8 = pnand %p909_p6, %p270_p7 }
  0x1a   : > { %s277_s5 = sand.u32 (!%p271_p8), 1, %s1132_s15   ;;  %s326_s6 = smul.u32 (!%p271_p8), 48, %s1140_s17 }
  0x1b   : > { %274 = sbr.rel (%p271_p8) target bundleno = 320 (0x140), region = 58  ;;  %p911_p10 = scmp.ne.s32.totalorder (!%p271_p8), %s1140_s17, 0 }
  0x1c   : > { %s1036_s7 = smul.u32 (!%p271_p8), 48, %s277_s5  ;;  %p327_p9 = scmp.lt.s32.totalorder (!%p271_p8), %s326_s6, 143 }
  0x1e   : > { %s1228_s12 = scalar_lea.vmem (!%p271_p8), [#allocation3], %s1036_s7 }
  0x22   : > { %s1304_s6 = smov (!%p327_p9, %s326_s6), 143  ;;  %360 = sbr.rel (%p911_p10) target bundleno = 41 (0x29), region = 66 }
  0x23   : > { %s910_s8 = sshll.u32 %s1304_s6, 2  ;;  %v1150_v8 = vmov (!%p911_p10), 0.0  }
  0x24   : > { %s1226_s11 = scalar_lea.vmem %s1293_s1, %s910_s8  ;;  %361 = vst [vmem:[#allocation2] sm:$0xff] (!%p911_p10), %v1150_v8  ;;  %362 = vst [vmem:[#allocation2 + $0x8] sm:$0xff] (!%p911_p10), %v1150_v8 }
  0x25   : > { %363 = vst [vmem:[#allocation2 + $0x10] sm:$0xff] (!%p911_p10), %v1150_v8  ;;  %364 = vst [vmem:[#allocation2 + $0x18] sm:$0xff] (!%p911_p10), %v1150_v8 }
  0x29 PF: > { %v1078_v9 = vld [vmem:[%s1226_s11 + $0x40] sm:$0xff]   ;;  %v1081_v12 = vld [vmem:[%s1226_s11 + $0x48] sm:$0xff]   ;;  %v1084_v15 = vld [vmem:[%s1226_s11 + $0x50] sm:$0xff]   ;;  %p942_p11 = scmp.ne.s32.totalorder %s1140_s17, 2 }
  0x2a   : > { %v1079_v10 = vld [vmem:[%s1226_s11] sm:$0xff]   ;;  %977 = vmatprep.subr.bf16.mxu0 %v1078_v9  ;;  %v1082_v13 = vld [vmem:[%s1226_s11 + $0x8] sm:$0xff]   ;;  %v1085_v16 = vld [vmem:[%s1226_s11 + $0x10] sm:$0xff]  }
  0x2b   : > { %v1080_v11 = vld [vmem:[%s1226_s11 + $0x80] sm:$0xff]   ;;  %978 = vmatpush3.bf16.msra.mxu0 %v1079_v10  ;;  %v1083_v14 = vld [vmem:[%s1226_s11 + $0x88] sm:$0xff]   ;;  %v1086_v17 = vld [vmem:[%s1226_s11 + $0x90] sm:$0xff]  }
  0x2c   : > { %1015 = vmatprep.subr.bf16.mxu1 %v1080_v11  ;;  %979 = vmatprep.subr.bf16.mxu0 %v1081_v12  ;;  %v1087_v18 = vld [vmem:[%s1226_s11 + $0x58] sm:$0xff]   ;;  %v1090_v21 = vld [vmem:[%s1226_s11 + $0x60] sm:$0xff]   ;;  %v1093_v24 = vld [vmem:[%s1226_s11 + $0x68] sm:$0xff]  }
  0x2d   : > { %1016 = vmatpush3.bf16.msra.mxu1 %v1080_v11  ;;  %v1088_v19 = vld [vmem:[%s1226_s11 + $0x18] sm:$0xff]   ;;  %v1092_v22 = vld [vmem:[%s1226_s11 + $0xa0] sm:$0xff]   ;;  %v1095_v25 = vld [vmem:[%s1226_s11 + $0xa8] sm:$0xff]  }
  0x2e   : > { %1017 = vmatprep.subr.bf16.mxu1 %v1083_v14  ;;  %v1089_v20 = vld [vmem:[%s1226_s11 + $0x98] sm:$0xff]   ;;  %v1091_v23 = vld [vmem:[%s1226_s11 + $0x20] sm:$0xff]   ;;  %v1094_v26 = vld [vmem:[%s1226_s11 + $0x28] sm:$0xff]  }
  0x2f   : > { %980 = vmatpush3.bf16.msra.mxu0 %v1082_v13  ;;  %v1096_v27 = vld [vmem:[%s1226_s11 + $0x70] sm:$0xff]   ;;  %v1099_v30 = vld [vmem:[%s1226_s11 + $0x78] sm:$0xff]   ;;  %v365_v45 = vld [vmem:[#allocation2] sm:$0xff] }
  0x30   : > { %981 = vmatprep.subr.bf16.mxu0 %v1084_v15  ;;  %v1097_v28 = vld [vmem:[%s1226_s11 + $0x30] sm:$0xff]   ;;  %v1101_v31 = vld [vmem:[%s1226_s11 + $0xb8] sm:$0xff]   ;;  %v366_v50 = vld [vmem:[#allocation2 + $0x8] sm:$0xff] }
  0x31   : > { %1018 = vmatpush3.bf16.msra.mxu1 %v1083_v14  ;;  %v1098_v29 = vld [vmem:[%s1226_s11 + $0xb0] sm:$0xff]   ;;  %v1100_v34 = vld [vmem:[%s1226_s11 + $0x38] sm:$0xff]   ;;  %v943_v5 = vld [vmem:[%s1294_s2] ss:$0 sm:$0xff] (!%p942_p11) }
  0x32   : > { %1019 = vmatprep.subr.bf16.mxu1 %v1086_v17  ;;  %v1104_v32 = vld [vmem:[%s1228_s12 + $0x4] ss:$12 sps:$4 sm:$0xff]   ;;  %v1105_v33 = vld [vmem:[%s1228_s12 + $0x8] ss:$12 sps:$4 sm:$0xff]   ;;  %v1102_v35 = vld [vmem:[%s1228_s12] ss:$12 sps:$4 sm:$0xff]  }
  0x33   : > { %982 = vmatpush3.bf16.msra.mxu0 %v1085_v16  ;;  %633 = vmatprep.mubr.bf16.mxu0 %v1104_v32  ;;  %v1107_v36 = vld [vmem:[%s1228_s12 + $0x1c] ss:$12 sps:$4 sm:$0xff]   ;;  %v1106_v37 = vld [vmem:[%s1228_s12 + $0x20] ss:$12 sps:$4 sm:$0xff]   ;;  %v1109_v38 = vld [vmem:[%s1228_s12 + $0x18] ss:$12 sps:$4 sm:$0xff]  }
  0x34   : > { %983 = vmatprep.subr.bf16.mxu0 %v1087_v18  ;;  %1031 = vmatprep.mubr.bf16.mxu1 %v1105_v33  ;;  %v367_v59 = vld [vmem:[#allocation2 + $0x10] sm:$0xff]  ;;  %v368_v63 = vld [vmem:[#allocation2 + $0x18] sm:$0xff]  ;;  %v958_v8 = vld [vmem:[%s1295_s3] sm:$0xff] (!%p942_p11)  }
  0x35   : > { %1020 = vmatpush3.bf16.msra.mxu1 %v1086_v17  ;;  %v959_v11 = vunpack.c.l.bf16 (!%p942_p11), %v958_v8  ;;  %v960_v12 = vunpack.c.h.bf16 (!%p942_p11), %v958_v8  ;;  %v975_v15 = vld [vmem:[%s1295_s3 + $0x8] sm:$0xff] (!%p942_p11)  }
  0x36   : > { %1021 = vmatprep.subr.bf16.mxu1 %v1089_v20  ;;  %v963_v16 = vunpack.c.l.bf16 (!%p942_p11), %v975_v15  ;;  %v964_v17 = vunpack.c.h.bf16 (!%p942_p11), %v975_v15 }
  0x37   : > { %984 = vmatpush3.bf16.msra.mxu0 %v1088_v19 }
  0x38   : > { %985 = vmatprep.subr.bf16.mxu0 %v1090_v21 }
  0x39   : > { %1022 = vmatpush3.bf16.msra.mxu1 %v1089_v20 }
  0x3a   : > { %1023 = vmatprep.subr.bf16.mxu1 %v1092_v22 }
  0x3b   : > { %986 = vmatpush3.bf16.msra.mxu0 %v1091_v23 }
  0x3c   : > { %987 = vmatprep.subr.bf16.mxu0 %v1093_v24 }
  0x3d   : > { %1024 = vmatpush3.bf16.msra.mxu1 %v1092_v22 }
  0x3e   : > { %1025 = vmatprep.subr.bf16.mxu1 %v1095_v25 }
  0x3f   : > { %988 = vmatpush3.bf16.msra.mxu0 %v1094_v26 }
  0x40   : > { %989 = vmatprep.subr.bf16.mxu0 %v1096_v27 }
  0x41   : > { %1026 = vmatpush3.bf16.msra.mxu1 %v1095_v25 }
  0x42   : > { %1027 = vmatprep.subr.bf16.mxu1 %v1098_v29 }
  0x43   : > { %990 = vmatpush3.bf16.msra.mxu0 %v1097_v28 }
  0x44   : > { %991 = vmatprep.subr.bf16.mxu0 %v1099_v30 }
  0x45   : > { %1028 = vmatpush3.bf16.msra.mxu1 %v1098_v29 }
  0x46   : > { %1029 = vmatprep.subr.bf16.mxu1 %v1101_v31 }
  0x47   : > { %992 = vmatpush3.bf16.msra.mxu0 %v1100_v34 }
  0x49   : > { %1030 = vmatpush3.bf16.msra.mxu1 %v1101_v31 }
  0x4a   : > { %634 = vmatmul.mubr.bf16.vlgmr.msra.gmra.mrb[0].mxu0 %v1102_v35 }
  0x4b   : > { %641 = vmatprep.mubr.bf16.mxu0 %v1107_v36 }
  0x4c   : > { %1032 = vmatmul.mubr.bf16.vlgmr.msra.gmra.mrb[0].mxu1 %v1106_v37 }
  0x52   : > { %642 = vmatmul.mubr.bf16.gmra.mrb[4].mxu0 %v1109_v38 }
 0x11d   : > { %v993_v39 = vpop.f32.mrb[0].mxu0 }
 0x11e   : > { %v994_v40 = vpop.f32.mrb[1].mxu0 }
 0x11f   : > { %v995_v41 = vadd.f32 %v994_v40, %v993_v39  ;;  %v996_v42 = vpop.f32.mrb[2].mxu0  ;;  %v1033_v43 = vpop.f32.mrb[0].mxu1 }
 0x120   : > { %v997_v44 = vpop.f32.mrb[3].mxu0  ;;  %v684_v46 = vpop.f32.mrb[1].mxu1 }
 0x121   : > { %v998_v47 = vadd.f32 %v997_v44, %v996_v42  ;;  %v685_v48 = vadd.f32 %v995_v41, %v684_v46  ;;  %v1034_v49 = vpop.f32.mrb[2].mxu1 }
 0x122   : > { %v687_v51 = vpop.f32.mrb[3].mxu1 }
 0x123   : > { %v699_v52 = vadd.f32 %v685_v48, %v365_v45  ;;  %v688_v53 = vadd.f32 %v998_v47, %v687_v51 }
 0x125   : > { %703 = vst [vmem:[#allocation2] sm:$0xff] %v699_v52  ;;  %v700_v54 = vadd.f32 %v688_v53, %v366_v50  ;;  %v999_v55 = vpop.f32.mrb[4].mxu0 }
 0x126   : > { %v1000_v56 = vpop.f32.mrb[5].mxu0 }
 0x127   : > { %704 = vst [vmem:[#allocation2 + $0x8] sm:$0xff] %v700_v54  ;;  %v1001_v57 = vadd.f32 %v1000_v56, %v999_v55  ;;  %v1002_v58 = vpop.f32.mrb[6].mxu0 }
 0x128   : > { %v1003_v60 = vpop.f32.mrb[7].mxu0 }
 0x129   : > { %v693_v61 = vadd.f32 %v1033_v43, %v1001_v57  ;;  %v1004_v62 = vadd.f32 %v1003_v60, %v1002_v58  ;;  %710 = sbr.rel (%p942_p11) target bundleno = 320 (0x140), region = 70 }
 0x12b   : > { %v701_v0 = vadd.f32 %v693_v61, %v367_v59  ;;  %v696_v1 = vadd.f32 %v1034_v49, %v1004_v62 }
 0x12c   : > { %v711_v3 = vld [vmem:[#allocation2] sm:$0xff] (!%p942_p11) }
 0x12d   : > { %705 = vst [vmem:[#allocation2 + $0x10] sm:$0xff] %v701_v0  ;;  %v702_v2 = vadd.f32 %v696_v1, %v368_v63  ;;  %v722_v6 = vadd.f32 (!%p942_p11), %v943_v5, %v711_v3 }
 0x12e   : > { %v712_v4 = vld [vmem:[#allocation2 + $0x8] sm:$0xff] (!%p942_p11) }
 0x12f   : > { %706 = vst [vmem:[#allocation2 + $0x18] sm:$0xff] %v702_v2  ;;  %v723_v7 = vadd.f32 (!%p942_p11), %v943_v5, %v712_v4  ;;  %v734_v18 = vadd.f32 (!%p942_p11), %v959_v11, %v722_v6 }
 0x131   : > { %v735_v19 = vadd.f32 %v960_v12, %v723_v7  ;;  %v738_v22 = vmax.f32 %v734_v18, 0.0 }
 0x133   : > { %v739_v23 = vmax.f32 %v735_v19, 0.0 }
 0x134   : > { %v713_v9 = vld [vmem:[#allocation2 + $0x10] sm:$0xff] }
 0x135   : > { %v724_v13 = vadd.f32 %v943_v5, %v713_v9  ;;  %v968_v26 = vpack.c.bf16 %v739_v23, %v738_v22 }
 0x136   : > { %v714_v10 = vld [vmem:[#allocation2 + $0x18] sm:$0xff] }
 0x137   : > { %v725_v14 = vadd.f32 %v943_v5, %v714_v10  ;;  %v736_v20 = vadd.f32 %v963_v16, %v724_v13  ;;  %969 = vst [vmem:[%s1296_s4] sm:$0xff] %v968_v26  }
 0x139   : > { %v737_v21 = vadd.f32 %v964_v17, %v725_v14  ;;  %v740_v24 = vmax.f32 %v736_v20, 0.0 }
 0x13b   : > { %v741_v25 = vmax.f32 %v737_v21, 0.0 }
 0x13d   : > { %v973_v27 = vpack.c.bf16 %v741_v25, %v740_v24 }
 0x13f   : > { %976 = vst [vmem:[%s1296_s4 + $0x8] sm:$0xff] %v973_v27  }
 0x140 PF: > { %s14_s19 = sadd.s32 1, %s1148_s19   ;;  %s1297_s15 = smov %s1136_s16 }
 0x141   : > { %p11_p12 = scmp.ge.s32.totalorder %s14_s19, 5   ;;  %s1298_s16 = smov %s1211_s23 }
 0x142   : > { %s1299_s17 = smov %s1144_s18  ;;  %s1300_s18 = smov %s1302_s20 }
 0x143   :  { %13 = sbr.rel (!%p11_p12) target bundleno = 3 (0x3), region = 120 }

// kernel: visual_encoder_forward.31
= control target key start
LH: loop header
LB: loop body
LE: loop exit
PB: predicated region body
PF: predicated region fallthrough
CT: control target
= control target key end

     0   :  { %s1036_s12 = smov 0   ;;  %s1038_s13 = smov 0   ;;  %s1135_s0 = inlined_call_operand.vmem [shape: bf16[8,1152], index: 0, kind: input, shape index: {}]   ;;  %s1136_s1 = inlined_call_operand.vmem [shape: bf16[1152,256], index: 1, kind: input, shape index: {}]   ;;  %s1137_s2 = inlined_call_operand.vmem [shape: f32[1,256], index: 2, kind: input, shape index: {}]   ;;  %s1138_s3 = inlined_call_operand.vmem [shape: bf16[8,256], index: 3, kind: output, shape index: {}]  }
   0x1   :  { %s1040_s14 = smov 0  }
   0x2 LB: > { %s25_s15 = sadd.s32 1, %s1008_s13  ;;  %p825_p0 = scmp.ge.s32.totalorder %s1012_s14, 1  ;;  %s1012_s14 = sphi %s1040_s14, %s13_s14   ;;  %s1008_s13 = sphi %s1038_s13, %s1140_s13   ;;  %s1004_s12 = sphi %s1036_s12, %s1139_s12  }
   0x3   : > { %p26_p1 = scmp.ge.s32.totalorder %s25_s15, 3  ;;  %p194_p2 = scmp.lt.s32.totalorder %s1012_s14, 4 }
   0x5   : > { %s1142_s15 = smov (%p26_p1, %s25_s15), 0  ;;  %p195_p3 = pnand %p825_p0, %p194_p2 }
   0x6   : > { %s240_s16 = smul.u32 (!%p195_p3), 3, %s1004_s12  ;;  %p829_p6 = scmp.ne.s32.totalorder (!%p195_p3), %s1004_s12, 0 }
   0x7   : > { %198 = sbr.rel (%p195_p3) target bundleno = 321 (0x141), region = 32 }
   0x8   : > { %s250_s17 = smul.u32 (!%p195_p3), 48, %s1004_s12  ;;  %p243_p4 = scmp.lt.s32.totalorder (!%p195_p3), %s240_s16, 8 }
   0xa   : > { %p252_p5 = scmp.lt.s32.totalorder (!%p195_p3), %s250_s17, 143 }
   0xe   : > { %s1144_s16 = smov (!%p243_p4, %s240_s16), 8  ;;  %s1146_s17 = smov (!%p252_p5, %s250_s17), 143 }
   0xf   : > { %s826_s18 = sshll.u32 %s1144_s16, 2  ;;  %s887_s22 = sshll.u32 %s1146_s17, 3  ;;  %v1014_v0 = vmov (!%p829_p6), 0.0  }
  0x10   : > { %s1061_s21 = scalar_lea.vmem %s1135_s0, %s826_s18  ;;  %s1066_s25 = scalar_lea.vmem %s1136_s1, %s887_s22  ;;  %282 = vst [vmem:[#allocation2] sm:$0xff] (!%p829_p6), %v1014_v0  ;;  %283 = vst [vmem:[#allocation2 + $0x8] sm:$0xff] (!%p829_p6), %v1014_v0 }
  0x11   : > { %281 = sbr.rel (%p829_p6) target bundleno = 24 (0x18), region = 36 }
  0x18 PF: > { %v915_v1 = vld [vmem:[%s1066_s25 + $0x4] ss:$8 sps:$4 sm:$0xff]   ;;  %v917_v2 = vld [vmem:[%s1066_s25] ss:$8 sps:$4 sm:$0xff]   ;;  %v1015_v3 = vmov 0   ;;  %p881_p7 = scmp.ne.s32.totalorder %s1004_s12, 2 }
  0x19   : > { %660 = vmatprep.mubr.bf16.mxu1 %v1015_v3  ;;  %587 = vmatprep.subr.bf16.mxu0 %v915_v1  ;;  %v918_v4 = vld [vmem:[%s1066_s25 + $0x14] ss:$8 sps:$4 sm:$0xff]   ;;  %v920_v5 = vld [vmem:[%s1066_s25 + $0x10] ss:$8 sps:$4 sm:$0xff]   ;;  %v921_v6 = vld [vmem:[%s1066_s25 + $0x24] ss:$8 sps:$4 sm:$0xff]  }
  0x1a   : > { %588 = vmatpush1.bf16.msra.mxu0 %v917_v2  ;;  %v923_v7 = vld [vmem:[%s1066_s25 + $0x20] ss:$8 sps:$4 sm:$0xff]   ;;  %v924_v8 = vld [vmem:[%s1066_s25 + $0x34] ss:$8 sps:$4 sm:$0xff]   ;;  %v926_v9 = vld [vmem:[%s1066_s25 + $0x30] ss:$8 sps:$4 sm:$0xff]  }
  0x1b   : > { %589 = vmatprep.subr.bf16.mxu0 %v918_v4  ;;  %v939_v10 = vld [vmem:[%s1066_s25 + $0x104] ss:$8 sps:$4 sm:$0xff]   ;;  %v941_v11 = vld [vmem:[%s1066_s25 + $0x100] ss:$8 sps:$4 sm:$0xff]   ;;  %v945_v13 = vld [vmem:[%s1066_s25 + $0x114] ss:$8 sps:$4 sm:$0xff]   ;;  %v681_v4 = vlaneseq (!%p881_p7) }
  0x1c   : > { %v927_v12 = vld [vmem:[%s1066_s25 + $0x44] ss:$8 sps:$4 sm:$0xff]   ;;  %628 = vmatprep.subr.bf16.mxu1 %v939_v10  ;;  %v947_v14 = vld [vmem:[%s1066_s25 + $0x110] ss:$8 sps:$4 sm:$0xff]   ;;  %v929_v15 = vld [vmem:[%s1066_s25 + $0x40] ss:$8 sps:$4 sm:$0xff]  }
  0x1d   : > { %629 = vmatpush1.bf16.msra.mxu1 %v941_v11  ;;  %v930_v16 = vld [vmem:[%s1066_s25 + $0x54] ss:$8 sps:$4 sm:$0xff]   ;;  %v951_v17 = vld [vmem:[%s1066_s25 + $0x124] ss:$8 sps:$4 sm:$0xff]   ;;  %v953_v18 = vld [vmem:[%s1066_s25 + $0x120] ss:$8 sps:$4 sm:$0xff]  }
  0x1e   : > { %590 = vmatpush1.bf16.msra.mxu0 %v920_v5  ;;  %630 = vmatprep.subr.bf16.mxu1 %v945_v13  ;;  %v932_v19 = vld [vmem:[%s1066_s25 + $0x50] ss:$8 sps:$4 sm:$0xff]   ;;  %v957_v20 = vld [vmem:[%s1066_s25 + $0x134] ss:$8 sps:$4 sm:$0xff]   ;;  %v933_v21 = vld [vmem:[%s1066_s25 + $0x64] ss:$8 sps:$4 sm:$0xff]  }
  0x1f   : > { %591 = vmatprep.subr.bf16.mxu0 %v921_v6  ;;  %v959_v22 = vld [vmem:[%s1066_s25 + $0x130] ss:$8 sps:$4 sm:$0xff]   ;;  %v935_v23 = vld [vmem:[%s1066_s25 + $0x60] ss:$8 sps:$4 sm:$0xff]   ;;  %v963_v24 = vld [vmem:[%s1066_s25 + $0x144] ss:$8 sps:$4 sm:$0xff]  }
  0x20   : > { %v936_v25 = vld [vmem:[%s1066_s25 + $0x74] ss:$8 sps:$4 sm:$0xff]   ;;  %v965_v26 = vld [vmem:[%s1066_s25 + $0x140] ss:$8 sps:$4 sm:$0xff]   ;;  %v938_v27 = vld [vmem:[%s1066_s25 + $0x70] ss:$8 sps:$4 sm:$0xff]  }
  0x21   : > { %631 = vmatpush1.bf16.msra.mxu1 %v947_v14  ;;  %v969_v28 = vld [vmem:[%s1066_s25 + $0x154] ss:$8 sps:$4 sm:$0xff]   ;;  %v942_v29 = vld [vmem:[%s1066_s25 + $0x84] ss:$8 sps:$4 sm:$0xff]   ;;  %v971_v30 = vld [vmem:[%s1066_s25 + $0x150] ss:$8 sps:$4 sm:$0xff]  }
  0x22   : > { %592 = vmatpush1.bf16.msra.mxu0 %v923_v7  ;;  %632 = vmatprep.subr.bf16.mxu1 %v951_v17  ;;  %v944_v31 = vld [vmem:[%s1066_s25 + $0x80] ss:$8 sps:$4 sm:$0xff]   ;;  %v975_v32 = vld [vmem:[%s1066_s25 + $0x164] ss:$8 sps:$4 sm:$0xff]   ;;  %v948_v33 = vld [vmem:[%s1066_s25 + $0x94] ss:$8 sps:$4 sm:$0xff]  }
  0x23   : > { %593 = vmatprep.subr.bf16.mxu0 %v924_v8  ;;  %v286_v34 = vld [vmem:[%s1061_s21] sm:$0xff]  ;;  %v950_v37 = vld [vmem:[%s1066_s25 + $0x90] ss:$8 sps:$4 sm:$0xff]   ;;  %v981_v38 = vld [vmem:[%s1066_s25 + $0x174] ss:$8 sps:$4 sm:$0xff]   ;;  %v682_v5 = vshrl.u32 (!%p881_p7), %v681_v4, 7 }
  0x24   : > { %v831_v35 = vcombine.high %v286_v34, %v286_v34  ;;  %v977_v36 = vld [vmem:[%s1066_s25 + $0x160] ss:$8 sps:$4 sm:$0xff]   ;;  %v954_v39 = vld [vmem:[%s1066_s25 + $0xa4] ss:$8 sps:$4 sm:$0xff]   ;;  %v983_v40 = vld [vmem:[%s1066_s25 + $0x170] ss:$8 sps:$4 sm:$0xff]   ;;  %v830_v53 = vcombine.low %v286_v34, %v286_v34 }
  0x25   : > { %633 = vmatpush1.bf16.msra.mxu1 %v953_v18  ;;  %v956_v41 = vld [vmem:[%s1066_s25 + $0xa0] ss:$8 sps:$4 sm:$0xff]   ;;  %v960_v42 = vld [vmem:[%s1066_s25 + $0xb4] ss:$8 sps:$4 sm:$0xff]   ;;  %v962_v44 = vld [vmem:[%s1066_s25 + $0xb0] ss:$8 sps:$4 sm:$0xff]  }
  0x26   : > { %594 = vmatpush1.bf16.msra.mxu0 %v926_v9  ;;  %634 = vmatprep.subr.bf16.mxu1 %v957_v20  ;;  %v987_v43 = vld [vmem:[%s1061_s21 + $0x8] ss:$0 sps:$4 sm:$0xff]   ;;  %v966_v45 = vld [vmem:[%s1066_s25 + $0xc4] ss:$8 sps:$4 sm:$0xff]   ;;  %v972_v47 = vld [vmem:[%s1066_s25 + $0xd4] ss:$8 sps:$4 sm:$0xff]  }
  0x27   : > { %595 = vmatprep.subr.bf16.mxu0 %v927_v12  ;;  %619 = vmatprep.mubr.bf16.mxu0 %v831_v35  ;;  %v968_v46 = vld [vmem:[%s1066_s25 + $0xc0] ss:$8 sps:$4 sm:$0xff]   ;;  %v974_v48 = vld [vmem:[%s1066_s25 + $0xd0] ss:$8 sps:$4 sm:$0xff]   ;;  %v978_v49 = vld [vmem:[%s1066_s25 + $0xe4] ss:$8 sps:$4 sm:$0xff]  }
  0x28   : > { %v980_v50 = vld [vmem:[%s1066_s25 + $0xe0] ss:$8 sps:$4 sm:$0xff]   ;;  %v984_v51 = vld [vmem:[%s1066_s25 + $0xf4] ss:$8 sps:$4 sm:$0xff]   ;;  %v986_v52 = vld [vmem:[%s1066_s25 + $0xf0] ss:$8 sps:$4 sm:$0xff]  }
  0x29   : > { %635 = vmatpush1.bf16.msra.mxu1 %v959_v22  ;;  %v284_v58 = vld [vmem:[#allocation2] sm:$0xff]  ;;  %v285_v61 = vld [vmem:[#allocation2 + $0x8] sm:$0xff]  ;;  %v683_v7 = vsub.s32 (!%p881_p7), 0, %v682_v5  ;;  %v687_v8 = vsub.s32 (!%p881_p7), 1, %v682_v5 }
  0x2a   : > { %596 = vmatpush1.bf16.msra.mxu0 %v929_v15  ;;  %636 = vmatprep.subr.bf16.mxu1 %v963_v24  ;;  %v679_v6 = vld [vmem:[%s1137_s2] sm:$0x3] (!%p881_p7) }
  0x2b   : > { %597 = vmatprep.subr.bf16.mxu0 %v930_v16  ;;  %v684_v11 = vrot.slane (!%p881_p7), %v679_v6, %v683_v7  ;;  %v688_v12 = vrot.slane (!%p881_p7), %v679_v6, %v687_v8 }
  0x2d   : > { %637 = vmatpush1.bf16.msra.mxu1 %v965_v26 }
  0x2e   : > { %598 = vmatpush1.bf16.msra.mxu0 %v932_v19  ;;  %638 = vmatprep.subr.bf16.mxu1 %v969_v28 }
  0x2f   : > { %599 = vmatprep.subr.bf16.mxu0 %v933_v21 }
  0x31   : > { %639 = vmatpush1.bf16.msra.mxu1 %v971_v30 }
  0x32   : > { %600 = vmatpush1.bf16.msra.mxu0 %v935_v23  ;;  %640 = vmatprep.subr.bf16.mxu1 %v975_v32 }
  0x33   : > { %601 = vmatprep.subr.bf16.mxu0 %v936_v25 }
  0x35   : > { %641 = vmatpush1.bf16.msra.mxu1 %v977_v36 }
  0x36   : > { %602 = vmatpush1.bf16.msra.mxu0 %v938_v27  ;;  %642 = vmatprep.subr.bf16.mxu1 %v981_v38 }
  0x37   : > { %603 = vmatprep.subr.bf16.mxu0 %v942_v29 }
  0x39   : > { %643 = vmatpush1.bf16.msra.mxu1 %v983_v40 }
  0x3a   : > { %604 = vmatpush1.bf16.msra.mxu0 %v944_v31 }
  0x3b   : > { %605 = vmatprep.subr.bf16.mxu0 %v948_v33 }
  0x3c   : > { %661 = vmatmul.mubr.bf16.vlgmr.msra.gmra.mrb[0].mxu1 %v987_v43 }
  0x3e   : > { %606 = vmatpush1.bf16.msra.mxu0 %v950_v37 }
  0x3f   : > { %607 = vmatprep.subr.bf16.mxu0 %v954_v39 }
  0x42   : > { %608 = vmatpush1.bf16.msra.mxu0 %v956_v41 }
  0x43   : > { %609 = vmatprep.subr.bf16.mxu0 %v960_v42 }
  0x46   : > { %610 = vmatpush1.bf16.msra.mxu0 %v962_v44 }
  0x47   : > { %611 = vmatprep.subr.bf16.mxu0 %v966_v45 }
  0x4a   : > { %612 = vmatpush1.bf16.msra.mxu0 %v968_v46 }
  0x4b   : > { %613 = vmatprep.subr.bf16.mxu0 %v972_v47 }
  0x4e   : > { %614 = vmatpush1.bf16.msra.mxu0 %v974_v48 }
  0x4f   : > { %615 = vmatprep.subr.bf16.mxu0 %v978_v49 }
  0x52   : > { %616 = vmatpush1.bf16.msra.mxu0 %v980_v50 }
  0x53   : > { %617 = vmatprep.subr.bf16.mxu0 %v984_v51 }
  0x56   : > { %618 = vmatpush1.bf16.msra.mxu0 %v986_v52 }
  0x59   : > { %620 = vmatmul.mubr.bf16.vlgmr.msra.gmra.mrb[0].mxu0 %v830_v53 }
 0x10f   : > { %v662_v54 = vpop.f32.mrb[0].mxu1 }
 0x110   : > { %v664_v55 = vpop.f32.mrb[1].mxu1 }
 0x111   : > { %v666_v56 = vpop.f32.mrb[2].mxu1 }
 0x112   : > { %v667_v57 = vpop.f32.mrb[3].mxu1 }
 0x12c   : > { %v621_v59 = vpop.f32.mrb[0].mxu0  ;;  %676 = sbr.rel (%p881_p7) target bundleno = 321 (0x141), region = 40 }
 0x12d   : > { %v663_v60 = vadd.f32 %v662_v54, %v621_v59  ;;  %v623_v62 = vpop.f32.mrb[1].mxu0 }
 0x12e   : > { %v665_v63 = vadd.f32 %v664_v55, %v623_v62  ;;  %v625_v0 = vpop.f32.mrb[2].mxu0 }
 0x12f   : > { %v669_v1 = vadd.f32 %v663_v60, %v284_v58  ;;  %v626_v2 = vpop.f32.mrb[3].mxu0 }
 0x130   : > { %v670_v3 = vadd.f32 %v665_v63, %v285_v61 }
 0x131   : > { %671 = vst [vmem:[#allocation2] sm:$0xff] %v669_v1 }
 0x132   : > { %672 = vst [vmem:[#allocation2 + $0x8] sm:$0xff] %v670_v3 }
 0x138   : > { %v677_v9 = vld [vmem:[#allocation2] sm:$0xff] }
 0x139   : > { %v678_v10 = vld [vmem:[#allocation2 + $0x8] sm:$0xff]  ;;  %v691_v13 = vadd.f32 %v684_v11, %v677_v9 }
 0x13a   : > { %v692_v14 = vadd.f32 %v688_v12, %v678_v10 }
 0x13b   : > { %v693_v15 = vmax.f32 %v691_v13, 0.0 }
 0x13c   : > { %v694_v16 = vmax.f32 %v692_v14, 0.0 }
 0x13e   : > { %v888_v17 = vpack.c.bf16 %v694_v16, %v693_v15 }
 0x140   : > { %703 = vst [vmem:[%s1138_s3] sm:$0xff] %v888_v17 }
 0x141 PF: > { %s13_s14 = sadd.s32 1, %s1012_s14   ;;  %s1139_s12 = smov %s1008_s13 }
 0x142   : > { %p10_p8 = scmp.ge.s32.totalorder %s13_s14, 5   ;;  %s1140_s13 = smov %s1142_s15 }
 0x144   :  { %12 = sbr.rel (!%p10_p8) target bundleno = 2 (0x2), region = 76 }

// kernel: visual_encoder_forward.32
= control target key start
LH: loop header
LB: loop body
LE: loop exit
PB: predicated region body
PF: predicated region fallthrough
CT: control target
= control target key end

     0   :  { %v240_v1 = vmov 0   ;;  %v172_v18 = vlaneseq  ;;  %s318_s1 = inlined_call_operand.vmem [shape: bf16[128,256], index: 1, kind: input, shape index: {}]   ;;  %s319_s0 = inlined_call_operand.vmem [shape: bf16[8,128], index: 0, kind: input, shape index: {}]   ;;  %s320_s2 = inlined_call_operand.vmem [shape: f32[1,256], index: 2, kind: input, shape index: {}]   ;;  %s321_s3 = inlined_call_operand.vmem [shape: bf16[8,256], index: 3, kind: output, shape index: {}]  }
   0x1   :  { %v216_v0 = vld [vmem:[%s318_s1 + $0x4] ss:$8 sps:$4 sm:$0xff]   ;;  %152 = vmatprep.mubr.bf16.mxu0 %v240_v1  ;;  %v218_v2 = vld [vmem:[%s318_s1] ss:$8 sps:$4 sm:$0xff]   ;;  %v219_v3 = vld [vmem:[%s318_s1 + $0x14] ss:$8 sps:$4 sm:$0xff]  }
   0x2   :  { %120 = vmatprep.subr.bf16.mxu0 %v216_v0  ;;  %v221_v4 = vld [vmem:[%s318_s1 + $0x10] ss:$8 sps:$4 sm:$0xff]   ;;  %v222_v5 = vld [vmem:[%s318_s1 + $0x24] ss:$8 sps:$4 sm:$0xff]   ;;  %v224_v6 = vld [vmem:[%s318_s1 + $0x20] ss:$8 sps:$4 sm:$0xff]  }
   0x3   :  { %121 = vmatpush1.bf16.msra.mxu0 %v218_v2  ;;  %v225_v7 = vld [vmem:[%s318_s1 + $0x34] ss:$8 sps:$4 sm:$0xff]   ;;  %v227_v8 = vld [vmem:[%s318_s1 + $0x30] ss:$8 sps:$4 sm:$0xff]   ;;  %v228_v9 = vld [vmem:[%s318_s1 + $0x44] ss:$8 sps:$4 sm:$0xff]  }
   0x4   :  { %122 = vmatprep.subr.bf16.mxu0 %v219_v3  ;;  %v230_v10 = vld [vmem:[%s318_s1 + $0x40] ss:$8 sps:$4 sm:$0xff]   ;;  %v231_v11 = vld [vmem:[%s318_s1 + $0x54] ss:$8 sps:$4 sm:$0xff]   ;;  %v233_v12 = vld [vmem:[%s318_s1 + $0x50] ss:$8 sps:$4 sm:$0xff]  }
   0x5   :  { %v234_v13 = vld [vmem:[%s318_s1 + $0x64] ss:$8 sps:$4 sm:$0xff]   ;;  %v236_v14 = vld [vmem:[%s318_s1 + $0x60] ss:$8 sps:$4 sm:$0xff]   ;;  %v237_v15 = vld [vmem:[%s318_s1 + $0x74] ss:$8 sps:$4 sm:$0xff]  }
   0x6   :  { %v239_v16 = vld [vmem:[%s318_s1 + $0x70] ss:$8 sps:$4 sm:$0xff]   ;;  %v23_v17 = vld [vmem:[%s319_s0] sm:$0xf]  ;;  %v173_v19 = vshrl.u32 %v172_v18, 7 }
   0x7   :  { %123 = vmatpush1.bf16.msra.mxu0 %v221_v4  ;;  %v170_v21 = vld [vmem:[%s320_s2] sm:$0x3] }
   0x8   :  { %124 = vmatprep.subr.bf16.mxu0 %v222_v5  ;;  %v174_v20 = vsub.s32 0, %v173_v19  ;;  %v178_v22 = vsub.s32 1, %v173_v19 }
   0xa   :  { %v175_v23 = vrot.slane %v170_v21, %v174_v20  ;;  %v179_v24 = vrot.slane %v170_v21, %v178_v22 }
   0xb   :  { %125 = vmatpush1.bf16.msra.mxu0 %v224_v6 }
   0xc   :  { %126 = vmatprep.subr.bf16.mxu0 %v225_v7 }
   0xf   :  { %127 = vmatpush1.bf16.msra.mxu0 %v227_v8 }
  0x10   :  { %128 = vmatprep.subr.bf16.mxu0 %v228_v9 }
  0x13   :  { %129 = vmatpush1.bf16.msra.mxu0 %v230_v10 }
  0x14   :  { %130 = vmatprep.subr.bf16.mxu0 %v231_v11 }
  0x17   :  { %131 = vmatpush1.bf16.msra.mxu0 %v233_v12 }
  0x18   :  { %132 = vmatprep.subr.bf16.mxu0 %v234_v13 }
  0x1b   :  { %133 = vmatpush1.bf16.msra.mxu0 %v236_v14 }
  0x1c   :  { %134 = vmatprep.subr.bf16.mxu0 %v237_v15 }
  0x1f   :  { %135 = vmatpush1.bf16.msra.mxu0 %v239_v16 }
  0x22   :  { %153 = vmatmul.mubr.bf16.vlgmr.msra.gmra.mrb[0].mxu0 %v23_v17 }
  0xf5   :  { %v154_v25 = vpop.f32.mrb[0].mxu0 }
  0xf6   :  { %v182_v26 = vadd.f32 %v175_v23, %v154_v25  ;;  %v156_v27 = vpop.f32.mrb[1].mxu0 }
  0xf7   :  { %v183_v28 = vadd.f32 %v179_v24, %v156_v27  ;;  %v158_v29 = vpop.f32.mrb[2].mxu0 }
  0xf8   :  { %v159_v30 = vpop.f32.mrb[3].mxu0 }
  0xf9   :  { %v214_v31 = vpack.c.bf16 %v183_v28, %v182_v26 }
  0xfb   :  { %192 = vst [vmem:[%s321_s3] sm:$0xff] %v214_v31 }

// kernel: visual_encoder_forward.33
= control target key start
LH: loop header
LB: loop body
LE: loop exit
PB: predicated region body
PF: predicated region fallthrough
CT: control target
= control target key end

     0   :  { %s1131_s15 = smov 0   ;;  %s1133_s16 = smov 0   ;;  %s1233_s0 = inlined_call_operand.vmem [shape: bf16[8,2304], index: 0, kind: input, shape index: {}]   ;;  %s1234_s1 = inlined_call_operand.vmem [shape: bf16[2304,256], index: 1, kind: input, shape index: {}]   ;;  %s1235_s2 = inlined_call_operand.vmem [shape: f32[1,256], index: 2, kind: input, shape index: {}]   ;;  %s1236_s3 = inlined_call_operand.vmem [shape: bf16[8,256], index: 3, kind: input, shape index: {}]   ;;  %s1237_s4 = inlined_call_operand.vmem [shape: bf16[8,256], index: 4, kind: output, shape index: {}]  }
   0x1   :  { %s1135_s17 = smov 0  }
   0x2 LB: > { %s26_s18 = sadd.s32 1, %s1098_s16  ;;  %p915_p0 = scmp.ge.s32.totalorder %s1102_s17, 1  ;;  %s1102_s17 = sphi %s1135_s17, %s14_s17   ;;  %s1098_s16 = sphi %s1133_s16, %s1239_s16   ;;  %s1094_s15 = sphi %s1131_s15, %s1238_s15  }
   0x3   : > { %p27_p1 = scmp.ge.s32.totalorder %s26_s18, 6  ;;  %p236_p2 = scmp.lt.s32.totalorder %s1102_s17, 7 }
   0x5   : > { %s1241_s18 = smov (%p27_p1, %s26_s18), 0  ;;  %p237_p3 = pnand %p915_p0, %p236_p2 }
   0x6   : > { %s293_s19 = smul.u32 (!%p237_p3), 3, %s1094_s15  ;;  %p919_p6 = scmp.ne.s32.totalorder (!%p237_p3), %s1094_s15, 0 }
   0x7   : > { %240 = sbr.rel (%p237_p3) target bundleno = 323 (0x143), region = 36 }
   0x8   : > { %s303_s20 = smul.u32 (!%p237_p3), 48, %s1094_s15  ;;  %p296_p4 = scmp.lt.s32.totalorder (!%p237_p3), %s293_s19, 17 }
   0xa   : > { %p305_p5 = scmp.lt.s32.totalorder (!%p237_p3), %s303_s20, 287 }
   0xe   : > { %s1243_s19 = smov (!%p296_p4, %s293_s19), 17  ;;  %s1245_s20 = smov (!%p305_p5, %s303_s20), 287 }
   0xf   : > { %s916_s21 = sshll.u32 %s1243_s19, 2  ;;  %s977_s25 = sshll.u32 %s1245_s20, 3  ;;  %v1104_v0 = vmov (!%p919_p6), 0.0  }
  0x10   : > { %s1156_s24 = scalar_lea.vmem %s1233_s0, %s916_s21  ;;  %s1161_s28 = scalar_lea.vmem %s1234_s1, %s977_s25  ;;  %345 = vst [vmem:[#allocation2] sm:$0xff] (!%p919_p6), %v1104_v0  ;;  %346 = vst [vmem:[#allocation2 + $0x8] sm:$0xff] (!%p919_p6), %v1104_v0 }
  0x11   : > { %344 = sbr.rel (%p919_p6) target bundleno = 24 (0x18), region = 40 }
  0x18 PF: > { %v1005_v1 = vld [vmem:[%s1161_s28 + $0x4] ss:$8 sps:$4 sm:$0xff]   ;;  %v1007_v2 = vld [vmem:[%s1161_s28] ss:$8 sps:$4 sm:$0xff]   ;;  %v1105_v3 = vmov 0   ;;  %p971_p7 = scmp.ne.s32.totalorder %s1094_s15, 5 }
  0x19   : > { %723 = vmatprep.mubr.bf16.mxu1 %v1105_v3  ;;  %650 = vmatprep.subr.bf16.mxu0 %v1005_v1  ;;  %v1008_v4 = vld [vmem:[%s1161_s28 + $0x14] ss:$8 sps:$4 sm:$0xff]   ;;  %v1010_v5 = vld [vmem:[%s1161_s28 + $0x10] ss:$8 sps:$4 sm:$0xff]   ;;  %v1011_v6 = vld [vmem:[%s1161_s28 + $0x24] ss:$8 sps:$4 sm:$0xff]  }
  0x1a   : > { %651 = vmatpush1.bf16.msra.mxu0 %v1007_v2  ;;  %v1013_v7 = vld [vmem:[%s1161_s28 + $0x20] ss:$8 sps:$4 sm:$0xff]   ;;  %v1014_v8 = vld [vmem:[%s1161_s28 + $0x34] ss:$8 sps:$4 sm:$0xff]   ;;  %v1016_v9 = vld [vmem:[%s1161_s28 + $0x30] ss:$8 sps:$4 sm:$0xff]  }
  0x1b   : > { %652 = vmatprep.subr.bf16.mxu0 %v1008_v4  ;;  %v1029_v10 = vld [vmem:[%s1161_s28 + $0x104] ss:$8 sps:$4 sm:$0xff]   ;;  %v1031_v11 = vld [vmem:[%s1161_s28 + $0x100] ss:$8 sps:$4 sm:$0xff]   ;;  %v1035_v13 = vld [vmem:[%s1161_s28 + $0x114] ss:$8 sps:$4 sm:$0xff]   ;;  %v744_v4 = vlaneseq (!%p971_p7) }
  0x1c   : > { %v1017_v12 = vld [vmem:[%s1161_s28 + $0x44] ss:$8 sps:$4 sm:$0xff]   ;;  %691 = vmatprep.subr.bf16.mxu1 %v1029_v10  ;;  %v1037_v14 = vld [vmem:[%s1161_s28 + $0x110] ss:$8 sps:$4 sm:$0xff]   ;;  %v1019_v15 = vld [vmem:[%s1161_s28 + $0x40] ss:$8 sps:$4 sm:$0xff]  }
  0x1d   : > { %692 = vmatpush1.bf16.msra.mxu1 %v1031_v11  ;;  %v1020_v16 = vld [vmem:[%s1161_s28 + $0x54] ss:$8 sps:$4 sm:$0xff]   ;;  %v1041_v17 = vld [vmem:[%s1161_s28 + $0x124] ss:$8 sps:$4 sm:$0xff]   ;;  %v1043_v18 = vld [vmem:[%s1161_s28 + $0x120] ss:$8 sps:$4 sm:$0xff]  }
  0x1e   : > { %653 = vmatpush1.bf16.msra.mxu0 %v1010_v5  ;;  %693 = vmatprep.subr.bf16.mxu1 %v1035_v13  ;;  %v1022_v19 = vld [vmem:[%s1161_s28 + $0x50] ss:$8 sps:$4 sm:$0xff]   ;;  %v1047_v20 = vld [vmem:[%s1161_s28 + $0x134] ss:$8 sps:$4 sm:$0xff]   ;;  %v1023_v21 = vld [vmem:[%s1161_s28 + $0x64] ss:$8 sps:$4 sm:$0xff]  }
  0x1f   : > { %654 = vmatprep.subr.bf16.mxu0 %v1011_v6  ;;  %v1049_v22 = vld [vmem:[%s1161_s28 + $0x130] ss:$8 sps:$4 sm:$0xff]   ;;  %v1025_v23 = vld [vmem:[%s1161_s28 + $0x60] ss:$8 sps:$4 sm:$0xff]   ;;  %v1053_v24 = vld [vmem:[%s1161_s28 + $0x144] ss:$8 sps:$4 sm:$0xff]  }
  0x20   : > { %v1026_v25 = vld [vmem:[%s1161_s28 + $0x74] ss:$8 sps:$4 sm:$0xff]   ;;  %v1055_v26 = vld [vmem:[%s1161_s28 + $0x140] ss:$8 sps:$4 sm:$0xff]   ;;  %v1028_v27 = vld [vmem:[%s1161_s28 + $0x70] ss:$8 sps:$4 sm:$0xff]  }
  0x21   : > { %694 = vmatpush1.bf16.msra.mxu1 %v1037_v14  ;;  %v1059_v28 = vld [vmem:[%s1161_s28 + $0x154] ss:$8 sps:$4 sm:$0xff]   ;;  %v1032_v29 = vld [vmem:[%s1161_s28 + $0x84] ss:$8 sps:$4 sm:$0xff]   ;;  %v1061_v30 = vld [vmem:[%s1161_s28 + $0x150] ss:$8 sps:$4 sm:$0xff]  }
  0x22   : > { %655 = vmatpush1.bf16.msra.mxu0 %v1013_v7  ;;  %695 = vmatprep.subr.bf16.mxu1 %v1041_v17  ;;  %v1034_v31 = vld [vmem:[%s1161_s28 + $0x80] ss:$8 sps:$4 sm:$0xff]   ;;  %v1065_v32 = vld [vmem:[%s1161_s28 + $0x164] ss:$8 sps:$4 sm:$0xff]   ;;  %v1038_v33 = vld [vmem:[%s1161_s28 + $0x94] ss:$8 sps:$4 sm:$0xff]  }
  0x23   : > { %656 = vmatprep.subr.bf16.mxu0 %v1014_v8  ;;  %v349_v34 = vld [vmem:[%s1156_s24] sm:$0xff]  ;;  %v1040_v37 = vld [vmem:[%s1161_s28 + $0x90] ss:$8 sps:$4 sm:$0xff]   ;;  %v1071_v38 = vld [vmem:[%s1161_s28 + $0x174] ss:$8 sps:$4 sm:$0xff]   ;;  %v745_v5 = vshrl.u32 (!%p971_p7), %v744_v4, 7 }
  0x24   : > { %v921_v35 = vcombine.high %v349_v34, %v349_v34  ;;  %v1067_v36 = vld [vmem:[%s1161_s28 + $0x160] ss:$8 sps:$4 sm:$0xff]   ;;  %v1044_v39 = vld [vmem:[%s1161_s28 + $0xa4] ss:$8 sps:$4 sm:$0xff]   ;;  %v1073_v40 = vld [vmem:[%s1161_s28 + $0x170] ss:$8 sps:$4 sm:$0xff]   ;;  %v920_v53 = vcombine.low %v349_v34, %v349_v34 }
  0x25   : > { %696 = vmatpush1.bf16.msra.mxu1 %v1043_v18  ;;  %v1046_v41 = vld [vmem:[%s1161_s28 + $0xa0] ss:$8 sps:$4 sm:$0xff]   ;;  %v1050_v42 = vld [vmem:[%s1161_s28 + $0xb4] ss:$8 sps:$4 sm:$0xff]   ;;  %v1052_v44 = vld [vmem:[%s1161_s28 + $0xb0] ss:$8 sps:$4 sm:$0xff]  }
  0x26   : > { %657 = vmatpush1.bf16.msra.mxu0 %v1016_v9  ;;  %697 = vmatprep.subr.bf16.mxu1 %v1047_v20  ;;  %v1077_v43 = vld [vmem:[%s1156_s24 + $0x8] ss:$0 sps:$4 sm:$0xff]   ;;  %v1056_v45 = vld [vmem:[%s1161_s28 + $0xc4] ss:$8 sps:$4 sm:$0xff]   ;;  %v1062_v47 = vld [vmem:[%s1161_s28 + $0xd4] ss:$8 sps:$4 sm:$0xff]  }
  0x27   : > { %658 = vmatprep.subr.bf16.mxu0 %v1017_v12  ;;  %682 = vmatprep.mubr.bf16.mxu0 %v921_v35  ;;  %v1058_v46 = vld [vmem:[%s1161_s28 + $0xc0] ss:$8 sps:$4 sm:$0xff]   ;;  %v1064_v48 = vld [vmem:[%s1161_s28 + $0xd0] ss:$8 sps:$4 sm:$0xff]   ;;  %v1068_v49 = vld [vmem:[%s1161_s28 + $0xe4] ss:$8 sps:$4 sm:$0xff]  }
  0x28   : > { %v1070_v50 = vld [vmem:[%s1161_s28 + $0xe0] ss:$8 sps:$4 sm:$0xff]   ;;  %v1074_v51 = vld [vmem:[%s1161_s28 + $0xf4] ss:$8 sps:$4 sm:$0xff]   ;;  %v1076_v52 = vld [vmem:[%s1161_s28 + $0xf0] ss:$8 sps:$4 sm:$0xff]  }
  0x29   : > { %698 = vmatpush1.bf16.msra.mxu1 %v1049_v22  ;;  %v347_v58 = vld [vmem:[#allocation2] sm:$0xff]  ;;  %v348_v61 = vld [vmem:[#allocation2 + $0x8] sm:$0xff]  ;;  %v746_v8 = vsub.s32 (!%p971_p7), 0, %v745_v5  ;;  %v750_v9 = vsub.s32 (!%p971_p7), 1, %v745_v5 }
  0x2a   : > { %659 = vmatpush1.bf16.msra.mxu0 %v1019_v15  ;;  %699 = vmatprep.subr.bf16.mxu1 %v1053_v24  ;;  %v742_v6 = vld [vmem:[%s1235_s2] sm:$0x3] (!%p971_p7) }
  0x2b   : > { %660 = vmatprep.subr.bf16.mxu0 %v1020_v16  ;;  %v756_v7 = vld [vmem:[%s1236_s3] sm:$0xff] (!%p971_p7)  ;;  %v747_v12 = vrot.slane (!%p971_p7), %v742_v6, %v746_v8  ;;  %v751_v13 = vrot.slane (!%p971_p7), %v742_v6, %v750_v9 }
  0x2c   : > { %v757_v14 = vunpack.c.l.bf16 (!%p971_p7), %v756_v7  ;;  %v758_v15 = vunpack.c.h.bf16 (!%p971_p7), %v756_v7 }
  0x2d   : > { %700 = vmatpush1.bf16.msra.mxu1 %v1055_v26 }
  0x2e   : > { %661 = vmatpush1.bf16.msra.mxu0 %v1022_v19  ;;  %701 = vmatprep.subr.bf16.mxu1 %v1059_v28 }
  0x2f   : > { %662 = vmatprep.subr.bf16.mxu0 %v1023_v21 }
  0x31   : > { %702 = vmatpush1.bf16.msra.mxu1 %v1061_v30 }
  0x32   : > { %663 = vmatpush1.bf16.msra.mxu0 %v1025_v23  ;;  %703 = vmatprep.subr.bf16.mxu1 %v1065_v32 }
  0x33   : > { %664 = vmatprep.subr.bf16.mxu0 %v1026_v25 }
  0x35   : > { %704 = vmatpush1.bf16.msra.mxu1 %v1067_v36 }
  0x36   : > { %665 = vmatpush1.bf16.msra.mxu0 %v1028_v27  ;;  %705 = vmatprep.subr.bf16.mxu1 %v1071_v38 }
  0x37   : > { %666 = vmatprep.subr.bf16.mxu0 %v1032_v29 }
  0x39   : > { %706 = vmatpush1.bf16.msra.mxu1 %v1073_v40 }
  0x3a   : > { %667 = vmatpush1.bf16.msra.mxu0 %v1034_v31 }
  0x3b   : > { %668 = vmatprep.subr.bf16.mxu0 %v1038_v33 }
  0x3c   : > { %724 = vmatmul.mubr.bf16.vlgmr.msra.gmra.mrb[0].mxu1 %v1077_v43 }
  0x3e   : > { %669 = vmatpush1.bf16.msra.mxu0 %v1040_v37 }
  0x3f   : > { %670 = vmatprep.subr.bf16.mxu0 %v1044_v39 }
  0x42   : > { %671 = vmatpush1.bf16.msra.mxu0 %v1046_v41 }
  0x43   : > { %672 = vmatprep.subr.bf16.mxu0 %v1050_v42 }
  0x46   : > { %673 = vmatpush1.bf16.msra.mxu0 %v1052_v44 }
  0x47   : > { %674 = vmatprep.subr.bf16.mxu0 %v1056_v45 }
  0x4a   : > { %675 = vmatpush1.bf16.msra.mxu0 %v1058_v46 }
  0x4b   : > { %676 = vmatprep.subr.bf16.mxu0 %v1062_v47 }
  0x4e   : > { %677 = vmatpush1.bf16.msra.mxu0 %v1064_v48 }
  0x4f   : > { %678 = vmatprep.subr.bf16.mxu0 %v1068_v49 }
  0x52   : > { %679 = vmatpush1.bf16.msra.mxu0 %v1070_v50 }
  0x53   : > { %680 = vmatprep.subr.bf16.mxu0 %v1074_v51 }
  0x56   : > { %681 = vmatpush1.bf16.msra.mxu0 %v1076_v52 }
  0x59   : > { %683 = vmatmul.mubr.bf16.vlgmr.msra.gmra.mrb[0].mxu0 %v920_v53 }
 0x10f   : > { %v725_v54 = vpop.f32.mrb[0].mxu1 }
 0x110   : > { %v727_v55 = vpop.f32.mrb[1].mxu1 }
 0x111   : > { %v729_v56 = vpop.f32.mrb[2].mxu1 }
 0x112   : > { %v730_v57 = vpop.f32.mrb[3].mxu1 }
 0x12c   : > { %v684_v59 = vpop.f32.mrb[0].mxu0  ;;  %739 = sbr.rel (%p971_p7) target bundleno = 323 (0x143), region = 44 }
 0x12d   : > { %v726_v60 = vadd.f32 %v725_v54, %v684_v59  ;;  %v686_v62 = vpop.f32.mrb[1].mxu0 }
 0x12e   : > { %v728_v63 = vadd.f32 %v727_v55, %v686_v62  ;;  %v688_v0 = vpop.f32.mrb[2].mxu0 }
 0x12f   : > { %v732_v1 = vadd.f32 %v726_v60, %v347_v58  ;;  %v689_v2 = vpop.f32.mrb[3].mxu0 }
 0x130   : > { %v733_v3 = vadd.f32 %v728_v63, %v348_v61 }
 0x131   : > { %734 = vst [vmem:[#allocation2] sm:$0xff] %v732_v1 }
 0x132   : > { %735 = vst [vmem:[#allocation2 + $0x8] sm:$0xff] %v733_v3 }
 0x138   : > { %v740_v10 = vld [vmem:[#allocation2] sm:$0xff] }
 0x139   : > { %v741_v11 = vld [vmem:[#allocation2 + $0x8] sm:$0xff]  ;;  %v754_v16 = vadd.f32 %v747_v12, %v740_v10 }
 0x13a   : > { %v755_v17 = vadd.f32 %v751_v13, %v741_v11 }
 0x13b   : > { %v759_v18 = vadd.f32 %v757_v14, %v754_v16 }
 0x13c   : > { %v760_v19 = vadd.f32 %v758_v15, %v755_v17 }
 0x13d   : > { %v761_v20 = vmax.f32 %v759_v18, 0.0 }
 0x13e   : > { %v762_v21 = vmax.f32 %v760_v19, 0.0 }
 0x140   : > { %v978_v22 = vpack.c.bf16 %v762_v21, %v761_v20 }
 0x142   : > { %771 = vst [vmem:[%s1237_s4] sm:$0xff] %v978_v22 }
 0x143 PF: > { %s14_s17 = sadd.s32 1, %s1102_s17   ;;  %s1238_s15 = smov %s1098_s16 }
 0x144   : > { %p11_p8 = scmp.ge.s32.totalorder %s14_s17, 8   ;;  %s1239_s16 = smov %s1241_s18 }
 0x146   :  { %13 = sbr.rel (!%p11_p8) target bundleno = 2 (0x2), region = 83 }

// kernel: visual_encoder_forward.34
= control target key start
LH: loop header
LB: loop body
LE: loop exit
PB: predicated region body
PF: predicated region fallthrough
CT: control target
= control target key end

     0   :  { %s1036_s12 = smov 0   ;;  %s1038_s13 = smov 0   ;;  %s1135_s0 = inlined_call_operand.vmem [shape: bf16[8,2304], index: 0, kind: input, shape index: {}]   ;;  %s1136_s1 = inlined_call_operand.vmem [shape: bf16[2304,256], index: 1, kind: input, shape index: {}]   ;;  %s1137_s2 = inlined_call_operand.vmem [shape: f32[1,256], index: 2, kind: input, shape index: {}]   ;;  %s1138_s3 = inlined_call_operand.vmem [shape: bf16[8,256], index: 3, kind: output, shape index: {}]  }
   0x1   :  { %s1040_s14 = smov 0  }
   0x2 LB: > { %s25_s15 = sadd.s32 1, %s1008_s13  ;;  %p825_p0 = scmp.ge.s32.totalorder %s1012_s14, 1  ;;  %s1012_s14 = sphi %s1040_s14, %s13_s14   ;;  %s1008_s13 = sphi %s1038_s13, %s1140_s13   ;;  %s1004_s12 = sphi %s1036_s12, %s1139_s12  }
   0x3   : > { %p26_p1 = scmp.ge.s32.totalorder %s25_s15, 6  ;;  %p194_p2 = scmp.lt.s32.totalorder %s1012_s14, 7 }
   0x5   : > { %s1142_s15 = smov (%p26_p1, %s25_s15), 0  ;;  %p195_p3 = pnand %p825_p0, %p194_p2 }
   0x6   : > { %s240_s16 = smul.u32 (!%p195_p3), 3, %s1004_s12  ;;  %p829_p6 = scmp.ne.s32.totalorder (!%p195_p3), %s1004_s12, 0 }
   0x7   : > { %198 = sbr.rel (%p195_p3) target bundleno = 321 (0x141), region = 32 }
   0x8   : > { %s250_s17 = smul.u32 (!%p195_p3), 48, %s1004_s12  ;;  %p243_p4 = scmp.lt.s32.totalorder (!%p195_p3), %s240_s16, 17 }
   0xa   : > { %p252_p5 = scmp.lt.s32.totalorder (!%p195_p3), %s250_s17, 287 }
   0xe   : > { %s1144_s16 = smov (!%p243_p4, %s240_s16), 17  ;;  %s1146_s17 = smov (!%p252_p5, %s250_s17), 287 }
   0xf   : > { %s826_s18 = sshll.u32 %s1144_s16, 2  ;;  %s887_s22 = sshll.u32 %s1146_s17, 3  ;;  %v1014_v0 = vmov (!%p829_p6), 0.0  }
  0x10   : > { %s1061_s21 = scalar_lea.vmem %s1135_s0, %s826_s18  ;;  %s1066_s25 = scalar_lea.vmem %s1136_s1, %s887_s22  ;;  %282 = vst [vmem:[#allocation2] sm:$0xff] (!%p829_p6), %v1014_v0  ;;  %283 = vst [vmem:[#allocation2 + $0x8] sm:$0xff] (!%p829_p6), %v1014_v0 }
  0x11   : > { %281 = sbr.rel (%p829_p6) target bundleno = 24 (0x18), region = 36 }
  0x18 PF: > { %v915_v1 = vld [vmem:[%s1066_s25 + $0x4] ss:$8 sps:$4 sm:$0xff]   ;;  %v917_v2 = vld [vmem:[%s1066_s25] ss:$8 sps:$4 sm:$0xff]   ;;  %v1015_v3 = vmov 0   ;;  %p881_p7 = scmp.ne.s32.totalorder %s1004_s12, 5 }
  0x19   : > { %660 = vmatprep.mubr.bf16.mxu1 %v1015_v3  ;;  %587 = vmatprep.subr.bf16.mxu0 %v915_v1  ;;  %v918_v4 = vld [vmem:[%s1066_s25 + $0x14] ss:$8 sps:$4 sm:$0xff]   ;;  %v920_v5 = vld [vmem:[%s1066_s25 + $0x10] ss:$8 sps:$4 sm:$0xff]   ;;  %v921_v6 = vld [vmem:[%s1066_s25 + $0x24] ss:$8 sps:$4 sm:$0xff]  }
  0x1a   : > { %588 = vmatpush1.bf16.msra.mxu0 %v917_v2  ;;  %v923_v7 = vld [vmem:[%s1066_s25 + $0x20] ss:$8 sps:$4 sm:$0xff]   ;;  %v924_v8 = vld [vmem:[%s1066_s25 + $0x34] ss:$8 sps:$4 sm:$0xff]   ;;  %v926_v9 = vld [vmem:[%s1066_s25 + $0x30] ss:$8 sps:$4 sm:$0xff]  }
  0x1b   : > { %589 = vmatprep.subr.bf16.mxu0 %v918_v4  ;;  %v939_v10 = vld [vmem:[%s1066_s25 + $0x104] ss:$8 sps:$4 sm:$0xff]   ;;  %v941_v11 = vld [vmem:[%s1066_s25 + $0x100] ss:$8 sps:$4 sm:$0xff]   ;;  %v945_v13 = vld [vmem:[%s1066_s25 + $0x114] ss:$8 sps:$4 sm:$0xff]   ;;  %v681_v4 = vlaneseq (!%p881_p7) }
  0x1c   : > { %v927_v12 = vld [vmem:[%s1066_s25 + $0x44] ss:$8 sps:$4 sm:$0xff]   ;;  %628 = vmatprep.subr.bf16.mxu1 %v939_v10  ;;  %v947_v14 = vld [vmem:[%s1066_s25 + $0x110] ss:$8 sps:$4 sm:$0xff]   ;;  %v929_v15 = vld [vmem:[%s1066_s25 + $0x40] ss:$8 sps:$4 sm:$0xff]  }
  0x1d   : > { %629 = vmatpush1.bf16.msra.mxu1 %v941_v11  ;;  %v930_v16 = vld [vmem:[%s1066_s25 + $0x54] ss:$8 sps:$4 sm:$0xff]   ;;  %v951_v17 = vld [vmem:[%s1066_s25 + $0x124] ss:$8 sps:$4 sm:$0xff]   ;;  %v953_v18 = vld [vmem:[%s1066_s25 + $0x120] ss:$8 sps:$4 sm:$0xff]  }
  0x1e   : > { %590 = vmatpush1.bf16.msra.mxu0 %v920_v5  ;;  %630 = vmatprep.subr.bf16.mxu1 %v945_v13  ;;  %v932_v19 = vld [vmem:[%s1066_s25 + $0x50] ss:$8 sps:$4 sm:$0xff]   ;;  %v957_v20 = vld [vmem:[%s1066_s25 + $0x134] ss:$8 sps:$4 sm:$0xff]   ;;  %v933_v21 = vld [vmem:[%s1066_s25 + $0x64] ss:$8 sps:$4 sm:$0xff]  }
  0x1f   : > { %591 = vmatprep.subr.bf16.mxu0 %v921_v6  ;;  %v959_v22 = vld [vmem:[%s1066_s25 + $0x130] ss:$8 sps:$4 sm:$0xff]   ;;  %v935_v23 = vld [vmem:[%s1066_s25 + $0x60] ss:$8 sps:$4 sm:$0xff]   ;;  %v963_v24 = vld [vmem:[%s1066_s25 + $0x144] ss:$8 sps:$4 sm:$0xff]  }
  0x20   : > { %v936_v25 = vld [vmem:[%s1066_s25 + $0x74] ss:$8 sps:$4 sm:$0xff]   ;;  %v965_v26 = vld [vmem:[%s1066_s25 + $0x140] ss:$8 sps:$4 sm:$0xff]   ;;  %v938_v27 = vld [vmem:[%s1066_s25 + $0x70] ss:$8 sps:$4 sm:$0xff]  }
  0x21   : > { %631 = vmatpush1.bf16.msra.mxu1 %v947_v14  ;;  %v969_v28 = vld [vmem:[%s1066_s25 + $0x154] ss:$8 sps:$4 sm:$0xff]   ;;  %v942_v29 = vld [vmem:[%s1066_s25 + $0x84] ss:$8 sps:$4 sm:$0xff]   ;;  %v971_v30 = vld [vmem:[%s1066_s25 + $0x150] ss:$8 sps:$4 sm:$0xff]  }
  0x22   : > { %592 = vmatpush1.bf16.msra.mxu0 %v923_v7  ;;  %632 = vmatprep.subr.bf16.mxu1 %v951_v17  ;;  %v944_v31 = vld [vmem:[%s1066_s25 + $0x80] ss:$8 sps:$4 sm:$0xff]   ;;  %v975_v32 = vld [vmem:[%s1066_s25 + $0x164] ss:$8 sps:$4 sm:$0xff]   ;;  %v948_v33 = vld [vmem:[%s1066_s25 + $0x94] ss:$8 sps:$4 sm:$0xff]  }
  0x23   : > { %593 = vmatprep.subr.bf16.mxu0 %v924_v8  ;;  %v286_v34 = vld [vmem:[%s1061_s21] sm:$0xff]  ;;  %v950_v37 = vld [vmem:[%s1066_s25 + $0x90] ss:$8 sps:$4 sm:$0xff]   ;;  %v981_v38 = vld [vmem:[%s1066_s25 + $0x174] ss:$8 sps:$4 sm:$0xff]   ;;  %v682_v5 = vshrl.u32 (!%p881_p7), %v681_v4, 7 }
  0x24   : > { %v831_v35 = vcombine.high %v286_v34, %v286_v34  ;;  %v977_v36 = vld [vmem:[%s1066_s25 + $0x160] ss:$8 sps:$4 sm:$0xff]   ;;  %v954_v39 = vld [vmem:[%s1066_s25 + $0xa4] ss:$8 sps:$4 sm:$0xff]   ;;  %v983_v40 = vld [vmem:[%s1066_s25 + $0x170] ss:$8 sps:$4 sm:$0xff]   ;;  %v830_v53 = vcombine.low %v286_v34, %v286_v34 }
  0x25   : > { %633 = vmatpush1.bf16.msra.mxu1 %v953_v18  ;;  %v956_v41 = vld [vmem:[%s1066_s25 + $0xa0] ss:$8 sps:$4 sm:$0xff]   ;;  %v960_v42 = vld [vmem:[%s1066_s25 + $0xb4] ss:$8 sps:$4 sm:$0xff]   ;;  %v962_v44 = vld [vmem:[%s1066_s25 + $0xb0] ss:$8 sps:$4 sm:$0xff]  }
  0x26   : > { %594 = vmatpush1.bf16.msra.mxu0 %v926_v9  ;;  %634 = vmatprep.subr.bf16.mxu1 %v957_v20  ;;  %v987_v43 = vld [vmem:[%s1061_s21 + $0x8] ss:$0 sps:$4 sm:$0xff]   ;;  %v966_v45 = vld [vmem:[%s1066_s25 + $0xc4] ss:$8 sps:$4 sm:$0xff]   ;;  %v972_v47 = vld [vmem:[%s1066_s25 + $0xd4] ss:$8 sps:$4 sm:$0xff]  }
  0x27   : > { %595 = vmatprep.subr.bf16.mxu0 %v927_v12  ;;  %619 = vmatprep.mubr.bf16.mxu0 %v831_v35  ;;  %v968_v46 = vld [vmem:[%s1066_s25 + $0xc0] ss:$8 sps:$4 sm:$0xff]   ;;  %v974_v48 = vld [vmem:[%s1066_s25 + $0xd0] ss:$8 sps:$4 sm:$0xff]   ;;  %v978_v49 = vld [vmem:[%s1066_s25 + $0xe4] ss:$8 sps:$4 sm:$0xff]  }
  0x28   : > { %v980_v50 = vld [vmem:[%s1066_s25 + $0xe0] ss:$8 sps:$4 sm:$0xff]   ;;  %v984_v51 = vld [vmem:[%s1066_s25 + $0xf4] ss:$8 sps:$4 sm:$0xff]   ;;  %v986_v52 = vld [vmem:[%s1066_s25 + $0xf0] ss:$8 sps:$4 sm:$0xff]  }
  0x29   : > { %635 = vmatpush1.bf16.msra.mxu1 %v959_v22  ;;  %v284_v58 = vld [vmem:[#allocation2] sm:$0xff]  ;;  %v285_v61 = vld [vmem:[#allocation2 + $0x8] sm:$0xff]  ;;  %v683_v7 = vsub.s32 (!%p881_p7), 0, %v682_v5  ;;  %v687_v8 = vsub.s32 (!%p881_p7), 1, %v682_v5 }
  0x2a   : > { %596 = vmatpush1.bf16.msra.mxu0 %v929_v15  ;;  %636 = vmatprep.subr.bf16.mxu1 %v963_v24  ;;  %v679_v6 = vld [vmem:[%s1137_s2] sm:$0x3] (!%p881_p7) }
  0x2b   : > { %597 = vmatprep.subr.bf16.mxu0 %v930_v16  ;;  %v684_v11 = vrot.slane (!%p881_p7), %v679_v6, %v683_v7  ;;  %v688_v12 = vrot.slane (!%p881_p7), %v679_v6, %v687_v8 }
  0x2d   : > { %637 = vmatpush1.bf16.msra.mxu1 %v965_v26 }
  0x2e   : > { %598 = vmatpush1.bf16.msra.mxu0 %v932_v19  ;;  %638 = vmatprep.subr.bf16.mxu1 %v969_v28 }
  0x2f   : > { %599 = vmatprep.subr.bf16.mxu0 %v933_v21 }
  0x31   : > { %639 = vmatpush1.bf16.msra.mxu1 %v971_v30 }
  0x32   : > { %600 = vmatpush1.bf16.msra.mxu0 %v935_v23  ;;  %640 = vmatprep.subr.bf16.mxu1 %v975_v32 }
  0x33   : > { %601 = vmatprep.subr.bf16.mxu0 %v936_v25 }
  0x35   : > { %641 = vmatpush1.bf16.msra.mxu1 %v977_v36 }
  0x36   : > { %602 = vmatpush1.bf16.msra.mxu0 %v938_v27  ;;  %642 = vmatprep.subr.bf16.mxu1 %v981_v38 }
  0x37   : > { %603 = vmatprep.subr.bf16.mxu0 %v942_v29 }
  0x39   : > { %643 = vmatpush1.bf16.msra.mxu1 %v983_v40 }
  0x3a   : > { %604 = vmatpush1.bf16.msra.mxu0 %v944_v31 }
  0x3b   : > { %605 = vmatprep.subr.bf16.mxu0 %v948_v33 }
  0x3c   : > { %661 = vmatmul.mubr.bf16.vlgmr.msra.gmra.mrb[0].mxu1 %v987_v43 }
  0x3e   : > { %606 = vmatpush1.bf16.msra.mxu0 %v950_v37 }
  0x3f   : > { %607 = vmatprep.subr.bf16.mxu0 %v954_v39 }
  0x42   : > { %608 = vmatpush1.bf16.msra.mxu0 %v956_v41 }
  0x43   : > { %609 = vmatprep.subr.bf16.mxu0 %v960_v42 }
  0x46   : > { %610 = vmatpush1.bf16.msra.mxu0 %v962_v44 }
  0x47   : > { %611 = vmatprep.subr.bf16.mxu0 %v966_v45 }
  0x4a   : > { %612 = vmatpush1.bf16.msra.mxu0 %v968_v46 }
  0x4b   : > { %613 = vmatprep.subr.bf16.mxu0 %v972_v47 }
  0x4e   : > { %614 = vmatpush1.bf16.msra.mxu0 %v974_v48 }
  0x4f   : > { %615 = vmatprep.subr.bf16.mxu0 %v978_v49 }
  0x52   : > { %616 = vmatpush1.bf16.msra.mxu0 %v980_v50 }
  0x53   : > { %617 = vmatprep.subr.bf16.mxu0 %v984_v51 }
  0x56   : > { %618 = vmatpush1.bf16.msra.mxu0 %v986_v52 }
  0x59   : > { %620 = vmatmul.mubr.bf16.vlgmr.msra.gmra.mrb[0].mxu0 %v830_v53 }
 0x10f   : > { %v662_v54 = vpop.f32.mrb[0].mxu1 }
 0x110   : > { %v664_v55 = vpop.f32.mrb[1].mxu1 }
 0x111   : > { %v666_v56 = vpop.f32.mrb[2].mxu1 }
 0x112   : > { %v667_v57 = vpop.f32.mrb[3].mxu1 }
 0x12c   : > { %v621_v59 = vpop.f32.mrb[0].mxu0  ;;  %676 = sbr.rel (%p881_p7) target bundleno = 321 (0x141), region = 40 }
 0x12d   : > { %v663_v60 = vadd.f32 %v662_v54, %v621_v59  ;;  %v623_v62 = vpop.f32.mrb[1].mxu0 }
 0x12e   : > { %v665_v63 = vadd.f32 %v664_v55, %v623_v62  ;;  %v625_v0 = vpop.f32.mrb[2].mxu0 }
 0x12f   : > { %v669_v1 = vadd.f32 %v663_v60, %v284_v58  ;;  %v626_v2 = vpop.f32.mrb[3].mxu0 }
 0x130   : > { %v670_v3 = vadd.f32 %v665_v63, %v285_v61 }
 0x131   : > { %671 = vst [vmem:[#allocation2] sm:$0xff] %v669_v1 }
 0x132   : > { %672 = vst [vmem:[#allocation2 + $0x8] sm:$0xff] %v670_v3 }
 0x138   : > { %v677_v9 = vld [vmem:[#allocation2] sm:$0xff] }
 0x139   : > { %v678_v10 = vld [vmem:[#allocation2 + $0x8] sm:$0xff]  ;;  %v691_v13 = vadd.f32 %v684_v11, %v677_v9 }
 0x13a   : > { %v692_v14 = vadd.f32 %v688_v12, %v678_v10 }
 0x13b   : > { %v693_v15 = vmax.f32 %v691_v13, 0.0 }
 0x13c   : > { %v694_v16 = vmax.f32 %v692_v14, 0.0 }
 0x13e   : > { %v888_v17 = vpack.c.bf16 %v694_v16, %v693_v15 }
 0x140   : > { %703 = vst [vmem:[%s1138_s3] sm:$0xff] %v888_v17 }
 0x141 PF: > { %s13_s14 = sadd.s32 1, %s1012_s14   ;;  %s1139_s12 = smov %s1008_s13 }
 0x142   : > { %p10_p8 = scmp.ge.s32.totalorder %s13_s14, 8   ;;  %s1140_s13 = smov %s1142_s15 }
 0x144   :  { %12 = sbr.rel (!%p10_p8) target bundleno = 2 (0x2), region = 76 }

// kernel: visual_encoder_forward.36
= control target key start
LH: loop header
LB: loop body
LE: loop exit
PB: predicated region body
PF: predicated region fallthrough
CT: control target
= control target key end

     0   :  { %s1353_s12 = smov 0   ;;  %s1355_s13 = smov 0   ;;  %s1633_s0 = inlined_call_operand.vmem [shape: bf16[2,2304], index: 0, kind: input, shape index: {}]   ;;  %s1634_s1 = inlined_call_operand.vmem [shape: bf16[2304,512], index: 1, kind: input, shape index: {}]   ;;  %s1635_s2 = inlined_call_operand.vmem [shape: f32[1,512], index: 2, kind: input, shape index: {}]   ;;  %s1636_s3 = inlined_call_operand.vmem [shape: bf16[2,512], index: 3, kind: output, shape index: {}]  }
   0x1   :  { %s1357_s14 = smov 0   ;;  %s1359_s15 = smov 0  }
   0x2   :  { %s1361_s16 = smov 0   ;;  %s1363_s17 = smov 0  }
   0x3   :  { %s1365_s18 = smov 0  }
   0x4 LB: > { %s25_s19 = sadd.s32 1, %s1319_s16  ;;  %s28_s20 = sadd.s32 1, %s1323_s17  ;;  %s1327_s18 = sphi %s1365_s18, %s13_s18   ;;  %s1323_s17 = sphi %s1363_s17, %s1642_s17   ;;  %s1319_s16 = sphi %s1361_s16, %s1641_s16   ;;  %s1315_s15 = sphi %s1359_s15, %s1640_s15   ;;  %s1311_s14 = sphi %s1357_s14, %s1639_s14   ;;  %s1307_s13 = sphi %s1355_s13, %s1638_s13   ;;  %s1303_s12 = sphi %s1353_s12, %s1637_s12  }
   0x5   : > { %p26_p0 = scmp.ge.s32.totalorder %s25_s19, 6  ;;  %p76_p1 = scmp.ne.s32.totalorder %s1307_s13, %s1303_s12 }
   0x6   : > { %p77_p2 = scmp.eq.s32.totalorder %s1327_s18, 0  ;;  %s69_s24 = sadd.s32 1, %s1307_s13 }
   0x7   : > { %s1644_s19 = smov (%p26_p0, %s25_s19), 0  ;;  %s1646_s20 = smov (!%p26_p0, %s28_s20), %s1323_s17 }
   0x8   : > { %p78_p3 = por %p77_p2, %p76_p1  ;;  %p30_p4 = scmp.ge.s32.totalorder %s1646_s20, 2 }
   0x9   : > { %s64_s21 = ssub.s32 %s1319_s16, %s1644_s19  ;;  %p1074_p6 = scmp.ge.s32.totalorder %s1327_s18, 12 }
   0xa   : > { %s1648_s20 = smov (%p30_p4, %s1646_s20), 0 }
   0xb   : > { %s65_s22 = ssub.s32 %s1323_s17, %s1648_s20  ;;  %156 = sbr.rel (%p1074_p6) target bundleno = 50 (0x32), region = 16 }
   0xc   : > { %s66_s23 = sor.u32 %s65_s22, %s64_s21 }
   0xd   : > { %p67_p5 = scmp.eq.s32.totalorder %s66_s23, 0 }
   0xf   : > { %s1404_s25 = scalar_select %p67_p5, %s1307_s13, %s69_s24  }
  0x12   : > { %171 = sbr.rel (!%p78_p3) target bundleno = 50 (0x32), region = 24  ;;  %s173_s26 = sand.u32 (%p78_p3), 1, %s1307_s13  }
  0x13   : > { %s1139_s27 = smul.u32 (%p78_p3), 384, %s173_s26  ;;  %s1075_s28 = sshll.u32 (%p78_p3), %s1323_s17, 1 }
  0x14   : > { %s1136_s29 = smul.u32 (%p78_p3), 192, %s1319_s16 }
  0x15   : > { %s1418_s8 = scalar_lea.vmem (%p78_p3), [#allocation3], %s1139_s27 }
  0x16   : > { %s179_s30 = sadd.s32 (%p78_p3), %s1136_s29, %s1075_s28 }
  0x17   : > { %s1077_s4 = sshll.u32 (%p78_p3), %s179_s30, 2 }
  0x18   : > { %s1413_s7 = scalar_lea.vmem (%p78_p3), %s1634_s1, %s1077_s4 }
  0x19   : > { %v303_v0 = vld [vmem:[%s1413_s7] sm:$0xff]  ;;  %v305_v1 = vld [vmem:[%s1413_s7 + $0x10] sm:$0xff] }
  0x1a   : > { %v307_v2 = vld [vmem:[%s1413_s7 + $0x20] sm:$0xff]  ;;  %304 = vst [vmem:[%s1418_s8] sm:$0xff] %v303_v0  ;;  %306 = vst [vmem:[%s1418_s8 + $0x8] sm:$0xff] %v305_v1  ;;  %v309_v3 = vld [vmem:[%s1413_s7 + $0x30] sm:$0xff] }
  0x1b   : > { %308 = vst [vmem:[%s1418_s8 + $0x10] sm:$0xff] %v307_v2  ;;  %v311_v4 = vld [vmem:[%s1413_s7 + $0x40] sm:$0xff]  ;;  %v313_v5 = vld [vmem:[%s1413_s7 + $0x50] sm:$0xff]  ;;  %310 = vst [vmem:[%s1418_s8 + $0x18] sm:$0xff] %v309_v3 }
  0x1c   : > { %312 = vst [vmem:[%s1418_s8 + $0x20] sm:$0xff] %v311_v4  ;;  %314 = vst [vmem:[%s1418_s8 + $0x28] sm:$0xff] %v313_v5  ;;  %v315_v6 = vld [vmem:[%s1413_s7 + $0x60] sm:$0xff]  ;;  %v317_v7 = vld [vmem:[%s1413_s7 + $0x70] sm:$0xff] }
  0x1d   : > { %v319_v8 = vld [vmem:[%s1413_s7 + $0x80] sm:$0xff]  ;;  %316 = vst [vmem:[%s1418_s8 + $0x30] sm:$0xff] %v315_v6  ;;  %318 = vst [vmem:[%s1418_s8 + $0x38] sm:$0xff] %v317_v7  ;;  %v321_v9 = vld [vmem:[%s1413_s7 + $0x90] sm:$0xff] }
  0x1e   : > { %320 = vst [vmem:[%s1418_s8 + $0x40] sm:$0xff] %v319_v8  ;;  %v323_v10 = vld [vmem:[%s1413_s7 + $0xa0] sm:$0xff]  ;;  %v325_v11 = vld [vmem:[%s1413_s7 + $0xb0] sm:$0xff]  ;;  %322 = vst [vmem:[%s1418_s8 + $0x48] sm:$0xff] %v321_v9 }
  0x1f   : > { %324 = vst [vmem:[%s1418_s8 + $0x50] sm:$0xff] %v323_v10  ;;  %326 = vst [vmem:[%s1418_s8 + $0x58] sm:$0xff] %v325_v11  ;;  %v327_v12 = vld [vmem:[%s1413_s7 + $0xc0] sm:$0xff]  ;;  %v329_v13 = vld [vmem:[%s1413_s7 + $0xd0] sm:$0xff] }
  0x20   : > { %v331_v14 = vld [vmem:[%s1413_s7 + $0xe0] sm:$0xff]  ;;  %328 = vst [vmem:[%s1418_s8 + $0x60] sm:$0xff] %v327_v12  ;;  %330 = vst [vmem:[%s1418_s8 + $0x68] sm:$0xff] %v329_v13  ;;  %v333_v15 = vld [vmem:[%s1413_s7 + $0xf0] sm:$0xff] }
  0x21   : > { %332 = vst [vmem:[%s1418_s8 + $0x70] sm:$0xff] %v331_v14  ;;  %v335_v16 = vld [vmem:[%s1413_s7 + $0x100] sm:$0xff]  ;;  %v337_v17 = vld [vmem:[%s1413_s7 + $0x110] sm:$0xff]  ;;  %334 = vst [vmem:[%s1418_s8 + $0x78] sm:$0xff] %v333_v15 }
  0x22   : > { %336 = vst [vmem:[%s1418_s8 + $0x80] sm:$0xff] %v335_v16  ;;  %338 = vst [vmem:[%s1418_s8 + $0x88] sm:$0xff] %v337_v17  ;;  %v339_v18 = vld [vmem:[%s1413_s7 + $0x120] sm:$0xff]  ;;  %v341_v19 = vld [vmem:[%s1413_s7 + $0x130] sm:$0xff] }
  0x23   : > { %v343_v20 = vld [vmem:[%s1413_s7 + $0x140] sm:$0xff]  ;;  %340 = vst [vmem:[%s1418_s8 + $0x90] sm:$0xff] %v339_v18  ;;  %342 = vst [vmem:[%s1418_s8 + $0x98] sm:$0xff] %v341_v19  ;;  %v345_v21 = vld [vmem:[%s1413_s7 + $0x150] sm:$0xff] }
  0x24   : > { %344 = vst [vmem:[%s1418_s8 + $0xa0] sm:$0xff] %v343_v20  ;;  %v347_v22 = vld [vmem:[%s1413_s7 + $0x160] sm:$0xff]  ;;  %v349_v23 = vld [vmem:[%s1413_s7 + $0x170] sm:$0xff]  ;;  %346 = vst [vmem:[%s1418_s8 + $0xa8] sm:$0xff] %v345_v21 }
  0x25   : > { %348 = vst [vmem:[%s1418_s8 + $0xb0] sm:$0xff] %v347_v22  ;;  %350 = vst [vmem:[%s1418_s8 + $0xb8] sm:$0xff] %v349_v23  ;;  %v351_v24 = vld [vmem:[%s1413_s7 + $0x180] sm:$0xff]  ;;  %v353_v25 = vld [vmem:[%s1413_s7 + $0x190] sm:$0xff] }
  0x26   : > { %v355_v26 = vld [vmem:[%s1413_s7 + $0x1a0] sm:$0xff]  ;;  %352 = vst [vmem:[%s1418_s8 + $0xc0] sm:$0xff] %v351_v24  ;;  %354 = vst [vmem:[%s1418_s8 + $0xc8] sm:$0xff] %v353_v25  ;;  %v357_v27 = vld [vmem:[%s1413_s7 + $0x1b0] sm:$0xff] }
  0x27   : > { %356 = vst [vmem:[%s1418_s8 + $0xd0] sm:$0xff] %v355_v26  ;;  %v359_v28 = vld [vmem:[%s1413_s7 + $0x1c0] sm:$0xff]  ;;  %v361_v29 = vld [vmem:[%s1413_s7 + $0x1d0] sm:$0xff]  ;;  %358 = vst [vmem:[%s1418_s8 + $0xd8] sm:$0xff] %v357_v27 }
  0x28   : > { %360 = vst [vmem:[%s1418_s8 + $0xe0] sm:$0xff] %v359_v28  ;;  %362 = vst [vmem:[%s1418_s8 + $0xe8] sm:$0xff] %v361_v29  ;;  %v363_v30 = vld [vmem:[%s1413_s7 + $0x1e0] sm:$0xff]  ;;  %v365_v31 = vld [vmem:[%s1413_s7 + $0x1f0] sm:$0xff] }
  0x29   : > { %v367_v32 = vld [vmem:[%s1413_s7 + $0x200] sm:$0xff]  ;;  %364 = vst [vmem:[%s1418_s8 + $0xf0] sm:$0xff] %v363_v30  ;;  %366 = vst [vmem:[%s1418_s8 + $0xf8] sm:$0xff] %v365_v31  ;;  %v369_v33 = vld [vmem:[%s1413_s7 + $0x210] sm:$0xff] }
  0x2a   : > { %368 = vst [vmem:[%s1418_s8 + $0x100] sm:$0xff] %v367_v32  ;;  %v371_v34 = vld [vmem:[%s1413_s7 + $0x220] sm:$0xff]  ;;  %v373_v35 = vld [vmem:[%s1413_s7 + $0x230] sm:$0xff]  ;;  %370 = vst [vmem:[%s1418_s8 + $0x108] sm:$0xff] %v369_v33 }
  0x2b   : > { %372 = vst [vmem:[%s1418_s8 + $0x110] sm:$0xff] %v371_v34  ;;  %374 = vst [vmem:[%s1418_s8 + $0x118] sm:$0xff] %v373_v35  ;;  %v375_v36 = vld [vmem:[%s1413_s7 + $0x240] sm:$0xff]  ;;  %v377_v37 = vld [vmem:[%s1413_s7 + $0x250] sm:$0xff] }
  0x2c   : > { %v379_v38 = vld [vmem:[%s1413_s7 + $0x260] sm:$0xff]  ;;  %376 = vst [vmem:[%s1418_s8 + $0x120] sm:$0xff] %v375_v36  ;;  %378 = vst [vmem:[%s1418_s8 + $0x128] sm:$0xff] %v377_v37  ;;  %v381_v39 = vld [vmem:[%s1413_s7 + $0x270] sm:$0xff] }
  0x2d   : > { %380 = vst [vmem:[%s1418_s8 + $0x130] sm:$0xff] %v379_v38  ;;  %v383_v40 = vld [vmem:[%s1413_s7 + $0x280] sm:$0xff]  ;;  %v385_v41 = vld [vmem:[%s1413_s7 + $0x290] sm:$0xff]  ;;  %382 = vst [vmem:[%s1418_s8 + $0x138] sm:$0xff] %v381_v39 }
  0x2e   : > { %384 = vst [vmem:[%s1418_s8 + $0x140] sm:$0xff] %v383_v40  ;;  %386 = vst [vmem:[%s1418_s8 + $0x148] sm:$0xff] %v385_v41  ;;  %v387_v42 = vld [vmem:[%s1413_s7 + $0x2a0] sm:$0xff]  ;;  %v389_v43 = vld [vmem:[%s1413_s7 + $0x2b0] sm:$0xff] }
  0x2f   : > { %v391_v44 = vld [vmem:[%s1413_s7 + $0x2c0] sm:$0xff]  ;;  %388 = vst [vmem:[%s1418_s8 + $0x150] sm:$0xff] %v387_v42  ;;  %390 = vst [vmem:[%s1418_s8 + $0x158] sm:$0xff] %v389_v43  ;;  %v393_v45 = vld [vmem:[%s1413_s7 + $0x2d0] sm:$0xff] }
  0x30   : > { %392 = vst [vmem:[%s1418_s8 + $0x160] sm:$0xff] %v391_v44  ;;  %v395_v46 = vld [vmem:[%s1413_s7 + $0x2e0] sm:$0xff]  ;;  %v397_v47 = vld [vmem:[%s1413_s7 + $0x2f0] sm:$0xff]  ;;  %394 = vst [vmem:[%s1418_s8 + $0x168] sm:$0xff] %v393_v45 }
  0x31   : > { %396 = vst [vmem:[%s1418_s8 + $0x170] sm:$0xff] %v395_v46  ;;  %398 = vst [vmem:[%s1418_s8 + $0x178] sm:$0xff] %v397_v47 }
  0x32 PF: > { %p1078_p7 = scmp.ge.s32.totalorder %s1327_s18, 1  ;;  %p411_p8 = scmp.lt.s32.totalorder %s1327_s18, 13 }
  0x34   : > { %p412_p9 = pnand %p1078_p7, %p411_p8 }
  0x35   : > { %s418_s9 = sand.u32 (!%p412_p9), 1, %s1303_s12   ;;  %s456_s10 = smul.u32 (!%p412_p9), 3, %s1311_s14 }
  0x36   : > { %415 = sbr.rel (%p412_p9) target bundleno = 377 (0x179), region = 66  ;;  %s1079_s21 = sshll.u32 (!%p412_p9), %s1315_s15, 1 }
  0x37   : > { %s1140_s11 = smul.u32 (!%p412_p9), 384, %s418_s9  ;;  %p459_p10 = scmp.lt.s32.totalorder (!%p412_p9), %s456_s10, 17 }
  0x38   : > { %p468_p11 = scmp.lt.s32.totalorder (!%p412_p9), %s1079_s21, 3  ;;  %p1081_p12 = scmp.ne.s32.totalorder (!%p412_p9), %s1311_s14, 0 }
  0x39   : > { %s1534_s30 = scalar_lea.vmem (!%p412_p9), [#allocation3], %s1140_s11 }
  0x3d   : > { %s1650_s10 = smov (!%p459_p10, %s456_s10), 17  ;;  %s1652_s21 = smov (!%p468_p11, %s1079_s21), 3 }
  0x3e   : > { %s463_s24 = scalar_lea.vmem %s1633_s0, %s1650_s10  ;;  %s470_s12 = scalar_lea.vmem %s1635_s2, %s1652_s21  ;;  %v1329_v48 = vmov (!%p1081_p12), 0.0  }
  0x3f   : > { %s479_s15 = scalar_lea.vmem %s1636_s3, %s1652_s21  ;;  %485 = sbr.rel (%p1081_p12) target bundleno = 70 (0x46), region = 74  ;;  %486 = vst [vmem:[#allocation2] sm:$0xf] (!%p1081_p12), %v1329_v48 }
  0x46 PF: > { %v1201_v49 = vld [vmem:[%s1534_s30 + $0x4] ss:$8 sps:$4 sm:$0xff]   ;;  %v1203_v50 = vld [vmem:[%s1534_s30] ss:$8 sps:$4 sm:$0xff]   ;;  %v1330_v51 = vmov 0   ;;  %v549_v12 = vlaneseq  ;;  %p1131_p13 = scmp.ne.s32.totalorder %s1311_s14, 5 }
  0x47   : > { %877 = vmatprep.mubr.bf16.mxu0 %v1330_v51  ;;  %804 = vmatprep.subr.bf16.mxu1 %v1201_v49  ;;  %v1204_v52 = vld [vmem:[%s1534_s30 + $0x14] ss:$8 sps:$4 sm:$0xff]   ;;  %v1206_v53 = vld [vmem:[%s1534_s30 + $0x10] ss:$8 sps:$4 sm:$0xff]   ;;  %v1207_v54 = vld [vmem:[%s1534_s30 + $0x24] ss:$8 sps:$4 sm:$0xff]  }
  0x48   : > { %805 = vmatpush1.bf16.msra.mxu1 %v1203_v50  ;;  %v1209_v55 = vld [vmem:[%s1534_s30 + $0x20] ss:$8 sps:$4 sm:$0xff]   ;;  %v1210_v56 = vld [vmem:[%s1534_s30 + $0x34] ss:$8 sps:$4 sm:$0xff]   ;;  %v1212_v57 = vld [vmem:[%s1534_s30 + $0x30] ss:$8 sps:$4 sm:$0xff]  }
  0x49   : > { %806 = vmatprep.subr.bf16.mxu1 %v1204_v52  ;;  %v1225_v58 = vld [vmem:[%s1534_s30 + $0x104] ss:$8 sps:$4 sm:$0xff]   ;;  %v1227_v59 = vld [vmem:[%s1534_s30 + $0x100] ss:$8 sps:$4 sm:$0xff]   ;;  %v1231_v61 = vld [vmem:[%s1534_s30 + $0x114] ss:$8 sps:$4 sm:$0xff]  }
  0x4a   : > { %v1213_v60 = vld [vmem:[%s1534_s30 + $0x44] ss:$8 sps:$4 sm:$0xff]   ;;  %845 = vmatprep.subr.bf16.mxu0 %v1225_v58  ;;  %v1233_v62 = vld [vmem:[%s1534_s30 + $0x110] ss:$8 sps:$4 sm:$0xff]   ;;  %v1215_v63 = vld [vmem:[%s1534_s30 + $0x40] ss:$8 sps:$4 sm:$0xff]  }
  0x4b   : > { %846 = vmatpush1.bf16.msra.mxu0 %v1227_v59  ;;  %v1216_v0 = vld [vmem:[%s1534_s30 + $0x54] ss:$8 sps:$4 sm:$0xff]   ;;  %v1237_v1 = vld [vmem:[%s1534_s30 + $0x124] ss:$8 sps:$4 sm:$0xff]   ;;  %v1239_v2 = vld [vmem:[%s1534_s30 + $0x120] ss:$8 sps:$4 sm:$0xff]  }
  0x4c   : > { %807 = vmatpush1.bf16.msra.mxu1 %v1206_v53  ;;  %847 = vmatprep.subr.bf16.mxu0 %v1231_v61  ;;  %v1218_v3 = vld [vmem:[%s1534_s30 + $0x50] ss:$8 sps:$4 sm:$0xff]   ;;  %v1243_v4 = vld [vmem:[%s1534_s30 + $0x134] ss:$8 sps:$4 sm:$0xff]   ;;  %v1219_v5 = vld [vmem:[%s1534_s30 + $0x64] ss:$8 sps:$4 sm:$0xff]  }
  0x4d   : > { %808 = vmatprep.subr.bf16.mxu1 %v1207_v54  ;;  %v1245_v6 = vld [vmem:[%s1534_s30 + $0x130] ss:$8 sps:$4 sm:$0xff]   ;;  %v1221_v7 = vld [vmem:[%s1534_s30 + $0x60] ss:$8 sps:$4 sm:$0xff]   ;;  %v1249_v8 = vld [vmem:[%s1534_s30 + $0x144] ss:$8 sps:$4 sm:$0xff]  }
  0x4e   : > { %v1222_v9 = vld [vmem:[%s1534_s30 + $0x74] ss:$8 sps:$4 sm:$0xff]   ;;  %v1331_v10 = vmov 1966171168   ;;  %v1251_v13 = vld [vmem:[%s1534_s30 + $0x140] ss:$8 sps:$4 sm:$0xff]  }
  0x4f   : > { %848 = vmatpush1.bf16.msra.mxu0 %v1233_v62  ;;  %v547_v11 = vunpack.c.l.s4 %v1331_v10  ;;  %v1224_v14 = vld [vmem:[%s1534_s30 + $0x70] ss:$8 sps:$4 sm:$0xff]   ;;  %v1255_v15 = vld [vmem:[%s1534_s30 + $0x154] ss:$8 sps:$4 sm:$0xff]   ;;  %v1228_v16 = vld [vmem:[%s1534_s30 + $0x84] ss:$8 sps:$4 sm:$0xff]  }
  0x50   : > { %809 = vmatpush1.bf16.msra.mxu1 %v1209_v55  ;;  %849 = vmatprep.subr.bf16.mxu0 %v1237_v1  ;;  %v1565_v18 = vshrl.u32 %v549_v12, 7  ;;  %v1257_v19 = vld [vmem:[%s1534_s30 + $0x150] ss:$8 sps:$4 sm:$0xff]   ;;  %v1230_v20 = vld [vmem:[%s1534_s30 + $0x80] ss:$8 sps:$4 sm:$0xff]  }
  0x51   : > { %810 = vmatprep.subr.bf16.mxu1 %v1210_v56  ;;  %v548_v17 = vunpack.c.0.s8 %v547_v11  ;;  %v1261_v21 = vld [vmem:[%s1534_s30 + $0x164] ss:$8 sps:$4 sm:$0xff]   ;;  %v1234_v22 = vld [vmem:[%s1534_s30 + $0x94] ss:$8 sps:$4 sm:$0xff]   ;;  %v1263_v26 = vld [vmem:[%s1534_s30 + $0x160] ss:$8 sps:$4 sm:$0xff]  }
  0x52   : > { %v1082_v23 = vld.sshfl [vmem:[%s463_s24] sm:$0x13 pattern:$0x75316420]  ;;  %v1236_v27 = vld [vmem:[%s1534_s30 + $0x90] ss:$8 sps:$4 sm:$0xff]  }
  0x53   : > { %850 = vmatpush1.bf16.msra.mxu0 %v1239_v2  ;;  %v1577_v24 = vsub.s32 %v548_v17, %v1565_v18  ;;  %v545_v25 = vcombine.high %v1082_v23, %v1082_v23  ;;  %v1267_v28 = vld [vmem:[%s1534_s30 + $0x174] ss:$8 sps:$4 sm:$0xff]   ;;  %v1240_v30 = vld [vmem:[%s1534_s30 + $0xa4] ss:$8 sps:$4 sm:$0xff]   ;;  %v1269_v32 = vld [vmem:[%s1534_s30 + $0x170] ss:$8 sps:$4 sm:$0xff]  }
  0x54   : > { %811 = vmatpush1.bf16.msra.mxu1 %v1212_v57  ;;  %851 = vmatprep.subr.bf16.mxu0 %v1243_v4  ;;  %v1242_v33 = vld [vmem:[%s1534_s30 + $0xa0] ss:$8 sps:$4 sm:$0xff]   ;;  %v1246_v34 = vld [vmem:[%s1534_s30 + $0xb4] ss:$8 sps:$4 sm:$0xff]   ;;  %v1248_v36 = vld [vmem:[%s1534_s30 + $0xb0] ss:$8 sps:$4 sm:$0xff]  }
  0x55   : > { %812 = vmatprep.subr.bf16.mxu1 %v1213_v60  ;;  %v559_v29 = vrot.slane %v545_v25, %v1577_v24  ;;  %v552_v31 = vrot.slane %v1082_v23, %v1577_v24  ;;  %v1252_v37 = vld [vmem:[%s1534_s30 + $0xc4] ss:$8 sps:$4 sm:$0xff]   ;;  %v1254_v38 = vld [vmem:[%s1534_s30 + $0xc0] ss:$8 sps:$4 sm:$0xff]   ;;  %v1258_v39 = vld [vmem:[%s1534_s30 + $0xd4] ss:$8 sps:$4 sm:$0xff]  }
  0x56   : > { %v1260_v40 = vld [vmem:[%s1534_s30 + $0xd0] ss:$8 sps:$4 sm:$0xff]   ;;  %v1264_v41 = vld [vmem:[%s1534_s30 + $0xe4] ss:$8 sps:$4 sm:$0xff]   ;;  %v1266_v42 = vld [vmem:[%s1534_s30 + $0xe0] ss:$8 sps:$4 sm:$0xff]  }
  0x57   : > { %852 = vmatpush1.bf16.msra.mxu0 %v1245_v6  ;;  %836 = vmatprep.mubr.bf16.mxu1 %v559_v29  ;;  %v560_v35 = vcombine.high %v552_v31, %v552_v31  ;;  %v1270_v43 = vld [vmem:[%s1534_s30 + $0xf4] ss:$8 sps:$4 sm:$0xff]   ;;  %v1272_v44 = vld [vmem:[%s1534_s30 + $0xf0] ss:$8 sps:$4 sm:$0xff]   ;;  %v1332_v49 = vmov 1983009808  }
  0x58   : > { %813 = vmatpush1.bf16.msra.mxu1 %v1215_v63  ;;  %853 = vmatprep.subr.bf16.mxu0 %v1249_v8  ;;  %v890_v50 = vunpack.c.l.s4 %v1332_v49  ;;  %v487_v60 = vld [vmem:[#allocation2] sm:$0xf]  ;;  %v912_v1 = vsub.s32 (!%p1131_p13), 1, %v1565_v18 }
  0x59   : > { %814 = vmatprep.subr.bf16.mxu1 %v1216_v0  ;;  %v904_v63 = vld [vmem:[%s470_s12] sm:$0x3] (!%p1131_p13)  ;;  %v908_v0 = vsub.s32 (!%p1131_p13), 0, %v1565_v18 }
  0x5a   : > { %v891_v51 = vunpack.c.0.s8 %v890_v50 }
  0x5b   : > { %854 = vmatpush1.bf16.msra.mxu0 %v1251_v13  ;;  %v909_v2 = vrot.slane (!%p1131_p13), %v904_v63, %v908_v0 }
  0x5c   : > { %815 = vmatpush1.bf16.msra.mxu1 %v1218_v3  ;;  %855 = vmatprep.subr.bf16.mxu0 %v1255_v15  ;;  %v894_v56 = vsub.s32 %v891_v51, %v1565_v18  ;;  %v913_v3 = vrot.slane (!%p1131_p13), %v904_v63, %v912_v1 }
  0x5d   : > { %816 = vmatprep.subr.bf16.mxu1 %v1219_v5 }
  0x5e   : > { %v914_v4 = vcombine.low (!%p1131_p13), %v909_v2, %v913_v3 }
  0x5f   : > { %856 = vmatpush1.bf16.msra.mxu0 %v1257_v19 }
  0x60   : > { %817 = vmatpush1.bf16.msra.mxu1 %v1221_v7  ;;  %857 = vmatprep.subr.bf16.mxu0 %v1261_v21  ;;  %v921_v6 = vrot.slane (!%p1131_p13), %v914_v4, %v894_v56 }
  0x61   : > { %818 = vmatprep.subr.bf16.mxu1 %v1222_v9 }
  0x63   : > { %858 = vmatpush1.bf16.msra.mxu0 %v1263_v26 }
  0x64   : > { %819 = vmatpush1.bf16.msra.mxu1 %v1224_v14  ;;  %859 = vmatprep.subr.bf16.mxu0 %v1267_v28 }
  0x65   : > { %820 = vmatprep.subr.bf16.mxu1 %v1228_v16 }
  0x67   : > { %860 = vmatpush1.bf16.msra.mxu0 %v1269_v32 }
  0x68   : > { %821 = vmatpush1.bf16.msra.mxu1 %v1230_v20 }
  0x69   : > { %822 = vmatprep.subr.bf16.mxu1 %v1234_v22 }
  0x6a   : > { %878 = vmatmul.mubr.bf16.vlgmr.msra.gmra.mrb[0].mxu0 %v560_v35 }
  0x6c   : > { %823 = vmatpush1.bf16.msra.mxu1 %v1236_v27 }
  0x6d   : > { %824 = vmatprep.subr.bf16.mxu1 %v1240_v30 }
  0x70   : > { %825 = vmatpush1.bf16.msra.mxu1 %v1242_v33 }
  0x71   : > { %826 = vmatprep.subr.bf16.mxu1 %v1246_v34 }
  0x74   : > { %827 = vmatpush1.bf16.msra.mxu1 %v1248_v36 }
  0x75   : > { %828 = vmatprep.subr.bf16.mxu1 %v1252_v37 }
  0x78   : > { %829 = vmatpush1.bf16.msra.mxu1 %v1254_v38 }
  0x79   : > { %830 = vmatprep.subr.bf16.mxu1 %v1258_v39 }
  0x7c   : > { %831 = vmatpush1.bf16.msra.mxu1 %v1260_v40 }
  0x7d   : > { %832 = vmatprep.subr.bf16.mxu1 %v1264_v41 }
  0x80   : > { %833 = vmatpush1.bf16.msra.mxu1 %v1266_v42 }
  0x81   : > { %834 = vmatprep.subr.bf16.mxu1 %v1270_v43 }
  0x84   : > { %835 = vmatpush1.bf16.msra.mxu1 %v1272_v44 }
  0x87   : > { %837 = vmatmul.mubr.bf16.vlgmr.msra.gmra.mrb[0].mxu1 %v552_v31 }
 0x13d   : > { %v879_v45 = vpop.f32.mrb[0].mxu0 }
 0x13e   : > { %v881_v46 = vpop.f32.mrb[1].mxu0 }
 0x13f   : > { %v883_v47 = vpop.f32.mrb[2].mxu0 }
 0x140   : > { %v884_v48 = vpop.f32.mrb[3].mxu0 }
 0x15a   : > { %v838_v52 = vpop.f32.mrb[0].mxu1 }
 0x15b   : > { %v880_v53 = vadd.f32 %v879_v45, %v838_v52  ;;  %v840_v54 = vpop.f32.mrb[1].mxu1 }
 0x15c   : > { %v882_v55 = vadd.f32 %v881_v46, %v840_v54  ;;  %v842_v57 = vpop.f32.mrb[2].mxu1 }
 0x15d   : > { %v843_v58 = vpop.f32.mrb[3].mxu1 }
 0x15e   : > { %v888_v59 = vcombine.low %v880_v53, %v882_v55  ;;  %902 = sbr.rel (%p1131_p13) target bundleno = 377 (0x179), region = 78 }
 0x160   : > { %v895_v61 = vrot.slane %v888_v59, %v894_v56 }
 0x162   : > { %v897_v62 = vadd.f32 %v895_v61, %v487_v60 }
 0x164   : > { %898 = vst [vmem:[#allocation2] sm:$0xf] %v897_v62 }
 0x16b   : > { %v903_v5 = vld [vmem:[#allocation2] sm:$0xf] }
 0x16c   : > { %v923_v7 = vadd.f32 %v921_v6, %v903_v5 }
 0x16e   : > { %v924_v8 = vmax.f32 %v923_v7, 0.0 }
 0x170   : > { %v932_v9 = vrot.slane %v924_v8, %v894_v56 }
 0x172   : > { %v933_v10 = vcombine.high %v932_v9, %v932_v9 }
 0x174   : > { %v1132_v11 = vpack.c.bf16 %v933_v10, %v932_v9 }
 0x176   : > { %v947_v12 = vrot.slane %v1132_v11, %v1577_v24 }
 0x178   : > { %1133 = vst.sshfl [vmem:[%s479_s15] sm:$0x5 pattern:$0x73625140] %v947_v12 }
 0x179 PF: > { %s13_s18 = sadd.s32 1, %s1327_s18   ;;  %s1637_s12 = smov %s1307_s13 }
 0x17a   : > { %p10_p0 = scmp.ge.s32.totalorder %s13_s18, 14   ;;  %s1638_s13 = smov %s1404_s25 }
 0x17b   : > { %s1639_s14 = smov %s1319_s16  ;;  %s1640_s15 = smov %s1323_s17 }
 0x17c   : > { %s1641_s16 = smov %s1644_s19  ;;  %s1642_s17 = smov %s1648_s20 }
 0x17d   :  { %12 = sbr.rel (!%p10_p0) target bundleno = 4 (0x4), region = 119 }

// kernel: visual_encoder_forward.37
= control target key start
LH: loop header
LB: loop body
LE: loop exit
PB: predicated region body
PF: predicated region fallthrough
CT: control target
= control target key end

     0   :  { %s1069_s12 = smov 0   ;;  %s1071_s13 = smov 0   ;;  %s1258_s0 = inlined_call_operand.vmem [shape: bf16[2,256], index: 0, kind: input, shape index: {}]   ;;  %s1259_s1 = inlined_call_operand.vmem [shape: bf16[256,512], index: 1, kind: input, shape index: {}]   ;;  %s1260_s2 = inlined_call_operand.vmem [shape: f32[1,512], index: 2, kind: input, shape index: {}]   ;;  %s1261_s3 = inlined_call_operand.vmem [shape: bf16[2,512], index: 3, kind: output, shape index: {}]  }
   0x1   :  { %s1073_s14 = smov 0   ;;  %s1075_s15 = smov 0  }
   0x2   :  { %s1077_s16 = smov 0  }
   0x3 LB: > { %s28_s17 = sadd.s32 1, %s1040_s15  ;;  %p76_p1 = scmp.ne.s32.totalorder %s1032_s13, %s1028_s12  ;;  %s1044_s16 = sphi %s1077_s16, %s13_s16   ;;  %s1040_s15 = sphi %s1075_s15, %s1265_s15   ;;  %s1036_s14 = sphi %s1073_s14, %s1264_s14   ;;  %s1032_s13 = sphi %s1071_s13, %s1263_s13   ;;  %s1028_s12 = sphi %s1069_s12, %s1262_s12  }
   0x4   : > { %p30_p0 = scmp.ge.s32.totalorder %s28_s17, 2  ;;  %p77_p2 = scmp.eq.s32.totalorder %s1044_s16, 0 }
   0x5   : > { %s69_s19 = sadd.s32 1, %s1032_s13  ;;  %p869_p5 = scmp.ge.s32.totalorder %s1044_s16, 2 }
   0x6   : > { %s1267_s17 = smov (%p30_p0, %s28_s17), 0  ;;  %p78_p3 = por %p77_p2, %p76_p1 }
   0x7   : > { %s65_s18 = ssub.s32 %s1040_s15, %s1267_s17  ;;  %168 = sbr.rel (%p869_p5) target bundleno = 34 (0x22), region = 20 }
   0x8   : > { %p67_p4 = scmp.eq.s32.totalorder %s65_s18, 0 }
   0xa   : > { %s1104_s20 = scalar_select %p67_p4, %s1032_s13, %s69_s19  }
   0xe   : > { %171 = sbr.rel (!%p78_p3) target bundleno = 34 (0x22), region = 24  ;;  %s173_s21 = sand.u32 (%p78_p3), 1, %s1032_s13  }
   0xf   : > { %s914_s22 = sshll.u32 (%p78_p3), %s1040_s15, 3  ;;  %s870_s23 = sshll.u32 (%p78_p3), %s173_s21, 8 }
  0x10   : > { %s1112_s26 = scalar_lea.vmem (%p78_p3), %s1259_s1, %s914_s22  ;;  %s1117_s27 = scalar_lea.vmem (%p78_p3), [#allocation3], %s870_s23 }
  0x11   : > { %v271_v0 = vld [vmem:[%s1112_s26] sm:$0xff] (%p78_p3)  ;;  %v273_v1 = vld [vmem:[%s1112_s26 + $0x10] sm:$0xff] (%p78_p3) }
  0x12   : > { %v275_v2 = vld [vmem:[%s1112_s26 + $0x20] sm:$0xff] (%p78_p3)  ;;  %272 = vst [vmem:[%s1117_s27] sm:$0xff] (%p78_p3), %v271_v0  ;;  %274 = vst [vmem:[%s1117_s27 + $0x8] sm:$0xff] (%p78_p3), %v273_v1  ;;  %v277_v3 = vld [vmem:[%s1112_s26 + $0x30] sm:$0xff] (%p78_p3) }
  0x13   : > { %276 = vst [vmem:[%s1117_s27 + $0x10] sm:$0xff] (%p78_p3), %v275_v2  ;;  %v279_v4 = vld [vmem:[%s1112_s26 + $0x40] sm:$0xff] (%p78_p3)  ;;  %v281_v5 = vld [vmem:[%s1112_s26 + $0x50] sm:$0xff] (%p78_p3)  ;;  %278 = vst [vmem:[%s1117_s27 + $0x18] sm:$0xff] (%p78_p3), %v277_v3 }
  0x14   : > { %280 = vst [vmem:[%s1117_s27 + $0x20] sm:$0xff] (%p78_p3), %v279_v4  ;;  %282 = vst [vmem:[%s1117_s27 + $0x28] sm:$0xff] (%p78_p3), %v281_v5  ;;  %v283_v6 = vld [vmem:[%s1112_s26 + $0x60] sm:$0xff] (%p78_p3)  ;;  %v285_v7 = vld [vmem:[%s1112_s26 + $0x70] sm:$0xff] (%p78_p3) }
  0x15   : > { %v287_v8 = vld [vmem:[%s1112_s26 + $0x80] sm:$0xff]  ;;  %284 = vst [vmem:[%s1117_s27 + $0x30] sm:$0xff] %v283_v6  ;;  %286 = vst [vmem:[%s1117_s27 + $0x38] sm:$0xff] %v285_v7  ;;  %v289_v9 = vld [vmem:[%s1112_s26 + $0x90] sm:$0xff] }
  0x16   : > { %288 = vst [vmem:[%s1117_s27 + $0x40] sm:$0xff] %v287_v8  ;;  %v291_v10 = vld [vmem:[%s1112_s26 + $0xa0] sm:$0xff]  ;;  %v293_v11 = vld [vmem:[%s1112_s26 + $0xb0] sm:$0xff]  ;;  %290 = vst [vmem:[%s1117_s27 + $0x48] sm:$0xff] %v289_v9 }
  0x17   : > { %292 = vst [vmem:[%s1117_s27 + $0x50] sm:$0xff] %v291_v10  ;;  %294 = vst [vmem:[%s1117_s27 + $0x58] sm:$0xff] %v293_v11  ;;  %v295_v12 = vld [vmem:[%s1112_s26 + $0xc0] sm:$0xff]  ;;  %v297_v13 = vld [vmem:[%s1112_s26 + $0xd0] sm:$0xff] }
  0x18   : > { %v299_v14 = vld [vmem:[%s1112_s26 + $0xe0] sm:$0xff]  ;;  %296 = vst [vmem:[%s1117_s27 + $0x60] sm:$0xff] %v295_v12  ;;  %298 = vst [vmem:[%s1117_s27 + $0x68] sm:$0xff] %v297_v13  ;;  %v301_v15 = vld [vmem:[%s1112_s26 + $0xf0] sm:$0xff] }
  0x19   : > { %300 = vst [vmem:[%s1117_s27 + $0x70] sm:$0xff] %v299_v14  ;;  %v303_v16 = vld [vmem:[%s1112_s26 + $0x100] sm:$0xff]  ;;  %v305_v17 = vld [vmem:[%s1112_s26 + $0x110] sm:$0xff]  ;;  %302 = vst [vmem:[%s1117_s27 + $0x78] sm:$0xff] %v301_v15 }
  0x1a   : > { %304 = vst [vmem:[%s1117_s27 + $0x80] sm:$0xff] %v303_v16  ;;  %306 = vst [vmem:[%s1117_s27 + $0x88] sm:$0xff] %v305_v17  ;;  %v307_v18 = vld [vmem:[%s1112_s26 + $0x120] sm:$0xff]  ;;  %v309_v19 = vld [vmem:[%s1112_s26 + $0x130] sm:$0xff] }
  0x1b   : > { %v311_v20 = vld [vmem:[%s1112_s26 + $0x140] sm:$0xff]  ;;  %308 = vst [vmem:[%s1117_s27 + $0x90] sm:$0xff] %v307_v18  ;;  %310 = vst [vmem:[%s1117_s27 + $0x98] sm:$0xff] %v309_v19  ;;  %v313_v21 = vld [vmem:[%s1112_s26 + $0x150] sm:$0xff] }
  0x1c   : > { %312 = vst [vmem:[%s1117_s27 + $0xa0] sm:$0xff] %v311_v20  ;;  %v315_v22 = vld [vmem:[%s1112_s26 + $0x160] sm:$0xff]  ;;  %v317_v23 = vld [vmem:[%s1112_s26 + $0x170] sm:$0xff]  ;;  %314 = vst [vmem:[%s1117_s27 + $0xa8] sm:$0xff] %v313_v21 }
  0x1d   : > { %316 = vst [vmem:[%s1117_s27 + $0xb0] sm:$0xff] %v315_v22  ;;  %318 = vst [vmem:[%s1117_s27 + $0xb8] sm:$0xff] %v317_v23  ;;  %v319_v24 = vld [vmem:[%s1112_s26 + $0x180] sm:$0xff]  ;;  %v321_v25 = vld [vmem:[%s1112_s26 + $0x190] sm:$0xff] }
  0x1e   : > { %v323_v26 = vld [vmem:[%s1112_s26 + $0x1a0] sm:$0xff]  ;;  %320 = vst [vmem:[%s1117_s27 + $0xc0] sm:$0xff] %v319_v24  ;;  %322 = vst [vmem:[%s1117_s27 + $0xc8] sm:$0xff] %v321_v25  ;;  %v325_v27 = vld [vmem:[%s1112_s26 + $0x1b0] sm:$0xff] }
  0x1f   : > { %324 = vst [vmem:[%s1117_s27 + $0xd0] sm:$0xff] %v323_v26  ;;  %v327_v28 = vld [vmem:[%s1112_s26 + $0x1c0] sm:$0xff]  ;;  %v329_v29 = vld [vmem:[%s1112_s26 + $0x1d0] sm:$0xff]  ;;  %326 = vst [vmem:[%s1117_s27 + $0xd8] sm:$0xff] %v325_v27 }
  0x20   : > { %328 = vst [vmem:[%s1117_s27 + $0xe0] sm:$0xff] %v327_v28  ;;  %330 = vst [vmem:[%s1117_s27 + $0xe8] sm:$0xff] %v329_v29  ;;  %v331_v30 = vld [vmem:[%s1112_s26 + $0x1e0] sm:$0xff]  ;;  %v333_v31 = vld [vmem:[%s1112_s26 + $0x1f0] sm:$0xff] }
  0x21   : > { %332 = vst [vmem:[%s1117_s27 + $0xf0] sm:$0xff] %v331_v30  ;;  %334 = vst [vmem:[%s1117_s27 + $0xf8] sm:$0xff] %v333_v31 }
  0x22 PF: > { %p873_p6 = scmp.ge.s32.totalorder %s1044_s16, 1  ;;  %p347_p7 = scmp.lt.s32.totalorder %s1044_s16, 3 }
  0x24   : > { %p348_p8 = pnand %p873_p6, %p347_p7 }
  0x25   : > { %s354_s28 = sand.u32 (!%p348_p8), 1, %s1028_s12   ;;  %v1186_v32 = vld.sshfl [vmem:[%s1258_s0] sm:$0x11 pattern:$0x75316420] (!%p348_p8)  ;;  %v468_v33 = vlaneseq (!%p348_p8)  ;;  %v1047_v10 = vmov (!%p348_p8), 0.0  }
  0x26   : > { %351 = sbr.rel (%p348_p8) target bundleno = 343 (0x157), region = 66  ;;  %s874_s4 = sshll.u32 (!%p348_p8), %s354_s28, 8  ;;  %v1046_v34 = vmov (!%p348_p8), 1966171168   ;;  %v464_v39 = vcombine.high (!%p348_p8), %v1186_v32, %v1186_v32  ;;  %421 = vst [vmem:[#allocation2] sm:$0xf] (!%p348_p8), %v1047_v10 }
  0x27   : > { %v466_v35 = vunpack.c.l.s4 (!%p348_p8), %v1046_v34  ;;  %v1188_v36 = vshrl.u32 (!%p348_p8), %v468_v33, 7  ;;  %s1190_s5 = scalar_lea.vmem (!%p348_p8), [#allocation3], %s874_s4  ;;  %s875_s6 = sshll.u32 (!%p348_p8), %s1036_s14, 1  ;;  %v1048_v11 = vmov (!%p348_p8), 1983009808  }
  0x28   : > { %v958_v37 = vld [vmem:[%s1190_s5 + $0x4] ss:$8 sps:$4 sm:$0xff] (!%p348_p8)   ;;  %v960_v38 = vld [vmem:[%s1190_s5] ss:$8 sps:$4 sm:$0xff] (!%p348_p8)   ;;  %v961_v41 = vld [vmem:[%s1190_s5 + $0x14] ss:$8 sps:$4 sm:$0xff] (!%p348_p8)   ;;  %v686_v12 = vunpack.c.l.s4 (!%p348_p8), %v1048_v11 }
  0x29   : > { %v467_v40 = vunpack.c.0.s8 (!%p348_p8), %v466_v35  ;;  %641 = vmatprep.subr.bf16.mxu0 (!%p348_p8), %v958_v37  ;;  %v963_v42 = vld [vmem:[%s1190_s5 + $0x10] ss:$8 sps:$4 sm:$0xff] (!%p348_p8)   ;;  %v964_v44 = vld [vmem:[%s1190_s5 + $0x24] ss:$8 sps:$4 sm:$0xff] (!%p348_p8)   ;;  %v966_v46 = vld [vmem:[%s1190_s5 + $0x20] ss:$8 sps:$4 sm:$0xff] (!%p348_p8)  }
  0x2a   : > { %642 = vmatpush1.bf16.msra.mxu0 (!%p348_p8), %v960_v38  ;;  %v967_v47 = vld [vmem:[%s1190_s5 + $0x34] ss:$8 sps:$4 sm:$0xff] (!%p348_p8)   ;;  %v969_v48 = vld [vmem:[%s1190_s5 + $0x30] ss:$8 sps:$4 sm:$0xff] (!%p348_p8)   ;;  %v970_v49 = vld [vmem:[%s1190_s5 + $0x44] ss:$8 sps:$4 sm:$0xff] (!%p348_p8)   ;;  %v687_v13 = vunpack.c.0.s8 (!%p348_p8), %v686_v12 }
  0x2b   : > { %v1199_v43 = vsub.s32 (!%p348_p8), %v467_v40, %v1188_v36  ;;  %643 = vmatprep.subr.bf16.mxu0 (!%p348_p8), %v961_v41  ;;  %v972_v50 = vld [vmem:[%s1190_s5 + $0x40] ss:$8 sps:$4 sm:$0xff] (!%p348_p8)   ;;  %v973_v51 = vld [vmem:[%s1190_s5 + $0x54] ss:$8 sps:$4 sm:$0xff] (!%p348_p8)   ;;  %v975_v52 = vld [vmem:[%s1190_s5 + $0x50] ss:$8 sps:$4 sm:$0xff] (!%p348_p8)  }
  0x2c   : > { %v976_v53 = vld [vmem:[%s1190_s5 + $0x64] ss:$8 sps:$4 sm:$0xff] (!%p348_p8)   ;;  %v978_v54 = vld [vmem:[%s1190_s5 + $0x60] ss:$8 sps:$4 sm:$0xff] (!%p348_p8)   ;;  %v979_v55 = vld [vmem:[%s1190_s5 + $0x74] ss:$8 sps:$4 sm:$0xff] (!%p348_p8)   ;;  %v690_v15 = vsub.s32 (!%p348_p8), %v687_v13, %v1188_v36 }
  0x2d   : > { %v478_v45 = vrot.slane %v464_v39, %v1199_v43  ;;  %v981_v56 = vld [vmem:[%s1190_s5 + $0x70] ss:$8 sps:$4 sm:$0xff]   ;;  %v982_v57 = vld [vmem:[%s1190_s5 + $0x84] ss:$8 sps:$4 sm:$0xff]   ;;  %v984_v58 = vld [vmem:[%s1190_s5 + $0x80] ss:$8 sps:$4 sm:$0xff]   ;;  %v471_v9 = vrot.slane %v1186_v32, %v1199_v43 }
  0x2e   : > { %644 = vmatpush1.bf16.msra.mxu0 %v963_v42  ;;  %v985_v59 = vld [vmem:[%s1190_s5 + $0x94] ss:$8 sps:$4 sm:$0xff]   ;;  %v987_v60 = vld [vmem:[%s1190_s5 + $0x90] ss:$8 sps:$4 sm:$0xff]   ;;  %v988_v61 = vld [vmem:[%s1190_s5 + $0xa4] ss:$8 sps:$4 sm:$0xff]  }
  0x2f   : > { %673 = vmatprep.mubr.bf16.mxu0 %v478_v45  ;;  %645 = vmatprep.subr.bf16.mxu0 %v964_v44  ;;  %v990_v62 = vld [vmem:[%s1190_s5 + $0xa0] ss:$8 sps:$4 sm:$0xff]   ;;  %v991_v63 = vld [vmem:[%s1190_s5 + $0xb4] ss:$8 sps:$4 sm:$0xff]   ;;  %v993_v0 = vld [vmem:[%s1190_s5 + $0xb0] ss:$8 sps:$4 sm:$0xff]  }
  0x30   : > { %v994_v1 = vld [vmem:[%s1190_s5 + $0xc4] ss:$8 sps:$4 sm:$0xff]   ;;  %v996_v2 = vld [vmem:[%s1190_s5 + $0xc0] ss:$8 sps:$4 sm:$0xff]   ;;  %v997_v3 = vld [vmem:[%s1190_s5 + $0xd4] ss:$8 sps:$4 sm:$0xff]  }
  0x31   : > { %v999_v4 = vld [vmem:[%s1190_s5 + $0xd0] ss:$8 sps:$4 sm:$0xff]   ;;  %v1000_v5 = vld [vmem:[%s1190_s5 + $0xe4] ss:$8 sps:$4 sm:$0xff]   ;;  %v1002_v6 = vld [vmem:[%s1190_s5 + $0xe0] ss:$8 sps:$4 sm:$0xff]  }
  0x32   : > { %646 = vmatpush1.bf16.msra.mxu0 %v966_v46  ;;  %v1003_v7 = vld [vmem:[%s1190_s5 + $0xf4] ss:$8 sps:$4 sm:$0xff]   ;;  %v1005_v8 = vld [vmem:[%s1190_s5 + $0xf0] ss:$8 sps:$4 sm:$0xff]   ;;  %p404_p9 = scmp.lt.s32.totalorder %s875_s6, 3  ;;  %v703_v16 = vsub.s32 0, %v1188_v36 }
  0x33   : > { %647 = vmatprep.subr.bf16.mxu0 %v967_v47  ;;  %v707_v17 = vsub.s32 1, %v1188_v36  ;;  %v422_v22 = vld [vmem:[#allocation2] sm:$0xf] }
  0x34   : > { %s1269_s6 = smov (!%p404_p9, %s875_s6), 3 }
  0x35   : > { %s406_s9 = scalar_lea.vmem %s1260_s2, %s1269_s6  ;;  %s415_s12 = scalar_lea.vmem %s1261_s3, %s1269_s6 }
  0x36   : > { %648 = vmatpush1.bf16.msra.mxu0 %v969_v48  ;;  %v699_v19 = vld [vmem:[%s406_s9] sm:$0x3] }
  0x37   : > { %649 = vmatprep.subr.bf16.mxu0 %v970_v49  ;;  %v704_v25 = vrot.slane %v699_v19, %v703_v16  ;;  %v708_v26 = vrot.slane %v699_v19, %v707_v17 }
  0x39   : > { %v709_v28 = vcombine.low %v704_v25, %v708_v26 }
  0x3a   : > { %650 = vmatpush1.bf16.msra.mxu0 %v972_v50 }
  0x3b   : > { %651 = vmatprep.subr.bf16.mxu0 %v973_v51  ;;  %v716_v29 = vrot.slane %v709_v28, %v690_v15 }
  0x3e   : > { %652 = vmatpush1.bf16.msra.mxu0 %v975_v52 }
  0x3f   : > { %653 = vmatprep.subr.bf16.mxu0 %v976_v53 }
  0x42   : > { %654 = vmatpush1.bf16.msra.mxu0 %v978_v54 }
  0x43   : > { %655 = vmatprep.subr.bf16.mxu0 %v979_v55 }
  0x46   : > { %656 = vmatpush1.bf16.msra.mxu0 %v981_v56 }
  0x47   : > { %657 = vmatprep.subr.bf16.mxu0 %v982_v57 }
  0x4a   : > { %658 = vmatpush1.bf16.msra.mxu0 %v984_v58 }
  0x4b   : > { %659 = vmatprep.subr.bf16.mxu0 %v985_v59 }
  0x4e   : > { %660 = vmatpush1.bf16.msra.mxu0 %v987_v60 }
  0x4f   : > { %661 = vmatprep.subr.bf16.mxu0 %v988_v61 }
  0x52   : > { %662 = vmatpush1.bf16.msra.mxu0 %v990_v62 }
  0x53   : > { %663 = vmatprep.subr.bf16.mxu0 %v991_v63 }
  0x56   : > { %664 = vmatpush1.bf16.msra.mxu0 %v993_v0 }
  0x57   : > { %665 = vmatprep.subr.bf16.mxu0 %v994_v1 }
  0x5a   : > { %666 = vmatpush1.bf16.msra.mxu0 %v996_v2 }
  0x5b   : > { %667 = vmatprep.subr.bf16.mxu0 %v997_v3 }
  0x5e   : > { %668 = vmatpush1.bf16.msra.mxu0 %v999_v4 }
  0x5f   : > { %669 = vmatprep.subr.bf16.mxu0 %v1000_v5 }
  0x62   : > { %670 = vmatpush1.bf16.msra.mxu0 %v1002_v6 }
  0x63   : > { %671 = vmatprep.subr.bf16.mxu0 %v1003_v7 }
  0x66   : > { %672 = vmatpush1.bf16.msra.mxu0 %v1005_v8 }
  0x69   : > { %674 = vmatmul.mubr.bf16.vlgmr.msra.gmra.mrb[0].mxu0 %v471_v9 }
 0x13c   : > { %v675_v14 = vpop.f32.mrb[0].mxu0 }
 0x13d   : > { %v677_v18 = vpop.f32.mrb[1].mxu0 }
 0x13e   : > { %v684_v20 = vcombine.low %v675_v14, %v677_v18  ;;  %v679_v21 = vpop.f32.mrb[2].mxu0 }
 0x13f   : > { %v680_v23 = vpop.f32.mrb[3].mxu0 }
 0x140   : > { %v691_v24 = vrot.slane %v684_v20, %v690_v15 }
 0x142   : > { %v693_v27 = vadd.f32 %v691_v24, %v422_v22 }
 0x144   : > { %694 = vst [vmem:[#allocation2] sm:$0xf] %v693_v27 }
 0x14b   : > { %v698_v30 = vld [vmem:[#allocation2] sm:$0xf] }
 0x14c   : > { %v718_v31 = vadd.f32 %v716_v29, %v698_v30 }
 0x14e   : > { %v726_v32 = vrot.slane %v718_v31, %v690_v15 }
 0x150   : > { %v727_v33 = vcombine.high %v726_v32, %v726_v32 }
 0x152   : > { %v910_v34 = vpack.c.bf16 %v727_v33, %v726_v32 }
 0x154   : > { %v741_v35 = vrot.slane %v910_v34, %v1199_v43 }
 0x156   : > { %911 = vst.sshfl [vmem:[%s415_s12] sm:$0x5 pattern:$0x73625140] %v741_v35 }
 0x157 PF: > { %s13_s16 = sadd.s32 1, %s1044_s16   ;;  %s1262_s12 = smov %s1032_s13 }
 0x158   : > { %p10_p10 = scmp.ge.s32.totalorder %s13_s16, 4   ;;  %s1263_s13 = smov %s1104_s20 }
 0x159   : > { %s1264_s14 = smov %s1040_s15  ;;  %s1265_s15 = smov %s1267_s17 }
 0x15a   :  { %12 = sbr.rel (!%p10_p10) target bundleno = 3 (0x3), region = 119 }

// kernel: visual_encoder_forward.38
= control target key start
LH: loop header
LB: loop body
LE: loop exit
PB: predicated region body
PF: predicated region fallthrough
CT: control target
= control target key end

     0   :  { %s1638_s15 = smov 0   ;;  %s1640_s16 = smov 0   ;;  %s1975_s0 = inlined_call_operand.vmem [shape: bf16[2,4608], index: 0, kind: input, shape index: {}]   ;;  %s1976_s1 = inlined_call_operand.vmem [shape: bf16[4608,512], index: 1, kind: input, shape index: {}]   ;;  %s1977_s2 = inlined_call_operand.vmem [shape: f32[1,512], index: 2, kind: input, shape index: {}]   ;;  %s1978_s3 = inlined_call_operand.vmem [shape: bf16[2,512], index: 3, kind: input, shape index: {}]   ;;  %s1979_s4 = inlined_call_operand.vmem [shape: bf16[2,512], index: 4, kind: output, shape index: {}]  }
   0x1   :  { %s1642_s17 = smov 0   ;;  %s1644_s18 = smov 0  }
   0x2   :  { %s1646_s19 = smov 0   ;;  %s1648_s20 = smov 0  }
   0x3   :  { %s1650_s21 = smov 0  }
   0x4 LB: > { %s26_s22 = sadd.s32 1, %s1600_s19  ;;  %s29_s23 = sadd.s32 1, %s1604_s20  ;;  %s1608_s21 = sphi %s1650_s21, %s14_s21   ;;  %s1604_s20 = sphi %s1648_s20, %s1985_s20   ;;  %s1600_s19 = sphi %s1646_s19, %s1984_s19   ;;  %s1596_s18 = sphi %s1644_s18, %s1983_s18   ;;  %s1592_s17 = sphi %s1642_s17, %s1982_s17   ;;  %s1588_s16 = sphi %s1640_s16, %s1981_s16   ;;  %s1584_s15 = sphi %s1638_s15, %s1980_s15  }
   0x5   : > { %p27_p0 = scmp.ge.s32.totalorder %s26_s22, 9  ;;  %p77_p1 = scmp.ne.s32.totalorder %s1588_s16, %s1584_s15 }
   0x6   : > { %p78_p2 = scmp.eq.s32.totalorder %s1608_s21, 0  ;;  %s70_s27 = sadd.s32 1, %s1588_s16 }
   0x7   : > { %s1987_s22 = smov (%p27_p0, %s26_s22), 0  ;;  %s1989_s23 = smov (!%p27_p0, %s29_s23), %s1604_s20 }
   0x8   : > { %p79_p3 = por %p78_p2, %p77_p1  ;;  %p31_p4 = scmp.ge.s32.totalorder %s1989_s23, 2 }
   0x9   : > { %s65_s24 = ssub.s32 %s1600_s19, %s1987_s22  ;;  %p1313_p6 = scmp.ge.s32.totalorder %s1608_s21, 18 }
   0xa   : > { %s1991_s23 = smov (%p31_p4, %s1989_s23), 0 }
   0xb   : > { %s66_s25 = ssub.s32 %s1604_s20, %s1991_s23  ;;  %185 = sbr.rel (%p1313_p6) target bundleno = 57 (0x39), region = 16 }
   0xc   : > { %s67_s26 = sor.u32 %s66_s25, %s65_s24 }
   0xd   : > { %p68_p5 = scmp.eq.s32.totalorder %s67_s26, 0 }
   0xf   : > { %s1689_s28 = scalar_select %p68_p5, %s1588_s16, %s70_s27  }
  0x12   : > { %200 = sbr.rel (!%p79_p3) target bundleno = 57 (0x39), region = 24  ;;  %s202_s29 = sand.u32 (%p79_p3), 1, %s1588_s16  }
  0x13   : > { %s1316_s30 = sshll.u32 (%p79_p3), %s1604_s20, 1  ;;  %s1314_s5 = sshll.u32 (%p79_p3), %s202_s29, 9 }
  0x14   : > { %s1396_s6 = sshll.u32 (%p79_p3), %s1600_s19, 8  ;;  %s1703_s12 = scalar_lea.vmem (%p79_p3), [#allocation3], %s1314_s5 }
  0x15   : > { %s208_s7 = sadd.s32 (%p79_p3), %s1396_s6, %s1316_s30 }
  0x16   : > { %s1318_s8 = sshll.u32 (%p79_p3), %s208_s7, 2 }
  0x17   : > { %s1698_s11 = scalar_lea.vmem (%p79_p3), %s1976_s1, %s1318_s8 }
  0x18   : > { %v364_v0 = vld [vmem:[%s1698_s11] sm:$0xff] (%p79_p3)  ;;  %v366_v1 = vld [vmem:[%s1698_s11 + $0x10] sm:$0xff] (%p79_p3) }
  0x19   : > { %v368_v2 = vld [vmem:[%s1698_s11 + $0x20] sm:$0xff]  ;;  %365 = vst [vmem:[%s1703_s12] sm:$0xff] %v364_v0  ;;  %367 = vst [vmem:[%s1703_s12 + $0x8] sm:$0xff] %v366_v1  ;;  %v370_v3 = vld [vmem:[%s1698_s11 + $0x30] sm:$0xff] }
  0x1a   : > { %369 = vst [vmem:[%s1703_s12 + $0x10] sm:$0xff] %v368_v2  ;;  %v372_v4 = vld [vmem:[%s1698_s11 + $0x40] sm:$0xff]  ;;  %v374_v5 = vld [vmem:[%s1698_s11 + $0x50] sm:$0xff]  ;;  %371 = vst [vmem:[%s1703_s12 + $0x18] sm:$0xff] %v370_v3 }
  0x1b   : > { %373 = vst [vmem:[%s1703_s12 + $0x20] sm:$0xff] %v372_v4  ;;  %375 = vst [vmem:[%s1703_s12 + $0x28] sm:$0xff] %v374_v5  ;;  %v376_v6 = vld [vmem:[%s1698_s11 + $0x60] sm:$0xff]  ;;  %v378_v7 = vld [vmem:[%s1698_s11 + $0x70] sm:$0xff] }
  0x1c   : > { %v380_v8 = vld [vmem:[%s1698_s11 + $0x80] sm:$0xff]  ;;  %377 = vst [vmem:[%s1703_s12 + $0x30] sm:$0xff] %v376_v6  ;;  %379 = vst [vmem:[%s1703_s12 + $0x38] sm:$0xff] %v378_v7  ;;  %v382_v9 = vld [vmem:[%s1698_s11 + $0x90] sm:$0xff] }
  0x1d   : > { %381 = vst [vmem:[%s1703_s12 + $0x40] sm:$0xff] %v380_v8  ;;  %v384_v10 = vld [vmem:[%s1698_s11 + $0xa0] sm:$0xff]  ;;  %v386_v11 = vld [vmem:[%s1698_s11 + $0xb0] sm:$0xff]  ;;  %383 = vst [vmem:[%s1703_s12 + $0x48] sm:$0xff] %v382_v9 }
  0x1e   : > { %385 = vst [vmem:[%s1703_s12 + $0x50] sm:$0xff] %v384_v10  ;;  %387 = vst [vmem:[%s1703_s12 + $0x58] sm:$0xff] %v386_v11  ;;  %v388_v12 = vld [vmem:[%s1698_s11 + $0xc0] sm:$0xff]  ;;  %v390_v13 = vld [vmem:[%s1698_s11 + $0xd0] sm:$0xff] }
  0x1f   : > { %v392_v14 = vld [vmem:[%s1698_s11 + $0xe0] sm:$0xff]  ;;  %389 = vst [vmem:[%s1703_s12 + $0x60] sm:$0xff] %v388_v12  ;;  %391 = vst [vmem:[%s1703_s12 + $0x68] sm:$0xff] %v390_v13  ;;  %v394_v15 = vld [vmem:[%s1698_s11 + $0xf0] sm:$0xff] }
  0x20   : > { %393 = vst [vmem:[%s1703_s12 + $0x70] sm:$0xff] %v392_v14  ;;  %v396_v16 = vld [vmem:[%s1698_s11 + $0x100] sm:$0xff]  ;;  %v398_v17 = vld [vmem:[%s1698_s11 + $0x110] sm:$0xff]  ;;  %395 = vst [vmem:[%s1703_s12 + $0x78] sm:$0xff] %v394_v15 }
  0x21   : > { %397 = vst [vmem:[%s1703_s12 + $0x80] sm:$0xff] %v396_v16  ;;  %399 = vst [vmem:[%s1703_s12 + $0x88] sm:$0xff] %v398_v17  ;;  %v400_v18 = vld [vmem:[%s1698_s11 + $0x120] sm:$0xff]  ;;  %v402_v19 = vld [vmem:[%s1698_s11 + $0x130] sm:$0xff] }
  0x22   : > { %v404_v20 = vld [vmem:[%s1698_s11 + $0x140] sm:$0xff]  ;;  %401 = vst [vmem:[%s1703_s12 + $0x90] sm:$0xff] %v400_v18  ;;  %403 = vst [vmem:[%s1703_s12 + $0x98] sm:$0xff] %v402_v19  ;;  %v406_v21 = vld [vmem:[%s1698_s11 + $0x150] sm:$0xff] }
  0x23   : > { %405 = vst [vmem:[%s1703_s12 + $0xa0] sm:$0xff] %v404_v20  ;;  %v408_v22 = vld [vmem:[%s1698_s11 + $0x160] sm:$0xff]  ;;  %v410_v23 = vld [vmem:[%s1698_s11 + $0x170] sm:$0xff]  ;;  %407 = vst [vmem:[%s1703_s12 + $0xa8] sm:$0xff] %v406_v21 }
  0x24   : > { %409 = vst [vmem:[%s1703_s12 + $0xb0] sm:$0xff] %v408_v22  ;;  %411 = vst [vmem:[%s1703_s12 + $0xb8] sm:$0xff] %v410_v23  ;;  %v412_v24 = vld [vmem:[%s1698_s11 + $0x180] sm:$0xff]  ;;  %v414_v25 = vld [vmem:[%s1698_s11 + $0x190] sm:$0xff] }
  0x25   : > { %v416_v26 = vld [vmem:[%s1698_s11 + $0x1a0] sm:$0xff]  ;;  %413 = vst [vmem:[%s1703_s12 + $0xc0] sm:$0xff] %v412_v24  ;;  %415 = vst [vmem:[%s1703_s12 + $0xc8] sm:$0xff] %v414_v25  ;;  %v418_v27 = vld [vmem:[%s1698_s11 + $0x1b0] sm:$0xff] }
  0x26   : > { %417 = vst [vmem:[%s1703_s12 + $0xd0] sm:$0xff] %v416_v26  ;;  %v420_v28 = vld [vmem:[%s1698_s11 + $0x1c0] sm:$0xff]  ;;  %v422_v29 = vld [vmem:[%s1698_s11 + $0x1d0] sm:$0xff]  ;;  %419 = vst [vmem:[%s1703_s12 + $0xd8] sm:$0xff] %v418_v27 }
  0x27   : > { %421 = vst [vmem:[%s1703_s12 + $0xe0] sm:$0xff] %v420_v28  ;;  %423 = vst [vmem:[%s1703_s12 + $0xe8] sm:$0xff] %v422_v29  ;;  %v424_v30 = vld [vmem:[%s1698_s11 + $0x1e0] sm:$0xff]  ;;  %v426_v31 = vld [vmem:[%s1698_s11 + $0x1f0] sm:$0xff] }
  0x28   : > { %v428_v32 = vld [vmem:[%s1698_s11 + $0x200] sm:$0xff]  ;;  %425 = vst [vmem:[%s1703_s12 + $0xf0] sm:$0xff] %v424_v30  ;;  %427 = vst [vmem:[%s1703_s12 + $0xf8] sm:$0xff] %v426_v31  ;;  %v430_v33 = vld [vmem:[%s1698_s11 + $0x210] sm:$0xff] }
  0x29   : > { %429 = vst [vmem:[%s1703_s12 + $0x100] sm:$0xff] %v428_v32  ;;  %v432_v34 = vld [vmem:[%s1698_s11 + $0x220] sm:$0xff]  ;;  %v434_v35 = vld [vmem:[%s1698_s11 + $0x230] sm:$0xff]  ;;  %431 = vst [vmem:[%s1703_s12 + $0x108] sm:$0xff] %v430_v33 }
  0x2a   : > { %433 = vst [vmem:[%s1703_s12 + $0x110] sm:$0xff] %v432_v34  ;;  %435 = vst [vmem:[%s1703_s12 + $0x118] sm:$0xff] %v434_v35  ;;  %v436_v36 = vld [vmem:[%s1698_s11 + $0x240] sm:$0xff]  ;;  %v438_v37 = vld [vmem:[%s1698_s11 + $0x250] sm:$0xff] }
  0x2b   : > { %v440_v38 = vld [vmem:[%s1698_s11 + $0x260] sm:$0xff]  ;;  %437 = vst [vmem:[%s1703_s12 + $0x120] sm:$0xff] %v436_v36  ;;  %439 = vst [vmem:[%s1703_s12 + $0x128] sm:$0xff] %v438_v37  ;;  %v442_v39 = vld [vmem:[%s1698_s11 + $0x270] sm:$0xff] }
  0x2c   : > { %441 = vst [vmem:[%s1703_s12 + $0x130] sm:$0xff] %v440_v38  ;;  %v444_v40 = vld [vmem:[%s1698_s11 + $0x280] sm:$0xff]  ;;  %v446_v41 = vld [vmem:[%s1698_s11 + $0x290] sm:$0xff]  ;;  %443 = vst [vmem:[%s1703_s12 + $0x138] sm:$0xff] %v442_v39 }
  0x2d   : > { %445 = vst [vmem:[%s1703_s12 + $0x140] sm:$0xff] %v444_v40  ;;  %447 = vst [vmem:[%s1703_s12 + $0x148] sm:$0xff] %v446_v41  ;;  %v448_v42 = vld [vmem:[%s1698_s11 + $0x2a0] sm:$0xff]  ;;  %v450_v43 = vld [vmem:[%s1698_s11 + $0x2b0] sm:$0xff] }
  0x2e   : > { %v452_v44 = vld [vmem:[%s1698_s11 + $0x2c0] sm:$0xff]  ;;  %449 = vst [vmem:[%s1703_s12 + $0x150] sm:$0xff] %v448_v42  ;;  %451 = vst [vmem:[%s1703_s12 + $0x158] sm:$0xff] %v450_v43  ;;  %v454_v45 = vld [vmem:[%s1698_s11 + $0x2d0] sm:$0xff] }
  0x2f   : > { %453 = vst [vmem:[%s1703_s12 + $0x160] sm:$0xff] %v452_v44  ;;  %v456_v46 = vld [vmem:[%s1698_s11 + $0x2e0] sm:$0xff]  ;;  %v458_v47 = vld [vmem:[%s1698_s11 + $0x2f0] sm:$0xff]  ;;  %455 = vst [vmem:[%s1703_s12 + $0x168] sm:$0xff] %v454_v45 }
  0x30   : > { %457 = vst [vmem:[%s1703_s12 + $0x170] sm:$0xff] %v456_v46  ;;  %459 = vst [vmem:[%s1703_s12 + $0x178] sm:$0xff] %v458_v47  ;;  %v460_v48 = vld [vmem:[%s1698_s11 + $0x300] sm:$0xff]  ;;  %v462_v49 = vld [vmem:[%s1698_s11 + $0x310] sm:$0xff] }
  0x31   : > { %v464_v50 = vld [vmem:[%s1698_s11 + $0x320] sm:$0xff]  ;;  %461 = vst [vmem:[%s1703_s12 + $0x180] sm:$0xff] %v460_v48  ;;  %463 = vst [vmem:[%s1703_s12 + $0x188] sm:$0xff] %v462_v49  ;;  %v466_v51 = vld [vmem:[%s1698_s11 + $0x330] sm:$0xff] }
  0x32   : > { %465 = vst [vmem:[%s1703_s12 + $0x190] sm:$0xff] %v464_v50  ;;  %v468_v52 = vld [vmem:[%s1698_s11 + $0x340] sm:$0xff]  ;;  %v470_v53 = vld [vmem:[%s1698_s11 + $0x350] sm:$0xff]  ;;  %467 = vst [vmem:[%s1703_s12 + $0x198] sm:$0xff] %v466_v51 }
  0x33   : > { %469 = vst [vmem:[%s1703_s12 + $0x1a0] sm:$0xff] %v468_v52  ;;  %471 = vst [vmem:[%s1703_s12 + $0x1a8] sm:$0xff] %v470_v53  ;;  %v472_v54 = vld [vmem:[%s1698_s11 + $0x360] sm:$0xff]  ;;  %v474_v55 = vld [vmem:[%s1698_s11 + $0x370] sm:$0xff] }
  0x34   : > { %v476_v56 = vld [vmem:[%s1698_s11 + $0x380] sm:$0xff]  ;;  %473 = vst [vmem:[%s1703_s12 + $0x1b0] sm:$0xff] %v472_v54  ;;  %475 = vst [vmem:[%s1703_s12 + $0x1b8] sm:$0xff] %v474_v55  ;;  %v478_v57 = vld [vmem:[%s1698_s11 + $0x390] sm:$0xff] }
  0x35   : > { %477 = vst [vmem:[%s1703_s12 + $0x1c0] sm:$0xff] %v476_v56  ;;  %v480_v58 = vld [vmem:[%s1698_s11 + $0x3a0] sm:$0xff]  ;;  %v482_v59 = vld [vmem:[%s1698_s11 + $0x3b0] sm:$0xff]  ;;  %479 = vst [vmem:[%s1703_s12 + $0x1c8] sm:$0xff] %v478_v57 }
  0x36   : > { %481 = vst [vmem:[%s1703_s12 + $0x1d0] sm:$0xff] %v480_v58  ;;  %483 = vst [vmem:[%s1703_s12 + $0x1d8] sm:$0xff] %v482_v59  ;;  %v484_v60 = vld [vmem:[%s1698_s11 + $0x3c0] sm:$0xff]  ;;  %v486_v61 = vld [vmem:[%s1698_s11 + $0x3d0] sm:$0xff] }
  0x37   : > { %v488_v62 = vld [vmem:[%s1698_s11 + $0x3e0] sm:$0xff]  ;;  %485 = vst [vmem:[%s1703_s12 + $0x1e0] sm:$0xff] %v484_v60  ;;  %487 = vst [vmem:[%s1703_s12 + $0x1e8] sm:$0xff] %v486_v61  ;;  %v490_v63 = vld [vmem:[%s1698_s11 + $0x3f0] sm:$0xff] }
  0x38   : > { %489 = vst [vmem:[%s1703_s12 + $0x1f0] sm:$0xff] %v488_v62  ;;  %491 = vst [vmem:[%s1703_s12 + $0x1f8] sm:$0xff] %v490_v63 }
  0x39 PF: > { %p1319_p7 = scmp.ge.s32.totalorder %s1608_s21, 1  ;;  %p516_p8 = scmp.lt.s32.totalorder %s1608_s21, 19 }
  0x3b   : > { %p517_p9 = pnand %p1319_p7, %p516_p8 }
  0x3c   : > { %s523_s13 = sand.u32 (!%p517_p9), 1, %s1584_s15   ;;  %s1321_s14 = sshll.u32 (!%p517_p9), %s1592_s17, 2 }
  0x3d   : > { %520 = sbr.rel (%p517_p9) target bundleno = 388 (0x184), region = 70  ;;  %s1320_s24 = sshll.u32 (!%p517_p9), %s523_s13, 9 }
  0x3e   : > { %p574_p10 = scmp.lt.s32.totalorder (!%p517_p9), %s1321_s14, 35  ;;  %s1322_s25 = sshll.u32 (!%p517_p9), %s1596_s18, 1 }
  0x3f   : > { %p583_p11 = scmp.lt.s32.totalorder (!%p517_p9), %s1322_s25, 3  ;;  %s1855_s11 = scalar_lea.vmem (!%p517_p9), [#allocation3], %s1320_s24 }
  0x40   : > { %p1325_p12 = scmp.ne.s32.totalorder (!%p517_p9), %s1592_s17, 0 }
  0x44   : > { %s1993_s14 = smov (!%p574_p10, %s1321_s14), 35  ;;  %s1995_s25 = smov (!%p583_p11, %s1322_s25), 3 }
  0x45   : > { %s578_s29 = scalar_lea.vmem %s1975_s0, %s1993_s14  ;;  %s585_s15 = scalar_lea.vmem %s1977_s2, %s1995_s25  ;;  %v1610_v0 = vmov (!%p1325_p12), 0.0  }
  0x46   : > { %s594_s18 = scalar_lea.vmem %s1978_s3, %s1995_s25  ;;  %s603_s10 = scalar_lea.vmem %s1979_s4, %s1995_s25  ;;  %609 = vst [vmem:[#allocation2] sm:$0xf] (!%p1325_p12), %v1610_v0 }
  0x47   : > { %608 = sbr.rel (%p1325_p12) target bundleno = 78 (0x4e), region = 78 }
  0x4e PF: > { %v1458_v1 = vld [vmem:[%s1855_s11 + $0x4] ss:$8 sps:$4 sm:$0xff]   ;;  %v1462_v3 = vld [vmem:[%s1855_s11] ss:$8 sps:$4 sm:$0xff]   ;;  %v1464_v5 = vld [vmem:[%s1855_s11 + $0x14] ss:$8 sps:$4 sm:$0xff]   ;;  %v688_v41 = vlaneseq }
  0x4f   : > { %v1460_v2 = vld [vmem:[%s1855_s11 + $0x104] ss:$8 sps:$4 sm:$0xff]   ;;  %1025 = vmatprep.subr.bf16.mxu1 %v1458_v1  ;;  %v1463_v4 = vld [vmem:[%s1855_s11 + $0x100] ss:$8 sps:$4 sm:$0xff]   ;;  %v1466_v6 = vld [vmem:[%s1855_s11 + $0x114] ss:$8 sps:$4 sm:$0xff]  }
  0x50   : > { %1066 = vmatprep.subr.bf16.mxu0 %v1460_v2  ;;  %1026 = vmatpush1.bf16.msra.mxu1 %v1462_v3  ;;  %v1468_v7 = vld [vmem:[%s1855_s11 + $0x10] ss:$8 sps:$4 sm:$0xff]   ;;  %v1470_v9 = vld [vmem:[%s1855_s11 + $0x24] ss:$8 sps:$4 sm:$0xff]   ;;  %v1474_v11 = vld [vmem:[%s1855_s11 + $0x20] ss:$8 sps:$4 sm:$0xff]  }
  0x51   : > { %1067 = vmatpush1.bf16.msra.mxu0 %v1463_v4  ;;  %1027 = vmatprep.subr.bf16.mxu1 %v1464_v5  ;;  %v1469_v8 = vld [vmem:[%s1855_s11 + $0x110] ss:$8 sps:$4 sm:$0xff]   ;;  %v1472_v10 = vld [vmem:[%s1855_s11 + $0x124] ss:$8 sps:$4 sm:$0xff]   ;;  %v1475_v12 = vld [vmem:[%s1855_s11 + $0x120] ss:$8 sps:$4 sm:$0xff]  }
  0x52   : > { %1068 = vmatprep.subr.bf16.mxu0 %v1466_v6  ;;  %v1476_v13 = vld [vmem:[%s1855_s11 + $0x34] ss:$8 sps:$4 sm:$0xff]   ;;  %v1480_v15 = vld [vmem:[%s1855_s11 + $0x30] ss:$8 sps:$4 sm:$0xff]   ;;  %v1482_v17 = vld [vmem:[%s1855_s11 + $0x44] ss:$8 sps:$4 sm:$0xff]  }
  0x53   : > { %v1478_v14 = vld [vmem:[%s1855_s11 + $0x134] ss:$8 sps:$4 sm:$0xff]   ;;  %v1481_v16 = vld [vmem:[%s1855_s11 + $0x130] ss:$8 sps:$4 sm:$0xff]   ;;  %v1484_v18 = vld [vmem:[%s1855_s11 + $0x144] ss:$8 sps:$4 sm:$0xff]  }
  0x54   : > { %1028 = vmatpush1.bf16.msra.mxu1 %v1468_v7  ;;  %v1486_v19 = vld [vmem:[%s1855_s11 + $0x40] ss:$8 sps:$4 sm:$0xff]   ;;  %v1488_v21 = vld [vmem:[%s1855_s11 + $0x54] ss:$8 sps:$4 sm:$0xff]   ;;  %v1492_v23 = vld [vmem:[%s1855_s11 + $0x50] ss:$8 sps:$4 sm:$0xff]  }
  0x55   : > { %1069 = vmatpush1.bf16.msra.mxu0 %v1469_v8  ;;  %1029 = vmatprep.subr.bf16.mxu1 %v1470_v9  ;;  %v1487_v20 = vld [vmem:[%s1855_s11 + $0x140] ss:$8 sps:$4 sm:$0xff]   ;;  %v1490_v22 = vld [vmem:[%s1855_s11 + $0x154] ss:$8 sps:$4 sm:$0xff]   ;;  %v1493_v24 = vld [vmem:[%s1855_s11 + $0x150] ss:$8 sps:$4 sm:$0xff]  }
  0x56   : > { %1070 = vmatprep.subr.bf16.mxu0 %v1472_v10  ;;  %v1494_v25 = vld [vmem:[%s1855_s11 + $0x64] ss:$8 sps:$4 sm:$0xff]   ;;  %v1498_v27 = vld [vmem:[%s1855_s11 + $0x60] ss:$8 sps:$4 sm:$0xff]   ;;  %v1500_v29 = vld [vmem:[%s1855_s11 + $0x74] ss:$8 sps:$4 sm:$0xff]  }
  0x57   : > { %v1496_v26 = vld [vmem:[%s1855_s11 + $0x164] ss:$8 sps:$4 sm:$0xff]   ;;  %v1499_v28 = vld [vmem:[%s1855_s11 + $0x160] ss:$8 sps:$4 sm:$0xff]   ;;  %v1502_v30 = vld [vmem:[%s1855_s11 + $0x174] ss:$8 sps:$4 sm:$0xff]  }
  0x58   : > { %1030 = vmatpush1.bf16.msra.mxu1 %v1474_v11  ;;  %v1504_v31 = vld [vmem:[%s1855_s11 + $0x70] ss:$8 sps:$4 sm:$0xff]   ;;  %v1506_v33 = vld [vmem:[%s1855_s11 + $0x84] ss:$8 sps:$4 sm:$0xff]   ;;  %v1510_v35 = vld [vmem:[%s1855_s11 + $0x80] ss:$8 sps:$4 sm:$0xff]  }
  0x59   : > { %1071 = vmatpush1.bf16.msra.mxu0 %v1475_v12  ;;  %1031 = vmatprep.subr.bf16.mxu1 %v1476_v13  ;;  %v1505_v32 = vld [vmem:[%s1855_s11 + $0x170] ss:$8 sps:$4 sm:$0xff]   ;;  %v1508_v34 = vld [vmem:[%s1855_s11 + $0x184] ss:$8 sps:$4 sm:$0xff]   ;;  %v1511_v36 = vld [vmem:[%s1855_s11 + $0x180] ss:$8 sps:$4 sm:$0xff]  }
  0x5a   : > { %1072 = vmatprep.subr.bf16.mxu0 %v1478_v14  ;;  %v1512_v37 = vld [vmem:[%s1855_s11 + $0x94] ss:$8 sps:$4 sm:$0xff]   ;;  %v1611_v39 = vmov 1966171168   ;;  %v1516_v42 = vld [vmem:[%s1855_s11 + $0x90] ss:$8 sps:$4 sm:$0xff]  }
  0x5b   : > { %v1514_v38 = vld [vmem:[%s1855_s11 + $0x194] ss:$8 sps:$4 sm:$0xff]   ;;  %v686_v40 = vunpack.c.l.s4 %v1611_v39  ;;  %v1517_v43 = vld [vmem:[%s1855_s11 + $0x190] ss:$8 sps:$4 sm:$0xff]   ;;  %v1518_v44 = vld [vmem:[%s1855_s11 + $0xa4] ss:$8 sps:$4 sm:$0xff]  }
  0x5c   : > { %1032 = vmatpush1.bf16.msra.mxu1 %v1480_v15  ;;  %v1520_v45 = vld [vmem:[%s1855_s11 + $0x1a4] ss:$8 sps:$4 sm:$0xff]   ;;  %v1900_v47 = vshrl.u32 %v688_v41, 7  ;;  %v1522_v48 = vld [vmem:[%s1855_s11 + $0xa0] ss:$8 sps:$4 sm:$0xff]   ;;  %p1391_p13 = scmp.ne.s32.totalorder %s1592_s17, 8 }
  0x5d   : > { %1073 = vmatpush1.bf16.msra.mxu0 %v1481_v16  ;;  %1033 = vmatprep.subr.bf16.mxu1 %v1482_v17  ;;  %v687_v46 = vunpack.c.0.s8 %v686_v40  ;;  %v1523_v49 = vld [vmem:[%s1855_s11 + $0x1a0] ss:$8 sps:$4 sm:$0xff]   ;;  %v1524_v50 = vld [vmem:[%s1855_s11 + $0xb4] ss:$8 sps:$4 sm:$0xff]   ;;  %v1528_v54 = vld [vmem:[%s1855_s11 + $0xb0] ss:$8 sps:$4 sm:$0xff]  }
  0x5e   : > { %1074 = vmatprep.subr.bf16.mxu0 %v1484_v18  ;;  %v1526_v51 = vld [vmem:[%s1855_s11 + $0x1b4] ss:$8 sps:$4 sm:$0xff]   ;;  %v1529_v55 = vld [vmem:[%s1855_s11 + $0x1b0] ss:$8 sps:$4 sm:$0xff]   ;;  %v1530_v57 = vld [vmem:[%s1855_s11 + $0xc4] ss:$8 sps:$4 sm:$0xff]  }
  0x5f   : > { %v1907_v52 = vsub.s32 %v687_v46, %v1900_v47  ;;  %v1326_v53 = vld.sshfl [vmem:[%s578_s29] sm:$0x33 pattern:$0x75316420]  ;;  %v1532_v58 = vld [vmem:[%s1855_s11 + $0x1c4] ss:$8 sps:$4 sm:$0xff]  }
  0x60   : > { %1034 = vmatpush1.bf16.msra.mxu1 %v1486_v19  ;;  %v684_v56 = vcombine.high %v1326_v53, %v1326_v53  ;;  %v1534_v60 = vld [vmem:[%s1855_s11 + $0xc0] ss:$8 sps:$4 sm:$0xff]   ;;  %v1536_v63 = vld [vmem:[%s1855_s11 + $0xd4] ss:$8 sps:$4 sm:$0xff]   ;;  %v1540_v1 = vld [vmem:[%s1855_s11 + $0xd0] ss:$8 sps:$4 sm:$0xff]  }
  0x61   : > { %1075 = vmatpush1.bf16.msra.mxu0 %v1487_v20  ;;  %1035 = vmatprep.subr.bf16.mxu1 %v1488_v21  ;;  %v1535_v61 = vld [vmem:[%s1855_s11 + $0x1c0] ss:$8 sps:$4 sm:$0xff]   ;;  %v1538_v0 = vld [vmem:[%s1855_s11 + $0x1d4] ss:$8 sps:$4 sm:$0xff]   ;;  %v1541_v2 = vld [vmem:[%s1855_s11 + $0x1d0] ss:$8 sps:$4 sm:$0xff]   ;;  %v691_v9 = vrot.slane %v1326_v53, %v1907_v52 }
  0x62   : > { %1076 = vmatprep.subr.bf16.mxu0 %v1490_v22  ;;  %v698_v59 = vrot.slane %v684_v56, %v1907_v52  ;;  %v1542_v3 = vld [vmem:[%s1855_s11 + $0xe4] ss:$8 sps:$4 sm:$0xff]   ;;  %v1546_v5 = vld [vmem:[%s1855_s11 + $0xe0] ss:$8 sps:$4 sm:$0xff]   ;;  %v1548_v7 = vld [vmem:[%s1855_s11 + $0xf4] ss:$8 sps:$4 sm:$0xff]  }
  0x63   : > { %v1544_v4 = vld [vmem:[%s1855_s11 + $0x1e4] ss:$8 sps:$4 sm:$0xff]   ;;  %v1547_v6 = vld [vmem:[%s1855_s11 + $0x1e0] ss:$8 sps:$4 sm:$0xff]   ;;  %v1550_v8 = vld [vmem:[%s1855_s11 + $0x1f4] ss:$8 sps:$4 sm:$0xff]   ;;  %v699_v12 = vcombine.high %v691_v9, %v691_v9 }
  0x64   : > { %1036 = vmatpush1.bf16.msra.mxu1 %v1492_v23  ;;  %v700_v62 = vcombine.high %v698_v59, %v698_v59  ;;  %1057 = vmatprep.mubr.bf16.mxu1 %v698_v59  ;;  %v1552_v10 = vld [vmem:[%s1855_s11 + $0xf0] ss:$8 sps:$4 sm:$0xff]   ;;  %v1612_v13 = vmov 1983009808  }
  0x65   : > { %1077 = vmatpush1.bf16.msra.mxu0 %v1493_v24  ;;  %1037 = vmatprep.subr.bf16.mxu1 %v1494_v25  ;;  %v1553_v11 = vld [vmem:[%s1855_s11 + $0x1f0] ss:$8 sps:$4 sm:$0xff]   ;;  %v1111_v14 = vunpack.c.l.s4 %v1612_v13 }
  0x66   : > { %1078 = vmatprep.subr.bf16.mxu0 %v1496_v26  ;;  %1098 = vmatprep.mubr.bf16.mxu0 %v700_v62 }
  0x67   : > { %v1112_v15 = vunpack.c.0.s8 %v1111_v14 }
  0x68   : > { %1038 = vmatpush1.bf16.msra.mxu1 %v1498_v27 }
  0x69   : > { %1079 = vmatpush1.bf16.msra.mxu0 %v1499_v28  ;;  %1039 = vmatprep.subr.bf16.mxu1 %v1500_v29  ;;  %v1115_v22 = vsub.s32 %v1112_v15, %v1900_v47  ;;  %v610_v28 = vld [vmem:[#allocation2] sm:$0xf] }
  0x6a   : > { %1080 = vmatprep.subr.bf16.mxu0 %v1502_v30 }
  0x6c   : > { %1040 = vmatpush1.bf16.msra.mxu1 %v1504_v31  ;;  %v1125_v31 = vld [vmem:[%s585_s15] sm:$0x3] (!%p1391_p13) }
  0x6d   : > { %1081 = vmatpush1.bf16.msra.mxu0 %v1505_v32  ;;  %1041 = vmatprep.subr.bf16.mxu1 %v1506_v33  ;;  %v1129_v32 = vsub.s32 (!%p1391_p13), 0, %v1900_v47  ;;  %v1133_v33 = vsub.s32 (!%p1391_p13), 1, %v1900_v47 }
  0x6e   : > { %1082 = vmatprep.subr.bf16.mxu0 %v1508_v34 }
  0x6f   : > { %v1130_v34 = vrot.slane (!%p1391_p13), %v1125_v31, %v1129_v32 }
  0x70   : > { %1042 = vmatpush1.bf16.msra.mxu1 %v1510_v35  ;;  %v1134_v35 = vrot.slane (!%p1391_p13), %v1125_v31, %v1133_v33 }
  0x71   : > { %1083 = vmatpush1.bf16.msra.mxu0 %v1511_v36  ;;  %1043 = vmatprep.subr.bf16.mxu1 %v1512_v37  ;;  %v1145_v36 = vld [vmem:[%s594_s18] sm:$0x3] (!%p1391_p13) }
  0x72   : > { %1084 = vmatprep.subr.bf16.mxu0 %v1514_v38  ;;  %v1135_v37 = vcombine.low (!%p1391_p13), %v1130_v34, %v1134_v35  ;;  %v1146_v40 = vunpack.c.l.bf16 (!%p1391_p13), %v1145_v36 }
  0x74   : > { %1044 = vmatpush1.bf16.msra.mxu1 %v1516_v42  ;;  %v1142_v39 = vrot.slane (!%p1391_p13), %v1135_v37, %v1115_v22 }
  0x75   : > { %1085 = vmatpush1.bf16.msra.mxu0 %v1517_v43  ;;  %1045 = vmatprep.subr.bf16.mxu1 %v1518_v44 }
  0x76   : > { %1086 = vmatprep.subr.bf16.mxu0 %v1520_v45 }
  0x78   : > { %1046 = vmatpush1.bf16.msra.mxu1 %v1522_v48 }
  0x79   : > { %1087 = vmatpush1.bf16.msra.mxu0 %v1523_v49  ;;  %1047 = vmatprep.subr.bf16.mxu1 %v1524_v50 }
  0x7a   : > { %1088 = vmatprep.subr.bf16.mxu0 %v1526_v51 }
  0x7c   : > { %1048 = vmatpush1.bf16.msra.mxu1 %v1528_v54 }
  0x7d   : > { %1089 = vmatpush1.bf16.msra.mxu0 %v1529_v55  ;;  %1049 = vmatprep.subr.bf16.mxu1 %v1530_v57 }
  0x7e   : > { %1090 = vmatprep.subr.bf16.mxu0 %v1532_v58 }
  0x80   : > { %1050 = vmatpush1.bf16.msra.mxu1 %v1534_v60 }
  0x81   : > { %1091 = vmatpush1.bf16.msra.mxu0 %v1535_v61  ;;  %1051 = vmatprep.subr.bf16.mxu1 %v1536_v63 }
  0x82   : > { %1092 = vmatprep.subr.bf16.mxu0 %v1538_v0 }
  0x84   : > { %1052 = vmatpush1.bf16.msra.mxu1 %v1540_v1 }
  0x85   : > { %1093 = vmatpush1.bf16.msra.mxu0 %v1541_v2  ;;  %1053 = vmatprep.subr.bf16.mxu1 %v1542_v3 }
  0x86   : > { %1094 = vmatprep.subr.bf16.mxu0 %v1544_v4 }
  0x88   : > { %1054 = vmatpush1.bf16.msra.mxu1 %v1546_v5 }
  0x89   : > { %1095 = vmatpush1.bf16.msra.mxu0 %v1547_v6  ;;  %1055 = vmatprep.subr.bf16.mxu1 %v1548_v7 }
  0x8a   : > { %1096 = vmatprep.subr.bf16.mxu0 %v1550_v8 }
  0x8c   : > { %1056 = vmatpush1.bf16.msra.mxu1 %v1552_v10 }
  0x8d   : > { %1097 = vmatpush1.bf16.msra.mxu0 %v1553_v11 }
  0x8f   : > { %1058 = vmatmul.mubr.bf16.vlgmr.msra.gmra.mrb[0].mxu1 %v691_v9 }
  0x90   : > { %1099 = vmatmul.mubr.bf16.vlgmr.msra.gmra.mrb[0].mxu0 %v699_v12 }
 0x162   : > { %v1059_v16 = vpop.f32.mrb[0].mxu1 }
 0x163   : > { %v1100_v17 = vpop.f32.mrb[0].mxu0  ;;  %v1061_v19 = vpop.f32.mrb[1].mxu1 }
 0x164   : > { %v1101_v18 = vadd.f32 %v1100_v17, %v1059_v16  ;;  %v1102_v20 = vpop.f32.mrb[1].mxu0  ;;  %v1063_v23 = vpop.f32.mrb[2].mxu1 }
 0x165   : > { %v1103_v21 = vadd.f32 %v1102_v20, %v1061_v19  ;;  %v1104_v24 = vpop.f32.mrb[2].mxu0  ;;  %v1064_v25 = vpop.f32.mrb[3].mxu1 }
 0x166   : > { %v1105_v26 = vpop.f32.mrb[3].mxu0 }
 0x167   : > { %v1109_v27 = vcombine.low %v1101_v18, %v1103_v21  ;;  %1123 = sbr.rel (%p1391_p13) target bundleno = 388 (0x184), region = 82 }
 0x169   : > { %v1116_v29 = vrot.slane %v1109_v27, %v1115_v22 }
 0x16b   : > { %v1118_v30 = vadd.f32 %v1116_v29, %v610_v28 }
 0x16d   : > { %1119 = vst [vmem:[#allocation2] sm:$0xf] %v1118_v30 }
 0x174   : > { %v1124_v38 = vld [vmem:[#allocation2] sm:$0xf] }
 0x175   : > { %v1144_v41 = vadd.f32 %v1142_v39, %v1124_v38 }
 0x177   : > { %v1147_v42 = vadd.f32 %v1146_v40, %v1144_v41 }
 0x179   : > { %v1148_v43 = vmax.f32 %v1147_v42, 0.0 }
 0x17b   : > { %v1156_v44 = vrot.slane %v1148_v43, %v1115_v22 }
 0x17d   : > { %v1157_v45 = vcombine.high %v1156_v44, %v1156_v44 }
 0x17f   : > { %v1392_v46 = vpack.c.bf16 %v1157_v45, %v1156_v44 }
 0x181   : > { %v1171_v48 = vrot.slane %v1392_v46, %v1907_v52 }
 0x183   : > { %1393 = vst.sshfl [vmem:[%s603_s10] sm:$0x5 pattern:$0x73625140] %v1171_v48 }
 0x184 PF: > { %s14_s21 = sadd.s32 1, %s1608_s21   ;;  %s1980_s15 = smov %s1588_s16 }
 0x185   : > { %p11_p0 = scmp.ge.s32.totalorder %s14_s21, 20   ;;  %s1981_s16 = smov %s1689_s28 }
 0x186   : > { %s1982_s17 = smov %s1600_s19  ;;  %s1983_s18 = smov %s1604_s20 }
 0x187   : > { %s1984_s19 = smov %s1987_s22  ;;  %s1985_s20 = smov %s1991_s23 }
 0x188   :  { %13 = sbr.rel (!%p11_p0) target bundleno = 4 (0x4), region = 126 }

// kernel: visual_encoder_forward.39
= control target key start
LH: loop header
LB: loop body
LE: loop exit
PB: predicated region body
PF: predicated region fallthrough
CT: control target
= control target key end

     0   :  { %s1554_s12 = smov 0   ;;  %s1556_s13 = smov 0   ;;  %s1882_s0 = inlined_call_operand.vmem [shape: bf16[2,4608], index: 0, kind: input, shape index: {}]   ;;  %s1883_s1 = inlined_call_operand.vmem [shape: bf16[4608,512], index: 1, kind: input, shape index: {}]   ;;  %s1884_s2 = inlined_call_operand.vmem [shape: f32[1,512], index: 2, kind: input, shape index: {}]   ;;  %s1885_s3 = inlined_call_operand.vmem [shape: bf16[2,512], index: 3, kind: output, shape index: {}]  }
   0x1   :  { %s1558_s14 = smov 0   ;;  %s1560_s15 = smov 0  }
   0x2   :  { %s1562_s16 = smov 0   ;;  %s1564_s17 = smov 0  }
   0x3   :  { %s1566_s18 = smov 0  }
   0x4 LB: > { %s25_s19 = sadd.s32 1, %s1521_s16  ;;  %s28_s20 = sadd.s32 1, %s1525_s17  ;;  %s1529_s18 = sphi %s1566_s18, %s13_s18   ;;  %s1525_s17 = sphi %s1564_s17, %s1891_s17   ;;  %s1521_s16 = sphi %s1562_s16, %s1890_s16   ;;  %s1517_s15 = sphi %s1560_s15, %s1889_s15   ;;  %s1513_s14 = sphi %s1558_s14, %s1888_s14   ;;  %s1509_s13 = sphi %s1556_s13, %s1887_s13   ;;  %s1505_s12 = sphi %s1554_s12, %s1886_s12  }
   0x5   : > { %p26_p0 = scmp.ge.s32.totalorder %s25_s19, 9  ;;  %p76_p1 = scmp.ne.s32.totalorder %s1509_s13, %s1505_s12 }
   0x6   : > { %p77_p2 = scmp.eq.s32.totalorder %s1529_s18, 0  ;;  %s69_s24 = sadd.s32 1, %s1509_s13 }
   0x7   : > { %s1893_s19 = smov (%p26_p0, %s25_s19), 0  ;;  %s1895_s20 = smov (!%p26_p0, %s28_s20), %s1525_s17 }
   0x8   : > { %p78_p3 = por %p77_p2, %p76_p1  ;;  %p30_p4 = scmp.ge.s32.totalorder %s1895_s20, 2 }
   0x9   : > { %s64_s21 = ssub.s32 %s1521_s16, %s1893_s19  ;;  %p1235_p6 = scmp.ge.s32.totalorder %s1529_s18, 18 }
   0xa   : > { %s1897_s20 = smov (%p30_p4, %s1895_s20), 0 }
   0xb   : > { %s65_s22 = ssub.s32 %s1525_s17, %s1897_s20  ;;  %156 = sbr.rel (%p1235_p6) target bundleno = 57 (0x39), region = 16 }
   0xc   : > { %s66_s23 = sor.u32 %s65_s22, %s64_s21 }
   0xd   : > { %p67_p5 = scmp.eq.s32.totalorder %s66_s23, 0 }
   0xf   : > { %s1605_s25 = scalar_select %p67_p5, %s1509_s13, %s69_s24  }
  0x12   : > { %171 = sbr.rel (!%p78_p3) target bundleno = 57 (0x39), region = 24  ;;  %s173_s26 = sand.u32 (%p78_p3), 1, %s1509_s13  }
  0x13   : > { %s1238_s27 = sshll.u32 (%p78_p3), %s1525_s17, 1  ;;  %s1236_s28 = sshll.u32 (%p78_p3), %s173_s26, 9 }
  0x14   : > { %s1317_s29 = sshll.u32 (%p78_p3), %s1521_s16, 8  ;;  %s1619_s8 = scalar_lea.vmem (%p78_p3), [#allocation3], %s1236_s28 }
  0x15   : > { %s179_s30 = sadd.s32 (%p78_p3), %s1317_s29, %s1238_s27 }
  0x16   : > { %s1240_s4 = sshll.u32 (%p78_p3), %s179_s30, 2 }
  0x17   : > { %s1614_s7 = scalar_lea.vmem (%p78_p3), %s1883_s1, %s1240_s4 }
  0x18   : > { %v335_v0 = vld [vmem:[%s1614_s7] sm:$0xff] (%p78_p3)  ;;  %v337_v1 = vld [vmem:[%s1614_s7 + $0x10] sm:$0xff] (%p78_p3) }
  0x19   : > { %v339_v2 = vld [vmem:[%s1614_s7 + $0x20] sm:$0xff]  ;;  %336 = vst [vmem:[%s1619_s8] sm:$0xff] %v335_v0  ;;  %338 = vst [vmem:[%s1619_s8 + $0x8] sm:$0xff] %v337_v1  ;;  %v341_v3 = vld [vmem:[%s1614_s7 + $0x30] sm:$0xff] }
  0x1a   : > { %340 = vst [vmem:[%s1619_s8 + $0x10] sm:$0xff] %v339_v2  ;;  %v343_v4 = vld [vmem:[%s1614_s7 + $0x40] sm:$0xff]  ;;  %v345_v5 = vld [vmem:[%s1614_s7 + $0x50] sm:$0xff]  ;;  %342 = vst [vmem:[%s1619_s8 + $0x18] sm:$0xff] %v341_v3 }
  0x1b   : > { %344 = vst [vmem:[%s1619_s8 + $0x20] sm:$0xff] %v343_v4  ;;  %346 = vst [vmem:[%s1619_s8 + $0x28] sm:$0xff] %v345_v5  ;;  %v347_v6 = vld [vmem:[%s1614_s7 + $0x60] sm:$0xff]  ;;  %v349_v7 = vld [vmem:[%s1614_s7 + $0x70] sm:$0xff] }
  0x1c   : > { %v351_v8 = vld [vmem:[%s1614_s7 + $0x80] sm:$0xff]  ;;  %348 = vst [vmem:[%s1619_s8 + $0x30] sm:$0xff] %v347_v6  ;;  %350 = vst [vmem:[%s1619_s8 + $0x38] sm:$0xff] %v349_v7  ;;  %v353_v9 = vld [vmem:[%s1614_s7 + $0x90] sm:$0xff] }
  0x1d   : > { %352 = vst [vmem:[%s1619_s8 + $0x40] sm:$0xff] %v351_v8  ;;  %v355_v10 = vld [vmem:[%s1614_s7 + $0xa0] sm:$0xff]  ;;  %v357_v11 = vld [vmem:[%s1614_s7 + $0xb0] sm:$0xff]  ;;  %354 = vst [vmem:[%s1619_s8 + $0x48] sm:$0xff] %v353_v9 }
  0x1e   : > { %356 = vst [vmem:[%s1619_s8 + $0x50] sm:$0xff] %v355_v10  ;;  %358 = vst [vmem:[%s1619_s8 + $0x58] sm:$0xff] %v357_v11  ;;  %v359_v12 = vld [vmem:[%s1614_s7 + $0xc0] sm:$0xff]  ;;  %v361_v13 = vld [vmem:[%s1614_s7 + $0xd0] sm:$0xff] }
  0x1f   : > { %v363_v14 = vld [vmem:[%s1614_s7 + $0xe0] sm:$0xff]  ;;  %360 = vst [vmem:[%s1619_s8 + $0x60] sm:$0xff] %v359_v12  ;;  %362 = vst [vmem:[%s1619_s8 + $0x68] sm:$0xff] %v361_v13  ;;  %v365_v15 = vld [vmem:[%s1614_s7 + $0xf0] sm:$0xff] }
  0x20   : > { %364 = vst [vmem:[%s1619_s8 + $0x70] sm:$0xff] %v363_v14  ;;  %v367_v16 = vld [vmem:[%s1614_s7 + $0x100] sm:$0xff]  ;;  %v369_v17 = vld [vmem:[%s1614_s7 + $0x110] sm:$0xff]  ;;  %366 = vst [vmem:[%s1619_s8 + $0x78] sm:$0xff] %v365_v15 }
  0x21   : > { %368 = vst [vmem:[%s1619_s8 + $0x80] sm:$0xff] %v367_v16  ;;  %370 = vst [vmem:[%s1619_s8 + $0x88] sm:$0xff] %v369_v17  ;;  %v371_v18 = vld [vmem:[%s1614_s7 + $0x120] sm:$0xff]  ;;  %v373_v19 = vld [vmem:[%s1614_s7 + $0x130] sm:$0xff] }
  0x22   : > { %v375_v20 = vld [vmem:[%s1614_s7 + $0x140] sm:$0xff]  ;;  %372 = vst [vmem:[%s1619_s8 + $0x90] sm:$0xff] %v371_v18  ;;  %374 = vst [vmem:[%s1619_s8 + $0x98] sm:$0xff] %v373_v19  ;;  %v377_v21 = vld [vmem:[%s1614_s7 + $0x150] sm:$0xff] }
  0x23   : > { %376 = vst [vmem:[%s1619_s8 + $0xa0] sm:$0xff] %v375_v20  ;;  %v379_v22 = vld [vmem:[%s1614_s7 + $0x160] sm:$0xff]  ;;  %v381_v23 = vld [vmem:[%s1614_s7 + $0x170] sm:$0xff]  ;;  %378 = vst [vmem:[%s1619_s8 + $0xa8] sm:$0xff] %v377_v21 }
  0x24   : > { %380 = vst [vmem:[%s1619_s8 + $0xb0] sm:$0xff] %v379_v22  ;;  %382 = vst [vmem:[%s1619_s8 + $0xb8] sm:$0xff] %v381_v23  ;;  %v383_v24 = vld [vmem:[%s1614_s7 + $0x180] sm:$0xff]  ;;  %v385_v25 = vld [vmem:[%s1614_s7 + $0x190] sm:$0xff] }
  0x25   : > { %v387_v26 = vld [vmem:[%s1614_s7 + $0x1a0] sm:$0xff]  ;;  %384 = vst [vmem:[%s1619_s8 + $0xc0] sm:$0xff] %v383_v24  ;;  %386 = vst [vmem:[%s1619_s8 + $0xc8] sm:$0xff] %v385_v25  ;;  %v389_v27 = vld [vmem:[%s1614_s7 + $0x1b0] sm:$0xff] }
  0x26   : > { %388 = vst [vmem:[%s1619_s8 + $0xd0] sm:$0xff] %v387_v26  ;;  %v391_v28 = vld [vmem:[%s1614_s7 + $0x1c0] sm:$0xff]  ;;  %v393_v29 = vld [vmem:[%s1614_s7 + $0x1d0] sm:$0xff]  ;;  %390 = vst [vmem:[%s1619_s8 + $0xd8] sm:$0xff] %v389_v27 }
  0x27   : > { %392 = vst [vmem:[%s1619_s8 + $0xe0] sm:$0xff] %v391_v28  ;;  %394 = vst [vmem:[%s1619_s8 + $0xe8] sm:$0xff] %v393_v29  ;;  %v395_v30 = vld [vmem:[%s1614_s7 + $0x1e0] sm:$0xff]  ;;  %v397_v31 = vld [vmem:[%s1614_s7 + $0x1f0] sm:$0xff] }
  0x28   : > { %v399_v32 = vld [vmem:[%s1614_s7 + $0x200] sm:$0xff]  ;;  %396 = vst [vmem:[%s1619_s8 + $0xf0] sm:$0xff] %v395_v30  ;;  %398 = vst [vmem:[%s1619_s8 + $0xf8] sm:$0xff] %v397_v31  ;;  %v401_v33 = vld [vmem:[%s1614_s7 + $0x210] sm:$0xff] }
  0x29   : > { %400 = vst [vmem:[%s1619_s8 + $0x100] sm:$0xff] %v399_v32  ;;  %v403_v34 = vld [vmem:[%s1614_s7 + $0x220] sm:$0xff]  ;;  %v405_v35 = vld [vmem:[%s1614_s7 + $0x230] sm:$0xff]  ;;  %402 = vst [vmem:[%s1619_s8 + $0x108] sm:$0xff] %v401_v33 }
  0x2a   : > { %404 = vst [vmem:[%s1619_s8 + $0x110] sm:$0xff] %v403_v34  ;;  %406 = vst [vmem:[%s1619_s8 + $0x118] sm:$0xff] %v405_v35  ;;  %v407_v36 = vld [vmem:[%s1614_s7 + $0x240] sm:$0xff]  ;;  %v409_v37 = vld [vmem:[%s1614_s7 + $0x250] sm:$0xff] }
  0x2b   : > { %v411_v38 = vld [vmem:[%s1614_s7 + $0x260] sm:$0xff]  ;;  %408 = vst [vmem:[%s1619_s8 + $0x120] sm:$0xff] %v407_v36  ;;  %410 = vst [vmem:[%s1619_s8 + $0x128] sm:$0xff] %v409_v37  ;;  %v413_v39 = vld [vmem:[%s1614_s7 + $0x270] sm:$0xff] }
  0x2c   : > { %412 = vst [vmem:[%s1619_s8 + $0x130] sm:$0xff] %v411_v38  ;;  %v415_v40 = vld [vmem:[%s1614_s7 + $0x280] sm:$0xff]  ;;  %v417_v41 = vld [vmem:[%s1614_s7 + $0x290] sm:$0xff]  ;;  %414 = vst [vmem:[%s1619_s8 + $0x138] sm:$0xff] %v413_v39 }
  0x2d   : > { %416 = vst [vmem:[%s1619_s8 + $0x140] sm:$0xff] %v415_v40  ;;  %418 = vst [vmem:[%s1619_s8 + $0x148] sm:$0xff] %v417_v41  ;;  %v419_v42 = vld [vmem:[%s1614_s7 + $0x2a0] sm:$0xff]  ;;  %v421_v43 = vld [vmem:[%s1614_s7 + $0x2b0] sm:$0xff] }
  0x2e   : > { %v423_v44 = vld [vmem:[%s1614_s7 + $0x2c0] sm:$0xff]  ;;  %420 = vst [vmem:[%s1619_s8 + $0x150] sm:$0xff] %v419_v42  ;;  %422 = vst [vmem:[%s1619_s8 + $0x158] sm:$0xff] %v421_v43  ;;  %v425_v45 = vld [vmem:[%s1614_s7 + $0x2d0] sm:$0xff] }
  0x2f   : > { %424 = vst [vmem:[%s1619_s8 + $0x160] sm:$0xff] %v423_v44  ;;  %v427_v46 = vld [vmem:[%s1614_s7 + $0x2e0] sm:$0xff]  ;;  %v429_v47 = vld [vmem:[%s1614_s7 + $0x2f0] sm:$0xff]  ;;  %426 = vst [vmem:[%s1619_s8 + $0x168] sm:$0xff] %v425_v45 }
  0x30   : > { %428 = vst [vmem:[%s1619_s8 + $0x170] sm:$0xff] %v427_v46  ;;  %430 = vst [vmem:[%s1619_s8 + $0x178] sm:$0xff] %v429_v47  ;;  %v431_v48 = vld [vmem:[%s1614_s7 + $0x300] sm:$0xff]  ;;  %v433_v49 = vld [vmem:[%s1614_s7 + $0x310] sm:$0xff] }
  0x31   : > { %v435_v50 = vld [vmem:[%s1614_s7 + $0x320] sm:$0xff]  ;;  %432 = vst [vmem:[%s1619_s8 + $0x180] sm:$0xff] %v431_v48  ;;  %434 = vst [vmem:[%s1619_s8 + $0x188] sm:$0xff] %v433_v49  ;;  %v437_v51 = vld [vmem:[%s1614_s7 + $0x330] sm:$0xff] }
  0x32   : > { %436 = vst [vmem:[%s1619_s8 + $0x190] sm:$0xff] %v435_v50  ;;  %v439_v52 = vld [vmem:[%s1614_s7 + $0x340] sm:$0xff]  ;;  %v441_v53 = vld [vmem:[%s1614_s7 + $0x350] sm:$0xff]  ;;  %438 = vst [vmem:[%s1619_s8 + $0x198] sm:$0xff] %v437_v51 }
  0x33   : > { %440 = vst [vmem:[%s1619_s8 + $0x1a0] sm:$0xff] %v439_v52  ;;  %442 = vst [vmem:[%s1619_s8 + $0x1a8] sm:$0xff] %v441_v53  ;;  %v443_v54 = vld [vmem:[%s1614_s7 + $0x360] sm:$0xff]  ;;  %v445_v55 = vld [vmem:[%s1614_s7 + $0x370] sm:$0xff] }
  0x34   : > { %v447_v56 = vld [vmem:[%s1614_s7 + $0x380] sm:$0xff]  ;;  %444 = vst [vmem:[%s1619_s8 + $0x1b0] sm:$0xff] %v443_v54  ;;  %446 = vst [vmem:[%s1619_s8 + $0x1b8] sm:$0xff] %v445_v55  ;;  %v449_v57 = vld [vmem:[%s1614_s7 + $0x390] sm:$0xff] }
  0x35   : > { %448 = vst [vmem:[%s1619_s8 + $0x1c0] sm:$0xff] %v447_v56  ;;  %v451_v58 = vld [vmem:[%s1614_s7 + $0x3a0] sm:$0xff]  ;;  %v453_v59 = vld [vmem:[%s1614_s7 + $0x3b0] sm:$0xff]  ;;  %450 = vst [vmem:[%s1619_s8 + $0x1c8] sm:$0xff] %v449_v57 }
  0x36   : > { %452 = vst [vmem:[%s1619_s8 + $0x1d0] sm:$0xff] %v451_v58  ;;  %454 = vst [vmem:[%s1619_s8 + $0x1d8] sm:$0xff] %v453_v59  ;;  %v455_v60 = vld [vmem:[%s1614_s7 + $0x3c0] sm:$0xff]  ;;  %v457_v61 = vld [vmem:[%s1614_s7 + $0x3d0] sm:$0xff] }
  0x37   : > { %v459_v62 = vld [vmem:[%s1614_s7 + $0x3e0] sm:$0xff]  ;;  %456 = vst [vmem:[%s1619_s8 + $0x1e0] sm:$0xff] %v455_v60  ;;  %458 = vst [vmem:[%s1619_s8 + $0x1e8] sm:$0xff] %v457_v61  ;;  %v461_v63 = vld [vmem:[%s1614_s7 + $0x3f0] sm:$0xff] }
  0x38   : > { %460 = vst [vmem:[%s1619_s8 + $0x1f0] sm:$0xff] %v459_v62  ;;  %462 = vst [vmem:[%s1619_s8 + $0x1f8] sm:$0xff] %v461_v63 }
  0x39 PF: > { %p1241_p7 = scmp.ge.s32.totalorder %s1529_s18, 1  ;;  %p475_p8 = scmp.lt.s32.totalorder %s1529_s18, 19 }
  0x3b   : > { %p476_p9 = pnand %p1241_p7, %p475_p8 }
  0x3c   : > { %s482_s9 = sand.u32 (!%p476_p9), 1, %s1505_s12   ;;  %s1243_s10 = sshll.u32 (!%p476_p9), %s1513_s14, 2 }
  0x3d   : > { %479 = sbr.rel (%p476_p9) target bundleno = 385 (0x181), region = 66  ;;  %s1242_s11 = sshll.u32 (!%p476_p9), %s482_s9, 9 }
  0x3e   : > { %p523_p10 = scmp.lt.s32.totalorder (!%p476_p9), %s1243_s10, 35  ;;  %s1244_s21 = sshll.u32 (!%p476_p9), %s1517_s15, 1 }
  0x3f   : > { %p532_p11 = scmp.lt.s32.totalorder (!%p476_p9), %s1244_s21, 3  ;;  %s1767_s30 = scalar_lea.vmem (!%p476_p9), [#allocation3], %s1242_s11 }
  0x40   : > { %p1246_p12 = scmp.ne.s32.totalorder (!%p476_p9), %s1513_s14, 0 }
  0x44   : > { %s1899_s10 = smov (!%p523_p10, %s1243_s10), 35  ;;  %s1901_s21 = smov (!%p532_p11, %s1244_s21), 3 }
  0x45   : > { %s527_s24 = scalar_lea.vmem %s1882_s0, %s1899_s10  ;;  %s534_s12 = scalar_lea.vmem %s1884_s2, %s1901_s21  ;;  %v1531_v0 = vmov (!%p1246_p12), 0.0  }
  0x46   : > { %s543_s15 = scalar_lea.vmem %s1885_s3, %s1901_s21  ;;  %548 = sbr.rel (%p1246_p12) target bundleno = 77 (0x4d), region = 74  ;;  %549 = vst [vmem:[#allocation2] sm:$0xf] (!%p1246_p12), %v1531_v0 }
  0x4d PF: > { %v1379_v1 = vld [vmem:[%s1767_s30 + $0x4] ss:$8 sps:$4 sm:$0xff]   ;;  %v1383_v3 = vld [vmem:[%s1767_s30] ss:$8 sps:$4 sm:$0xff]   ;;  %v1385_v5 = vld [vmem:[%s1767_s30 + $0x14] ss:$8 sps:$4 sm:$0xff]   ;;  %v628_v41 = vlaneseq }
  0x4e   : > { %v1381_v2 = vld [vmem:[%s1767_s30 + $0x104] ss:$8 sps:$4 sm:$0xff]   ;;  %965 = vmatprep.subr.bf16.mxu1 %v1379_v1  ;;  %v1384_v4 = vld [vmem:[%s1767_s30 + $0x100] ss:$8 sps:$4 sm:$0xff]   ;;  %v1387_v6 = vld [vmem:[%s1767_s30 + $0x114] ss:$8 sps:$4 sm:$0xff]  }
  0x4f   : > { %1006 = vmatprep.subr.bf16.mxu0 %v1381_v2  ;;  %966 = vmatpush1.bf16.msra.mxu1 %v1383_v3  ;;  %v1389_v7 = vld [vmem:[%s1767_s30 + $0x10] ss:$8 sps:$4 sm:$0xff]   ;;  %v1391_v9 = vld [vmem:[%s1767_s30 + $0x24] ss:$8 sps:$4 sm:$0xff]   ;;  %v1395_v11 = vld [vmem:[%s1767_s30 + $0x20] ss:$8 sps:$4 sm:$0xff]  }
  0x50   : > { %1007 = vmatpush1.bf16.msra.mxu0 %v1384_v4  ;;  %967 = vmatprep.subr.bf16.mxu1 %v1385_v5  ;;  %v1390_v8 = vld [vmem:[%s1767_s30 + $0x110] ss:$8 sps:$4 sm:$0xff]   ;;  %v1393_v10 = vld [vmem:[%s1767_s30 + $0x124] ss:$8 sps:$4 sm:$0xff]   ;;  %v1396_v12 = vld [vmem:[%s1767_s30 + $0x120] ss:$8 sps:$4 sm:$0xff]  }
  0x51   : > { %1008 = vmatprep.subr.bf16.mxu0 %v1387_v6  ;;  %v1397_v13 = vld [vmem:[%s1767_s30 + $0x34] ss:$8 sps:$4 sm:$0xff]   ;;  %v1401_v15 = vld [vmem:[%s1767_s30 + $0x30] ss:$8 sps:$4 sm:$0xff]   ;;  %v1403_v17 = vld [vmem:[%s1767_s30 + $0x44] ss:$8 sps:$4 sm:$0xff]  }
  0x52   : > { %v1399_v14 = vld [vmem:[%s1767_s30 + $0x134] ss:$8 sps:$4 sm:$0xff]   ;;  %v1402_v16 = vld [vmem:[%s1767_s30 + $0x130] ss:$8 sps:$4 sm:$0xff]   ;;  %v1405_v18 = vld [vmem:[%s1767_s30 + $0x144] ss:$8 sps:$4 sm:$0xff]  }
  0x53   : > { %968 = vmatpush1.bf16.msra.mxu1 %v1389_v7  ;;  %v1407_v19 = vld [vmem:[%s1767_s30 + $0x40] ss:$8 sps:$4 sm:$0xff]   ;;  %v1409_v21 = vld [vmem:[%s1767_s30 + $0x54] ss:$8 sps:$4 sm:$0xff]   ;;  %v1413_v23 = vld [vmem:[%s1767_s30 + $0x50] ss:$8 sps:$4 sm:$0xff]  }
  0x54   : > { %1009 = vmatpush1.bf16.msra.mxu0 %v1390_v8  ;;  %969 = vmatprep.subr.bf16.mxu1 %v1391_v9  ;;  %v1408_v20 = vld [vmem:[%s1767_s30 + $0x140] ss:$8 sps:$4 sm:$0xff]   ;;  %v1411_v22 = vld [vmem:[%s1767_s30 + $0x154] ss:$8 sps:$4 sm:$0xff]   ;;  %v1414_v24 = vld [vmem:[%s1767_s30 + $0x150] ss:$8 sps:$4 sm:$0xff]  }
  0x55   : > { %1010 = vmatprep.subr.bf16.mxu0 %v1393_v10  ;;  %v1415_v25 = vld [vmem:[%s1767_s30 + $0x64] ss:$8 sps:$4 sm:$0xff]   ;;  %v1419_v27 = vld [vmem:[%s1767_s30 + $0x60] ss:$8 sps:$4 sm:$0xff]   ;;  %v1421_v29 = vld [vmem:[%s1767_s30 + $0x74] ss:$8 sps:$4 sm:$0xff]  }
  0x56   : > { %v1417_v26 = vld [vmem:[%s1767_s30 + $0x164] ss:$8 sps:$4 sm:$0xff]   ;;  %v1420_v28 = vld [vmem:[%s1767_s30 + $0x160] ss:$8 sps:$4 sm:$0xff]   ;;  %v1423_v30 = vld [vmem:[%s1767_s30 + $0x174] ss:$8 sps:$4 sm:$0xff]  }
  0x57   : > { %970 = vmatpush1.bf16.msra.mxu1 %v1395_v11  ;;  %v1425_v31 = vld [vmem:[%s1767_s30 + $0x70] ss:$8 sps:$4 sm:$0xff]   ;;  %v1427_v33 = vld [vmem:[%s1767_s30 + $0x84] ss:$8 sps:$4 sm:$0xff]   ;;  %v1431_v35 = vld [vmem:[%s1767_s30 + $0x80] ss:$8 sps:$4 sm:$0xff]  }
  0x58   : > { %1011 = vmatpush1.bf16.msra.mxu0 %v1396_v12  ;;  %971 = vmatprep.subr.bf16.mxu1 %v1397_v13  ;;  %v1426_v32 = vld [vmem:[%s1767_s30 + $0x170] ss:$8 sps:$4 sm:$0xff]   ;;  %v1429_v34 = vld [vmem:[%s1767_s30 + $0x184] ss:$8 sps:$4 sm:$0xff]   ;;  %v1432_v36 = vld [vmem:[%s1767_s30 + $0x180] ss:$8 sps:$4 sm:$0xff]  }
  0x59   : > { %1012 = vmatprep.subr.bf16.mxu0 %v1399_v14  ;;  %v1433_v37 = vld [vmem:[%s1767_s30 + $0x94] ss:$8 sps:$4 sm:$0xff]   ;;  %v1532_v39 = vmov 1966171168   ;;  %v1437_v42 = vld [vmem:[%s1767_s30 + $0x90] ss:$8 sps:$4 sm:$0xff]  }
  0x5a   : > { %v1435_v38 = vld [vmem:[%s1767_s30 + $0x194] ss:$8 sps:$4 sm:$0xff]   ;;  %v626_v40 = vunpack.c.l.s4 %v1532_v39  ;;  %v1438_v43 = vld [vmem:[%s1767_s30 + $0x190] ss:$8 sps:$4 sm:$0xff]   ;;  %v1439_v44 = vld [vmem:[%s1767_s30 + $0xa4] ss:$8 sps:$4 sm:$0xff]  }
  0x5b   : > { %972 = vmatpush1.bf16.msra.mxu1 %v1401_v15  ;;  %v1441_v45 = vld [vmem:[%s1767_s30 + $0x1a4] ss:$8 sps:$4 sm:$0xff]   ;;  %v1812_v47 = vshrl.u32 %v628_v41, 7  ;;  %v1443_v48 = vld [vmem:[%s1767_s30 + $0xa0] ss:$8 sps:$4 sm:$0xff]   ;;  %p1312_p13 = scmp.ne.s32.totalorder %s1513_s14, 8 }
  0x5c   : > { %1013 = vmatpush1.bf16.msra.mxu0 %v1402_v16  ;;  %973 = vmatprep.subr.bf16.mxu1 %v1403_v17  ;;  %v627_v46 = vunpack.c.0.s8 %v626_v40  ;;  %v1444_v49 = vld [vmem:[%s1767_s30 + $0x1a0] ss:$8 sps:$4 sm:$0xff]   ;;  %v1445_v50 = vld [vmem:[%s1767_s30 + $0xb4] ss:$8 sps:$4 sm:$0xff]   ;;  %v1449_v54 = vld [vmem:[%s1767_s30 + $0xb0] ss:$8 sps:$4 sm:$0xff]  }
  0x5d   : > { %1014 = vmatprep.subr.bf16.mxu0 %v1405_v18  ;;  %v1447_v51 = vld [vmem:[%s1767_s30 + $0x1b4] ss:$8 sps:$4 sm:$0xff]   ;;  %v1450_v55 = vld [vmem:[%s1767_s30 + $0x1b0] ss:$8 sps:$4 sm:$0xff]   ;;  %v1451_v57 = vld [vmem:[%s1767_s30 + $0xc4] ss:$8 sps:$4 sm:$0xff]  }
  0x5e   : > { %v1819_v52 = vsub.s32 %v627_v46, %v1812_v47  ;;  %v1247_v53 = vld.sshfl [vmem:[%s527_s24] sm:$0x33 pattern:$0x75316420]  ;;  %v1453_v58 = vld [vmem:[%s1767_s30 + $0x1c4] ss:$8 sps:$4 sm:$0xff]  }
  0x5f   : > { %974 = vmatpush1.bf16.msra.mxu1 %v1407_v19  ;;  %v624_v56 = vcombine.high %v1247_v53, %v1247_v53  ;;  %v1455_v60 = vld [vmem:[%s1767_s30 + $0xc0] ss:$8 sps:$4 sm:$0xff]   ;;  %v1457_v63 = vld [vmem:[%s1767_s30 + $0xd4] ss:$8 sps:$4 sm:$0xff]   ;;  %v1461_v1 = vld [vmem:[%s1767_s30 + $0xd0] ss:$8 sps:$4 sm:$0xff]  }
  0x60   : > { %1015 = vmatpush1.bf16.msra.mxu0 %v1408_v20  ;;  %975 = vmatprep.subr.bf16.mxu1 %v1409_v21  ;;  %v1456_v61 = vld [vmem:[%s1767_s30 + $0x1c0] ss:$8 sps:$4 sm:$0xff]   ;;  %v1459_v0 = vld [vmem:[%s1767_s30 + $0x1d4] ss:$8 sps:$4 sm:$0xff]   ;;  %v1462_v2 = vld [vmem:[%s1767_s30 + $0x1d0] ss:$8 sps:$4 sm:$0xff]   ;;  %v631_v9 = vrot.slane %v1247_v53, %v1819_v52 }
  0x61   : > { %1016 = vmatprep.subr.bf16.mxu0 %v1411_v22  ;;  %v638_v59 = vrot.slane %v624_v56, %v1819_v52  ;;  %v1463_v3 = vld [vmem:[%s1767_s30 + $0xe4] ss:$8 sps:$4 sm:$0xff]   ;;  %v1467_v5 = vld [vmem:[%s1767_s30 + $0xe0] ss:$8 sps:$4 sm:$0xff]   ;;  %v1469_v7 = vld [vmem:[%s1767_s30 + $0xf4] ss:$8 sps:$4 sm:$0xff]  }
  0x62   : > { %v1465_v4 = vld [vmem:[%s1767_s30 + $0x1e4] ss:$8 sps:$4 sm:$0xff]   ;;  %v1468_v6 = vld [vmem:[%s1767_s30 + $0x1e0] ss:$8 sps:$4 sm:$0xff]   ;;  %v1471_v8 = vld [vmem:[%s1767_s30 + $0x1f4] ss:$8 sps:$4 sm:$0xff]   ;;  %v639_v12 = vcombine.high %v631_v9, %v631_v9 }
  0x63   : > { %976 = vmatpush1.bf16.msra.mxu1 %v1413_v23  ;;  %v640_v62 = vcombine.high %v638_v59, %v638_v59  ;;  %997 = vmatprep.mubr.bf16.mxu1 %v638_v59  ;;  %v1473_v10 = vld [vmem:[%s1767_s30 + $0xf0] ss:$8 sps:$4 sm:$0xff]   ;;  %v1533_v13 = vmov 1983009808  }
  0x64   : > { %1017 = vmatpush1.bf16.msra.mxu0 %v1414_v24  ;;  %977 = vmatprep.subr.bf16.mxu1 %v1415_v25  ;;  %v1474_v11 = vld [vmem:[%s1767_s30 + $0x1f0] ss:$8 sps:$4 sm:$0xff]   ;;  %v1051_v14 = vunpack.c.l.s4 %v1533_v13 }
  0x65   : > { %1018 = vmatprep.subr.bf16.mxu0 %v1417_v26  ;;  %1038 = vmatprep.mubr.bf16.mxu0 %v640_v62 }
  0x66   : > { %v1052_v15 = vunpack.c.0.s8 %v1051_v14 }
  0x67   : > { %978 = vmatpush1.bf16.msra.mxu1 %v1419_v27 }
  0x68   : > { %1019 = vmatpush1.bf16.msra.mxu0 %v1420_v28  ;;  %979 = vmatprep.subr.bf16.mxu1 %v1421_v29  ;;  %v1055_v22 = vsub.s32 %v1052_v15, %v1812_v47  ;;  %v550_v28 = vld [vmem:[#allocation2] sm:$0xf] }
  0x69   : > { %1020 = vmatprep.subr.bf16.mxu0 %v1423_v30 }
  0x6b   : > { %980 = vmatpush1.bf16.msra.mxu1 %v1425_v31  ;;  %v1065_v31 = vld [vmem:[%s534_s12] sm:$0x3] (!%p1312_p13) }
  0x6c   : > { %1021 = vmatpush1.bf16.msra.mxu0 %v1426_v32  ;;  %981 = vmatprep.subr.bf16.mxu1 %v1427_v33  ;;  %v1069_v32 = vsub.s32 (!%p1312_p13), 0, %v1812_v47  ;;  %v1073_v33 = vsub.s32 (!%p1312_p13), 1, %v1812_v47 }
  0x6d   : > { %1022 = vmatprep.subr.bf16.mxu0 %v1429_v34 }
  0x6e   : > { %v1070_v34 = vrot.slane (!%p1312_p13), %v1065_v31, %v1069_v32 }
  0x6f   : > { %982 = vmatpush1.bf16.msra.mxu1 %v1431_v35  ;;  %v1074_v35 = vrot.slane (!%p1312_p13), %v1065_v31, %v1073_v33 }
  0x70   : > { %1023 = vmatpush1.bf16.msra.mxu0 %v1432_v36  ;;  %983 = vmatprep.subr.bf16.mxu1 %v1433_v37 }
  0x71   : > { %1024 = vmatprep.subr.bf16.mxu0 %v1435_v38  ;;  %v1075_v36 = vcombine.low (!%p1312_p13), %v1070_v34, %v1074_v35 }
  0x73   : > { %984 = vmatpush1.bf16.msra.mxu1 %v1437_v42  ;;  %v1082_v38 = vrot.slane (!%p1312_p13), %v1075_v36, %v1055_v22 }
  0x74   : > { %1025 = vmatpush1.bf16.msra.mxu0 %v1438_v43  ;;  %985 = vmatprep.subr.bf16.mxu1 %v1439_v44 }
  0x75   : > { %1026 = vmatprep.subr.bf16.mxu0 %v1441_v45 }
  0x77   : > { %986 = vmatpush1.bf16.msra.mxu1 %v1443_v48 }
  0x78   : > { %1027 = vmatpush1.bf16.msra.mxu0 %v1444_v49  ;;  %987 = vmatprep.subr.bf16.mxu1 %v1445_v50 }
  0x79   : > { %1028 = vmatprep.subr.bf16.mxu0 %v1447_v51 }
  0x7b   : > { %988 = vmatpush1.bf16.msra.mxu1 %v1449_v54 }
  0x7c   : > { %1029 = vmatpush1.bf16.msra.mxu0 %v1450_v55  ;;  %989 = vmatprep.subr.bf16.mxu1 %v1451_v57 }
  0x7d   : > { %1030 = vmatprep.subr.bf16.mxu0 %v1453_v58 }
  0x7f   : > { %990 = vmatpush1.bf16.msra.mxu1 %v1455_v60 }
  0x80   : > { %1031 = vmatpush1.bf16.msra.mxu0 %v1456_v61  ;;  %991 = vmatprep.subr.bf16.mxu1 %v1457_v63 }
  0x81   : > { %1032 = vmatprep.subr.bf16.mxu0 %v1459_v0 }
  0x83   : > { %992 = vmatpush1.bf16.msra.mxu1 %v1461_v1 }
  0x84   : > { %1033 = vmatpush1.bf16.msra.mxu0 %v1462_v2  ;;  %993 = vmatprep.subr.bf16.mxu1 %v1463_v3 }
  0x85   : > { %1034 = vmatprep.subr.bf16.mxu0 %v1465_v4 }
  0x87   : > { %994 = vmatpush1.bf16.msra.mxu1 %v1467_v5 }
  0x88   : > { %1035 = vmatpush1.bf16.msra.mxu0 %v1468_v6  ;;  %995 = vmatprep.subr.bf16.mxu1 %v1469_v7 }
  0x89   : > { %1036 = vmatprep.subr.bf16.mxu0 %v1471_v8 }
  0x8b   : > { %996 = vmatpush1.bf16.msra.mxu1 %v1473_v10 }
  0x8c   : > { %1037 = vmatpush1.bf16.msra.mxu0 %v1474_v11 }
  0x8e   : > { %998 = vmatmul.mubr.bf16.vlgmr.msra.gmra.mrb[0].mxu1 %v631_v9 }
  0x8f   : > { %1039 = vmatmul.mubr.bf16.vlgmr.msra.gmra.mrb[0].mxu0 %v639_v12 }
 0x161   : > { %v999_v16 = vpop.f32.mrb[0].mxu1 }
 0x162   : > { %v1040_v17 = vpop.f32.mrb[0].mxu0  ;;  %v1001_v19 = vpop.f32.mrb[1].mxu1 }
 0x163   : > { %v1041_v18 = vadd.f32 %v1040_v17, %v999_v16  ;;  %v1042_v20 = vpop.f32.mrb[1].mxu0  ;;  %v1003_v23 = vpop.f32.mrb[2].mxu1 }
 0x164   : > { %v1043_v21 = vadd.f32 %v1042_v20, %v1001_v19  ;;  %v1044_v24 = vpop.f32.mrb[2].mxu0  ;;  %v1004_v25 = vpop.f32.mrb[3].mxu1 }
 0x165   : > { %v1045_v26 = vpop.f32.mrb[3].mxu0 }
 0x166   : > { %v1049_v27 = vcombine.low %v1041_v18, %v1043_v21  ;;  %1063 = sbr.rel (%p1312_p13) target bundleno = 385 (0x181), region = 78 }
 0x168   : > { %v1056_v29 = vrot.slane %v1049_v27, %v1055_v22 }
 0x16a   : > { %v1058_v30 = vadd.f32 %v1056_v29, %v550_v28 }
 0x16c   : > { %1059 = vst [vmem:[#allocation2] sm:$0xf] %v1058_v30 }
 0x173   : > { %v1064_v37 = vld [vmem:[#allocation2] sm:$0xf] }
 0x174   : > { %v1084_v39 = vadd.f32 %v1082_v38, %v1064_v37 }
 0x176   : > { %v1085_v40 = vmax.f32 %v1084_v39, 0.0 }
 0x178   : > { %v1093_v41 = vrot.slane %v1085_v40, %v1055_v22 }
 0x17a   : > { %v1094_v42 = vcombine.high %v1093_v41, %v1093_v41 }
 0x17c   : > { %v1313_v43 = vpack.c.bf16 %v1094_v42, %v1093_v41 }
 0x17e   : > { %v1108_v44 = vrot.slane %v1313_v43, %v1819_v52 }
 0x180   : > { %1314 = vst.sshfl [vmem:[%s543_s15] sm:$0x5 pattern:$0x73625140] %v1108_v44 }
 0x181 PF: > { %s13_s18 = sadd.s32 1, %s1529_s18   ;;  %s1886_s12 = smov %s1509_s13 }
 0x182   : > { %p10_p0 = scmp.ge.s32.totalorder %s13_s18, 20   ;;  %s1887_s13 = smov %s1605_s25 }
 0x183   : > { %s1888_s14 = smov %s1521_s16  ;;  %s1889_s15 = smov %s1525_s17 }
 0x184   : > { %s1890_s16 = smov %s1893_s19  ;;  %s1891_s17 = smov %s1897_s20 }
 0x185   :  { %12 = sbr.rel (!%p10_p0) target bundleno = 4 (0x4), region = 119 }

// kernel: visual_encoder_forward.41
= control target key start
LH: loop header
LB: loop body
LE: loop exit
PB: predicated region body
PF: predicated region fallthrough
CT: control target
= control target key end

     0   :  { %v22_v38 = vlaneseq  ;;  %vm163_vm0 = vcmask 1041409   ;;  %s1005_s1 = inlined_call_operand.vmem [shape: bf16[512,256], index: 1, kind: input, shape index: {}]   ;;  %s1006_s0 = inlined_call_operand.vmem [shape: bf16[2,1,512], index: 0, kind: input, shape index: {}]   ;;  %s1007_s2 = inlined_call_operand.vmem [shape: f32[1,256], index: 2, kind: input, shape index: {}]   ;;  %s1008_s3 = inlined_call_operand.vmem [shape: f32[2,256], index: 3, kind: output, shape index: {}]  }
   0x1   :  { %v672_v0 = vld [vmem:[%s1005_s1 + $0x4] ss:$8 sps:$4 sm:$0xff]   ;;  %v676_v2 = vld [vmem:[%s1005_s1] ss:$8 sps:$4 sm:$0xff]   ;;  %v678_v4 = vld [vmem:[%s1005_s1 + $0x14] ss:$8 sps:$4 sm:$0xff]  }
   0x2   :  { %v674_v1 = vld [vmem:[%s1005_s1 + $0x104] ss:$8 sps:$4 sm:$0xff]   ;;  %499 = vmatprep.subr.bf16.mxu1 %v672_v0  ;;  %v677_v3 = vld [vmem:[%s1005_s1 + $0x100] ss:$8 sps:$4 sm:$0xff]   ;;  %v680_v5 = vld [vmem:[%s1005_s1 + $0x114] ss:$8 sps:$4 sm:$0xff]  }
   0x3   :  { %540 = vmatprep.subr.bf16.mxu0 %v674_v1  ;;  %500 = vmatpush1.bf16.msra.mxu1 %v676_v2  ;;  %v682_v6 = vld [vmem:[%s1005_s1 + $0x10] ss:$8 sps:$4 sm:$0xff]   ;;  %v684_v8 = vld [vmem:[%s1005_s1 + $0x24] ss:$8 sps:$4 sm:$0xff]   ;;  %v688_v10 = vld [vmem:[%s1005_s1 + $0x20] ss:$8 sps:$4 sm:$0xff]  }
   0x4   :  { %541 = vmatpush1.bf16.msra.mxu0 %v677_v3  ;;  %501 = vmatprep.subr.bf16.mxu1 %v678_v4  ;;  %v683_v7 = vld [vmem:[%s1005_s1 + $0x110] ss:$8 sps:$4 sm:$0xff]   ;;  %v686_v9 = vld [vmem:[%s1005_s1 + $0x124] ss:$8 sps:$4 sm:$0xff]   ;;  %v689_v11 = vld [vmem:[%s1005_s1 + $0x120] ss:$8 sps:$4 sm:$0xff]  }
   0x5   :  { %542 = vmatprep.subr.bf16.mxu0 %v680_v5  ;;  %v690_v12 = vld [vmem:[%s1005_s1 + $0x34] ss:$8 sps:$4 sm:$0xff]   ;;  %v694_v14 = vld [vmem:[%s1005_s1 + $0x30] ss:$8 sps:$4 sm:$0xff]   ;;  %v696_v16 = vld [vmem:[%s1005_s1 + $0x44] ss:$8 sps:$4 sm:$0xff]  }
   0x6   :  { %v692_v13 = vld [vmem:[%s1005_s1 + $0x134] ss:$8 sps:$4 sm:$0xff]   ;;  %v695_v15 = vld [vmem:[%s1005_s1 + $0x130] ss:$8 sps:$4 sm:$0xff]   ;;  %v698_v17 = vld [vmem:[%s1005_s1 + $0x144] ss:$8 sps:$4 sm:$0xff]  }
   0x7   :  { %502 = vmatpush1.bf16.msra.mxu1 %v682_v6  ;;  %v700_v18 = vld [vmem:[%s1005_s1 + $0x40] ss:$8 sps:$4 sm:$0xff]   ;;  %v702_v20 = vld [vmem:[%s1005_s1 + $0x54] ss:$8 sps:$4 sm:$0xff]   ;;  %v706_v22 = vld [vmem:[%s1005_s1 + $0x50] ss:$8 sps:$4 sm:$0xff]  }
   0x8   :  { %543 = vmatpush1.bf16.msra.mxu0 %v683_v7  ;;  %503 = vmatprep.subr.bf16.mxu1 %v684_v8  ;;  %v701_v19 = vld [vmem:[%s1005_s1 + $0x140] ss:$8 sps:$4 sm:$0xff]   ;;  %v704_v21 = vld [vmem:[%s1005_s1 + $0x154] ss:$8 sps:$4 sm:$0xff]   ;;  %v707_v23 = vld [vmem:[%s1005_s1 + $0x150] ss:$8 sps:$4 sm:$0xff]  }
   0x9   :  { %544 = vmatprep.subr.bf16.mxu0 %v686_v9  ;;  %v708_v24 = vld [vmem:[%s1005_s1 + $0x64] ss:$8 sps:$4 sm:$0xff]   ;;  %v712_v26 = vld [vmem:[%s1005_s1 + $0x60] ss:$8 sps:$4 sm:$0xff]   ;;  %v714_v28 = vld [vmem:[%s1005_s1 + $0x74] ss:$8 sps:$4 sm:$0xff]  }
   0xa   :  { %v710_v25 = vld [vmem:[%s1005_s1 + $0x164] ss:$8 sps:$4 sm:$0xff]   ;;  %v713_v27 = vld [vmem:[%s1005_s1 + $0x160] ss:$8 sps:$4 sm:$0xff]   ;;  %v716_v29 = vld [vmem:[%s1005_s1 + $0x174] ss:$8 sps:$4 sm:$0xff]  }
   0xb   :  { %504 = vmatpush1.bf16.msra.mxu1 %v688_v10  ;;  %v718_v30 = vld [vmem:[%s1005_s1 + $0x70] ss:$8 sps:$4 sm:$0xff]   ;;  %v720_v32 = vld [vmem:[%s1005_s1 + $0x84] ss:$8 sps:$4 sm:$0xff]   ;;  %v724_v34 = vld [vmem:[%s1005_s1 + $0x80] ss:$8 sps:$4 sm:$0xff]  }
   0xc   :  { %545 = vmatpush1.bf16.msra.mxu0 %v689_v11  ;;  %505 = vmatprep.subr.bf16.mxu1 %v690_v12  ;;  %v719_v31 = vld [vmem:[%s1005_s1 + $0x170] ss:$8 sps:$4 sm:$0xff]   ;;  %v722_v33 = vld [vmem:[%s1005_s1 + $0x184] ss:$8 sps:$4 sm:$0xff]   ;;  %v725_v35 = vld [vmem:[%s1005_s1 + $0x180] ss:$8 sps:$4 sm:$0xff]  }
   0xd   :  { %546 = vmatprep.subr.bf16.mxu0 %v692_v13  ;;  %v726_v36 = vld [vmem:[%s1005_s1 + $0x94] ss:$8 sps:$4 sm:$0xff]   ;;  %v730_v39 = vld [vmem:[%s1005_s1 + $0x90] ss:$8 sps:$4 sm:$0xff]   ;;  %v732_v41 = vld [vmem:[%s1005_s1 + $0xa4] ss:$8 sps:$4 sm:$0xff]  }
   0xe   :  { %v728_v37 = vld [vmem:[%s1005_s1 + $0x194] ss:$8 sps:$4 sm:$0xff]   ;;  %v731_v40 = vld [vmem:[%s1005_s1 + $0x190] ss:$8 sps:$4 sm:$0xff]   ;;  %v734_v42 = vld [vmem:[%s1005_s1 + $0x1a4] ss:$8 sps:$4 sm:$0xff]  }
   0xf   :  { %506 = vmatpush1.bf16.msra.mxu1 %v694_v14  ;;  %v914_v43 = vshrl.u32 %v22_v38, 7  ;;  %v736_v44 = vld [vmem:[%s1005_s1 + $0xa0] ss:$8 sps:$4 sm:$0xff]   ;;  %v738_v46 = vld [vmem:[%s1005_s1 + $0xb4] ss:$8 sps:$4 sm:$0xff]  }
  0x10   :  { %547 = vmatpush1.bf16.msra.mxu0 %v695_v15  ;;  %507 = vmatprep.subr.bf16.mxu1 %v696_v16  ;;  %v737_v45 = vld [vmem:[%s1005_s1 + $0x1a0] ss:$8 sps:$4 sm:$0xff]   ;;  %v740_v47 = vld [vmem:[%s1005_s1 + $0x1b4] ss:$8 sps:$4 sm:$0xff]   ;;  %v742_v55 = vld [vmem:[%s1005_s1 + $0xb0] ss:$8 sps:$4 sm:$0xff]  }
  0x11   :  { %548 = vmatprep.subr.bf16.mxu0 %v698_v17  ;;  %v28_v48 = vsub.s32 2, %v914_v43  ;;  %v665_v49 = vld [vmem:[%s1006_s0] sm:$0xff]   ;;  %v36_v50 = vsub.s32 6, %v914_v43  ;;  %v934_v51 = vsub.s32 0, %v914_v43  ;;  %v32_v54 = vsub.s32 4, %v914_v43 }
  0x12   :  { %v666_v52 = vunpack.c.l.bf16 %v665_v49  ;;  %v667_v53 = vunpack.c.h.bf16 %v665_v49  ;;  %v743_v56 = vld [vmem:[%s1005_s1 + $0x1b0] ss:$8 sps:$4 sm:$0xff]   ;;  %v744_v57 = vld [vmem:[%s1005_s1 + $0xc4] ss:$8 sps:$4 sm:$0xff]   ;;  %v748_v5 = vld [vmem:[%s1005_s1 + $0xc0] ss:$8 sps:$4 sm:$0xff]  }
  0x13   :  { %508 = vmatpush1.bf16.msra.mxu1 %v700_v18  ;;  %v746_v58 = vld [vmem:[%s1005_s1 + $0x1c4] ss:$8 sps:$4 sm:$0xff]   ;;  %v749_v6 = vld [vmem:[%s1005_s1 + $0x1c0] ss:$8 sps:$4 sm:$0xff]   ;;  %v750_v10 = vld [vmem:[%s1005_s1 + $0xd4] ss:$8 sps:$4 sm:$0xff]  }
  0x14   :  { %549 = vmatpush1.bf16.msra.mxu0 %v701_v19  ;;  %509 = vmatprep.subr.bf16.mxu1 %v702_v20  ;;  %v29_v59 = vrot.slane %v666_v52, %v28_v48  ;;  %v45_v60 = vrot.slane %v667_v53, %v28_v48  ;;  %v37_v61 = vrot.slane %v666_v52, %v36_v50  ;;  %v752_v11 = vld [vmem:[%s1005_s1 + $0x1d4] ss:$8 sps:$4 sm:$0xff]   ;;  %v754_v19 = vld [vmem:[%s1005_s1 + $0xd0] ss:$8 sps:$4 sm:$0xff]  }
  0x15   :  { %550 = vmatprep.subr.bf16.mxu0 %v704_v21  ;;  %v53_v62 = vrot.slane %v667_v53, %v36_v50  ;;  %v25_v63 = vrot.slane %v666_v52, %v934_v51  ;;  %v41_v0 = vrot.slane %v667_v53, %v934_v51  ;;  %v49_v4 = vrot.slane %v667_v53, %v32_v54  ;;  %v755_v20 = vld [vmem:[%s1005_s1 + $0x1d0] ss:$8 sps:$4 sm:$0xff]   ;;  %v764_v38 = vld [vmem:[%s1005_s1 + $0x1f4] ss:$8 sps:$4 sm:$0xff]  }
  0x16   :  { %v63_v1 = vpack.c.bf16 %v29_v59, %v29_v59  ;;  %v67_v2 = vpack.c.bf16 %v45_v60, %v45_v60  ;;  %v65_v3 = vpack.c.bf16 %v37_v61, %v37_v61  ;;  %v33_v9 = vrot.slane %v666_v52, %v32_v54 }
  0x17   :  { %510 = vmatpush1.bf16.msra.mxu1 %v706_v22  ;;  %v69_v7 = vpack.c.bf16 %v53_v62, %v53_v62  ;;  %v66_v8 = vpack.c.bf16 %v41_v0, %v41_v0  ;;  %v68_v16 = vpack.c.bf16 %v49_v4, %v49_v4  ;;  %v62_v18 = vpack.c.bf16 %v25_v63, %v25_v63 }
  0x18   :  { %551 = vmatpush1.bf16.msra.mxu0 %v707_v23  ;;  %511 = vmatprep.subr.bf16.mxu1 %v708_v24  ;;  %v155_v12 = vunpack.c.l.b16 %v63_v1  ;;  %v159_v13 = vunpack.c.l.b16 %v67_v2  ;;  %v157_v14 = vunpack.c.l.b16 %v65_v3  ;;  %v64_v23 = vpack.c.bf16 %v33_v9, %v33_v9 }
  0x19   :  { %552 = vmatprep.subr.bf16.mxu0 %v710_v25  ;;  %v161_v15 = vunpack.c.l.b16 %v69_v7  ;;  %v158_v22 = vunpack.c.l.b16 %v66_v8  ;;  %v160_v24 = vunpack.c.l.b16 %v68_v16  ;;  %v756_v25 = vld [vmem:[%s1005_s1 + $0xe4] ss:$8 sps:$4 sm:$0xff]  }
  0x1a   :  { %v165_v17 = vrot.slane %v159_v13, 7 }
  0x1b   :  { %512 = vmatpush1.bf16.msra.mxu1 %v712_v26  ;;  %v169_v21 = vrot.slane %v161_v15, 7  ;;  %v758_v26 = vld [vmem:[%s1005_s1 + $0x1e4] ss:$8 sps:$4 sm:$0xff]  }
  0x1c   :  { %553 = vmatpush1.bf16.msra.mxu0 %v713_v27  ;;  %513 = vmatprep.subr.bf16.mxu1 %v714_v28  ;;  %v166_v27 = vsel %vm163_vm0, %v165_v17, %v155_v12 }
  0x1d   :  { %554 = vmatprep.subr.bf16.mxu0 %v716_v29  ;;  %v172_v28 = vpack.c.b16 %v166_v27, %v166_v27  ;;  %v170_v29 = vsel %vm163_vm0, %v169_v21, %v157_v14 }
  0x1f   :  { %514 = vmatpush1.bf16.msra.mxu1 %v718_v30  ;;  %v174_v30 = vpack.c.b16 %v170_v29, %v170_v29  ;;  %531 = vmatprep.mubr.bf16.mxu1 %v172_v28 }
  0x20   :  { %555 = vmatpush1.bf16.msra.mxu0 %v719_v31  ;;  %515 = vmatprep.subr.bf16.mxu1 %v720_v32  ;;  %v760_v31 = vld [vmem:[%s1005_s1 + $0xe0] ss:$8 sps:$4 sm:$0xff]  }
  0x21   :  { %556 = vmatprep.subr.bf16.mxu0 %v722_v33  ;;  %v761_v32 = vld [vmem:[%s1005_s1 + $0x1e0] ss:$8 sps:$4 sm:$0xff]   ;;  %v154_v33 = vunpack.c.l.b16 %v62_v18  ;;  %572 = vmatprep.mubr.bf16.mxu0 %v174_v30 }
  0x23   :  { %516 = vmatpush1.bf16.msra.mxu1 %v724_v34  ;;  %v162_v34 = vrot.slane %v158_v22, 7 }
  0x24   :  { %557 = vmatpush1.bf16.msra.mxu0 %v725_v35  ;;  %517 = vmatprep.subr.bf16.mxu1 %v726_v36  ;;  %v156_v35 = vunpack.c.l.b16 %v64_v23  ;;  %v167_v36 = vrot.slane %v160_v24, 7 }
  0x25   :  { %558 = vmatprep.subr.bf16.mxu0 %v728_v37  ;;  %v762_v37 = vld [vmem:[%s1005_s1 + $0xf4] ss:$8 sps:$4 sm:$0xff]  }
  0x27   :  { %518 = vmatpush1.bf16.msra.mxu1 %v730_v39  ;;  %v766_v39 = vld [vmem:[%s1005_s1 + $0xf0] ss:$8 sps:$4 sm:$0xff]  }
  0x28   :  { %559 = vmatpush1.bf16.msra.mxu0 %v731_v40  ;;  %519 = vmatprep.subr.bf16.mxu1 %v732_v41  ;;  %v767_v40 = vld [vmem:[%s1005_s1 + $0x1f0] ss:$8 sps:$4 sm:$0xff]   ;;  %v164_v41 = vsel %vm163_vm0, %v162_v34, %v154_v33 }
  0x29   :  { %560 = vmatprep.subr.bf16.mxu0 %v734_v42  ;;  %v168_v42 = vsel %vm163_vm0, %v167_v36, %v156_v35 }
  0x2b   :  { %520 = vmatpush1.bf16.msra.mxu1 %v736_v44  ;;  %v171_v44 = vpack.c.b16 %v164_v41, %v164_v41 }
  0x2c   :  { %561 = vmatpush1.bf16.msra.mxu0 %v737_v45  ;;  %521 = vmatprep.subr.bf16.mxu1 %v738_v46  ;;  %v173_v45 = vpack.c.b16 %v168_v42, %v168_v42  ;;  %v134_v46 = vld [vmem:[%s1007_s2] sm:$0x3] }
  0x2d   :  { %562 = vmatprep.subr.bf16.mxu0 %v740_v47  ;;  %v142_v47 = vsub.s32 1, %v914_v43  ;;  %v139_v48 = vrot.slane %v134_v46, %v934_v51 }
  0x2f   :  { %522 = vmatpush1.bf16.msra.mxu1 %v742_v55  ;;  %v143_v49 = vrot.slane %v134_v46, %v142_v47 }
  0x30   :  { %563 = vmatpush1.bf16.msra.mxu0 %v743_v56  ;;  %523 = vmatprep.subr.bf16.mxu1 %v744_v57 }
  0x31   :  { %564 = vmatprep.subr.bf16.mxu0 %v746_v58 }
  0x33   :  { %524 = vmatpush1.bf16.msra.mxu1 %v748_v5 }
  0x34   :  { %565 = vmatpush1.bf16.msra.mxu0 %v749_v6  ;;  %525 = vmatprep.subr.bf16.mxu1 %v750_v10 }
  0x35   :  { %566 = vmatprep.subr.bf16.mxu0 %v752_v11 }
  0x37   :  { %526 = vmatpush1.bf16.msra.mxu1 %v754_v19 }
  0x38   :  { %567 = vmatpush1.bf16.msra.mxu0 %v755_v20  ;;  %527 = vmatprep.subr.bf16.mxu1 %v756_v25 }
  0x39   :  { %568 = vmatprep.subr.bf16.mxu0 %v758_v26 }
  0x3b   :  { %528 = vmatpush1.bf16.msra.mxu1 %v760_v31 }
  0x3c   :  { %569 = vmatpush1.bf16.msra.mxu0 %v761_v32  ;;  %529 = vmatprep.subr.bf16.mxu1 %v762_v37 }
  0x3d   :  { %570 = vmatprep.subr.bf16.mxu0 %v764_v38 }
  0x3f   :  { %530 = vmatpush1.bf16.msra.mxu1 %v766_v39 }
  0x40   :  { %571 = vmatpush1.bf16.msra.mxu0 %v767_v40 }
  0x42   :  { %532 = vmatmul.mubr.bf16.vlgmr.msra.gmra.mrb[0].mxu1 %v171_v44 }
  0x43   :  { %573 = vmatmul.mubr.bf16.vlgmr.msra.gmra.mrb[0].mxu0 %v173_v45 }
 0x115   :  { %v533_v50 = vpop.f32.mrb[0].mxu1 }
 0x116   :  { %v574_v52 = vpop.f32.mrb[0].mxu0  ;;  %v534_v53 = vadd.f32 %v533_v50, %v139_v48  ;;  %v535_v54 = vpop.f32.mrb[1].mxu1 }
 0x117   :  { %v576_v55 = vpop.f32.mrb[1].mxu0  ;;  %v536_v56 = vadd.f32 %v535_v54, %v143_v49  ;;  %v537_v57 = vpop.f32.mrb[2].mxu1 }
 0x118   :  { %v578_v58 = vpop.f32.mrb[2].mxu0  ;;  %v575_v59 = vadd.f32 %v574_v52, %v534_v53  ;;  %v538_v60 = vpop.f32.mrb[3].mxu1 }
 0x119   :  { %v579_v61 = vpop.f32.mrb[3].mxu0  ;;  %v577_v62 = vadd.f32 %v576_v55, %v536_v56 }
 0x11a   :  { %v581_v63 = vmax.f32 %v575_v59, 0.0 }
 0x11b   :  { %v582_v0 = vmax.f32 %v577_v62, 0.0 }
 0x11d   :  { %v585_v1 = vcombine.low %v581_v63, %v582_v0 }
 0x11f   :  { %663 = vst.sshfl [vmem:[%s1008_s3] sm:$0x33 pattern:$0x76325410] %v585_v1 }

</bundles_post_ra>
